<compile_context>
chip_gen: v7x
topology: tpu7x:2x2x1
jax: 0.10.0
libtpu: 0.0.40
codegen_flags: <defaults>
</compile_context>

<pallas_src>
import functools

import jax
import jax.numpy as jnp
from jax.experimental import pallas as pl
from jax.experimental.pallas import tpu as pltpu

TILE_T = 8                      # timesteps processed per LSTM grid step
LANE = 128
SUBLANE = 8
NEG_INF = -1e30
VMEM_LIMIT = 48 * 1024 * 1024   # explicit scoped-VMEM limit


def _round_up(x, m):
    return (x + m - 1) // m * m


# ---------------------------------------------------------------------------
# Shared LSTM cell step (PyTorch gate order i, f, g, o), fused single matmul.
# ---------------------------------------------------------------------------
def _lstm_step(x_t, h, c, w, b, Hp):
    """x_t: (B, Ep) bf16; h, c: (B, Hp) f32; w: (Ep+Hp, 4Hp) bf16; b: (1, 4Hp) f32."""
    xh = jnp.concatenate([x_t.astype(jnp.float32), h], axis=-1).astype(jnp.bfloat16)
    gates = jnp.dot(xh, w, preferred_element_type=jnp.float32) + b      # (B, 4Hp) f32
    i = jax.nn.sigmoid(gates[:, 0 * Hp:1 * Hp])
    f = jax.nn.sigmoid(gates[:, 1 * Hp:2 * Hp])
    g = jnp.tanh(gates[:, 2 * Hp:3 * Hp])
    o = jax.nn.sigmoid(gates[:, 3 * Hp:4 * Hp])
    c_new = f * c + i * g
    h_new = o * jnp.tanh(c_new)
    return h_new, c_new


# ---------------------------------------------------------------------------
# Kernel 1: encoder LSTM.  Processes TILE_T steps per grid iteration, carries
# h/c in VMEM scratch, selects the last-valid state (t == length-1) in-kernel
# and emits ONLY the final (B, H) h/c (no per-step sequence writeback).
# ---------------------------------------------------------------------------
def enc_lstm_kernel(x_ref, w_ref, b_ref, len_ref, h0_ref, c0_ref,
                    h_out_ref, c_out_ref, h_scr, c_scr, hf_scr, cf_scr):
    step = pl.program_id(0)

    @pl.when(step == 0)
    def _():
        h_scr[...] = h0_ref[...]
        c_scr[...] = c0_ref[...]
        hf_scr[...] = h0_ref[...]
        cf_scr[...] = c0_ref[...]

    Hp = h_scr.shape[-1]
    w = w_ref[...]
    b = b_ref[...]
    # last valid timestep per row; rows with length 0 (e.g. batch padding) give
    # -1 which never matches, so they keep the initial hidden state.
    last_t = len_ref[...] - 1                       # (Bp, 1) int32

    h = h_scr[...]
    c = c_scr[...]
    hf = hf_scr[...]
    cf = cf_scr[...]
    t0 = step * TILE_T
    for tt in range(TILE_T):                        # static unroll
        h, c = _lstm_step(x_ref[tt], h, c, w, b, Hp)
        sel = last_t == (t0 + tt)                   # (Bp, 1) bool
        hf = jnp.where(sel, h, hf)
        cf = jnp.where(sel, c, cf)
    h_scr[...] = h
    c_scr[...] = c
    hf_scr[...] = hf
    cf_scr[...] = cf

    @pl.when(step == pl.num_programs(0) - 1)
    def _():
        h_out_ref[...] = hf
        c_out_ref[...] = cf


def run_lstm_final(x, w, b, lengths, h0, c0):
    """x: (Tp, Bp, Ep) bf16 -> final (Bp, Hp) h, c selected at t = length-1."""
    Tp, Bp, Ep = x.shape
    Hp = h0.shape[-1]
    out_shapes = (jax.ShapeDtypeStruct((Bp, Hp), jnp.float32),
                  jax.ShapeDtypeStruct((Bp, Hp), jnp.float32))
    return pl.pallas_call(
        enc_lstm_kernel,
        out_shape=out_shapes,
        grid_spec=pltpu.PrefetchScalarGridSpec(
            num_scalar_prefetch=0,
            grid=(Tp // TILE_T,),
            in_specs=[
                pl.BlockSpec((TILE_T, Bp, Ep), lambda t: (t, 0, 0)),   # x chunk
                pl.BlockSpec((Ep + Hp, 4 * Hp), lambda t: (0, 0)),     # fused W
                pl.BlockSpec((1, 4 * Hp), lambda t: (0, 0)),           # bias
                pl.BlockSpec((Bp, 1), lambda t: (0, 0)),               # lengths
                pl.BlockSpec((Bp, Hp), lambda t: (0, 0)),              # h0
                pl.BlockSpec((Bp, Hp), lambda t: (0, 0)),              # c0
            ],
            out_specs=[
                pl.BlockSpec((Bp, Hp), lambda t: (0, 0)),
                pl.BlockSpec((Bp, Hp), lambda t: (0, 0)),
            ],
            scratch_shapes=[pltpu.VMEM((Bp, Hp), jnp.float32)] * 4,
        ),
        compiler_params=pltpu.CompilerParams(
            dimension_semantics=("arbitrary",),
            vmem_limit_bytes=VMEM_LIMIT),
    )(x, w, b, lengths, h0, c0)


# ---------------------------------------------------------------------------
# Kernel 2: decoder LSTM.  Same cell math; emits only the hidden sequence
# (the cell sequence is unused downstream, so it is never materialized).
# ---------------------------------------------------------------------------
def dec_lstm_kernel(x_ref, w_ref, b_ref, h0_ref, c0_ref, hs_ref, h_scr, c_scr):
    step = pl.program_id(0)

    @pl.when(step == 0)
    def _():
        h_scr[...] = h0_ref[...]
        c_scr[...] = c0_ref[...]

    Hp = h_scr.shape[-1]
    w = w_ref[...]
    b = b_ref[...]
    h = h_scr[...]
    c = c_scr[...]
    for tt in range(TILE_T):                        # static unroll
        h, c = _lstm_step(x_ref[tt], h, c, w, b, Hp)
        hs_ref[tt] = h
    h_scr[...] = h
    c_scr[...] = c


def run_lstm_seq(x, w, b, h0, c0):
    """x: (Tp, Bp, Ep) bf16 -> hidden sequence (Tp, Bp, Hp) f32."""
    Tp, Bp, Ep = x.shape
    Hp = h0.shape[-1]
    return pl.pallas_call(
        dec_lstm_kernel,
        out_shape=jax.ShapeDtypeStruct((Tp, Bp, Hp), jnp.float32),
        grid_spec=pltpu.PrefetchScalarGridSpec(
            num_scalar_prefetch=0,
            grid=(Tp // TILE_T,),
            in_specs=[
                pl.BlockSpec((TILE_T, Bp, Ep), lambda t: (t, 0, 0)),
                pl.BlockSpec((Ep + Hp, 4 * Hp), lambda t: (0, 0)),
                pl.BlockSpec((1, 4 * Hp), lambda t: (0, 0)),
                pl.BlockSpec((Bp, Hp), lambda t: (0, 0)),
                pl.BlockSpec((Bp, Hp), lambda t: (0, 0)),
            ],
            out_specs=pl.BlockSpec((TILE_T, Bp, Hp), lambda t: (t, 0, 0)),
            scratch_shapes=[pltpu.VMEM((Bp, Hp), jnp.float32)] * 2,
        ),
        compiler_params=pltpu.CompilerParams(
            dimension_semantics=("arbitrary",),
            vmem_limit_bytes=VMEM_LIMIT),
    )(x, w, b, h0, c0)


# ---------------------------------------------------------------------------
# Kernels 3 & 4: tiled output projection + log_softmax (two-pass).
#   pass 1: streaming row-wise logsumexp over vocab tiles (online max/sumexp).
#   pass 2: recompute logits per (row-tile, vocab-tile) and subtract the lse.
# ---------------------------------------------------------------------------
def lse_kernel(x_ref, w_ref, b_ref, lse_ref, m_scr, l_scr):
    v = pl.program_id(1)

    @pl.when(v == 0)
    def _():
        m_scr[...] = jnp.full_like(m_scr, -jnp.inf)
        l_scr[...] = jnp.zeros_like(l_scr)

    logits = (jnp.dot(x_ref[...].astype(jnp.bfloat16), w_ref[...],
                      preferred_element_type=jnp.float32) + b_ref[...])
    m_prev = m_scr[...]
    m_new = jnp.maximum(m_prev, jnp.max(logits, axis=-1, keepdims=True))
    l_scr[...] = (jnp.exp(m_prev - m_new) * l_scr[...]
                  + jnp.sum(jnp.exp(logits - m_new), axis=-1, keepdims=True))
    m_scr[...] = m_new

    @pl.when(v == pl.num_programs(1) - 1)
    def _():
        lse_ref[...] = m_scr[...] + jnp.log(l_scr[...])


def logsoftmax_norm_kernel(x_ref, w_ref, b_ref, lse_ref, o_ref):
    logits = (jnp.dot(x_ref[...].astype(jnp.bfloat16), w_ref[...],
                      preferred_element_type=jnp.float32) + b_ref[...])
    o_ref[...] = logits - lse_ref[...]


def run_linear_logsoftmax(x, w, b):
    """x: (N, Hp) f32, w: (Hp, Vp) bf16, b: (1, Vp) f32 -> (N, Vp) log-probs."""
    N, Hp = x.shape
    Vp = w.shape[1]
    tile_n = min(256, _round_up(N, SUBLANE))
    Np = _round_up(N, tile_n)
    if Np != N:
        x = jnp.zeros((Np, Hp), x.dtype).at[:N].set(x)
    tile_v = 512 if Vp % 512 == 0 else (256 if Vp % 256 == 0 else 128)
    n_tiles, v_tiles = Np // tile_n, Vp // tile_v

    matmul_flops = 2 * Np * Hp * Vp
    bytes_common = Np * Hp * 4 * v_tiles + Hp * Vp * 2 + Vp * 4

    lse = pl.pallas_call(
        lse_kernel,
        out_shape=jax.ShapeDtypeStruct((Np, 1), jnp.float32),
        grid_spec=pltpu.PrefetchScalarGridSpec(
            num_scalar_prefetch=0,
            grid=(n_tiles, v_tiles),
            in_specs=[
                pl.BlockSpec((tile_n, Hp), lambda n, v: (n, 0)),
                pl.BlockSpec((Hp, tile_v), lambda n, v: (0, v)),
                pl.BlockSpec((1, tile_v), lambda n, v: (0, v)),
            ],
            out_specs=pl.BlockSpec((tile_n, 1), lambda n, v: (n, 0)),
            scratch_shapes=[pltpu.VMEM((tile_n, 1), jnp.float32)] * 2,
        ),
        compiler_params=pltpu.CompilerParams(
            dimension_semantics=("parallel", "arbitrary"),
            vmem_limit_bytes=VMEM_LIMIT),
        cost_estimate=pl.CostEstimate(
            flops=matmul_flops + 4 * Np * Vp,
            transcendentals=Np * Vp,
            bytes_accessed=bytes_common + Np * 4),
    )(x, w, b)

    out = pl.pallas_call(
        logsoftmax_norm_kernel,
        out_shape=jax.ShapeDtypeStruct((Np, Vp), jnp.float32),
        grid_spec=pltpu.PrefetchScalarGridSpec(
            num_scalar_prefetch=0,
            grid=(n_tiles, v_tiles),
            in_specs=[
                pl.BlockSpec((tile_n, Hp), lambda n, v: (n, 0)),
                pl.BlockSpec((Hp, tile_v), lambda n, v: (0, v)),
                pl.BlockSpec((1, tile_v), lambda n, v: (0, v)),
                pl.BlockSpec((tile_n, 1), lambda n, v: (n, 0)),
            ],
            out_specs=pl.BlockSpec((tile_n, tile_v), lambda n, v: (n, v)),
        ),
        compiler_params=pltpu.CompilerParams(
            dimension_semantics=("parallel", "parallel"),
            vmem_limit_bytes=VMEM_LIMIT),
        cost_estimate=pl.CostEstimate(
            flops=matmul_flops + 2 * Np * Vp,
            transcendentals=0,
            bytes_accessed=bytes_common + Np * 4 * v_tiles + Np * Vp * 4),
    )(x, w, b, lse)
    return out[:N]


# ---------------------------------------------------------------------------
# Parameter init: deterministic, stored pre-padded / pre-transposed / fused and
# (for matmul operands) in bfloat16.  Padding is neutral by construction.
# ---------------------------------------------------------------------------
def init_params(key, eng_vocab, chn_vocab, embed_size, hidden_size):
    E, H, V = embed_size, hidden_size, chn_vocab
    Ep, Hp, Vp = _round_up(E, LANE), _round_up(H, LANE), _round_up(V, LANE)
    ks = jax.random.split(key, 11)
    bound = 1.0 / (H ** 0.5)

    def u(k, shape, lo, hi):
        return jax.random.uniform(k, shape, jnp.float32, lo, hi)

    def pad2(a, rows, cols):
        return jnp.zeros((rows, cols), a.dtype).at[:a.shape[0], :a.shape[1]].set(a)

    # embeddings: uniform(-0.1, 0.1), E padded with zero columns, stored bf16
    emb_eng = pad2(u(ks[0], (eng_vocab, E), -0.1, 0.1), eng_vocab, Ep).astype(jnp.bfloat16)
    emb_chn = pad2(u(ks[1], (chn_vocab, E), -0.1, 0.1), chn_vocab, Ep).astype(jnp.bfloat16)

    def lstm_weights(k_ih, k_hh, k_bih, k_bhh):
        # PyTorch LSTM init: uniform(-1/sqrt(H), 1/sqrt(H)); stored transposed
        # and fused into a single (Ep+Hp, 4Hp) operand with per-gate padding.
        w_ih = u(k_ih, (E, 4 * H), -bound, bound)
        w_hh = u(k_hh, (H, 4 * H), -bound, bound)
        bsum = u(k_bih, (1, 4 * H), -bound, bound) + u(k_bhh, (1, 4 * H), -bound, bound)
        w = jnp.zeros((Ep + Hp, 4 * Hp), jnp.float32)
        bias = jnp.zeros((1, 4 * Hp), jnp.float32)
        for g in range(4):
            w = w.at[:E, g * Hp:g * Hp + H].set(w_ih[:, g * H:(g + 1) * H])
            w = w.at[Ep:Ep + H, g * Hp:g * Hp + H].set(w_hh[:, g * H:(g + 1) * H])
            bias = bias.at[:, g * Hp:g * Hp + H].set(bsum[:, g * H:(g + 1) * H])
        return w.astype(jnp.bfloat16), bias

    enc_w, enc_b = lstm_weights(ks[2], ks[3], ks[4], ks[5])
    dec_w, dec_b = lstm_weights(ks[6], ks[7], ks[8], ks[9])

    # output linear: weight uniform(-0.1, 0.1) (transposed, padded, bf16),
    # bias = 0 on real vocab columns and -1e30 on padded columns so that
    # log_softmax over the padded vocab equals log_softmax over the real vocab.
    lin_w = pad2(u(ks[10], (H, V), -0.1, 0.1), Hp, Vp).astype(jnp.bfloat16)
    lin_b = jnp.full((1, Vp), NEG_INF, jnp.float32).at[:, :V].set(0.0)

    return {
        "embed_english": emb_eng,
        "embed_chinese": emb_chn,
        "enc_w": enc_w, "enc_b": enc_b,
        "dec_w": dec_w, "dec_b": dec_b,
        "lin_w": lin_w, "lin_b": lin_b,
    }


# ---------------------------------------------------------------------------
# Forward pass (matches the PyTorch module semantics).
# ---------------------------------------------------------------------------
@functools.partial(jax.jit, static_argnames=("hidden_size", "vocab_size"))
def encoder_decoder_forward(params, english_matrix, english_mask, chinese_matrix,
                            h0, c0, *, hidden_size, vocab_size):
    Hp = params["enc_w"].shape[1] // 4
    B, T = english_matrix.shape
    J = chinese_matrix.shape[1]
    Bp = _round_up(B, SUBLANE)
    Tp = _round_up(T, TILE_T)
    Jp = _round_up(J, TILE_T)

    # Transpose the cheap int32 id matrices to time-major BEFORE the embedding
    # gather (avoids a (B,T,E) -> (T,B,E) activation transpose in HBM).
    eng_ids = jnp.zeros((Tp, Bp), jnp.int32).at[:T, :B].set(english_matrix.T)
    chn_ids = jnp.zeros((Jp, Bp), jnp.int32).at[:J, :B].set(chinese_matrix.T)
    lengths = jnp.zeros((Bp, 1), jnp.int32).at[:B, 0].set(
        english_mask.sum(axis=1).astype(jnp.int32))
    # NOTE: rows with an all-zero mask (length 0) keep the initial hidden state
    # instead of gathering index -1 like the reference would attempt.

    h0p = jnp.zeros((Bp, Hp), jnp.float32).at[:B, :hidden_size].set(h0)
    c0p = jnp.zeros((Bp, Hp), jnp.float32).at[:B, :hidden_size].set(c0)

    # --- encoder: LSTMCell over T, final state selected in-kernel at len-1 ---
    # TODO(synk): the embedding gathers stay as XLA gathers; fusing them into
    # the LSTM kernel via Element-style index maps is a further optimization.
    x_eng = params["embed_english"][eng_ids]                   # (Tp, Bp, Ep) bf16
    h_enc, c_enc = run_lstm_final(x_eng, params["enc_w"], params["enc_b"],
                                  lengths, h0p, c0p)           # (Bp, Hp) each

    # --- decoder: single-layer LSTM over the chinese sequence ---
    # TODO(synk): the reference passes raw chinese ids to nn.LSTM and has
    # `.gether`/`unsqueeze(2)` typos that would raise; we implement the clearly
    # intended semantics (feed chinese embeddings, init with gathered h and c).
    x_chn = params["embed_chinese"][chn_ids]                   # (Jp, Bp, Ep) bf16
    hs = run_lstm_seq(x_chn, params["dec_w"], params["dec_b"],
                      h_enc, c_enc)                            # (Jp, Bp, Hp) f32

    hiddens_p = jnp.transpose(hs, (1, 0, 2))                   # (Bp, Jp, Hp)
    flat = hiddens_p.reshape(Bp * Jp, Hp)

    # --- output projection + log_softmax (tiled two-pass Pallas kernels) ---
    decoded_p = run_linear_logsoftmax(flat, params["lin_w"], params["lin_b"])
    Vp = decoded_p.shape[-1]
    decoded = decoded_p.reshape(Bp, Jp, Vp)[:B, :J, :vocab_size]
    hiddens = hiddens_p[:B, :J, :hidden_size]
    return decoded, hiddens


if __name__ == "__main__":
    # small synthetic config (deliberately NOT hardware-aligned to exercise the
    # internal padding: E=64->128, H=96->128, V=300->384, B=2->8, T/J -> x8)
    B, T, J = 2, 10, 9
    E, H = 64, 96
    ENG_VOCAB, CHN_VOCAB = 50, 300

    key = jax.random.PRNGKey(0)
    kp, ke, kc = jax.random.split(key, 3)

    params = init_params(kp, ENG_VOCAB, CHN_VOCAB, E, H)

    english_matrix = jax.random.randint(ke, (B, T), 0, ENG_VOCAB, jnp.int32)
    chinese_matrix = jax.random.randint(kc, (B, J), 0, CHN_VOCAB, jnp.int32)
    seq_lengths = jnp.array([T, T - 3], jnp.int32)
    english_mask = (jnp.arange(T)[None, :] < seq_lengths[:, None]).astype(jnp.int32)

    # init_hidden(B): zeros
    h0 = jnp.zeros((B, H), jnp.float32)
    c0 = jnp.zeros((B, H), jnp.float32)

    decoded, hiddens = encoder_decoder_forward(
        params, english_matrix, english_mask, chinese_matrix, h0, c0,
        hidden_size=H, vocab_size=CHN_VOCAB)
    jax.block_until_ready((decoded, hiddens))

    assert decoded.shape == (B, J, CHN_VOCAB)
    assert hiddens.shape == (B, J, H)
    assert bool(jnp.all(jnp.isfinite(decoded)))
    # log_softmax rows should sum to ~1 in probability space
    assert jnp.allclose(jnp.sum(jnp.exp(decoded), axis=-1), 1.0, atol=1e-3)

    print("KERNEL_OK")
</pallas_src>

<mosaic_0001>
module attributes {stable_mosaic.version = 11 : i64} {
  func.func @logsoftmax_norm_kernel(%arg0: i32, %arg1: i32, %arg2: memref<128x128xf32, #tpu.memory_space<vmem>>, %arg3: memref<128x128xbf16, #tpu.memory_space<vmem>>, %arg4: memref<1x128xf32, #tpu.memory_space<vmem>>, %arg5: memref<128x1xf32, #tpu.memory_space<vmem>>, %arg6: memref<128x128xf32, #tpu.memory_space<vmem>>) attributes {dimension_semantics = [#tpu.dimension_semantics<parallel>, #tpu.dimension_semantics<parallel>], iteration_bounds = array<i64: 1, 3>, scalar_prefetch = 0 : i64, scratch_operands = 0 : i64, tpu.core_type = #tpu.core_type<tc>, window_params = [{transform_indices = @transform_0, window_bounds = array<i64: 128, 128>}, {transform_indices = @transform_1, window_bounds = array<i64: 128, 128>}, {transform_indices = @transform_2, window_bounds = array<i64: 1, 128>}, {transform_indices = @transform_3, window_bounds = array<i64: 128, 1>}, {transform_indices = @transform_4, window_bounds = array<i64: 128, 128>}]} {
    %c0 = arith.constant 0 : index
    %c0_0 = arith.constant 0 : index
    %0 = vector.load %arg2[%c0, %c0_0] : memref<128x128xf32, #tpu.memory_space<vmem>>, vector<128x128xf32>
    %1 = arith.truncf %0 : vector<128x128xf32> to vector<128x128xbf16>
    %c0_1 = arith.constant 0 : index
    %c0_2 = arith.constant 0 : index
    %2 = vector.load %arg3[%c0_1, %c0_2] : memref<128x128xbf16, #tpu.memory_space<vmem>>, vector<128x128xbf16>
    %cst = arith.constant dense<0.000000e+00> : vector<128x128xf32>
    %3 = tpu.matmul %1, %2, %cst {dimension_numbers = #tpu.dot_dimension_numbers<[1], [0], [0], [1], [0, 0, 1, 1], [], []>} : vector<128x128xbf16>, vector<128x128xbf16>, vector<128x128xf32> -> vector<128x128xf32>
    %c0_3 = arith.constant 0 : index
    %c0_4 = arith.constant 0 : index
    %4 = vector.load %arg4[%c0_3, %c0_4] : memref<1x128xf32, #tpu.memory_space<vmem>>, vector<1x128xf32>
    %5 = vector.broadcast %4 : vector<1x128xf32> to vector<128x128xf32>
    %6 = arith.addf %3, %5 : vector<128x128xf32>
    %c0_5 = arith.constant 0 : index
    %c0_6 = arith.constant 0 : index
    %7 = vector.load %arg5[%c0_5, %c0_6] : memref<128x1xf32, #tpu.memory_space<vmem>>, vector<128x1xf32>
    %8 = vector.broadcast %7 : vector<128x1xf32> to vector<128x128xf32>
    %9 = arith.subf %6, %8 : vector<128x128xf32>
    %c0_7 = arith.constant 0 : index
    %c0_8 = arith.constant 0 : index
    %10 = vector.load %arg6[%c0_7, %c0_8] : memref<128x128xf32, #tpu.memory_space<vmem>>, vector<128x128xf32>
    tpu.vector_store %arg6[%c0_7, %c0_8], %9 {strides = array<i32>} : memref<128x128xf32, #tpu.memory_space<vmem>>, vector<128x128xf32>,
    return
  }
  func.func @transform_0(%arg0: i32, %arg1: i32) -> (i32, i32) {
    %c0_i32 = arith.constant 0 : i32
    %c0_i32_0 = arith.constant 0 : i32
    return %arg0, %c0_i32 : i32, i32
  }
  func.func @transform_1(%arg0: i32, %arg1: i32) -> (i32, i32) {
    %c0_i32 = arith.constant 0 : i32
    %c0_i32_0 = arith.constant 0 : i32
    return %c0_i32, %arg1 : i32, i32
  }
  func.func @transform_2(%arg0: i32, %arg1: i32) -> (i32, i32) {
    %c0_i32 = arith.constant 0 : i32
    %c0_i32_0 = arith.constant 0 : i32
    return %c0_i32, %arg1 : i32, i32
  }
  func.func @transform_3(%arg0: i32, %arg1: i32) -> (i32, i32) {
    %c0_i32 = arith.constant 0 : i32
    %c0_i32_0 = arith.constant 0 : i32
    return %arg0, %c0_i32 : i32, i32
  }
  func.func @transform_4(%arg0: i32, %arg1: i32) -> (i32, i32) {
    %c0_i32 = arith.constant 0 : i32
    return %arg0, %arg1 : i32, i32
  }
}

module attributes {stable_mosaic.version = 11 : i64} {
  func.func @enc_lstm_kernel(%arg0: i32, %arg1: memref<8x8x128xbf16, #tpu.memory_space<vmem>>, %arg2: memref<256x512xbf16, #tpu.memory_space<vmem>>, %arg3: memref<1x512xf32, #tpu.memory_space<vmem>>, %arg4: memref<8x1xi32, #tpu.memory_space<vmem>>, %arg5: memref<8x128xf32, #tpu.memory_space<vmem>>, %arg6: memref<8x128xf32, #tpu.memory_space<vmem>>, %arg7: memref<8x128xf32, #tpu.memory_space<vmem>>, %arg8: memref<8x128xf32, #tpu.memory_space<vmem>>, %arg9: memref<8x128xf32, #tpu.memory_space<vmem>>, %arg10: memref<8x128xf32, #tpu.memory_space<vmem>>, %arg11: memref<8x128xf32, #tpu.memory_space<vmem>>, %arg12: memref<8x128xf32, #tpu.memory_space<vmem>>) attributes {dimension_semantics = [#tpu.dimension_semantics<arbitrary>], iteration_bounds = array<i64: 2>, scalar_prefetch = 0 : i64, scratch_operands = 4 : i64, tpu.core_type = #tpu.core_type<tc>, window_params = [{transform_indices = @transform_0, window_bounds = array<i64: 8, 8, 128>}, {pipeline_mode = #tpu.pipeline_mode<synchronous>, transform_indices = @transform_1, window_bounds = array<i64: 256, 512>}, {pipeline_mode = #tpu.pipeline_mode<synchronous>, transform_indices = @transform_2, window_bounds = array<i64: 1, 512>}, {pipeline_mode = #tpu.pipeline_mode<synchronous>, transform_indices = @transform_3, window_bounds = array<i64: 8, 1>}, {pipeline_mode = #tpu.pipeline_mode<synchronous>, transform_indices = @transform_4, window_bounds = array<i64: 8, 128>}, {pipeline_mode = #tpu.pipeline_mode<synchronous>, transform_indices = @transform_5, window_bounds = array<i64: 8, 128>}, {pipeline_mode = #tpu.pipeline_mode<synchronous>, transform_indices = @transform_6, window_bounds = array<i64: 8, 128>}, {pipeline_mode = #tpu.pipeline_mode<synchronous>, transform_indices = @transform_7, window_bounds = array<i64: 8, 128>}]} {
    %c0_i32 = arith.constant 0 : i32
    %0 = arith.cmpi eq, %arg0, %c0_i32 : i32
    %1 = arith.extui %0 : i1 to i32
    %c0_i32_0 = arith.constant 0 : i32
    %2 = arith.cmpi ne, %1, %c0_i32_0 : i32
    scf.if %2 {
      %c0_74 = arith.constant 0 : index
      %c0_75 = arith.constant 0 : index
      %356 = vector.load %arg5[%c0_74, %c0_75] : memref<8x128xf32, #tpu.memory_space<vmem>>, vector<8x128xf32>
      %c0_76 = arith.constant 0 : index
      %c0_77 = arith.constant 0 : index
      %357 = vector.load %arg9[%c0_76, %c0_77] : memref<8x128xf32, #tpu.memory_space<vmem>>, vector<8x128xf32>
      tpu.vector_store %arg9[%c0_76, %c0_77], %356 {strides = array<i32>} : memref<8x128xf32, #tpu.memory_space<vmem>>, vector<8x128xf32>,
      %c0_78 = arith.constant 0 : index
      %c0_79 = arith.constant 0 : index
      %358 = vector.load %arg6[%c0_78, %c0_79] : memref<8x128xf32, #tpu.memory_space<vmem>>, vector<8x128xf32>
      %c0_80 = arith.constant 0 : index
      %c0_81 = arith.constant 0 : index
      %359 = vector.load %arg10[%c0_80, %c0_81] : memref<8x128xf32, #tpu.memory_space<vmem>>, vector<8x128xf32>
      tpu.vector_store %arg10[%c0_80, %c0_81], %358 {strides = array<i32>} : memref<8x128xf32, #tpu.memory_space<vmem>>, vector<8x128xf32>,
      %c0_82 = arith.constant 0 : index
      %c0_83 = arith.constant 0 : index
      %360 = vector.load %arg5[%c0_82, %c0_83] : memref<8x128xf32, #tpu.memory_space<vmem>>, vector<8x128xf32>
      %c0_84 = arith.constant 0 : index
      %c0_85 = arith.constant 0 : index
      %361 = vector.load %arg11[%c0_84, %c0_85] : memref<8x128xf32, #tpu.memory_space<vmem>>, vector<8x128xf32>
      tpu.vector_store %arg11[%c0_84, %c0_85], %360 {strides = array<i32>} : memref<8x128xf32, #tpu.memory_space<vmem>>, vector<8x128xf32>,
      %c0_86 = arith.constant 0 : index
      %c0_87 = arith.constant 0 : index
      %362 = vector.load %arg6[%c0_86, %c0_87] : memref<8x128xf32, #tpu.memory_space<vmem>>, vector<8x128xf32>
      %c0_88 = arith.constant 0 : index
      %c0_89 = arith.constant 0 : index
      %363 = vector.load %arg12[%c0_88, %c0_89] : memref<8x128xf32, #tpu.memory_space<vmem>>, vector<8x128xf32>
      tpu.vector_store %arg12[%c0_88, %c0_89], %362 {strides = array<i32>} : memref<8x128xf32, #tpu.memory_space<vmem>>, vector<8x128xf32>,
    } else {
    }
    %c0 = arith.constant 0 : index
    %c0_1 = arith.constant 0 : index
    %3 = vector.load %arg2[%c0, %c0_1] : memref<256x512xbf16, #tpu.memory_space<vmem>>, vector<256x512xbf16>
    %c0_2 = arith.constant 0 : index
    %c0_3 = arith.constant 0 : index
    %4 = vector.load %arg3[%c0_2, %c0_3] : memref<1x512xf32, #tpu.memory_space<vmem>>, vector<1x512xf32>
    %c0_4 = arith.constant 0 : index
    %c0_5 = arith.constant 0 : index
    %5 = vector.load %arg4[%c0_4, %c0_5] : memref<8x1xi32, #tpu.memory_space<vmem>>, vector<8x1xi32>
    %c1_i32 = arith.constant 1 : i32
    %6 = vector.broadcast %c1_i32 : i32 to vector<8x1xi32>
    %7 = arith.subi %5, %6 : vector<8x1xi32>
    %c0_6 = arith.constant 0 : index
    %c0_7 = arith.constant 0 : index
    %8 = vector.load %arg9[%c0_6, %c0_7] : memref<8x128xf32, #tpu.memory_space<vmem>>, vector<8x128xf32>
    %c0_8 = arith.constant 0 : index
    %c0_9 = arith.constant 0 : index
    %9 = vector.load %arg10[%c0_8, %c0_9] : memref<8x128xf32, #tpu.memory_space<vmem>>, vector<8x128xf32>
    %c0_10 = arith.constant 0 : index
    %c0_11 = arith.constant 0 : index
    %10 = vector.load %arg11[%c0_10, %c0_11] : memref<8x128xf32, #tpu.memory_space<vmem>>, vector<8x128xf32>
    %c0_12 = arith.constant 0 : index
    %c0_13 = arith.constant 0 : index
    %11 = vector.load %arg12[%c0_12, %c0_13] : memref<8x128xf32, #tpu.memory_space<vmem>>, vector<8x128xf32>
    %c8_i32 = arith.constant 8 : i32
    %12 = arith.muli %arg0, %c8_i32 : i32
    %c0_14 = arith.constant 0 : index
    %c0_15 = arith.constant 0 : index
    %c0_16 = arith.constant 0 : index
    %13 = vector.load %arg1[%c0_14, %c0_15, %c0_16] : memref<8x8x128xbf16, #tpu.memory_space<vmem>>, vector<1x8x128xbf16>
    %14 = vector.shape_cast %13 : vector<1x8x128xbf16> to vector<8x128xbf16>
    %15 = arith.extf %14 : vector<8x128xbf16> to vector<8x128xf32>
    %16 = tpu.concatenate %15, %8 in 1 : vector<8x128xf32>, vector<8x128xf32> -> vector<8x256xf32>
    %17 = arith.truncf %16 : vector<8x256xf32> to vector<8x256xbf16>
    %cst = arith.constant dense<0.000000e+00> : vector<8x512xf32>
    %18 = tpu.matmul %17, %3, %cst {dimension_numbers = #tpu.dot_dimension_numbers<[1], [0], [0], [1], [0, 0, 1, 1], [], []>} : vector<8x256xbf16>, vector<256x512xbf16>, vector<8x512xf32> -> vector<8x512xf32>
    %19 = vector.broadcast %4 : vector<1x512xf32> to vector<8x512xf32>
    %20 = arith.addf %18, %19 : vector<8x512xf32>
    %21 = vector.extract_strided_slice %20 {offsets = [0, 0], sizes = [8, 128], strides = [1, 1]} : vector<8x512xf32> to vector<8x128xf32>
    %22 = arith.negf %21 : vector<8x128xf32>
    %23 = math.exp %22 : vector<8x128xf32>
    %cst_17 = arith.constant 1.000000e+00 : f32
    %24 = vector.broadcast %cst_17 : f32 to vector<8x128xf32>
    %25 = arith.addf %24, %23 : vector<8x128xf32>
    %26 = arith.divf %24, %25 : vector<8x128xf32>
    %27 = vector.extract_strided_slice %20 {offsets = [0, 128], sizes = [8, 128], strides = [1, 1]} : vector<8x512xf32> to vector<8x128xf32>
    %28 = arith.negf %27 : vector<8x128xf32>
    %29 = math.exp %28 : vector<8x128xf32>
    %cst_18 = arith.constant 1.000000e+00 : f32
    %30 = vector.broadcast %cst_18 : f32 to vector<8x128xf32>
    %31 = arith.addf %30, %29 : vector<8x128xf32>
    %32 = arith.divf %30, %31 : vector<8x128xf32>
    %33 = vector.extract_strided_slice %20 {offsets = [0, 256], sizes = [8, 128], strides = [1, 1]} : vector<8x512xf32> to vector<8x128xf32>
    %34 = math.tanh %33 : vector<8x128xf32>
    %35 = vector.extract_strided_slice %20 {offsets = [0, 384], sizes = [8, 128], strides = [1, 1]} : vector<8x512xf32> to vector<8x128xf32>
    %36 = arith.negf %35 : vector<8x128xf32>
    %37 = math.exp %36 : vector<8x128xf32>
    %cst_19 = arith.constant 1.000000e+00 : f32
    %38 = vector.broadcast %cst_19 : f32 to vector<8x128xf32>
    %39 = arith.addf %38, %37 : vector<8x128xf32>
    %40 = arith.divf %38, %39 : vector<8x128xf32>
    %41 = arith.mulf %32, %9 : vector<8x128xf32>
    %42 = arith.mulf %26, %34 : vector<8x128xf32>
    %43 = arith.addf %41, %42 : vector<8x128xf32>
    %44 = math.tanh %43 : vector<8x128xf32>
    %45 = arith.mulf %40, %44 : vector<8x128xf32>
    %c0_i32_20 = arith.constant 0 : i32
    %46 = arith.addi %12, %c0_i32_20 : i32
    %47 = vector.broadcast %46 : i32 to vector<8x1xi32>
    %48 = arith.cmpi eq, %7, %47 : vector<8x1xi32>
    %49 = vector.shape_cast %48 : vector<8x1xi1> to vector<8x1xi1>
    %50 = vector.broadcast %49 : vector<8x1xi1> to vector<8x128xi1>
    %51 = arith.select %50, %45, %10 : vector<8x128xi1>, vector<8x128xf32>
    %52 = vector.shape_cast %48 : vector<8x1xi1> to vector<8x1xi1>
    %53 = vector.broadcast %52 : vector<8x1xi1> to vector<8x128xi1>
    %54 = arith.select %53, %43, %11 : vector<8x128xi1>, vector<8x128xf32>
    %c1 = arith.constant 1 : index
    %c0_21 = arith.constant 0 : index
    %c0_22 = arith.constant 0 : index
    %55 = vector.load %arg1[%c1, %c0_21, %c0_22] : memref<8x8x128xbf16, #tpu.memory_space<vmem>>, vector<1x8x128xbf16>
    %56 = vector.shape_cast %55 : vector<1x8x128xbf16> to vector<8x128xbf16>
    %57 = arith.extf %56 : vector<8x128xbf16> to vector<8x128xf32>
    %58 = tpu.concatenate %57, %45 in 1 : vector<8x128xf32>, vector<8x128xf32> -> vector<8x256xf32>
    %59 = arith.truncf %58 : vector<8x256xf32> to vector<8x256xbf16>
    %cst_23 = arith.constant dense<0.000000e+00> : vector<8x512xf32>
    %60 = tpu.matmul %59, %3, %cst_23 {dimension_numbers = #tpu.dot_dimension_numbers<[1], [0], [0], [1], [0, 0, 1, 1], [], []>} : vector<8x256xbf16>, vector<256x512xbf16>, vector<8x512xf32> -> vector<8x512xf32>
    %61 = vector.broadcast %4 : vector<1x512xf32> to vector<8x512xf32>
    %62 = arith.addf %60, %61 : vector<8x512xf32>
    %63 = vector.extract_strided_slice %62 {offsets = [0, 0], sizes = [8, 128], strides = [1, 1]} : vector<8x512xf32> to vector<8x128xf32>
    %64 = arith.negf %63 : vector<8x128xf32>
    %65 = math.exp %64 : vector<8x128xf32>
    %cst_24 = arith.constant 1.000000e+00 : f32
    %66 = vector.broadcast %cst_24 : f32 to vector<8x128xf32>
    %67 = arith.addf %66, %65 : vector<8x128xf32>
    %68 = arith.divf %66, %67 : vector<8x128xf32>
    %69 = vector.extract_strided_slice %62 {offsets = [0, 128], sizes = [8, 128], strides = [1, 1]} : vector<8x512xf32> to vector<8x128xf32>
    %70 = arith.negf %69 : vector<8x128xf32>
    %71 = math.exp %70 : vector<8x128xf32>
    %cst_25 = arith.constant 1.000000e+00 : f32
    %72 = vector.broadcast %cst_25 : f32 to vector<8x128xf32>
    %73 = arith.addf %72, %71 : vector<8x128xf32>
    %74 = arith.divf %72, %73 : vector<8x128xf32>
    %75 = vector.extract_strided_slice %62 {offsets = [0, 256], sizes = [8, 128], strides = [1, 1]} : vector<8x512xf32> to vector<8x128xf32>
    %76 = math.tanh %75 : vector<8x128xf32>
    %77 = vector.extract_strided_slice %62 {offsets = [0, 384], sizes = [8, 128], strides = [1, 1]} : vector<8x512xf32> to vector<8x128xf32>
    %78 = arith.negf %77 : vector<8x128xf32>
    %79 = math.exp %78 : vector<8x128xf32>
    %cst_26 = arith.constant 1.000000e+00 : f32
    %80 = vector.broadcast %cst_26 : f32 to vector<8x128xf32>
    %81 = arith.addf %80, %79 : vector<8x128xf32>
    %82 = arith.divf %80, %81 : vector<8x128xf32>
    %83 = arith.mulf %74, %43 : vector<8x128xf32>
    %84 = arith.mulf %68, %76 : vector<8x128xf32>
    %85 = arith.addf %83, %84 : vector<8x128xf32>
    %86 = math.tanh %85 : vector<8x128xf32>
    %87 = arith.mulf %82, %86 : vector<8x128xf32>
    %c1_i32_27 = arith.constant 1 : i32
    %88 = arith.addi %12, %c1_i32_27 : i32
    %89 = vector.broadcast %88 : i32 to vector<8x1xi32>
    %90 = arith.cmpi eq, %7, %89 : vector<8x1xi32>
    %91 = vector.shape_cast %90 : vector<8x1xi1> to vector<8x1xi1>
    %92 = vector.broadcast %91 : vector<8x1xi1> to vector<8x128xi1>
    %93 = arith.select %92, %87, %51 : vector<8x128xi1>, vector<8x128xf32>
    %94 = vector.shape_cast %90 : vector<8x1xi1> to vector<8x1xi1>
    %95 = vector.broadcast %94 : vector<8x1xi1> to vector<8x128xi1>
    %96 = arith.select %95, %85, %54 : vector<8x128xi1>, vector<8x128xf32>
    %c2 = arith.constant 2 : index
    %c0_28 = arith.constant 0 : index
    %c0_29 = arith.constant 0 : index
    %97 = vector.load %arg1[%c2, %c0_28, %c0_29] : memref<8x8x128xbf16, #tpu.memory_space<vmem>>, vector<1x8x128xbf16>
    %98 = vector.shape_cast %97 : vector<1x8x128xbf16> to vector<8x128xbf16>
    %99 = arith.extf %98 : vector<8x128xbf16> to vector<8x128xf32>
    %100 = tpu.concatenate %99, %87 in 1 : vector<8x128xf32>, vector<8x128xf32> -> vector<8x256xf32>
    %101 = arith.truncf %100 : vector<8x256xf32> to vector<8x256xbf16>
    %cst_30 = arith.constant dense<0.000000e+00> : vector<8x512xf32>
    %102 = tpu.matmul %101, %3, %cst_30 {dimension_numbers = #tpu.dot_dimension_numbers<[1], [0], [0], [1], [0, 0, 1, 1], [], []>} : vector<8x256xbf16>, vector<256x512xbf16>, vector<8x512xf32> -> vector<8x512xf32>
    %103 = vector.broadcast %4 : vector<1x512xf32> to vector<8x512xf32>
    %104 = arith.addf %102, %103 : vector<8x512xf32>
    %105 = vector.extract_strided_slice %104 {offsets = [0, 0], sizes = [8, 128], strides = [1, 1]} : vector<8x512xf32> to vector<8x128xf32>
    %106 = arith.negf %105 : vector<8x128xf32>
    %107 = math.exp %106 : vector<8x128xf32>
    %cst_31 = arith.constant 1.000000e+00 : f32
    %108 = vector.broadcast %cst_31 : f32 to vector<8x128xf32>
    %109 = arith.addf %108, %107 : vector<8x128xf32>
    %110 = arith.divf %108, %109 : vector<8x128xf32>
    %111 = vector.extract_strided_slice %104 {offsets = [0, 128], sizes = [8, 128], strides = [1, 1]} : vector<8x512xf32> to vector<8x128xf32>
    %112 = arith.negf %111 : vector<8x128xf32>
    %113 = math.exp %112 : vector<8x128xf32>
    %cst_32 = arith.constant 1.000000e+00 : f32
    %114 = vector.broadcast %cst_32 : f32 to vector<8x128xf32>
    %115 = arith.addf %114, %113 : vector<8x128xf32>
    %116 = arith.divf %114, %115 : vector<8x128xf32>
    %117 = vector.extract_strided_slice %104 {offsets = [0, 256], sizes = [8, 128], strides = [1, 1]} : vector<8x512xf32> to vector<8x128xf32>
    %118 = math.tanh %117 : vector<8x128xf32>
    %119 = vector.extract_strided_slice %104 {offsets = [0, 384], sizes = [8, 128], strides = [1, 1]} : vector<8x512xf32> to vector<8x128xf32>
    %120 = arith.negf %119 : vector<8x128xf32>
    %121 = math.exp %120 : vector<8x128xf32>
    %cst_33 = arith.constant 1.000000e+00 : f32
    %122 = vector.broadcast %cst_33 : f32 to vector<8x128xf32>
    %123 = arith.addf %122, %121 : vector<8x128xf32>
    %124 = arith.divf %122, %123 : vector<8x128xf32>
    %125 = arith.mulf %116, %85 : vector<8x128xf32>
    %126 = arith.mulf %110, %118 : vector<8x128xf32>
    %127 = arith.addf %125, %126 : vector<8x128xf32>
    %128 = math.tanh %127 : vector<8x128xf32>
    %129 = arith.mulf %124, %128 : vector<8x128xf32>
    %c2_i32 = arith.constant 2 : i32
    %130 = arith.addi %12, %c2_i32 : i32
    %131 = vector.broadcast %130 : i32 to vector<8x1xi32>
    %132 = arith.cmpi eq, %7, %131 : vector<8x1xi32>
    %133 = vector.shape_cast %132 : vector<8x1xi1> to vector<8x1xi1>
    %134 = vector.broadcast %133 : vector<8x1xi1> to vector<8x128xi1>
    %135 = arith.select %134, %129, %93 : vector<8x128xi1>, vector<8x128xf32>
    %136 = vector.shape_cast %132 : vector<8x1xi1> to vector<8x1xi1>
    %137 = vector.broadcast %136 : vector<8x1xi1> to vector<8x128xi1>
    %138 = arith.select %137, %127, %96 : vector<8x128xi1>, vector<8x128xf32>
    %c3 = arith.constant 3 : index
    %c0_34 = arith.constant 0 : index
    %c0_35 = arith.constant 0 : index
    %139 = vector.load %arg1[%c3, %c0_34, %c0_35] : memref<8x8x128xbf16, #tpu.memory_space<vmem>>, vector<1x8x128xbf16>
    %140 = vector.shape_cast %139 : vector<1x8x128xbf16> to vector<8x128xbf16>
    %141 = arith.extf %140 : vector<8x128xbf16> to vector<8x128xf32>
    %142 = tpu.concatenate %141, %129 in 1 : vector<8x128xf32>, vector<8x128xf32> -> vector<8x256xf32>
    %143 = arith.truncf %142 : vector<8x256xf32> to vector<8x256xbf16>
    %cst_36 = arith.constant dense<0.000000e+00> : vector<8x512xf32>
    %144 = tpu.matmul %143, %3, %cst_36 {dimension_numbers = #tpu.dot_dimension_numbers<[1], [0], [0], [1], [0, 0, 1, 1], [], []>} : vector<8x256xbf16>, vector<256x512xbf16>, vector<8x512xf32> -> vector<8x512xf32>
    %145 = vector.broadcast %4 : vector<1x512xf32> to vector<8x512xf32>
    %146 = arith.addf %144, %145 : vector<8x512xf32>
    %147 = vector.extract_strided_slice %146 {offsets = [0, 0], sizes = [8, 128], strides = [1, 1]} : vector<8x512xf32> to vector<8x128xf32>
    %148 = arith.negf %147 : vector<8x128xf32>
    %149 = math.exp %148 : vector<8x128xf32>
    %cst_37 = arith.constant 1.000000e+00 : f32
    %150 = vector.broadcast %cst_37 : f32 to vector<8x128xf32>
    %151 = arith.addf %150, %149 : vector<8x128xf32>
    %152 = arith.divf %150, %151 : vector<8x128xf32>
    %153 = vector.extract_strided_slice %146 {offsets = [0, 128], sizes = [8, 128], strides = [1, 1]} : vector<8x512xf32> to vector<8x128xf32>
    %154 = arith.negf %153 : vector<8x128xf32>
    %155 = math.exp %154 : vector<8x128xf32>
    %cst_38 = arith.constant 1.000000e+00 : f32
    %156 = vector.broadcast %cst_38 : f32 to vector<8x128xf32>
    %157 = arith.addf %156, %155 : vector<8x128xf32>
    %158 = arith.divf %156, %157 : vector<8x128xf32>
    %159 = vector.extract_strided_slice %146 {offsets = [0, 256], sizes = [8, 128], strides = [1, 1]} : vector<8x512xf32> to vector<8x128xf32>
    %160 = math.tanh %159 : vector<8x128xf32>
    %161 = vector.extract_strided_slice %146 {offsets = [0, 384], sizes = [8, 128], strides = [1, 1]} : vector<8x512xf32> to vector<8x128xf32>
    %162 = arith.negf %161 : vector<8x128xf32>
    %163 = math.exp %162 : vector<8x128xf32>
    %cst_39 = arith.constant 1.000000e+00 : f32
    %164 = vector.broadcast %cst_39 : f32 to vector<8x128xf32>
    %165 = arith.addf %164, %163 : vector<8x128xf32>
    %166 = arith.divf %164, %165 : vector<8x128xf32>
    %167 = arith.mulf %158, %127 : vector<8x128xf32>
    %168 = arith.mulf %152, %160 : vector<8x128xf32>
    %169 = arith.addf %167, %168 : vector<8x128xf32>
    %170 = math.tanh %169 : vector<8x128xf32>
    %171 = arith.mulf %166, %170 : vector<8x128xf32>
    %c3_i32 = arith.constant 3 : i32
    %172 = arith.addi %12, %c3_i32 : i32
    %173 = vector.broadcast %172 : i32 to vector<8x1xi32>
    %174 = arith.cmpi eq, %7, %173 : vector<8x1xi32>
    %175 = vector.shape_cast %174 : vector<8x1xi1> to vector<8x1xi1>
    %176 = vector.broadcast %175 : vector<8x1xi1> to vector<8x128xi1>
    %177 = arith.select %176, %171, %135 : vector<8x128xi1>, vector<8x128xf32>
    %178 = vector.shape_cast %174 : vector<8x1xi1> to vector<8x1xi1>
    %179 = vector.broadcast %178 : vector<8x1xi1> to vector<8x128xi1>
    %180 = arith.select %179, %169, %138 : vector<8x128xi1>, vector<8x128xf32>
    %c4 = arith.constant 4 : index
    %c0_40 = arith.constant 0 : index
    %c0_41 = arith.constant 0 : index
    %181 = vector.load %arg1[%c4, %c0_40, %c0_41] : memref<8x8x128xbf16, #tpu.memory_space<vmem>>, vector<1x8x128xbf16>
    %182 = vector.shape_cast %181 : vector<1x8x128xbf16> to vector<8x128xbf16>
    %183 = arith.extf %182 : vector<8x128xbf16> to vector<8x128xf32>
    %184 = tpu.concatenate %183, %171 in 1 : vector<8x128xf32>, vector<8x128xf32> -> vector<8x256xf32>
    %185 = arith.truncf %184 : vector<8x256xf32> to vector<8x256xbf16>
    %cst_42 = arith.constant dense<0.000000e+00> : vector<8x512xf32>
    %186 = tpu.matmul %185, %3, %cst_42 {dimension_numbers = #tpu.dot_dimension_numbers<[1], [0], [0], [1], [0, 0, 1, 1], [], []>} : vector<8x256xbf16>, vector<256x512xbf16>, vector<8x512xf32> -> vector<8x512xf32>
    %187 = vector.broadcast %4 : vector<1x512xf32> to vector<8x512xf32>
    %188 = arith.addf %186, %187 : vector<8x512xf32>
    %189 = vector.extract_strided_slice %188 {offsets = [0, 0], sizes = [8, 128], strides = [1, 1]} : vector<8x512xf32> to vector<8x128xf32>
    %190 = arith.negf %189 : vector<8x128xf32>
    %191 = math.exp %190 : vector<8x128xf32>
    %cst_43 = arith.constant 1.000000e+00 : f32
    %192 = vector.broadcast %cst_43 : f32 to vector<8x128xf32>
    %193 = arith.addf %192, %191 : vector<8x128xf32>
    %194 = arith.divf %192, %193 : vector<8x128xf32>
    %195 = vector.extract_strided_slice %188 {offsets = [0, 128], sizes = [8, 128], strides = [1, 1]} : vector<8x512xf32> to vector<8x128xf32>
    %196 = arith.negf %195 : vector<8x128xf32>
    %197 = math.exp %196 : vector<8x128xf32>
    %cst_44 = arith.constant 1.000000e+00 : f32
    %198 = vector.broadcast %cst_44 : f32 to vector<8x128xf32>
    %199 = arith.addf %198, %197 : vector<8x128xf32>
    %200 = arith.divf %198, %199 : vector<8x128xf32>
    %201 = vector.extract_strided_slice %188 {offsets = [0, 256], sizes = [8, 128], strides = [1, 1]} : vector<8x512xf32> to vector<8x128xf32>
    %202 = math.tanh %201 : vector<8x128xf32>
    %203 = vector.extract_strided_slice %188 {offsets = [0, 384], sizes = [8, 128], strides = [1, 1]} : vector<8x512xf32> to vector<8x128xf32>
    %204 = arith.negf %203 : vector<8x128xf32>
    %205 = math.exp %204 : vector<8x128xf32>
    %cst_45 = arith.constant 1.000000e+00 : f32
    %206 = vector.broadcast %cst_45 : f32 to vector<8x128xf32>
    %207 = arith.addf %206, %205 : vector<8x128xf32>
    %208 = arith.divf %206, %207 : vector<8x128xf32>
    %209 = arith.mulf %200, %169 : vector<8x128xf32>
    %210 = arith.mulf %194, %202 : vector<8x128xf32>
    %211 = arith.addf %209, %210 : vector<8x128xf32>
    %212 = math.tanh %211 : vector<8x128xf32>
    %213 = arith.mulf %208, %212 : vector<8x128xf32>
    %c4_i32 = arith.constant 4 : i32
    %214 = arith.addi %12, %c4_i32 : i32
    %215 = vector.broadcast %214 : i32 to vector<8x1xi32>
    %216 = arith.cmpi eq, %7, %215 : vector<8x1xi32>
    %217 = vector.shape_cast %216 : vector<8x1xi1> to vector<8x1xi1>
    %218 = vector.broadcast %217 : vector<8x1xi1> to vector<8x128xi1>
    %219 = arith.select %218, %213, %177 : vector<8x128xi1>, vector<8x128xf32>
    %220 = vector.shape_cast %216 : vector<8x1xi1> to vector<8x1xi1>
    %221 = vector.broadcast %220 : vector<8x1xi1> to vector<8x128xi1>
    %222 = arith.select %221, %211, %180 : vector<8x128xi1>, vector<8x128xf32>
    %c5 = arith.constant 5 : index
    %c0_46 = arith.constant 0 : index
    %c0_47 = arith.constant 0 : index
    %223 = vector.load %arg1[%c5, %c0_46, %c0_47] : memref<8x8x128xbf16, #tpu.memory_space<vmem>>, vector<1x8x128xbf16>
    %224 = vector.shape_cast %223 : vector<1x8x128xbf16> to vector<8x128xbf16>
    %225 = arith.extf %224 : vector<8x128xbf16> to vector<8x128xf32>
    %226 = tpu.concatenate %225, %213 in 1 : vector<8x128xf32>, vector<8x128xf32> -> vector<8x256xf32>
    %227 = arith.truncf %226 : vector<8x256xf32> to vector<8x256xbf16>
    %cst_48 = arith.constant dense<0.000000e+00> : vector<8x512xf32>
    %228 = tpu.matmul %227, %3, %cst_48 {dimension_numbers = #tpu.dot_dimension_numbers<[1], [0], [0], [1], [0, 0, 1, 1], [], []>} : vector<8x256xbf16>, vector<256x512xbf16>, vector<8x512xf32> -> vector<8x512xf32>
    %229 = vector.broadcast %4 : vector<1x512xf32> to vector<8x512xf32>
    %230 = arith.addf %228, %229 : vector<8x512xf32>
    %231 = vector.extract_strided_slice %230 {offsets = [0, 0], sizes = [8, 128], strides = [1, 1]} : vector<8x512xf32> to vector<8x128xf32>
    %232 = arith.negf %231 : vector<8x128xf32>
    %233 = math.exp %232 : vector<8x128xf32>
    %cst_49 = arith.constant 1.000000e+00 : f32
    %234 = vector.broadcast %cst_49 : f32 to vector<8x128xf32>
    %235 = arith.addf %234, %233 : vector<8x128xf32>
    %236 = arith.divf %234, %235 : vector<8x128xf32>
    %237 = vector.extract_strided_slice %230 {offsets = [0, 128], sizes = [8, 128], strides = [1, 1]} : vector<8x512xf32> to vector<8x128xf32>
    %238 = arith.negf %237 : vector<8x128xf32>
    %239 = math.exp %238 : vector<8x128xf32>
    %cst_50 = arith.constant 1.000000e+00 : f32
    %240 = vector.broadcast %cst_50 : f32 to vector<8x128xf32>
    %241 = arith.addf %240, %239 : vector<8x128xf32>
    %242 = arith.divf %240, %241 : vector<8x128xf32>
    %243 = vector.extract_strided_slice %230 {offsets = [0, 256], sizes = [8, 128], strides = [1, 1]} : vector<8x512xf32> to vector<8x128xf32>
    %244 = math.tanh %243 : vector<8x128xf32>
    %245 = vector.extract_strided_slice %230 {offsets = [0, 384], sizes = [8, 128], strides = [1, 1]} : vector<8x512xf32> to vector<8x128xf32>
    %246 = arith.negf %245 : vector<8x128xf32>
    %247 = math.exp %246 : vector<8x128xf32>
    %cst_51 = arith.constant 1.000000e+00 : f32
    %248 = vector.broadcast %cst_51 : f32 to vector<8x128xf32>
    %249 = arith.addf %248, %247 : vector<8x128xf32>
    %250 = arith.divf %248, %249 : vector<8x128xf32>
    %251 = arith.mulf %242, %211 : vector<8x128xf32>
    %252 = arith.mulf %236, %244 : vector<8x128xf32>
    %253 = arith.addf %251, %252 : vector<8x128xf32>
    %254 = math.tanh %253 : vector<8x128xf32>
    %255 = arith.mulf %250, %254 : vector<8x128xf32>
    %c5_i32 = arith.constant 5 : i32
    %256 = arith.addi %12, %c5_i32 : i32
    %257 = vector.broadcast %256 : i32 to vector<8x1xi32>
    %258 = arith.cmpi eq, %7, %257 : vector<8x1xi32>
    %259 = vector.shape_cast %258 : vector<8x1xi1> to vector<8x1xi1>
    %260 = vector.broadcast %259 : vector<8x1xi1> to vector<8x128xi1>
    %261 = arith.select %260, %255, %219 : vector<8x128xi1>, vector<8x128xf32>
    %262 = vector.shape_cast %258 : vector<8x1xi1> to vector<8x1xi1>
    %263 = vector.broadcast %262 : vector<8x1xi1> to vector<8x128xi1>
    %264 = arith.select %263, %253, %222 : vector<8x128xi1>, vector<8x128xf32>
    %c6 = arith.constant 6 : index
    %c0_52 = arith.constant 0 : index
    %c0_53 = arith.constant 0 : index
    %265 = vector.load %arg1[%c6, %c0_52, %c0_53] : memref<8x8x128xbf16, #tpu.memory_space<vmem>>, vector<1x8x128xbf16>
    %266 = vector.shape_cast %265 : vector<1x8x128xbf16> to vector<8x128xbf16>
    %267 = arith.extf %266 : vector<8x128xbf16> to vector<8x128xf32>
    %268 = tpu.concatenate %267, %255 in 1 : vector<8x128xf32>, vector<8x128xf32> -> vector<8x256xf32>
    %269 = arith.truncf %268 : vector<8x256xf32> to vector<8x256xbf16>
    %cst_54 = arith.constant dense<0.000000e+00> : vector<8x512xf32>
    %270 = tpu.matmul %269, %3, %cst_54 {dimension_numbers = #tpu.dot_dimension_numbers<[1], [0], [0], [1], [0, 0, 1, 1], [], []>} : vector<8x256xbf16>, vector<256x512xbf16>, vector<8x512xf32> -> vector<8x512xf32>
    %271 = vector.broadcast %4 : vector<1x512xf32> to vector<8x512xf32>
    %272 = arith.addf %270, %271 : vector<8x512xf32>
    %273 = vector.extract_strided_slice %272 {offsets = [0, 0], sizes = [8, 128], strides = [1, 1]} : vector<8x512xf32> to vector<8x128xf32>
    %274 = arith.negf %273 : vector<8x128xf32>
    %275 = math.exp %274 : vector<8x128xf32>
    %cst_55 = arith.constant 1.000000e+00 : f32
    %276 = vector.broadcast %cst_55 : f32 to vector<8x128xf32>
    %277 = arith.addf %276, %275 : vector<8x128xf32>
    %278 = arith.divf %276, %277 : vector<8x128xf32>
    %279 = vector.extract_strided_slice %272 {offsets = [0, 128], sizes = [8, 128], strides = [1, 1]} : vector<8x512xf32> to vector<8x128xf32>
    %280 = arith.negf %279 : vector<8x128xf32>
    %281 = math.exp %280 : vector<8x128xf32>
    %cst_56 = arith.constant 1.000000e+00 : f32
    %282 = vector.broadcast %cst_56 : f32 to vector<8x128xf32>
    %283 = arith.addf %282, %281 : vector<8x128xf32>
    %284 = arith.divf %282, %283 : vector<8x128xf32>
    %285 = vector.extract_strided_slice %272 {offsets = [0, 256], sizes = [8, 128], strides = [1, 1]} : vector<8x512xf32> to vector<8x128xf32>
    %286 = math.tanh %285 : vector<8x128xf32>
    %287 = vector.extract_strided_slice %272 {offsets = [0, 384], sizes = [8, 128], strides = [1, 1]} : vector<8x512xf32> to vector<8x128xf32>
    %288 = arith.negf %287 : vector<8x128xf32>
    %289 = math.exp %288 : vector<8x128xf32>
    %cst_57 = arith.constant 1.000000e+00 : f32
    %290 = vector.broadcast %cst_57 : f32 to vector<8x128xf32>
    %291 = arith.addf %290, %289 : vector<8x128xf32>
    %292 = arith.divf %290, %291 : vector<8x128xf32>
    %293 = arith.mulf %284, %253 : vector<8x128xf32>
    %294 = arith.mulf %278, %286 : vector<8x128xf32>
    %295 = arith.addf %293, %294 : vector<8x128xf32>
    %296 = math.tanh %295 : vector<8x128xf32>
    %297 = arith.mulf %292, %296 : vector<8x128xf32>
    %c6_i32 = arith.constant 6 : i32
    %298 = arith.addi %12, %c6_i32 : i32
    %299 = vector.broadcast %298 : i32 to vector<8x1xi32>
    %300 = arith.cmpi eq, %7, %299 : vector<8x1xi32>
    %301 = vector.shape_cast %300 : vector<8x1xi1> to vector<8x1xi1>
    %302 = vector.broadcast %301 : vector<8x1xi1> to vector<8x128xi1>
    %303 = arith.select %302, %297, %261 : vector<8x128xi1>, vector<8x128xf32>
    %304 = vector.shape_cast %300 : vector<8x1xi1> to vector<8x1xi1>
    %305 = vector.broadcast %304 : vector<8x1xi1> to vector<8x128xi1>
    %306 = arith.select %305, %295, %264 : vector<8x128xi1>, vector<8x128xf32>
    %c7 = arith.constant 7 : index
    %c0_58 = arith.constant 0 : index
    %c0_59 = arith.constant 0 : index
    %307 = vector.load %arg1[%c7, %c0_58, %c0_59] : memref<8x8x128xbf16, #tpu.memory_space<vmem>>, vector<1x8x128xbf16>
    %308 = vector.shape_cast %307 : vector<1x8x128xbf16> to vector<8x128xbf16>
    %309 = arith.extf %308 : vector<8x128xbf16> to vector<8x128xf32>
    %310 = tpu.concatenate %309, %297 in 1 : vector<8x128xf32>, vector<8x128xf32> -> vector<8x256xf32>
    %311 = arith.truncf %310 : vector<8x256xf32> to vector<8x256xbf16>
    %cst_60 = arith.constant dense<0.000000e+00> : vector<8x512xf32>
    %312 = tpu.matmul %311, %3, %cst_60 {dimension_numbers = #tpu.dot_dimension_numbers<[1], [0], [0], [1], [0, 0, 1, 1], [], []>} : vector<8x256xbf16>, vector<256x512xbf16>, vector<8x512xf32> -> vector<8x512xf32>
    %313 = vector.broadcast %4 : vector<1x512xf32> to vector<8x512xf32>
    %314 = arith.addf %312, %313 : vector<8x512xf32>
    %315 = vector.extract_strided_slice %314 {offsets = [0, 0], sizes = [8, 128], strides = [1, 1]} : vector<8x512xf32> to vector<8x128xf32>
    %316 = arith.negf %315 : vector<8x128xf32>
    %317 = math.exp %316 : vector<8x128xf32>
    %cst_61 = arith.constant 1.000000e+00 : f32
    %318 = vector.broadcast %cst_61 : f32 to vector<8x128xf32>
    %319 = arith.addf %318, %317 : vector<8x128xf32>
    %320 = arith.divf %318, %319 : vector<8x128xf32>
    %321 = vector.extract_strided_slice %314 {offsets = [0, 128], sizes = [8, 128], strides = [1, 1]} : vector<8x512xf32> to vector<8x128xf32>
    %322 = arith.negf %321 : vector<8x128xf32>
    %323 = math.exp %322 : vector<8x128xf32>
    %cst_62 = arith.constant 1.000000e+00 : f32
    %324 = vector.broadcast %cst_62 : f32 to vector<8x128xf32>
    %325 = arith.addf %324, %323 : vector<8x128xf32>
    %326 = arith.divf %324, %325 : vector<8x128xf32>
    %327 = vector.extract_strided_slice %314 {offsets = [0, 256], sizes = [8, 128], strides = [1, 1]} : vector<8x512xf32> to vector<8x128xf32>
    %328 = math.tanh %327 : vector<8x128xf32>
    %329 = vector.extract_strided_slice %314 {offsets = [0, 384], sizes = [8, 128], strides = [1, 1]} : vector<8x512xf32> to vector<8x128xf32>
    %330 = arith.negf %329 : vector<8x128xf32>
    %331 = math.exp %330 : vector<8x128xf32>
    %cst_63 = arith.constant 1.000000e+00 : f32
    %332 = vector.broadcast %cst_63 : f32 to vector<8x128xf32>
    %333 = arith.addf %332, %331 : vector<8x128xf32>
    %334 = arith.divf %332, %333 : vector<8x128xf32>
    %335 = arith.mulf %326, %295 : vector<8x128xf32>
    %336 = arith.mulf %320, %328 : vector<8x128xf32>
    %337 = arith.addf %335, %336 : vector<8x128xf32>
    %338 = math.tanh %337 : vector<8x128xf32>
    %339 = arith.mulf %334, %338 : vector<8x128xf32>
    %c7_i32 = arith.constant 7 : i32
    %340 = arith.addi %12, %c7_i32 : i32
    %341 = vector.broadcast %340 : i32 to vector<8x1xi32>
    %342 = arith.cmpi eq, %7, %341 : vector<8x1xi32>
    %343 = vector.shape_cast %342 : vector<8x1xi1> to vector<8x1xi1>
    %344 = vector.broadcast %343 : vector<8x1xi1> to vector<8x128xi1>
    %345 = arith.select %344, %339, %303 : vector<8x128xi1>, vector<8x128xf32>
    %346 = vector.shape_cast %342 : vector<8x1xi1> to vector<8x1xi1>
    %347 = vector.broadcast %346 : vector<8x1xi1> to vector<8x128xi1>
    %348 = arith.select %347, %337, %306 : vector<8x128xi1>, vector<8x128xf32>
    %c0_64 = arith.constant 0 : index
    %c0_65 = arith.constant 0 : index
    %349 = vector.load %arg9[%c0_64, %c0_65] : memref<8x128xf32, #tpu.memory_space<vmem>>, vector<8x128xf32>
    tpu.vector_store %arg9[%c0_64, %c0_65], %339 {strides = array<i32>} : memref<8x128xf32, #tpu.memory_space<vmem>>, vector<8x128xf32>,
    %c0_66 = arith.constant 0 : index
    %c0_67 = arith.constant 0 : index
    %350 = vector.load %arg10[%c0_66, %c0_67] : memref<8x128xf32, #tpu.memory_space<vmem>>, vector<8x128xf32>
    tpu.vector_store %arg10[%c0_66, %c0_67], %337 {strides = array<i32>} : memref<8x128xf32, #tpu.memory_space<vmem>>, vector<8x128xf32>,
    %c0_68 = arith.constant 0 : index
    %c0_69 = arith.constant 0 : index
    %351 = vector.load %arg11[%c0_68, %c0_69] : memref<8x128xf32, #tpu.memory_space<vmem>>, vector<8x128xf32>
    tpu.vector_store %arg11[%c0_68, %c0_69], %345 {strides = array<i32>} : memref<8x128xf32, #tpu.memory_space<vmem>>, vector<8x128xf32>,
    %c0_70 = arith.constant 0 : index
    %c0_71 = arith.constant 0 : index
    %352 = vector.load %arg12[%c0_70, %c0_71] : memref<8x128xf32, #tpu.memory_space<vmem>>, vector<8x128xf32>
    tpu.vector_store %arg12[%c0_70, %c0_71], %348 {strides = array<i32>} : memref<8x128xf32, #tpu.memory_space<vmem>>, vector<8x128xf32>,
    %c1_i32_72 = arith.constant 1 : i32
    %353 = arith.cmpi eq, %arg0, %c1_i32_72 : i32
    %354 = arith.extui %353 : i1 to i32
    %c0_i32_73 = arith.constant 0 : i32
    %355 = arith.cmpi ne, %354, %c0_i32_73 : i32
    scf.if %355 {
      %c0_74 = arith.constant 0 : index
      %c0_75 = arith.constant 0 : index
      %356 = vector.load %arg7[%c0_74, %c0_75] : memref<8x128xf32, #tpu.memory_space<vmem>>, vector<8x128xf32>
      tpu.vector_store %arg7[%c0_74, %c0_75], %345 {strides = array<i32>} : memref<8x128xf32, #tpu.memory_space<vmem>>, vector<8x128xf32>,
      %c0_76 = arith.constant 0 : index
      %c0_77 = arith.constant 0 : index
      %357 = vector.load %arg8[%c0_76, %c0_77] : memref<8x128xf32, #tpu.memory_space<vmem>>, vector<8x128xf32>
      tpu.vector_store %arg8[%c0_76, %c0_77], %348 {strides = array<i32>} : memref<8x128xf32, #tpu.memory_space<vmem>>, vector<8x128xf32>,
    } else {
    }
    return
  }
  func.func @transform_0(%arg0: i32) -> (i32, i32, i32) {
    %c0_i32 = arith.constant 0 : i32
    %c0_i32_0 = arith.constant 0 : i32
    %c0_i32_1 = arith.constant 0 : i32
    return %arg0, %c0_i32, %c0_i32_0 : i32, i32, i32
  }
  func.func @transform_1(%arg0: i32) -> (i32, i32) {
    %c0_i32 = arith.constant 0 : i32
    %c0_i32_0 = arith.constant 0 : i32
    %c0_i32_1 = arith.constant 0 : i32
    return %c0_i32, %c0_i32_0 : i32, i32
  }
  func.func @transform_2(%arg0: i32) -> (i32, i32) {
    %c0_i32 = arith.constant 0 : i32
    %c0_i32_0 = arith.constant 0 : i32
    %c0_i32_1 = arith.constant 0 : i32
    return %c0_i32, %c0_i32_0 : i32, i32
  }
  func.func @transform_3(%arg0: i32) -> (i32, i32) {
    %c0_i32 = arith.constant 0 : i32
    %c0_i32_0 = arith.constant 0 : i32
    %c0_i32_1 = arith.constant 0 : i32
    return %c0_i32, %c0_i32_0 : i32, i32
  }
  func.func @transform_4(%arg0: i32) -> (i32, i32) {
    %c0_i32 = arith.constant 0 : i32
    %c0_i32_0 = arith.constant 0 : i32
    %c0_i32_1 = arith.constant 0 : i32
    return %c0_i32, %c0_i32_0 : i32, i32
  }
  func.func @transform_5(%arg0: i32) -> (i32, i32) {
    %c0_i32 = arith.constant 0 : i32
    %c0_i32_0 = arith.constant 0 : i32
    %c0_i32_1 = arith.constant 0 : i32
    return %c0_i32, %c0_i32_0 : i32, i32
  }
  func.func @transform_6(%arg0: i32) -> (i32, i32) {
    %c0_i32 = arith.constant 0 : i32
    %c0_i32_0 = arith.constant 0 : i32
    %c0_i32_1 = arith.constant 0 : i32
    return %c0_i32, %c0_i32_0 : i32, i32
  }
  func.func @transform_7(%arg0: i32) -> (i32, i32) {
    %c0_i32 = arith.constant 0 : i32
    %c0_i32_0 = arith.constant 0 : i32
    %c0_i32_1 = arith.constant 0 : i32
    return %c0_i32, %c0_i32_0 : i32, i32
  }
}

module attributes {stable_mosaic.version = 11 : i64} {
  func.func @lse_kernel(%arg0: i32, %arg1: i32, %arg2: memref<128x128xf32, #tpu.memory_space<vmem>>, %arg3: memref<128x128xbf16, #tpu.memory_space<vmem>>, %arg4: memref<1x128xf32, #tpu.memory_space<vmem>>, %arg5: memref<128x1xf32, #tpu.memory_space<vmem>>, %arg6: memref<128x1xf32, #tpu.memory_space<vmem>>, %arg7: memref<128x1xf32, #tpu.memory_space<vmem>>) attributes {dimension_semantics = [#tpu.dimension_semantics<parallel>, #tpu.dimension_semantics<arbitrary>], iteration_bounds = array<i64: 1, 3>, scalar_prefetch = 0 : i64, scratch_operands = 2 : i64, tpu.core_type = #tpu.core_type<tc>, window_params = [{transform_indices = @transform_0, window_bounds = array<i64: 128, 128>}, {transform_indices = @transform_1, window_bounds = array<i64: 128, 128>}, {transform_indices = @transform_2, window_bounds = array<i64: 1, 128>}, {transform_indices = @transform_3, window_bounds = array<i64: 128, 1>}]} {
    %c0_i32 = arith.constant 0 : i32
    %0 = arith.cmpi eq, %arg1, %c0_i32 : i32
    %1 = arith.extui %0 : i1 to i32
    %c0_i32_0 = arith.constant 0 : i32
    %2 = arith.cmpi ne, %1, %c0_i32_0 : i32
    scf.if %2 {
      %cst_17 = arith.constant 0xFF800000 : f32
      %29 = vector.broadcast %cst_17 : f32 to vector<128x1xf32>
      %c0_18 = arith.constant 0 : index
      %c0_19 = arith.constant 0 : index
      %30 = vector.load %arg6[%c0_18, %c0_19] : memref<128x1xf32, #tpu.memory_space<vmem>>, vector<128x1xf32>
      tpu.vector_store %arg6[%c0_18, %c0_19], %29 {strides = array<i32>} : memref<128x1xf32, #tpu.memory_space<vmem>>, vector<128x1xf32>,
      %cst_20 = arith.constant 0.000000e+00 : f32
      %31 = vector.broadcast %cst_20 : f32 to vector<128x1xf32>
      %c0_21 = arith.constant 0 : index
      %c0_22 = arith.constant 0 : index
      %32 = vector.load %arg7[%c0_21, %c0_22] : memref<128x1xf32, #tpu.memory_space<vmem>>, vector<128x1xf32>
      tpu.vector_store %arg7[%c0_21, %c0_22], %31 {strides = array<i32>} : memref<128x1xf32, #tpu.memory_space<vmem>>, vector<128x1xf32>,
    } else {
    }
    %c0 = arith.constant 0 : index
    %c0_1 = arith.constant 0 : index
    %3 = vector.load %arg2[%c0, %c0_1] : memref<128x128xf32, #tpu.memory_space<vmem>>, vector<128x128xf32>
    %4 = arith.truncf %3 : vector<128x128xf32> to vector<128x128xbf16>
    %c0_2 = arith.constant 0 : index
    %c0_3 = arith.constant 0 : index
    %5 = vector.load %arg3[%c0_2, %c0_3] : memref<128x128xbf16, #tpu.memory_space<vmem>>, vector<128x128xbf16>
    %cst = arith.constant dense<0.000000e+00> : vector<128x128xf32>
    %6 = tpu.matmul %4, %5, %cst {dimension_numbers = #tpu.dot_dimension_numbers<[1], [0], [0], [1], [0, 0, 1, 1], [], []>} : vector<128x128xbf16>, vector<128x128xbf16>, vector<128x128xf32> -> vector<128x128xf32>
    %c0_4 = arith.constant 0 : index
    %c0_5 = arith.constant 0 : index
    %7 = vector.load %arg4[%c0_4, %c0_5] : memref<1x128xf32, #tpu.memory_space<vmem>>, vector<1x128xf32>
    %8 = vector.broadcast %7 : vector<1x128xf32> to vector<128x128xf32>
    %9 = arith.addf %6, %8 : vector<128x128xf32>
    %c0_6 = arith.constant 0 : index
    %c0_7 = arith.constant 0 : index
    %10 = vector.load %arg6[%c0_6, %c0_7] : memref<128x1xf32, #tpu.memory_space<vmem>>, vector<128x1xf32>
    %cst_8 = arith.constant dense<0xFF800000> : vector<128xf32>
    %11 = vector.multi_reduction <maximumf>, %9, %cst_8 [1] : vector<128x128xf32> to vector<128xf32>
    %12 = vector.shape_cast %11 : vector<128xf32> to vector<128x1xf32>
    %13 = arith.maximumf %10, %12 : vector<128x1xf32>
    %14 = arith.subf %10, %13 : vector<128x1xf32>
    %15 = math.exp %14 : vector<128x1xf32>
    %c0_9 = arith.constant 0 : index
    %c0_10 = arith.constant 0 : index
    %16 = vector.load %arg7[%c0_9, %c0_10] : memref<128x1xf32, #tpu.memory_space<vmem>>, vector<128x1xf32>
    %17 = arith.mulf %15, %16 : vector<128x1xf32>
    %18 = vector.broadcast %13 : vector<128x1xf32> to vector<128x128xf32>
    %19 = arith.subf %9, %18 : vector<128x128xf32>
    %20 = math.exp %19 : vector<128x128xf32>
    %cst_11 = arith.constant dense<0.000000e+00> : vector<128xf32>
    %21 = vector.multi_reduction <add>, %20, %cst_11 [1] : vector<128x128xf32> to vector<128xf32>
    %22 = vector.shape_cast %21 : vector<128xf32> to vector<128x1xf32>
    %23 = arith.addf %17, %22 : vector<128x1xf32>
    %c0_12 = arith.constant 0 : index
    %c0_13 = arith.constant 0 : index
    %24 = vector.load %arg7[%c0_12, %c0_13] : memref<128x1xf32, #tpu.memory_space<vmem>>, vector<128x1xf32>
    tpu.vector_store %arg7[%c0_12, %c0_13], %23 {strides = array<i32>} : memref<128x1xf32, #tpu.memory_space<vmem>>, vector<128x1xf32>,
    %c0_14 = arith.constant 0 : index
    %c0_15 = arith.constant 0 : index
    %25 = vector.load %arg6[%c0_14, %c0_15] : memref<128x1xf32, #tpu.memory_space<vmem>>, vector<128x1xf32>
    tpu.vector_store %arg6[%c0_14, %c0_15], %13 {strides = array<i32>} : memref<128x1xf32, #tpu.memory_space<vmem>>, vector<128x1xf32>,
    %c2_i32 = arith.constant 2 : i32
    %26 = arith.cmpi eq, %arg1, %c2_i32 : i32
    %27 = arith.extui %26 : i1 to i32
    %c0_i32_16 = arith.constant 0 : i32
    %28 = arith.cmpi ne, %27, %c0_i32_16 : i32
    scf.if %28 {
      %c0_17 = arith.constant 0 : index
      %c0_18 = arith.constant 0 : index
      %29 = vector.load %arg6[%c0_17, %c0_18] : memref<128x1xf32, #tpu.memory_space<vmem>>, vector<128x1xf32>
      %c0_19 = arith.constant 0 : index
      %c0_20 = arith.constant 0 : index
      %30 = vector.load %arg7[%c0_19, %c0_20] : memref<128x1xf32, #tpu.memory_space<vmem>>, vector<128x1xf32>
      %31 = math.log %30 : vector<128x1xf32>
      %32 = arith.addf %29, %31 : vector<128x1xf32>
      %c0_21 = arith.constant 0 : index
      %c0_22 = arith.constant 0 : index
      %33 = vector.load %arg5[%c0_21, %c0_22] : memref<128x1xf32, #tpu.memory_space<vmem>>, vector<128x1xf32>
      tpu.vector_store %arg5[%c0_21, %c0_22], %32 {strides = array<i32>} : memref<128x1xf32, #tpu.memory_space<vmem>>, vector<128x1xf32>,
    } else {
    }
    return
  }
  func.func @transform_0(%arg0: i32, %arg1: i32) -> (i32, i32) {
    %c0_i32 = arith.constant 0 : i32
    %c0_i32_0 = arith.constant 0 : i32
    return %arg0, %c0_i32 : i32, i32
  }
  func.func @transform_1(%arg0: i32, %arg1: i32) -> (i32, i32) {
    %c0_i32 = arith.constant 0 : i32
    %c0_i32_0 = arith.constant 0 : i32
    return %c0_i32, %arg1 : i32, i32
  }
  func.func @transform_2(%arg0: i32, %arg1: i32) -> (i32, i32) {
    %c0_i32 = arith.constant 0 : i32
    %c0_i32_0 = arith.constant 0 : i32
    return %c0_i32, %arg1 : i32, i32
  }
  func.func @transform_3(%arg0: i32, %arg1: i32) -> (i32, i32) {
    %c0_i32 = arith.constant 0 : i32
    %c0_i32_0 = arith.constant 0 : i32
    return %arg0, %c0_i32 : i32, i32
  }
}

module attributes {stable_mosaic.version = 11 : i64} {
  func.func @dec_lstm_kernel(%arg0: i32, %arg1: memref<8x8x128xbf16, #tpu.memory_space<vmem>>, %arg2: memref<256x512xbf16, #tpu.memory_space<vmem>>, %arg3: memref<1x512xf32, #tpu.memory_space<vmem>>, %arg4: memref<8x128xf32, #tpu.memory_space<vmem>>, %arg5: memref<8x128xf32, #tpu.memory_space<vmem>>, %arg6: memref<8x8x128xf32, #tpu.memory_space<vmem>>, %arg7: memref<8x128xf32, #tpu.memory_space<vmem>>, %arg8: memref<8x128xf32, #tpu.memory_space<vmem>>) attributes {dimension_semantics = [#tpu.dimension_semantics<arbitrary>], iteration_bounds = array<i64: 2>, scalar_prefetch = 0 : i64, scratch_operands = 2 : i64, tpu.core_type = #tpu.core_type<tc>, window_params = [{transform_indices = @transform_0, window_bounds = array<i64: 8, 8, 128>}, {pipeline_mode = #tpu.pipeline_mode<synchronous>, transform_indices = @transform_1, window_bounds = array<i64: 256, 512>}, {pipeline_mode = #tpu.pipeline_mode<synchronous>, transform_indices = @transform_2, window_bounds = array<i64: 1, 512>}, {pipeline_mode = #tpu.pipeline_mode<synchronous>, transform_indices = @transform_3, window_bounds = array<i64: 8, 128>}, {pipeline_mode = #tpu.pipeline_mode<synchronous>, transform_indices = @transform_4, window_bounds = array<i64: 8, 128>}, {transform_indices = @transform_5, window_bounds = array<i64: 8, 8, 128>}]} {
    %c0_i32 = arith.constant 0 : i32
    %0 = arith.cmpi eq, %arg0, %c0_i32 : i32
    %1 = arith.extui %0 : i1 to i32
    %c0_i32_0 = arith.constant 0 : i32
    %2 = arith.cmpi ne, %1, %c0_i32_0 : i32
    scf.if %2 {
      %c0_84 = arith.constant 0 : index
      %c0_85 = arith.constant 0 : index
      %297 = vector.load %arg4[%c0_84, %c0_85] : memref<8x128xf32, #tpu.memory_space<vmem>>, vector<8x128xf32>
      %c0_86 = arith.constant 0 : index
      %c0_87 = arith.constant 0 : index
      %298 = vector.load %arg7[%c0_86, %c0_87] : memref<8x128xf32, #tpu.memory_space<vmem>>, vector<8x128xf32>
      tpu.vector_store %arg7[%c0_86, %c0_87], %297 {strides = array<i32>} : memref<8x128xf32, #tpu.memory_space<vmem>>, vector<8x128xf32>,
      %c0_88 = arith.constant 0 : index
      %c0_89 = arith.constant 0 : index
      %299 = vector.load %arg5[%c0_88, %c0_89] : memref<8x128xf32, #tpu.memory_space<vmem>>, vector<8x128xf32>
      %c0_90 = arith.constant 0 : index
      %c0_91 = arith.constant 0 : index
      %300 = vector.load %arg8[%c0_90, %c0_91] : memref<8x128xf32, #tpu.memory_space<vmem>>, vector<8x128xf32>
      tpu.vector_store %arg8[%c0_90, %c0_91], %299 {strides = array<i32>} : memref<8x128xf32, #tpu.memory_space<vmem>>, vector<8x128xf32>,
    } else {
    }
    %c0 = arith.constant 0 : index
    %c0_1 = arith.constant 0 : index
    %3 = vector.load %arg2[%c0, %c0_1] : memref<256x512xbf16, #tpu.memory_space<vmem>>, vector<256x512xbf16>
    %c0_2 = arith.constant 0 : index
    %c0_3 = arith.constant 0 : index
    %4 = vector.load %arg3[%c0_2, %c0_3] : memref<1x512xf32, #tpu.memory_space<vmem>>, vector<1x512xf32>
    %c0_4 = arith.constant 0 : index
    %c0_5 = arith.constant 0 : index
    %5 = vector.load %arg7[%c0_4, %c0_5] : memref<8x128xf32, #tpu.memory_space<vmem>>, vector<8x128xf32>
    %c0_6 = arith.constant 0 : index
    %c0_7 = arith.constant 0 : index
    %6 = vector.load %arg8[%c0_6, %c0_7] : memref<8x128xf32, #tpu.memory_space<vmem>>, vector<8x128xf32>
    %c0_8 = arith.constant 0 : index
    %c0_9 = arith.constant 0 : index
    %c0_10 = arith.constant 0 : index
    %7 = vector.load %arg1[%c0_8, %c0_9, %c0_10] : memref<8x8x128xbf16, #tpu.memory_space<vmem>>, vector<1x8x128xbf16>
    %8 = vector.shape_cast %7 : vector<1x8x128xbf16> to vector<8x128xbf16>
    %9 = arith.extf %8 : vector<8x128xbf16> to vector<8x128xf32>
    %10 = tpu.concatenate %9, %5 in 1 : vector<8x128xf32>, vector<8x128xf32> -> vector<8x256xf32>
    %11 = arith.truncf %10 : vector<8x256xf32> to vector<8x256xbf16>
    %cst = arith.constant dense<0.000000e+00> : vector<8x512xf32>
    %12 = tpu.matmul %11, %3, %cst {dimension_numbers = #tpu.dot_dimension_numbers<[1], [0], [0], [1], [0, 0, 1, 1], [], []>} : vector<8x256xbf16>, vector<256x512xbf16>, vector<8x512xf32> -> vector<8x512xf32>
    %13 = vector.broadcast %4 : vector<1x512xf32> to vector<8x512xf32>
    %14 = arith.addf %12, %13 : vector<8x512xf32>
    %15 = vector.extract_strided_slice %14 {offsets = [0, 0], sizes = [8, 128], strides = [1, 1]} : vector<8x512xf32> to vector<8x128xf32>
    %16 = arith.negf %15 : vector<8x128xf32>
    %17 = math.exp %16 : vector<8x128xf32>
    %cst_11 = arith.constant 1.000000e+00 : f32
    %18 = vector.broadcast %cst_11 : f32 to vector<8x128xf32>
    %19 = arith.addf %18, %17 : vector<8x128xf32>
    %20 = arith.divf %18, %19 : vector<8x128xf32>
    %21 = vector.extract_strided_slice %14 {offsets = [0, 128], sizes = [8, 128], strides = [1, 1]} : vector<8x512xf32> to vector<8x128xf32>
    %22 = arith.negf %21 : vector<8x128xf32>
    %23 = math.exp %22 : vector<8x128xf32>
    %cst_12 = arith.constant 1.000000e+00 : f32
    %24 = vector.broadcast %cst_12 : f32 to vector<8x128xf32>
    %25 = arith.addf %24, %23 : vector<8x128xf32>
    %26 = arith.divf %24, %25 : vector<8x128xf32>
    %27 = vector.extract_strided_slice %14 {offsets = [0, 256], sizes = [8, 128], strides = [1, 1]} : vector<8x512xf32> to vector<8x128xf32>
    %28 = math.tanh %27 : vector<8x128xf32>
    %29 = vector.extract_strided_slice %14 {offsets = [0, 384], sizes = [8, 128], strides = [1, 1]} : vector<8x512xf32> to vector<8x128xf32>
    %30 = arith.negf %29 : vector<8x128xf32>
    %31 = math.exp %30 : vector<8x128xf32>
    %cst_13 = arith.constant 1.000000e+00 : f32
    %32 = vector.broadcast %cst_13 : f32 to vector<8x128xf32>
    %33 = arith.addf %32, %31 : vector<8x128xf32>
    %34 = arith.divf %32, %33 : vector<8x128xf32>
    %35 = arith.mulf %26, %6 : vector<8x128xf32>
    %36 = arith.mulf %20, %28 : vector<8x128xf32>
    %37 = arith.addf %35, %36 : vector<8x128xf32>
    %38 = math.tanh %37 : vector<8x128xf32>
    %39 = arith.mulf %34, %38 : vector<8x128xf32>
    %c0_14 = arith.constant 0 : index
    %c0_15 = arith.constant 0 : index
    %c0_16 = arith.constant 0 : index
    %40 = vector.load %arg6[%c0_14, %c0_15, %c0_16] : memref<8x8x128xf32, #tpu.memory_space<vmem>>, vector<1x8x128xf32>
    %41 = vector.shape_cast %40 : vector<1x8x128xf32> to vector<8x128xf32>
    %42 = vector.shape_cast %39 : vector<8x128xf32> to vector<1x8x128xf32>
    tpu.vector_store %arg6[%c0_14, %c0_15, %c0_16], %42 {strides = array<i32>} : memref<8x8x128xf32, #tpu.memory_space<vmem>>, vector<1x8x128xf32>,
    %c1 = arith.constant 1 : index
    %c0_17 = arith.constant 0 : index
    %c0_18 = arith.constant 0 : index
    %43 = vector.load %arg1[%c1, %c0_17, %c0_18] : memref<8x8x128xbf16, #tpu.memory_space<vmem>>, vector<1x8x128xbf16>
    %44 = vector.shape_cast %43 : vector<1x8x128xbf16> to vector<8x128xbf16>
    %45 = arith.extf %44 : vector<8x128xbf16> to vector<8x128xf32>
    %46 = tpu.concatenate %45, %39 in 1 : vector<8x128xf32>, vector<8x128xf32> -> vector<8x256xf32>
    %47 = arith.truncf %46 : vector<8x256xf32> to vector<8x256xbf16>
    %cst_19 = arith.constant dense<0.000000e+00> : vector<8x512xf32>
    %48 = tpu.matmul %47, %3, %cst_19 {dimension_numbers = #tpu.dot_dimension_numbers<[1], [0], [0], [1], [0, 0, 1, 1], [], []>} : vector<8x256xbf16>, vector<256x512xbf16>, vector<8x512xf32> -> vector<8x512xf32>
    %49 = vector.broadcast %4 : vector<1x512xf32> to vector<8x512xf32>
    %50 = arith.addf %48, %49 : vector<8x512xf32>
    %51 = vector.extract_strided_slice %50 {offsets = [0, 0], sizes = [8, 128], strides = [1, 1]} : vector<8x512xf32> to vector<8x128xf32>
    %52 = arith.negf %51 : vector<8x128xf32>
    %53 = math.exp %52 : vector<8x128xf32>
    %cst_20 = arith.constant 1.000000e+00 : f32
    %54 = vector.broadcast %cst_20 : f32 to vector<8x128xf32>
    %55 = arith.addf %54, %53 : vector<8x128xf32>
    %56 = arith.divf %54, %55 : vector<8x128xf32>
    %57 = vector.extract_strided_slice %50 {offsets = [0, 128], sizes = [8, 128], strides = [1, 1]} : vector<8x512xf32> to vector<8x128xf32>
    %58 = arith.negf %57 : vector<8x128xf32>
    %59 = math.exp %58 : vector<8x128xf32>
    %cst_21 = arith.constant 1.000000e+00 : f32
    %60 = vector.broadcast %cst_21 : f32 to vector<8x128xf32>
    %61 = arith.addf %60, %59 : vector<8x128xf32>
    %62 = arith.divf %60, %61 : vector<8x128xf32>
    %63 = vector.extract_strided_slice %50 {offsets = [0, 256], sizes = [8, 128], strides = [1, 1]} : vector<8x512xf32> to vector<8x128xf32>
    %64 = math.tanh %63 : vector<8x128xf32>
    %65 = vector.extract_strided_slice %50 {offsets = [0, 384], sizes = [8, 128], strides = [1, 1]} : vector<8x512xf32> to vector<8x128xf32>
    %66 = arith.negf %65 : vector<8x128xf32>
    %67 = math.exp %66 : vector<8x128xf32>
    %cst_22 = arith.constant 1.000000e+00 : f32
    %68 = vector.broadcast %cst_22 : f32 to vector<8x128xf32>
    %69 = arith.addf %68, %67 : vector<8x128xf32>
    %70 = arith.divf %68, %69 : vector<8x128xf32>
    %71 = arith.mulf %62, %37 : vector<8x128xf32>
    %72 = arith.mulf %56, %64 : vector<8x128xf32>
    %73 = arith.addf %71, %72 : vector<8x128xf32>
    %74 = math.tanh %73 : vector<8x128xf32>
    %75 = arith.mulf %70, %74 : vector<8x128xf32>
    %c1_23 = arith.constant 1 : index
    %c0_24 = arith.constant 0 : index
    %c0_25 = arith.constant 0 : index
    %76 = vector.load %arg6[%c1_23, %c0_24, %c0_25] : memref<8x8x128xf32, #tpu.memory_space<vmem>>, vector<1x8x128xf32>
    %77 = vector.shape_cast %76 : vector<1x8x128xf32> to vector<8x128xf32>
    %78 = vector.shape_cast %75 : vector<8x128xf32> to vector<1x8x128xf32>
    tpu.vector_store %arg6[%c1_23, %c0_24, %c0_25], %78 {strides = array<i32>} : memref<8x8x128xf32, #tpu.memory_space<vmem>>, vector<1x8x128xf32>,
    %c2 = arith.constant 2 : index
    %c0_26 = arith.constant 0 : index
    %c0_27 = arith.constant 0 : index
    %79 = vector.load %arg1[%c2, %c0_26, %c0_27] : memref<8x8x128xbf16, #tpu.memory_space<vmem>>, vector<1x8x128xbf16>
    %80 = vector.shape_cast %79 : vector<1x8x128xbf16> to vector<8x128xbf16>
    %81 = arith.extf %80 : vector<8x128xbf16> to vector<8x128xf32>
    %82 = tpu.concatenate %81, %75 in 1 : vector<8x128xf32>, vector<8x128xf32> -> vector<8x256xf32>
    %83 = arith.truncf %82 : vector<8x256xf32> to vector<8x256xbf16>
    %cst_28 = arith.constant dense<0.000000e+00> : vector<8x512xf32>
    %84 = tpu.matmul %83, %3, %cst_28 {dimension_numbers = #tpu.dot_dimension_numbers<[1], [0], [0], [1], [0, 0, 1, 1], [], []>} : vector<8x256xbf16>, vector<256x512xbf16>, vector<8x512xf32> -> vector<8x512xf32>
    %85 = vector.broadcast %4 : vector<1x512xf32> to vector<8x512xf32>
    %86 = arith.addf %84, %85 : vector<8x512xf32>
    %87 = vector.extract_strided_slice %86 {offsets = [0, 0], sizes = [8, 128], strides = [1, 1]} : vector<8x512xf32> to vector<8x128xf32>
    %88 = arith.negf %87 : vector<8x128xf32>
    %89 = math.exp %88 : vector<8x128xf32>
    %cst_29 = arith.constant 1.000000e+00 : f32
    %90 = vector.broadcast %cst_29 : f32 to vector<8x128xf32>
    %91 = arith.addf %90, %89 : vector<8x128xf32>
    %92 = arith.divf %90, %91 : vector<8x128xf32>
    %93 = vector.extract_strided_slice %86 {offsets = [0, 128], sizes = [8, 128], strides = [1, 1]} : vector<8x512xf32> to vector<8x128xf32>
    %94 = arith.negf %93 : vector<8x128xf32>
    %95 = math.exp %94 : vector<8x128xf32>
    %cst_30 = arith.constant 1.000000e+00 : f32
    %96 = vector.broadcast %cst_30 : f32 to vector<8x128xf32>
    %97 = arith.addf %96, %95 : vector<8x128xf32>
    %98 = arith.divf %96, %97 : vector<8x128xf32>
    %99 = vector.extract_strided_slice %86 {offsets = [0, 256], sizes = [8, 128], strides = [1, 1]} : vector<8x512xf32> to vector<8x128xf32>
    %100 = math.tanh %99 : vector<8x128xf32>
    %101 = vector.extract_strided_slice %86 {offsets = [0, 384], sizes = [8, 128], strides = [1, 1]} : vector<8x512xf32> to vector<8x128xf32>
    %102 = arith.negf %101 : vector<8x128xf32>
    %103 = math.exp %102 : vector<8x128xf32>
    %cst_31 = arith.constant 1.000000e+00 : f32
    %104 = vector.broadcast %cst_31 : f32 to vector<8x128xf32>
    %105 = arith.addf %104, %103 : vector<8x128xf32>
    %106 = arith.divf %104, %105 : vector<8x128xf32>
    %107 = arith.mulf %98, %73 : vector<8x128xf32>
    %108 = arith.mulf %92, %100 : vector<8x128xf32>
    %109 = arith.addf %107, %108 : vector<8x128xf32>
    %110 = math.tanh %109 : vector<8x128xf32>
    %111 = arith.mulf %106, %110 : vector<8x128xf32>
    %c2_32 = arith.constant 2 : index
    %c0_33 = arith.constant 0 : index
    %c0_34 = arith.constant 0 : index
    %112 = vector.load %arg6[%c2_32, %c0_33, %c0_34] : memref<8x8x128xf32, #tpu.memory_space<vmem>>, vector<1x8x128xf32>
    %113 = vector.shape_cast %112 : vector<1x8x128xf32> to vector<8x128xf32>
    %114 = vector.shape_cast %111 : vector<8x128xf32> to vector<1x8x128xf32>
    tpu.vector_store %arg6[%c2_32, %c0_33, %c0_34], %114 {strides = array<i32>} : memref<8x8x128xf32, #tpu.memory_space<vmem>>, vector<1x8x128xf32>,
    %c3 = arith.constant 3 : index
    %c0_35 = arith.constant 0 : index
    %c0_36 = arith.constant 0 : index
    %115 = vector.load %arg1[%c3, %c0_35, %c0_36] : memref<8x8x128xbf16, #tpu.memory_space<vmem>>, vector<1x8x128xbf16>
    %116 = vector.shape_cast %115 : vector<1x8x128xbf16> to vector<8x128xbf16>
    %117 = arith.extf %116 : vector<8x128xbf16> to vector<8x128xf32>
    %118 = tpu.concatenate %117, %111 in 1 : vector<8x128xf32>, vector<8x128xf32> -> vector<8x256xf32>
    %119 = arith.truncf %118 : vector<8x256xf32> to vector<8x256xbf16>
    %cst_37 = arith.constant dense<0.000000e+00> : vector<8x512xf32>
    %120 = tpu.matmul %119, %3, %cst_37 {dimension_numbers = #tpu.dot_dimension_numbers<[1], [0], [0], [1], [0, 0, 1, 1], [], []>} : vector<8x256xbf16>, vector<256x512xbf16>, vector<8x512xf32> -> vector<8x512xf32>
    %121 = vector.broadcast %4 : vector<1x512xf32> to vector<8x512xf32>
    %122 = arith.addf %120, %121 : vector<8x512xf32>
    %123 = vector.extract_strided_slice %122 {offsets = [0, 0], sizes = [8, 128], strides = [1, 1]} : vector<8x512xf32> to vector<8x128xf32>
    %124 = arith.negf %123 : vector<8x128xf32>
    %125 = math.exp %124 : vector<8x128xf32>
    %cst_38 = arith.constant 1.000000e+00 : f32
    %126 = vector.broadcast %cst_38 : f32 to vector<8x128xf32>
    %127 = arith.addf %126, %125 : vector<8x128xf32>
    %128 = arith.divf %126, %127 : vector<8x128xf32>
    %129 = vector.extract_strided_slice %122 {offsets = [0, 128], sizes = [8, 128], strides = [1, 1]} : vector<8x512xf32> to vector<8x128xf32>
    %130 = arith.negf %129 : vector<8x128xf32>
    %131 = math.exp %130 : vector<8x128xf32>
    %cst_39 = arith.constant 1.000000e+00 : f32
    %132 = vector.broadcast %cst_39 : f32 to vector<8x128xf32>
    %133 = arith.addf %132, %131 : vector<8x128xf32>
    %134 = arith.divf %132, %133 : vector<8x128xf32>
    %135 = vector.extract_strided_slice %122 {offsets = [0, 256], sizes = [8, 128], strides = [1, 1]} : vector<8x512xf32> to vector<8x128xf32>
    %136 = math.tanh %135 : vector<8x128xf32>
    %137 = vector.extract_strided_slice %122 {offsets = [0, 384], sizes = [8, 128], strides = [1, 1]} : vector<8x512xf32> to vector<8x128xf32>
    %138 = arith.negf %137 : vector<8x128xf32>
    %139 = math.exp %138 : vector<8x128xf32>
    %cst_40 = arith.constant 1.000000e+00 : f32
    %140 = vector.broadcast %cst_40 : f32 to vector<8x128xf32>
    %141 = arith.addf %140, %139 : vector<8x128xf32>
    %142 = arith.divf %140, %141 : vector<8x128xf32>
    %143 = arith.mulf %134, %109 : vector<8x128xf32>
    %144 = arith.mulf %128, %136 : vector<8x128xf32>
    %145 = arith.addf %143, %144 : vector<8x128xf32>
    %146 = math.tanh %145 : vector<8x128xf32>
    %147 = arith.mulf %142, %146 : vector<8x128xf32>
    %c3_41 = arith.constant 3 : index
    %c0_42 = arith.constant 0 : index
    %c0_43 = arith.constant 0 : index
    %148 = vector.load %arg6[%c3_41, %c0_42, %c0_43] : memref<8x8x128xf32, #tpu.memory_space<vmem>>, vector<1x8x128xf32>
    %149 = vector.shape_cast %148 : vector<1x8x128xf32> to vector<8x128xf32>
    %150 = vector.shape_cast %147 : vector<8x128xf32> to vector<1x8x128xf32>
    tpu.vector_store %arg6[%c3_41, %c0_42, %c0_43], %150 {strides = array<i32>} : memref<8x8x128xf32, #tpu.memory_space<vmem>>, vector<1x8x128xf32>,
    %c4 = arith.constant 4 : index
    %c0_44 = arith.constant 0 : index
    %c0_45 = arith.constant 0 : index
    %151 = vector.load %arg1[%c4, %c0_44, %c0_45] : memref<8x8x128xbf16, #tpu.memory_space<vmem>>, vector<1x8x128xbf16>
    %152 = vector.shape_cast %151 : vector<1x8x128xbf16> to vector<8x128xbf16>
    %153 = arith.extf %152 : vector<8x128xbf16> to vector<8x128xf32>
    %154 = tpu.concatenate %153, %147 in 1 : vector<8x128xf32>, vector<8x128xf32> -> vector<8x256xf32>
    %155 = arith.truncf %154 : vector<8x256xf32> to vector<8x256xbf16>
    %cst_46 = arith.constant dense<0.000000e+00> : vector<8x512xf32>
    %156 = tpu.matmul %155, %3, %cst_46 {dimension_numbers = #tpu.dot_dimension_numbers<[1], [0], [0], [1], [0, 0, 1, 1], [], []>} : vector<8x256xbf16>, vector<256x512xbf16>, vector<8x512xf32> -> vector<8x512xf32>
    %157 = vector.broadcast %4 : vector<1x512xf32> to vector<8x512xf32>
    %158 = arith.addf %156, %157 : vector<8x512xf32>
    %159 = vector.extract_strided_slice %158 {offsets = [0, 0], sizes = [8, 128], strides = [1, 1]} : vector<8x512xf32> to vector<8x128xf32>
    %160 = arith.negf %159 : vector<8x128xf32>
    %161 = math.exp %160 : vector<8x128xf32>
    %cst_47 = arith.constant 1.000000e+00 : f32
    %162 = vector.broadcast %cst_47 : f32 to vector<8x128xf32>
    %163 = arith.addf %162, %161 : vector<8x128xf32>
    %164 = arith.divf %162, %163 : vector<8x128xf32>
    %165 = vector.extract_strided_slice %158 {offsets = [0, 128], sizes = [8, 128], strides = [1, 1]} : vector<8x512xf32> to vector<8x128xf32>
    %166 = arith.negf %165 : vector<8x128xf32>
    %167 = math.exp %166 : vector<8x128xf32>
    %cst_48 = arith.constant 1.000000e+00 : f32
    %168 = vector.broadcast %cst_48 : f32 to vector<8x128xf32>
    %169 = arith.addf %168, %167 : vector<8x128xf32>
    %170 = arith.divf %168, %169 : vector<8x128xf32>
    %171 = vector.extract_strided_slice %158 {offsets = [0, 256], sizes = [8, 128], strides = [1, 1]} : vector<8x512xf32> to vector<8x128xf32>
    %172 = math.tanh %171 : vector<8x128xf32>
    %173 = vector.extract_strided_slice %158 {offsets = [0, 384], sizes = [8, 128], strides = [1, 1]} : vector<8x512xf32> to vector<8x128xf32>
    %174 = arith.negf %173 : vector<8x128xf32>
    %175 = math.exp %174 : vector<8x128xf32>
    %cst_49 = arith.constant 1.000000e+00 : f32
    %176 = vector.broadcast %cst_49 : f32 to vector<8x128xf32>
    %177 = arith.addf %176, %175 : vector<8x128xf32>
    %178 = arith.divf %176, %177 : vector<8x128xf32>
    %179 = arith.mulf %170, %145 : vector<8x128xf32>
    %180 = arith.mulf %164, %172 : vector<8x128xf32>
    %181 = arith.addf %179, %180 : vector<8x128xf32>
    %182 = math.tanh %181 : vector<8x128xf32>
    %183 = arith.mulf %178, %182 : vector<8x128xf32>
    %c4_50 = arith.constant 4 : index
    %c0_51 = arith.constant 0 : index
    %c0_52 = arith.constant 0 : index
    %184 = vector.load %arg6[%c4_50, %c0_51, %c0_52] : memref<8x8x128xf32, #tpu.memory_space<vmem>>, vector<1x8x128xf32>
    %185 = vector.shape_cast %184 : vector<1x8x128xf32> to vector<8x128xf32>
    %186 = vector.shape_cast %183 : vector<8x128xf32> to vector<1x8x128xf32>
    tpu.vector_store %arg6[%c4_50, %c0_51, %c0_52], %186 {strides = array<i32>} : memref<8x8x128xf32, #tpu.memory_space<vmem>>, vector<1x8x128xf32>,
    %c5 = arith.constant 5 : index
    %c0_53 = arith.constant 0 : index
    %c0_54 = arith.constant 0 : index
    %187 = vector.load %arg1[%c5, %c0_53, %c0_54] : memref<8x8x128xbf16, #tpu.memory_space<vmem>>, vector<1x8x128xbf16>
    %188 = vector.shape_cast %187 : vector<1x8x128xbf16> to vector<8x128xbf16>
    %189 = arith.extf %188 : vector<8x128xbf16> to vector<8x128xf32>
    %190 = tpu.concatenate %189, %183 in 1 : vector<8x128xf32>, vector<8x128xf32> -> vector<8x256xf32>
    %191 = arith.truncf %190 : vector<8x256xf32> to vector<8x256xbf16>
    %cst_55 = arith.constant dense<0.000000e+00> : vector<8x512xf32>
    %192 = tpu.matmul %191, %3, %cst_55 {dimension_numbers = #tpu.dot_dimension_numbers<[1], [0], [0], [1], [0, 0, 1, 1], [], []>} : vector<8x256xbf16>, vector<256x512xbf16>, vector<8x512xf32> -> vector<8x512xf32>
    %193 = vector.broadcast %4 : vector<1x512xf32> to vector<8x512xf32>
    %194 = arith.addf %192, %193 : vector<8x512xf32>
    %195 = vector.extract_strided_slice %194 {offsets = [0, 0], sizes = [8, 128], strides = [1, 1]} : vector<8x512xf32> to vector<8x128xf32>
    %196 = arith.negf %195 : vector<8x128xf32>
    %197 = math.exp %196 : vector<8x128xf32>
    %cst_56 = arith.constant 1.000000e+00 : f32
    %198 = vector.broadcast %cst_56 : f32 to vector<8x128xf32>
    %199 = arith.addf %198, %197 : vector<8x128xf32>
    %200 = arith.divf %198, %199 : vector<8x128xf32>
    %201 = vector.extract_strided_slice %194 {offsets = [0, 128], sizes = [8, 128], strides = [1, 1]} : vector<8x512xf32> to vector<8x128xf32>
    %202 = arith.negf %201 : vector<8x128xf32>
    %203 = math.exp %202 : vector<8x128xf32>
    %cst_57 = arith.constant 1.000000e+00 : f32
    %204 = vector.broadcast %cst_57 : f32 to vector<8x128xf32>
    %205 = arith.addf %204, %203 : vector<8x128xf32>
    %206 = arith.divf %204, %205 : vector<8x128xf32>
    %207 = vector.extract_strided_slice %194 {offsets = [0, 256], sizes = [8, 128], strides = [1, 1]} : vector<8x512xf32> to vector<8x128xf32>
    %208 = math.tanh %207 : vector<8x128xf32>
    %209 = vector.extract_strided_slice %194 {offsets = [0, 384], sizes = [8, 128], strides = [1, 1]} : vector<8x512xf32> to vector<8x128xf32>
    %210 = arith.negf %209 : vector<8x128xf32>
    %211 = math.exp %210 : vector<8x128xf32>
    %cst_58 = arith.constant 1.000000e+00 : f32
    %212 = vector.broadcast %cst_58 : f32 to vector<8x128xf32>
    %213 = arith.addf %212, %211 : vector<8x128xf32>
    %214 = arith.divf %212, %213 : vector<8x128xf32>
    %215 = arith.mulf %206, %181 : vector<8x128xf32>
    %216 = arith.mulf %200, %208 : vector<8x128xf32>
    %217 = arith.addf %215, %216 : vector<8x128xf32>
    %218 = math.tanh %217 : vector<8x128xf32>
    %219 = arith.mulf %214, %218 : vector<8x128xf32>
    %c5_59 = arith.constant 5 : index
    %c0_60 = arith.constant 0 : index
    %c0_61 = arith.constant 0 : index
    %220 = vector.load %arg6[%c5_59, %c0_60, %c0_61] : memref<8x8x128xf32, #tpu.memory_space<vmem>>, vector<1x8x128xf32>
    %221 = vector.shape_cast %220 : vector<1x8x128xf32> to vector<8x128xf32>
    %222 = vector.shape_cast %219 : vector<8x128xf32> to vector<1x8x128xf32>
    tpu.vector_store %arg6[%c5_59, %c0_60, %c0_61], %222 {strides = array<i32>} : memref<8x8x128xf32, #tpu.memory_space<vmem>>, vector<1x8x128xf32>,
    %c6 = arith.constant 6 : index
    %c0_62 = arith.constant 0 : index
    %c0_63 = arith.constant 0 : index
    %223 = vector.load %arg1[%c6, %c0_62, %c0_63] : memref<8x8x128xbf16, #tpu.memory_space<vmem>>, vector<1x8x128xbf16>
    %224 = vector.shape_cast %223 : vector<1x8x128xbf16> to vector<8x128xbf16>
    %225 = arith.extf %224 : vector<8x128xbf16> to vector<8x128xf32>
    %226 = tpu.concatenate %225, %219 in 1 : vector<8x128xf32>, vector<8x128xf32> -> vector<8x256xf32>
    %227 = arith.truncf %226 : vector<8x256xf32> to vector<8x256xbf16>
    %cst_64 = arith.constant dense<0.000000e+00> : vector<8x512xf32>
    %228 = tpu.matmul %227, %3, %cst_64 {dimension_numbers = #tpu.dot_dimension_numbers<[1], [0], [0], [1], [0, 0, 1, 1], [], []>} : vector<8x256xbf16>, vector<256x512xbf16>, vector<8x512xf32> -> vector<8x512xf32>
    %229 = vector.broadcast %4 : vector<1x512xf32> to vector<8x512xf32>
    %230 = arith.addf %228, %229 : vector<8x512xf32>
    %231 = vector.extract_strided_slice %230 {offsets = [0, 0], sizes = [8, 128], strides = [1, 1]} : vector<8x512xf32> to vector<8x128xf32>
    %232 = arith.negf %231 : vector<8x128xf32>
    %233 = math.exp %232 : vector<8x128xf32>
    %cst_65 = arith.constant 1.000000e+00 : f32
    %234 = vector.broadcast %cst_65 : f32 to vector<8x128xf32>
    %235 = arith.addf %234, %233 : vector<8x128xf32>
    %236 = arith.divf %234, %235 : vector<8x128xf32>
    %237 = vector.extract_strided_slice %230 {offsets = [0, 128], sizes = [8, 128], strides = [1, 1]} : vector<8x512xf32> to vector<8x128xf32>
    %238 = arith.negf %237 : vector<8x128xf32>
    %239 = math.exp %238 : vector<8x128xf32>
    %cst_66 = arith.constant 1.000000e+00 : f32
    %240 = vector.broadcast %cst_66 : f32 to vector<8x128xf32>
    %241 = arith.addf %240, %239 : vector<8x128xf32>
    %242 = arith.divf %240, %241 : vector<8x128xf32>
    %243 = vector.extract_strided_slice %230 {offsets = [0, 256], sizes = [8, 128], strides = [1, 1]} : vector<8x512xf32> to vector<8x128xf32>
    %244 = math.tanh %243 : vector<8x128xf32>
    %245 = vector.extract_strided_slice %230 {offsets = [0, 384], sizes = [8, 128], strides = [1, 1]} : vector<8x512xf32> to vector<8x128xf32>
    %246 = arith.negf %245 : vector<8x128xf32>
    %247 = math.exp %246 : vector<8x128xf32>
    %cst_67 = arith.constant 1.000000e+00 : f32
    %248 = vector.broadcast %cst_67 : f32 to vector<8x128xf32>
    %249 = arith.addf %248, %247 : vector<8x128xf32>
    %250 = arith.divf %248, %249 : vector<8x128xf32>
    %251 = arith.mulf %242, %217 : vector<8x128xf32>
    %252 = arith.mulf %236, %244 : vector<8x128xf32>
    %253 = arith.addf %251, %252 : vector<8x128xf32>
    %254 = math.tanh %253 : vector<8x128xf32>
    %255 = arith.mulf %250, %254 : vector<8x128xf32>
    %c6_68 = arith.constant 6 : index
    %c0_69 = arith.constant 0 : index
    %c0_70 = arith.constant 0 : index
    %256 = vector.load %arg6[%c6_68, %c0_69, %c0_70] : memref<8x8x128xf32, #tpu.memory_space<vmem>>, vector<1x8x128xf32>
    %257 = vector.shape_cast %256 : vector<1x8x128xf32> to vector<8x128xf32>
    %258 = vector.shape_cast %255 : vector<8x128xf32> to vector<1x8x128xf32>
    tpu.vector_store %arg6[%c6_68, %c0_69, %c0_70], %258 {strides = array<i32>} : memref<8x8x128xf32, #tpu.memory_space<vmem>>, vector<1x8x128xf32>,
    %c7 = arith.constant 7 : index
    %c0_71 = arith.constant 0 : index
    %c0_72 = arith.constant 0 : index
    %259 = vector.load %arg1[%c7, %c0_71, %c0_72] : memref<8x8x128xbf16, #tpu.memory_space<vmem>>, vector<1x8x128xbf16>
    %260 = vector.shape_cast %259 : vector<1x8x128xbf16> to vector<8x128xbf16>
    %261 = arith.extf %260 : vector<8x128xbf16> to vector<8x128xf32>
    %262 = tpu.concatenate %261, %255 in 1 : vector<8x128xf32>, vector<8x128xf32> -> vector<8x256xf32>
    %263 = arith.truncf %262 : vector<8x256xf32> to vector<8x256xbf16>
    %cst_73 = arith.constant dense<0.000000e+00> : vector<8x512xf32>
    %264 = tpu.matmul %263, %3, %cst_73 {dimension_numbers = #tpu.dot_dimension_numbers<[1], [0], [0], [1], [0, 0, 1, 1], [], []>} : vector<8x256xbf16>, vector<256x512xbf16>, vector<8x512xf32> -> vector<8x512xf32>
    %265 = vector.broadcast %4 : vector<1x512xf32> to vector<8x512xf32>
    %266 = arith.addf %264, %265 : vector<8x512xf32>
    %267 = vector.extract_strided_slice %266 {offsets = [0, 0], sizes = [8, 128], strides = [1, 1]} : vector<8x512xf32> to vector<8x128xf32>
    %268 = arith.negf %267 : vector<8x128xf32>
    %269 = math.exp %268 : vector<8x128xf32>
    %cst_74 = arith.constant 1.000000e+00 : f32
    %270 = vector.broadcast %cst_74 : f32 to vector<8x128xf32>
    %271 = arith.addf %270, %269 : vector<8x128xf32>
    %272 = arith.divf %270, %271 : vector<8x128xf32>
    %273 = vector.extract_strided_slice %266 {offsets = [0, 128], sizes = [8, 128], strides = [1, 1]} : vector<8x512xf32> to vector<8x128xf32>
    %274 = arith.negf %273 : vector<8x128xf32>
    %275 = math.exp %274 : vector<8x128xf32>
    %cst_75 = arith.constant 1.000000e+00 : f32
    %276 = vector.broadcast %cst_75 : f32 to vector<8x128xf32>
    %277 = arith.addf %276, %275 : vector<8x128xf32>
    %278 = arith.divf %276, %277 : vector<8x128xf32>
    %279 = vector.extract_strided_slice %266 {offsets = [0, 256], sizes = [8, 128], strides = [1, 1]} : vector<8x512xf32> to vector<8x128xf32>
    %280 = math.tanh %279 : vector<8x128xf32>
    %281 = vector.extract_strided_slice %266 {offsets = [0, 384], sizes = [8, 128], strides = [1, 1]} : vector<8x512xf32> to vector<8x128xf32>
    %282 = arith.negf %281 : vector<8x128xf32>
    %283 = math.exp %282 : vector<8x128xf32>
    %cst_76 = arith.constant 1.000000e+00 : f32
    %284 = vector.broadcast %cst_76 : f32 to vector<8x128xf32>
    %285 = arith.addf %284, %283 : vector<8x128xf32>
    %286 = arith.divf %284, %285 : vector<8x128xf32>
    %287 = arith.mulf %278, %253 : vector<8x128xf32>
    %288 = arith.mulf %272, %280 : vector<8x128xf32>
    %289 = arith.addf %287, %288 : vector<8x128xf32>
    %290 = math.tanh %289 : vector<8x128xf32>
    %291 = arith.mulf %286, %290 : vector<8x128xf32>
    %c7_77 = arith.constant 7 : index
    %c0_78 = arith.constant 0 : index
    %c0_79 = arith.constant 0 : index
    %292 = vector.load %arg6[%c7_77, %c0_78, %c0_79] : memref<8x8x128xf32, #tpu.memory_space<vmem>>, vector<1x8x128xf32>
    %293 = vector.shape_cast %292 : vector<1x8x128xf32> to vector<8x128xf32>
    %294 = vector.shape_cast %291 : vector<8x128xf32> to vector<1x8x128xf32>
    tpu.vector_store %arg6[%c7_77, %c0_78, %c0_79], %294 {strides = array<i32>} : memref<8x8x128xf32, #tpu.memory_space<vmem>>, vector<1x8x128xf32>,
    %c0_80 = arith.constant 0 : index
    %c0_81 = arith.constant 0 : index
    %295 = vector.load %arg7[%c0_80, %c0_81] : memref<8x128xf32, #tpu.memory_space<vmem>>, vector<8x128xf32>
    tpu.vector_store %arg7[%c0_80, %c0_81], %291 {strides = array<i32>} : memref<8x128xf32, #tpu.memory_space<vmem>>, vector<8x128xf32>,
    %c0_82 = arith.constant 0 : index
    %c0_83 = arith.constant 0 : index
    %296 = vector.load %arg8[%c0_82, %c0_83] : memref<8x128xf32, #tpu.memory_space<vmem>>, vector<8x128xf32>
    tpu.vector_store %arg8[%c0_82, %c0_83], %289 {strides = array<i32>} : memref<8x128xf32, #tpu.memory_space<vmem>>, vector<8x128xf32>,
    return
  }
  func.func @transform_0(%arg0: i32) -> (i32, i32, i32) {
    %c0_i32 = arith.constant 0 : i32
    %c0_i32_0 = arith.constant 0 : i32
    %c0_i32_1 = arith.constant 0 : i32
    return %arg0, %c0_i32, %c0_i32_0 : i32, i32, i32
  }
  func.func @transform_1(%arg0: i32) -> (i32, i32) {
    %c0_i32 = arith.constant 0 : i32
    %c0_i32_0 = arith.constant 0 : i32
    %c0_i32_1 = arith.constant 0 : i32
    return %c0_i32, %c0_i32_0 : i32, i32
  }
  func.func @transform_2(%arg0: i32) -> (i32, i32) {
    %c0_i32 = arith.constant 0 : i32
    %c0_i32_0 = arith.constant 0 : i32
    %c0_i32_1 = arith.constant 0 : i32
    return %c0_i32, %c0_i32_0 : i32, i32
  }
  func.func @transform_3(%arg0: i32) -> (i32, i32) {
    %c0_i32 = arith.constant 0 : i32
    %c0_i32_0 = arith.constant 0 : i32
    %c0_i32_1 = arith.constant 0 : i32
    return %c0_i32, %c0_i32_0 : i32, i32
  }
  func.func @transform_4(%arg0: i32) -> (i32, i32) {
    %c0_i32 = arith.constant 0 : i32
    %c0_i32_0 = arith.constant 0 : i32
    %c0_i32_1 = arith.constant 0 : i32
    return %c0_i32, %c0_i32_0 : i32, i32
  }
  func.func @transform_5(%arg0: i32) -> (i32, i32, i32) {
    %c0_i32 = arith.constant 0 : i32
    %c0_i32_0 = arith.constant 0 : i32
    %c0_i32_1 = arith.constant 0 : i32
    return %arg0, %c0_i32, %c0_i32_0 : i32, i32, i32
  }
}

</mosaic_0001>

<bundles_post_ra>
// kernel: encoder_decoder_forward.7
= control target key start
LH: loop header
LB: loop body
LE: loop exit
PB: predicated region body
PF: predicated region fallthrough
CT: control target
= control target key end

     0   :  { %s1102_s15 = smov 0   ;;  %s1104_s16 = smov 0   ;;  %s1356_s0 = inlined_call_operand.vmem [shape: f32[128,128], index: 0, kind: input, shape index: {}]   ;;  %s1357_s1 = inlined_call_operand.vmem [shape: bf16[128,384], index: 1, kind: input, shape index: {}]   ;;  %s1358_s2 = inlined_call_operand.vmem [shape: f32[1,384], index: 2, kind: input, shape index: {}]   ;;  %s1359_s3 = inlined_call_operand.vmem [shape: f32[128,1], index: 3, kind: input, shape index: {}]   ;;  %s1360_s4 = inlined_call_operand.vmem [shape: f32[128,384], index: 4, kind: output, shape index: {}]  }
   0x1   :  { %s1106_s17 = smov 0   ;;  %s1108_s18 = smov 0  }
   0x2   :  { %s1110_s19 = smov 0  }
   0x3 LB: > { %s23_s20 = sadd.s32 1, %s1070_s18  ;;  %s897_s21 = sadd.s32 4294967295, %s1074_s19   ;;  %s1074_s19 = sphi %s1110_s19, %s14_s19   ;;  %s1070_s18 = sphi %s1108_s18, %s1365_s18   ;;  %s1066_s17 = sphi %s1106_s17, %s1364_s17   ;;  %s1062_s16 = sphi %s1104_s16, %s1363_s16   ;;  %s1058_s15 = sphi %s1102_s15, %s1362_s15  }
   0x4   : > { %p24_p0 = scmp.ge.s32.totalorder %s23_s20, 3  ;;  %p66_p1 = scmp.ne.s32.totalorder %s1062_s16, %s1058_s15 }
   0x5   : > { %p67_p2 = scmp.eq.s32.totalorder %s1074_s19, 0  ;;  %p150_p4 = scmp.eq.s32.totalorder %s897_s21, 2 }
   0x6   : > { %s1367_s20 = smov (%p24_p0, %s23_s20), 0  ;;  %s59_s23 = sadd.s32 1, %s1062_s16 }
   0x7   : > { %p68_p3 = por %p67_p2, %p66_p1  ;;  %s56_s22 = ssub.s32 %s1070_s18, %s1367_s20 }
   0x8   : > { %p57_p5 = scmp.eq.s32.totalorder %s56_s22, 0  ;;  %p1137_p6 = por %p150_p4, %p66_p1 }
   0x9   : > { %p902_p7 = scmp.ge.s32.totalorder %s1074_s19, 3 }
   0xa   : > { %s1142_s25 = scalar_select %p57_p5, %s1062_s16, %s59_s23  }
   0xb   : > { %190 = sbr.rel (%p902_p7) target bundleno = 32 (0x20), region = 24 }
  0x12   : > { %193 = sbr.rel (!%p68_p3) target bundleno = 32 (0x20), region = 28  ;;  %s195_s26 = sand.u32 (%p68_p3), 1, %s1062_s16  }
  0x13   : > { %s904_s27 = sshll.u32 (%p68_p3), %s1070_s18, 2  ;;  %s903_s28 = sshll.u32 (%p68_p3), %s195_s26, 6 }
  0x14   : > { %s1150_s5 = scalar_lea.vmem (%p68_p3), %s1357_s1, %s904_s27  ;;  %s197_s6 = scalar_lea.vmem (%p68_p3), [#allocation2], %s903_s28 }
  0x15   : > { %v215_v0 = vld [vmem:[%s1150_s5] sm:$0xf] (%p68_p3)  ;;  %v217_v1 = vld [vmem:[%s1150_s5 + $0xc] sm:$0xf] (%p68_p3)  ;;  %v219_v2 = vld [vmem:[%s1150_s5 + $0x18] sm:$0xf] (%p68_p3) }
  0x16   : > { %216 = vst [vmem:[%s197_s6] sm:$0xf] (%p68_p3), %v215_v0  ;;  %218 = vst [vmem:[%s197_s6 + $0x4] sm:$0xf] (%p68_p3), %v217_v1  ;;  %v221_v3 = vld [vmem:[%s1150_s5 + $0x24] sm:$0xf] (%p68_p3) }
  0x17   : > { %v223_v4 = vld [vmem:[%s1150_s5 + $0x30] sm:$0xf] (%p68_p3)  ;;  %220 = vst [vmem:[%s197_s6 + $0x8] sm:$0xf] (%p68_p3), %v219_v2  ;;  %222 = vst [vmem:[%s197_s6 + $0xc] sm:$0xf] (%p68_p3), %v221_v3 }
  0x18   : > { %224 = vst [vmem:[%s197_s6 + $0x10] sm:$0xf] (%p68_p3), %v223_v4  ;;  %v225_v5 = vld [vmem:[%s1150_s5 + $0x3c] sm:$0xf] (%p68_p3)  ;;  %v227_v6 = vld [vmem:[%s1150_s5 + $0x48] sm:$0xf] (%p68_p3) }
  0x19   : > { %v229_v7 = vld [vmem:[%s1150_s5 + $0x54] sm:$0xf]  ;;  %226 = vst [vmem:[%s197_s6 + $0x14] sm:$0xf] %v225_v5  ;;  %228 = vst [vmem:[%s197_s6 + $0x18] sm:$0xf] %v227_v6 }
  0x1a   : > { %230 = vst [vmem:[%s197_s6 + $0x1c] sm:$0xf] %v229_v7  ;;  %v231_v8 = vld [vmem:[%s1150_s5 + $0x60] sm:$0xf]  ;;  %v233_v9 = vld [vmem:[%s1150_s5 + $0x6c] sm:$0xf] }
  0x1b   : > { %v235_v10 = vld [vmem:[%s1150_s5 + $0x78] sm:$0xf]  ;;  %232 = vst [vmem:[%s197_s6 + $0x20] sm:$0xf] %v231_v8  ;;  %234 = vst [vmem:[%s197_s6 + $0x24] sm:$0xf] %v233_v9 }
  0x1c   : > { %236 = vst [vmem:[%s197_s6 + $0x28] sm:$0xf] %v235_v10  ;;  %v237_v11 = vld [vmem:[%s1150_s5 + $0x84] sm:$0xf]  ;;  %v239_v12 = vld [vmem:[%s1150_s5 + $0x90] sm:$0xf] }
  0x1d   : > { %v241_v13 = vld [vmem:[%s1150_s5 + $0x9c] sm:$0xf]  ;;  %238 = vst [vmem:[%s197_s6 + $0x2c] sm:$0xf] %v237_v11  ;;  %240 = vst [vmem:[%s197_s6 + $0x30] sm:$0xf] %v239_v12 }
  0x1e   : > { %242 = vst [vmem:[%s197_s6 + $0x34] sm:$0xf] %v241_v13  ;;  %v243_v14 = vld [vmem:[%s1150_s5 + $0xa8] sm:$0xf]  ;;  %v245_v15 = vld [vmem:[%s1150_s5 + $0xb4] sm:$0xf] }
  0x1f   : > { %244 = vst [vmem:[%s197_s6 + $0x38] sm:$0xf] %v243_v14  ;;  %246 = vst [vmem:[%s197_s6 + $0x3c] sm:$0xf] %v245_v15 }
  0x20 PF: > { %p905_p8 = scmp.ge.s32.totalorder %s1074_s19, 1  ;;  %p306_p9 = scmp.lt.s32.totalorder %s1074_s19, 4 }
  0x22   : > { %p307_p10 = pnand %p905_p8, %p306_p9 }
  0x23   : > { %s313_s7 = sand.u32 (!%p307_p10), 1, %s1058_s15   ;;  %v367_v16 = vld [vmem:[%s1356_s0] sm:$0xff] (!%p307_p10)  ;;  %v368_v17 = vld [vmem:[%s1356_s0 + $0x8] sm:$0xff] (!%p307_p10)  ;;  %v1076_v21 = vmov (!%p307_p10), 0   ;;  %v561_v27 = vld [vmem:[%s1359_s3 + $0x10] sm:$0xff] (!%p307_p10)  ;;  %p356_p11 = scmp.lt.s32.totalorder (!%p307_p10), %s1066_s17, 2 }
  0x24   : > { %310 = sbr.rel (%p307_p10) target bundleno = 308 (0x134), region = 73  ;;  %v375_v18 = vld [vmem:[%s1356_s0 + $0x40] sm:$0xff] (!%p307_p10)  ;;  %s906_s14 = sshll.u32 (!%p307_p10), %s313_s7, 6  ;;  %v383_v19 = vpack.c.bf16 (!%p307_p10), %v368_v17, %v367_v16  ;;  %v376_v20 = vld [vmem:[%s1356_s0 + $0x48] sm:$0xff] (!%p307_p10)  ;;  %1027 = vset.pattern.permute.xlu1 (!%p307_p10), %v1076_v21  ;;  %1026 = vset.pattern.permute.xlu0 (!%p307_p10), %v1076_v21  ;;  %v562_v30 = vld [vmem:[%s1359_s3 + $0x18] sm:$0xff] (!%p307_p10) }
  0x25   : > { %v387_v22 = vpack.c.bf16 (!%p307_p10), %v376_v20, %v375_v18  ;;  %s1185_s23 = scalar_lea.vmem (!%p307_p10), [#allocation2], %s906_s14  ;;  %v559_v28 = vld [vmem:[%s1359_s3] sm:$0xff] (!%p307_p10)  ;;  %587 = vperm.xlu1 (!%p307_p10), %1027, %v561_v27   ;;  %v560_v31 = vld [vmem:[%s1359_s3 + $0x8] sm:$0xff] (!%p307_p10)  ;;  %v566_v36 = vld [vmem:[%s1359_s3 + $0x38] sm:$0xff] (!%p307_p10)  ;;  %s907_s10 = sshll.u32 (!%p307_p10), %s313_s7, 7 }
  0x26   : > { %v1028_v23 = vld [vmem:[%s1185_s23] sm:$0xff] (!%p307_p10)   ;;  %953 = vmatprep.mubr.bf16.mxu0 (!%p307_p10), %v383_v19  ;;  %v1029_v24 = vld [vmem:[%s1185_s23 + $0x8] sm:$0xff] (!%p307_p10)   ;;  %v1030_v25 = vld [vmem:[%s1185_s23 + $0x10] sm:$0xff] (!%p307_p10)   ;;  %577 = vperm.xlu0 (!%p307_p10), %1026, %v559_v28   ;;  %s1296_s15 = scalar_lea.vmem (!%p307_p10), [#allocation3], %s907_s10 }
  0x27   : > { %961 = vmatprep.mubr.bf16.mxu1 (!%p307_p10), %v387_v22  ;;  %937 = vmatprep.subr.bf16.mxu0 (!%p307_p10), %v1028_v23  ;;  %v1031_v26 = vld [vmem:[%s1185_s23 + $0x18] sm:$0xff] (!%p307_p10)   ;;  %v1032_v29 = vld [vmem:[%s1185_s23 + $0x20] sm:$0xff] (!%p307_p10)   ;;  %v1033_v32 = vld [vmem:[%s1185_s23 + $0x28] sm:$0xff] (!%p307_p10)  }
  0x28   : > { %969 = vmatprep.subr.bf16.mxu1 (!%p307_p10), %v1028_v23  ;;  %938 = vmatpush3.bf16.msra.mxu0 (!%p307_p10), %v1028_v23  ;;  %v564_v33 = vld [vmem:[%s1359_s3 + $0x28] sm:$0xff] (!%p307_p10)  ;;  %v563_v34 = vld [vmem:[%s1359_s3 + $0x20] sm:$0xff] (!%p307_p10)  ;;  %v1034_v35 = vld [vmem:[%s1185_s23 + $0x30] sm:$0xff] (!%p307_p10)  }
  0x29   : > { %977 = vmatpush3.bf16.msra.mxu1 (!%p307_p10), %v1028_v23  ;;  %939 = vmatprep.subr.bf16.mxu0 (!%p307_p10), %v1029_v24  ;;  %v565_v37 = vld [vmem:[%s1359_s3 + $0x30] sm:$0xff] (!%p307_p10)  ;;  %v1035_v38 = vld [vmem:[%s1185_s23 + $0x38] sm:$0xff] (!%p307_p10)   ;;  %v568_v41 = vld [vmem:[%s1359_s3 + $0x48] sm:$0xff] (!%p307_p10) }
  0x2a   : > { %970 = vmatprep.subr.bf16.mxu1 (!%p307_p10), %v1029_v24  ;;  %592 = vperm.xlu1 (!%p307_p10), %1027, %v562_v30   ;;  %v369_v39 = vld [vmem:[%s1356_s0 + $0x10] sm:$0xff] (!%p307_p10)  ;;  %v370_v40 = vld [vmem:[%s1356_s0 + $0x18] sm:$0xff] (!%p307_p10)  ;;  %v567_v42 = vld [vmem:[%s1359_s3 + $0x40] sm:$0xff] (!%p307_p10) }
  0x2b   : > { %582 = vperm.xlu0 %1026, %v560_v31   ;;  %v377_v43 = vld [vmem:[%s1356_s0 + $0x50] sm:$0xff]  ;;  %v378_v44 = vld [vmem:[%s1356_s0 + $0x58] sm:$0xff]  ;;  %v371_v45 = vld [vmem:[%s1356_s0 + $0x20] sm:$0xff]  ;;  %v384_v49 = vpack.c.bf16 %v370_v40, %v369_v39  ;;  %s357_s6 = scalar_select %p356_p11, %s1066_s17, 2 }
  0x2c   : > { %940 = vmatpush3.bf16.msra.mxu0 %v1029_v24  ;;  %v372_v46 = vld [vmem:[%s1356_s0 + $0x28] sm:$0xff]  ;;  %v379_v47 = vld [vmem:[%s1356_s0 + $0x60] sm:$0xff]  ;;  %v388_v50 = vpack.c.bf16 %v378_v44, %v377_v43  ;;  %v570_v51 = vld [vmem:[%s1359_s3 + $0x58] sm:$0xff]  ;;  %s918_s7 = sshll.u32 (%p1137_p6), %s1066_s17, 3 }
  0x2d   : > { %978 = vmatpush3.bf16.msra.mxu1 %v1029_v24  ;;  %941 = vmatprep.subr.bf16.mxu0 %v1030_v25  ;;  %v380_v48 = vld [vmem:[%s1356_s0 + $0x68] sm:$0xff]  ;;  %v569_v52 = vld [vmem:[%s1359_s3 + $0x50] sm:$0xff]  ;;  %v385_v53 = vpack.c.bf16 %v372_v46, %v371_v45  ;;  %v571_v57 = vld [vmem:[%s1359_s3 + $0x60] sm:$0xff]  ;;  %s358_s9 = scalar_lea.vmem %s1358_s2, %s357_s6  ;;  %s698_s13 = scalar_lea.vmem (%p1137_p6), %s1360_s4, %s918_s7 }
  0x2e   : > { %971 = vmatprep.subr.bf16.mxu1 %v1030_v25  ;;  %602 = vperm.xlu1 %1027, %v564_v33   ;;  %v389_v54 = vpack.c.bf16 %v380_v48, %v379_v47  ;;  %v373_v55 = vld [vmem:[%s1356_s0 + $0x30] sm:$0xff]  ;;  %v572_v56 = vld [vmem:[%s1359_s3 + $0x68] sm:$0xff]  ;;  %v374_v58 = vld [vmem:[%s1356_s0 + $0x38] sm:$0xff] }
  0x2f   : > { %597 = vperm.xlu0 %1026, %v563_v34   ;;  %v381_v59 = vld [vmem:[%s1356_s0 + $0x70] sm:$0xff]  ;;  %v382_v60 = vld [vmem:[%s1356_s0 + $0x78] sm:$0xff]  ;;  %v386_v61 = vpack.c.bf16 %v374_v58, %v373_v55  ;;  %v908_v12 = vld [vmem:[%s358_s9] ss:$0 sm:$0xff] }
  0x30   : > { %942 = vmatpush3.bf16.msra.mxu0 %v1030_v25  ;;  %v390_v62 = vpack.c.bf16 %v382_v60, %v381_v59  ;;  %v574_v63 = vld [vmem:[%s1359_s3 + $0x78] sm:$0xff]  ;;  %v573_v0 = vld [vmem:[%s1359_s3 + $0x70] sm:$0xff] }
  0x31   : > { %979 = vmatpush3.bf16.msra.mxu1 %v1030_v25  ;;  %943 = vmatprep.subr.bf16.mxu0 %v1031_v26 }
  0x32   : > { %972 = vmatprep.subr.bf16.mxu1 %v1031_v26  ;;  %612 = vperm.xlu1 %1027, %v566_v36  }
  0x33   : > { %607 = vperm.xlu0 %1026, %v565_v37  }
  0x34   : > { %944 = vmatpush3.bf16.msra.mxu0 %v1031_v26 }
  0x35   : > { %980 = vmatpush3.bf16.msra.mxu1 %v1031_v26  ;;  %945 = vmatprep.subr.bf16.mxu0 %v1032_v29 }
  0x36   : > { %973 = vmatprep.subr.bf16.mxu1 %v1032_v29  ;;  %622 = vperm.xlu1 %1027, %v568_v41  }
  0x37   : > { %617 = vperm.xlu0 %1026, %v567_v42  }
  0x38   : > { %946 = vmatpush3.bf16.msra.mxu0 %v1032_v29 }
  0x39   : > { %981 = vmatpush3.bf16.msra.mxu1 %v1032_v29  ;;  %947 = vmatprep.subr.bf16.mxu0 %v1033_v32 }
  0x3a   : > { %974 = vmatprep.subr.bf16.mxu1 %v1033_v32  ;;  %632 = vperm.xlu1 %1027, %v570_v51  }
  0x3b   : > { %627 = vperm.xlu0 %1026, %v569_v52  }
  0x3c   : > { %948 = vmatpush3.bf16.msra.mxu0 %v1033_v32 }
  0x3d   : > { %982 = vmatpush3.bf16.msra.mxu1 %v1033_v32  ;;  %949 = vmatprep.subr.bf16.mxu0 %v1034_v35 }
  0x3e   : > { %975 = vmatprep.subr.bf16.mxu1 %v1034_v35  ;;  %642 = vperm.xlu1 %1027, %v572_v56  }
  0x3f   : > { %637 = vperm.xlu0 %1026, %v571_v57  }
  0x40   : > { %950 = vmatpush3.bf16.msra.mxu0 %v1034_v35 }
  0x41   : > { %983 = vmatpush3.bf16.msra.mxu1 %v1034_v35  ;;  %951 = vmatprep.subr.bf16.mxu0 %v1035_v38 }
  0x42   : > { %976 = vmatprep.subr.bf16.mxu1 %v1035_v38  ;;  %652 = vperm.xlu1 %1027, %v574_v63  }
  0x43   : > { %647 = vperm.xlu0 %1026, %v573_v0  }
  0x44   : > { %952 = vmatpush3.bf16.msra.mxu0 %v1035_v38 }
  0x45   : > { %984 = vmatpush3.bf16.msra.mxu1 %v1035_v38 }
  0x47   : > { %954 = vmatmul.mubr.bf16.vlgmr.msra.gmra.mrb[0].mxu0 %v384_v49 }
  0x48   : > { %962 = vmatmul.mubr.bf16.vlgmr.msra.gmra.mrb[0].mxu1 %v388_v50  ;;  %957 = vmatprep.mubr.bf16.mxu0 %v385_v53 }
  0x49   : > { %965 = vmatprep.mubr.bf16.mxu1 %v389_v54 }
  0x4f   : > { %958 = vmatmul.mubr.bf16.gmra.mrb[4].mxu0 %v386_v61 }
  0x50   : > { %966 = vmatmul.mubr.bf16.gmra.mrb[4].mxu1 %v390_v62 }
  0xa4   : > { %v588_v2 = vpop.permute.xlu1 %587 }
  0xa5   : > { %v578_v1 = vpop.permute.xlu0 %577 }
  0xa9   : > { %v593_v4 = vpop.permute.xlu1 %592 }
  0xaa   : > { %v583_v3 = vpop.permute.xlu0 %582 }
  0xad   : > { %v1281_v6 = vpop.permute.xlu1 %602 }
  0xae   : > { %v1279_v5 = vpop.permute.xlu0 %597 }
  0xb1   : > { %v1285_v8 = vpop.permute.xlu1 %612 }
  0xb2   : > { %v1283_v7 = vpop.permute.xlu0 %607 }
  0xb5   : > { %v623_v10 = vpop.permute.xlu1 %622 }
  0xb6   : > { %v618_v9 = vpop.permute.xlu0 %617 }
  0xb9   : > { %v633_v13 = vpop.permute.xlu1 %632 }
  0xba   : > { %v628_v11 = vpop.permute.xlu0 %627 }
  0xbd   : > { %v643_v37 = vpop.permute.xlu1 %642 }
  0xbe   : > { %v1292_v14 = vpop.permute.xlu0 %637 }
  0xc1   : > { %v653_v57 = vpop.permute.xlu1 %652 }
  0xc2   : > { %v648_v40 = vpop.permute.xlu0 %647 }
 0x11a   : > { %v955_v15 = vpop.f32.mrb[0].mxu0 }
 0x11b   : > { %v963_v16 = vpop.f32.mrb[0].mxu1  ;;  %v505_v17 = vadd.f32 %v955_v15, %v908_v12  ;;  %v496_v19 = vpop.f32.mrb[1].mxu0 }
 0x11c   : > { %v537_v18 = vadd.f32 %v963_v16, %v908_v12  ;;  %v528_v20 = vpop.f32.mrb[1].mxu1  ;;  %v497_v21 = vadd.f32 %v908_v12, %v496_v19  ;;  %v956_v23 = vpop.f32.mrb[2].mxu0 }
 0x11d   : > { %v529_v22 = vadd.f32 %v908_v12, %v528_v20  ;;  %v964_v24 = vpop.f32.mrb[2].mxu1  ;;  %v657_v25 = vsub.f32 %v505_v17, %v588_v2  ;;  %v508_v27 = vadd.f32 %v956_v23, %v908_v12  ;;  %v499_v29 = vpop.f32.mrb[3].mxu0 }
 0x11e   : > { %v665_v26 = vsub.f32 %v537_v18, %v628_v11  ;;  %v540_v28 = vadd.f32 %v964_v24, %v908_v12  ;;  %v531_v30 = vpop.f32.mrb[3].mxu1  ;;  %v655_v31 = vsub.f32 %v497_v21, %v578_v1  ;;  %v500_v33 = vadd.f32 %v908_v12, %v499_v29 }
 0x11f   : > { %v663_v32 = vsub.f32 %v529_v22, %v618_v9  ;;  %v532_v34 = vadd.f32 %v908_v12, %v531_v30  ;;  %673 = vst [vmem:[%s1296_s15 + $0x10] sm:$0xff] %v657_v25  ;;  %v658_v35 = vsub.f32 %v508_v27, %v593_v4 }
 0x120   : > { %681 = vst [vmem:[%s1296_s15 + $0x50] sm:$0xff] %v665_v26  ;;  %v666_v36 = vsub.f32 %v540_v28, %v633_v13  ;;  %671 = vst [vmem:[%s1296_s15] sm:$0xff] %v655_v31  ;;  %v656_v38 = vsub.f32 %v500_v33, %v583_v3 }
 0x121   : > { %679 = vst [vmem:[%s1296_s15 + $0x40] sm:$0xff] %v663_v32  ;;  %v664_v39 = vsub.f32 %v532_v34, %v623_v10  ;;  %674 = vst [vmem:[%s1296_s15 + $0x18] sm:$0xff] %v658_v35 }
 0x122   : > { %682 = vst [vmem:[%s1296_s15 + $0x58] sm:$0xff] %v666_v36  ;;  %672 = vst [vmem:[%s1296_s15 + $0x8] sm:$0xff] %v656_v38  ;;  %v959_v41 = vpop.f32.mrb[4].mxu0 }
 0x123   : > { %680 = vst [vmem:[%s1296_s15 + $0x48] sm:$0xff] %v664_v39  ;;  %v967_v42 = vpop.f32.mrb[4].mxu1  ;;  %v521_v43 = vadd.f32 %v959_v41, %v908_v12  ;;  %v512_v45 = vpop.f32.mrb[5].mxu0 }
 0x124   : > { %v553_v44 = vadd.f32 %v967_v42, %v908_v12  ;;  %v544_v46 = vpop.f32.mrb[5].mxu1  ;;  %v513_v47 = vadd.f32 %v908_v12, %v512_v45  ;;  %v960_v49 = vpop.f32.mrb[6].mxu0 }
 0x125   : > { %v545_v48 = vadd.f32 %v908_v12, %v544_v46  ;;  %v968_v50 = vpop.f32.mrb[6].mxu1  ;;  %v661_v51 = vsub.f32 %v521_v43, %v1283_v7  ;;  %v524_v53 = vadd.f32 %v960_v49, %v908_v12  ;;  %v515_v55 = vpop.f32.mrb[7].mxu0  ;;  %693 = sbr.rel (!%p1137_p6) target bundleno = 308 (0x134), region = 81 }
 0x126   : > { %v669_v52 = vsub.f32 %v553_v44, %v648_v40  ;;  %v556_v54 = vadd.f32 %v968_v50, %v908_v12  ;;  %v547_v56 = vpop.f32.mrb[7].mxu1  ;;  %v659_v58 = vsub.f32 %v513_v47, %v1279_v5  ;;  %v516_v60 = vadd.f32 %v908_v12, %v515_v55  ;;  %v760_v4 = vld [vmem:[%s1296_s15 + $0x10] sm:$0xff] (%p1137_p6) }
 0x127   : > { %v667_v59 = vsub.f32 %v545_v48, %v1292_v14  ;;  %v548_v61 = vadd.f32 %v908_v12, %v547_v56  ;;  %677 = vst [vmem:[%s1296_s15 + $0x30] sm:$0xff] %v661_v51  ;;  %v662_v62 = vsub.f32 %v524_v53, %v1285_v8  ;;  %v756_v2 = vld [vmem:[%s1296_s15] sm:$0xff] (%p1137_p6)  ;;  %761 = vst [vmem:[%s698_s13 + $0x30] sm:$0xff] (%p1137_p6), %v760_v4  ;;  %v776_v12 = vld [vmem:[%s1296_s15 + $0x50] sm:$0xff] (%p1137_p6) }
 0x128   : > { %685 = vst [vmem:[%s1296_s15 + $0x70] sm:$0xff] %v669_v52  ;;  %v670_v63 = vsub.f32 %v556_v54, %v653_v57  ;;  %675 = vst [vmem:[%s1296_s15 + $0x20] sm:$0xff] %v659_v58  ;;  %v660_v0 = vsub.f32 %v516_v60, %v1281_v6  ;;  %v762_v5 = vld [vmem:[%s1296_s15 + $0x18] sm:$0xff] (%p1137_p6)  ;;  %v772_v10 = vld [vmem:[%s1296_s15 + $0x40] sm:$0xff] (%p1137_p6) }
 0x129   : > { %683 = vst [vmem:[%s1296_s15 + $0x60] sm:$0xff] %v667_v59  ;;  %v668_v1 = vsub.f32 %v548_v61, %v643_v37  ;;  %678 = vst [vmem:[%s1296_s15 + $0x38] sm:$0xff] %v662_v62  ;;  %v758_v3 = vld [vmem:[%s1296_s15 + $0x8] sm:$0xff] (%p1137_p6)  ;;  %v778_v13 = vld [vmem:[%s1296_s15 + $0x58] sm:$0xff] (%p1137_p6) }
 0x12a   : > { %686 = vst [vmem:[%s1296_s15 + $0x78] sm:$0xff] %v670_v63  ;;  %676 = vst [vmem:[%s1296_s15 + $0x28] sm:$0xff] %v660_v0  ;;  %v774_v11 = vld [vmem:[%s1296_s15 + $0x48] sm:$0xff] (%p1137_p6) }
 0x12b   : > { %684 = vst [vmem:[%s1296_s15 + $0x68] sm:$0xff] %v668_v1  ;;  %757 = vst [vmem:[%s698_s13] sm:$0xff] (%p1137_p6), %v756_v2 }
 0x12c   : > { %759 = vst [vmem:[%s698_s13 + $0x18] sm:$0xff] %v758_v3  ;;  %763 = vst [vmem:[%s698_s13 + $0x48] sm:$0xff] %v762_v5 }
 0x12d   : > { %773 = vst [vmem:[%s698_s13 + $0xc0] sm:$0xff] %v772_v10  ;;  %775 = vst [vmem:[%s698_s13 + $0xd8] sm:$0xff] %v774_v11 }
 0x12e   : > { %v768_v8 = vld [vmem:[%s1296_s15 + $0x30] sm:$0xff]  ;;  %777 = vst [vmem:[%s698_s13 + $0xf0] sm:$0xff] %v776_v12  ;;  %779 = vst [vmem:[%s698_s13 + $0x108] sm:$0xff] %v778_v13 }
 0x12f   : > { %v764_v6 = vld [vmem:[%s1296_s15 + $0x20] sm:$0xff]  ;;  %769 = vst [vmem:[%s698_s13 + $0x90] sm:$0xff] %v768_v8  ;;  %v784_v16 = vld [vmem:[%s1296_s15 + $0x70] sm:$0xff] }
 0x130   : > { %765 = vst [vmem:[%s698_s13 + $0x60] sm:$0xff] %v764_v6  ;;  %v770_v9 = vld [vmem:[%s1296_s15 + $0x38] sm:$0xff]  ;;  %v780_v14 = vld [vmem:[%s1296_s15 + $0x60] sm:$0xff]  ;;  %785 = vst [vmem:[%s698_s13 + $0x150] sm:$0xff] %v784_v16 }
 0x131   : > { %v766_v7 = vld [vmem:[%s1296_s15 + $0x28] sm:$0xff]  ;;  %771 = vst [vmem:[%s698_s13 + $0xa8] sm:$0xff] %v770_v9  ;;  %781 = vst [vmem:[%s698_s13 + $0x120] sm:$0xff] %v780_v14  ;;  %v786_v17 = vld [vmem:[%s1296_s15 + $0x78] sm:$0xff] }
 0x132   : > { %767 = vst [vmem:[%s698_s13 + $0x78] sm:$0xff] %v766_v7  ;;  %v782_v15 = vld [vmem:[%s1296_s15 + $0x68] sm:$0xff]  ;;  %787 = vst [vmem:[%s698_s13 + $0x168] sm:$0xff] %v786_v17 }
 0x133   : > { %783 = vst [vmem:[%s698_s13 + $0x138] sm:$0xff] %v782_v15 }
 0x134 PF: > { %s14_s19 = sadd.s32 1, %s1074_s19   ;;  %s1362_s15 = smov %s1062_s16 }
 0x135   : > { %p11_p12 = scmp.ge.s32.totalorder %s14_s19, 5   ;;  %s1363_s16 = smov %s1142_s25 }
 0x136   : > { %s1364_s17 = smov %s1070_s18  ;;  %s1365_s18 = smov %s1367_s20 }
 0x137   :  { %13 = sbr.rel (!%p11_p12) target bundleno = 3 (0x3), region = 159 }

// kernel: encoder_decoder_forward.6
= control target key start
LH: loop header
LB: loop body
LE: loop exit
PB: predicated region body
PF: predicated region fallthrough
CT: control target
= control target key end

     0   :  { %s1395_s12 = smov 0   ;;  %s1397_s13 = smov 0   ;;  %s1931_s0 = inlined_call_operand.vmem [shape: f32[128,128], index: 0, kind: input, shape index: {}]   ;;  %s1932_s1 = inlined_call_operand.vmem [shape: bf16[128,384], index: 1, kind: input, shape index: {}]   ;;  %s1933_s2 = inlined_call_operand.vmem [shape: f32[1,384], index: 2, kind: input, shape index: {}]   ;;  %s1934_s3 = inlined_call_operand.vmem [shape: f32[128,1], index: 3, kind: output, shape index: {}]  }
   0x1   :  { %s1399_s14 = smov 0   ;;  %s1401_s15 = smov 0  }
   0x2   :  { %s1403_s16 = smov 0  }
   0x3 LB: > { %s22_s17 = sadd.s32 1, %s1366_s15  ;;  %p65_p1 = scmp.ne.s32.totalorder %s1358_s13, %s1354_s12  ;;  %s1370_s16 = sphi %s1403_s16, %s13_s16   ;;  %s1366_s15 = sphi %s1401_s15, %s1952_s15   ;;  %s1362_s14 = sphi %s1399_s14, %s1951_s14   ;;  %s1358_s13 = sphi %s1397_s13, %s1950_s13   ;;  %s1354_s12 = sphi %s1395_s12, %s1949_s12  }
   0x4   : > { %p23_p0 = scmp.ge.s32.totalorder %s22_s17, 3  ;;  %p66_p2 = scmp.eq.s32.totalorder %s1370_s16, 0 }
   0x5   : > { %s58_s19 = sadd.s32 1, %s1358_s13  ;;  %p1099_p5 = scmp.ge.s32.totalorder %s1370_s16, 3 }
   0x6   : > { %s1954_s17 = smov (%p23_p0, %s22_s17), 0  ;;  %p67_p3 = por %p66_p2, %p65_p1 }
   0x7   : > { %s55_s18 = ssub.s32 %s1366_s15, %s1954_s17  ;;  %152 = sbr.rel (%p1099_p5) target bundleno = 28 (0x1c), region = 20 }
   0x8   : > { %p56_p4 = scmp.eq.s32.totalorder %s55_s18, 0 }
   0xa   : > { %s1430_s20 = scalar_select %p56_p4, %s1358_s13, %s58_s19  }
   0xe   : > { %155 = sbr.rel (!%p67_p3) target bundleno = 28 (0x1c), region = 24  ;;  %s157_s21 = sand.u32 (%p67_p3), 1, %s1358_s13  }
   0xf   : > { %s1101_s22 = sshll.u32 (%p67_p3), %s1366_s15, 2  ;;  %s1100_s23 = sshll.u32 (%p67_p3), %s157_s21, 6 }
  0x10   : > { %s1438_s26 = scalar_lea.vmem (%p67_p3), %s1932_s1, %s1101_s22  ;;  %s159_s27 = scalar_lea.vmem (%p67_p3), [#allocation4], %s1100_s23 }
  0x11   : > { %v177_v0 = vld [vmem:[%s1438_s26] sm:$0xf] (%p67_p3)  ;;  %v179_v1 = vld [vmem:[%s1438_s26 + $0xc] sm:$0xf] (%p67_p3)  ;;  %v181_v2 = vld [vmem:[%s1438_s26 + $0x18] sm:$0xf] (%p67_p3) }
  0x12   : > { %178 = vst [vmem:[%s159_s27] sm:$0xf] (%p67_p3), %v177_v0  ;;  %180 = vst [vmem:[%s159_s27 + $0x4] sm:$0xf] (%p67_p3), %v179_v1  ;;  %v183_v3 = vld [vmem:[%s1438_s26 + $0x24] sm:$0xf] (%p67_p3) }
  0x13   : > { %v185_v4 = vld [vmem:[%s1438_s26 + $0x30] sm:$0xf] (%p67_p3)  ;;  %182 = vst [vmem:[%s159_s27 + $0x8] sm:$0xf] (%p67_p3), %v181_v2  ;;  %184 = vst [vmem:[%s159_s27 + $0xc] sm:$0xf] (%p67_p3), %v183_v3 }
  0x14   : > { %186 = vst [vmem:[%s159_s27 + $0x10] sm:$0xf] (%p67_p3), %v185_v4  ;;  %v187_v5 = vld [vmem:[%s1438_s26 + $0x3c] sm:$0xf] (%p67_p3)  ;;  %v189_v6 = vld [vmem:[%s1438_s26 + $0x48] sm:$0xf] (%p67_p3) }
  0x15   : > { %v191_v7 = vld [vmem:[%s1438_s26 + $0x54] sm:$0xf]  ;;  %188 = vst [vmem:[%s159_s27 + $0x14] sm:$0xf] %v187_v5  ;;  %190 = vst [vmem:[%s159_s27 + $0x18] sm:$0xf] %v189_v6 }
  0x16   : > { %192 = vst [vmem:[%s159_s27 + $0x1c] sm:$0xf] %v191_v7  ;;  %v193_v8 = vld [vmem:[%s1438_s26 + $0x60] sm:$0xf]  ;;  %v195_v9 = vld [vmem:[%s1438_s26 + $0x6c] sm:$0xf] }
  0x17   : > { %v197_v10 = vld [vmem:[%s1438_s26 + $0x78] sm:$0xf]  ;;  %194 = vst [vmem:[%s159_s27 + $0x20] sm:$0xf] %v193_v8  ;;  %196 = vst [vmem:[%s159_s27 + $0x24] sm:$0xf] %v195_v9 }
  0x18   : > { %198 = vst [vmem:[%s159_s27 + $0x28] sm:$0xf] %v197_v10  ;;  %v199_v11 = vld [vmem:[%s1438_s26 + $0x84] sm:$0xf]  ;;  %v201_v12 = vld [vmem:[%s1438_s26 + $0x90] sm:$0xf] }
  0x19   : > { %v203_v13 = vld [vmem:[%s1438_s26 + $0x9c] sm:$0xf]  ;;  %200 = vst [vmem:[%s159_s27 + $0x2c] sm:$0xf] %v199_v11  ;;  %202 = vst [vmem:[%s159_s27 + $0x30] sm:$0xf] %v201_v12 }
  0x1a   : > { %204 = vst [vmem:[%s159_s27 + $0x34] sm:$0xf] %v203_v13  ;;  %v205_v14 = vld [vmem:[%s1438_s26 + $0xa8] sm:$0xf]  ;;  %v207_v15 = vld [vmem:[%s1438_s26 + $0xb4] sm:$0xf] }
  0x1b   : > { %206 = vst [vmem:[%s159_s27 + $0x38] sm:$0xf] %v205_v14  ;;  %208 = vst [vmem:[%s159_s27 + $0x3c] sm:$0xf] %v207_v15 }
  0x1c PF: > { %p1102_p6 = scmp.ge.s32.totalorder %s1370_s16, 1  ;;  %p268_p7 = scmp.lt.s32.totalorder %s1370_s16, 4 }
  0x1e   : > { %p269_p8 = pnand %p1102_p6, %p268_p7 }
  0x1f   : > { %s275_s28 = sand.u32 (!%p269_p8), 1, %s1354_s12   ;;  %p312_p9 = scmp.lt.s32.totalorder (!%p269_p8), %s1362_s14, 2 }
  0x20   : > { %272 = sbr.rel (%p269_p8) target bundleno = 805 (0x325), region = 69  ;;  %s1103_s29 = sshll.u32 (!%p269_p8), %s275_s28, 6 }
  0x21   : > { %s1467_s7 = scalar_lea.vmem (!%p269_p8), [#allocation4], %s1103_s29  ;;  %p1104_p10 = scmp.ne.s32.totalorder (!%p269_p8), %s1362_s14, 0 }
  0x27   : > { %s1461_s30 = scalar_select %p312_p9, %s1362_s14, 2 }
  0x28   : > { %325 = sbr.rel (%p1104_p10) target bundleno = 57 (0x39), region = 77  ;;  %vm326_vm0 = vcmask (!%p1104_p10), 7168   ;;  %v1372_v16 = vmov (!%p1104_p10), -inf   ;;  %v1373_v17 = vmov (!%p1104_p10), 0.0  }
  0x29   : > { %s314_s6 = scalar_lea.vmem %s1933_s2, %s1461_s30  ;;  %327 = vst.msk [vmem:[#allocation2] sm:$0xff] (!%p1104_p10), %vm326_vm0, %v1372_v16  ;;  %328 = vst.msk [vmem:[#allocation2 + $0x8] sm:$0xff] (!%p1104_p10), %vm326_vm0, %v1372_v16 }
  0x2a   : > { %329 = vst.msk [vmem:[#allocation2 + $0x10] sm:$0xff] (!%p1104_p10), %vm326_vm0, %v1372_v16  ;;  %330 = vst.msk [vmem:[#allocation2 + $0x18] sm:$0xff] (!%p1104_p10), %vm326_vm0, %v1372_v16 }
  0x2b   : > { %331 = vst.msk [vmem:[#allocation2 + $0x20] sm:$0xff] (!%p1104_p10), %vm326_vm0, %v1372_v16  ;;  %332 = vst.msk [vmem:[#allocation2 + $0x28] sm:$0xff] (!%p1104_p10), %vm326_vm0, %v1372_v16 }
  0x2c   : > { %333 = vst.msk [vmem:[#allocation2 + $0x30] sm:$0xff] (!%p1104_p10), %vm326_vm0, %v1372_v16  ;;  %334 = vst.msk [vmem:[#allocation2 + $0x38] sm:$0xff] (!%p1104_p10), %vm326_vm0, %v1372_v16 }
  0x2d   : > { %335 = vst.msk [vmem:[#allocation2 + $0x40] sm:$0xff] (!%p1104_p10), %vm326_vm0, %v1372_v16  ;;  %336 = vst.msk [vmem:[#allocation2 + $0x48] sm:$0xff] (!%p1104_p10), %vm326_vm0, %v1372_v16 }
  0x2e   : > { %337 = vst.msk [vmem:[#allocation2 + $0x50] sm:$0xff] (!%p1104_p10), %vm326_vm0, %v1372_v16  ;;  %338 = vst.msk [vmem:[#allocation2 + $0x58] sm:$0xff] (!%p1104_p10), %vm326_vm0, %v1372_v16 }
  0x2f   : > { %339 = vst.msk [vmem:[#allocation2 + $0x60] sm:$0xff] %vm326_vm0, %v1372_v16  ;;  %340 = vst.msk [vmem:[#allocation2 + $0x68] sm:$0xff] %vm326_vm0, %v1372_v16 }
  0x30   : > { %341 = vst.msk [vmem:[#allocation2 + $0x70] sm:$0xff] %vm326_vm0, %v1372_v16  ;;  %342 = vst.msk [vmem:[#allocation2 + $0x78] sm:$0xff] %vm326_vm0, %v1372_v16 }
  0x31   : > { %343 = vst.msk [vmem:[#allocation3] sm:$0xff] %vm326_vm0, %v1373_v17  ;;  %344 = vst.msk [vmem:[#allocation3 + $0x8] sm:$0xff] %vm326_vm0, %v1373_v17 }
  0x32   : > { %345 = vst.msk [vmem:[#allocation3 + $0x10] sm:$0xff] %vm326_vm0, %v1373_v17  ;;  %346 = vst.msk [vmem:[#allocation3 + $0x18] sm:$0xff] %vm326_vm0, %v1373_v17 }
  0x33   : > { %347 = vst.msk [vmem:[#allocation3 + $0x20] sm:$0xff] %vm326_vm0, %v1373_v17  ;;  %348 = vst.msk [vmem:[#allocation3 + $0x28] sm:$0xff] %vm326_vm0, %v1373_v17 }
  0x34   : > { %349 = vst.msk [vmem:[#allocation3 + $0x30] sm:$0xff] %vm326_vm0, %v1373_v17  ;;  %350 = vst.msk [vmem:[#allocation3 + $0x38] sm:$0xff] %vm326_vm0, %v1373_v17 }
  0x35   : > { %351 = vst.msk [vmem:[#allocation3 + $0x40] sm:$0xff] %vm326_vm0, %v1373_v17  ;;  %352 = vst.msk [vmem:[#allocation3 + $0x48] sm:$0xff] %vm326_vm0, %v1373_v17 }
  0x36   : > { %353 = vst.msk [vmem:[#allocation3 + $0x50] sm:$0xff] %vm326_vm0, %v1373_v17  ;;  %354 = vst.msk [vmem:[#allocation3 + $0x58] sm:$0xff] %vm326_vm0, %v1373_v17 }
  0x37   : > { %355 = vst.msk [vmem:[#allocation3 + $0x60] sm:$0xff] %vm326_vm0, %v1373_v17  ;;  %356 = vst.msk [vmem:[#allocation3 + $0x68] sm:$0xff] %vm326_vm0, %v1373_v17 }
  0x38   : > { %357 = vst.msk [vmem:[#allocation3 + $0x70] sm:$0xff] %vm326_vm0, %v1373_v17  ;;  %358 = vst.msk [vmem:[#allocation3 + $0x78] sm:$0xff] %vm326_vm0, %v1373_v17 }
  0x39 PF: > { %v1228_v18 = vld [vmem:[%s1467_s7] sm:$0xff]   ;;  %v1229_v19 = vld [vmem:[%s1467_s7 + $0x8] sm:$0xff]   ;;  %v1230_v20 = vld [vmem:[%s1467_s7 + $0x10] sm:$0xff]   ;;  %v1374_v15 = vmov 0   ;;  %vm871_vm1 = vcmask 7168   ;;  %p1114_p11 = scmp.ne.s32.totalorder %s1362_s14, 2 }
  0x3a   : > { %1135 = vmatprep.subr.bf16.mxu0 %v1228_v18  ;;  %1167 = vmatprep.subr.bf16.mxu1 %v1228_v18  ;;  %v1231_v21 = vld [vmem:[%s1467_s7 + $0x18] sm:$0xff]   ;;  %v359_v22 = vld [vmem:[%s1931_s0] sm:$0xff]  ;;  %v360_v23 = vld [vmem:[%s1931_s0 + $0x8] sm:$0xff] }
  0x3b   : > { %1136 = vmatpush3.bf16.msra.mxu0 %v1228_v18  ;;  %1175 = vmatpush3.bf16.msra.mxu1 %v1228_v18  ;;  %v367_v24 = vld [vmem:[%s1931_s0 + $0x40] sm:$0xff]  ;;  %v375_v25 = vpack.c.bf16 %v360_v23, %v359_v22  ;;  %v368_v26 = vld [vmem:[%s1931_s0 + $0x48] sm:$0xff]  ;;  %v1234_v30 = vld [vmem:[%s1467_s7 + $0x30] sm:$0xff]  }
  0x3c   : > { %1137 = vmatprep.subr.bf16.mxu0 %v1229_v19  ;;  %1168 = vmatprep.subr.bf16.mxu1 %v1229_v19  ;;  %v379_v27 = vpack.c.bf16 %v368_v26, %v367_v24  ;;  %v1232_v28 = vld [vmem:[%s1467_s7 + $0x20] sm:$0xff]   ;;  %v1233_v29 = vld [vmem:[%s1467_s7 + $0x28] sm:$0xff]   ;;  %v1235_v31 = vld [vmem:[%s1467_s7 + $0x38] sm:$0xff]  }
  0x3d   : > { %1151 = vmatprep.mubr.bf16.mxu0 %v375_v25  ;;  %v361_v32 = vld [vmem:[%s1931_s0 + $0x10] sm:$0xff]  ;;  %v362_v33 = vld [vmem:[%s1931_s0 + $0x18] sm:$0xff]  ;;  %v363_v36 = vld [vmem:[%s1931_s0 + $0x20] sm:$0xff]  ;;  %1226 = vset.pattern.permute.xlu1 %v1374_v15 }
  0x3e   : > { %1159 = vmatprep.mubr.bf16.mxu1 %v379_v27  ;;  %v369_v34 = vld [vmem:[%s1931_s0 + $0x50] sm:$0xff]  ;;  %v370_v35 = vld [vmem:[%s1931_s0 + $0x58] sm:$0xff]  ;;  %v364_v37 = vld [vmem:[%s1931_s0 + $0x28] sm:$0xff]  ;;  %v376_v40 = vpack.c.bf16 %v362_v33, %v361_v32  ;;  %1227 = vset.pattern.permute.xlu0 %v1374_v15 }
  0x3f   : > { %1138 = vmatpush3.bf16.msra.mxu0 %v1229_v19  ;;  %1176 = vmatpush3.bf16.msra.mxu1 %v1229_v19  ;;  %v371_v38 = vld [vmem:[%s1931_s0 + $0x60] sm:$0xff]  ;;  %v372_v39 = vld [vmem:[%s1931_s0 + $0x68] sm:$0xff]  ;;  %v380_v41 = vpack.c.bf16 %v370_v35, %v369_v34  ;;  %v377_v42 = vpack.c.bf16 %v364_v37, %v363_v36  ;;  %v365_v44 = vld [vmem:[%s1931_s0 + $0x30] sm:$0xff] }
  0x40   : > { %1139 = vmatprep.subr.bf16.mxu0 %v1230_v20  ;;  %1169 = vmatprep.subr.bf16.mxu1 %v1230_v20  ;;  %v381_v43 = vpack.c.bf16 %v372_v39, %v371_v38  ;;  %v366_v45 = vld [vmem:[%s1931_s0 + $0x38] sm:$0xff]  ;;  %v373_v46 = vld [vmem:[%s1931_s0 + $0x70] sm:$0xff]  ;;  %v1105_v50 = vld [vmem:[%s314_s6] ss:$0 sm:$0xff] }
  0x41   : > { %v374_v47 = vld [vmem:[%s1931_s0 + $0x78] sm:$0xff]  ;;  %v378_v48 = vpack.c.bf16 %v366_v45, %v365_v44  ;;  %v1623_v27 = vld [vmem:[#allocation2] sm:$0xff] }
  0x42   : > { %v382_v49 = vpack.c.bf16 %v374_v47, %v373_v46  ;;  %v1621_v26 = vld [vmem:[#allocation2 + $0x18] sm:$0xff]  ;;  %v1642_v35 = vld [vmem:[#allocation2 + $0x40] sm:$0xff] }
  0x43   : > { %1140 = vmatpush3.bf16.msra.mxu0 %v1230_v20  ;;  %1177 = vmatpush3.bf16.msra.mxu1 %v1230_v20  ;;  %v1611_v20 = vld [vmem:[#allocation2 + $0x50] sm:$0xff]  ;;  %v1640_v34 = vld [vmem:[#allocation2 + $0x58] sm:$0xff]  ;;  %v1721_v15 = vld [vmem:[#allocation2 + $0x60] sm:$0xff] }
  0x44   : > { %1141 = vmatprep.subr.bf16.mxu0 %v1231_v21  ;;  %1170 = vmatprep.subr.bf16.mxu1 %v1231_v21 }
  0x47   : > { %1142 = vmatpush3.bf16.msra.mxu0 %v1231_v21  ;;  %1178 = vmatpush3.bf16.msra.mxu1 %v1231_v21  ;;  %v1613_v21 = vld [vmem:[#allocation2 + $0x10] sm:$0xff] }
  0x48   : > { %1143 = vmatprep.subr.bf16.mxu0 %v1232_v28  ;;  %1171 = vmatprep.subr.bf16.mxu1 %v1232_v28 }
  0x4b   : > { %1144 = vmatpush3.bf16.msra.mxu0 %v1232_v28  ;;  %1179 = vmatpush3.bf16.msra.mxu1 %v1232_v28 }
  0x4c   : > { %1145 = vmatprep.subr.bf16.mxu0 %v1233_v29  ;;  %1172 = vmatprep.subr.bf16.mxu1 %v1233_v29 }
  0x4f   : > { %1146 = vmatpush3.bf16.msra.mxu0 %v1233_v29  ;;  %1180 = vmatpush3.bf16.msra.mxu1 %v1233_v29 }
  0x50   : > { %1147 = vmatprep.subr.bf16.mxu0 %v1234_v30  ;;  %1173 = vmatprep.subr.bf16.mxu1 %v1234_v30 }
  0x53   : > { %1148 = vmatpush3.bf16.msra.mxu0 %v1234_v30  ;;  %1181 = vmatpush3.bf16.msra.mxu1 %v1234_v30 }
  0x54   : > { %1149 = vmatprep.subr.bf16.mxu0 %v1235_v31  ;;  %1174 = vmatprep.subr.bf16.mxu1 %v1235_v31 }
  0x57   : > { %1150 = vmatpush3.bf16.msra.mxu0 %v1235_v31  ;;  %1182 = vmatpush3.bf16.msra.mxu1 %v1235_v31 }
  0x5a   : > { %1152 = vmatmul.mubr.bf16.vlgmr.msra.gmra.mrb[0].mxu0 %v376_v40  ;;  %1160 = vmatmul.mubr.bf16.vlgmr.msra.gmra.mrb[0].mxu1 %v380_v41 }
  0x5b   : > { %1155 = vmatprep.mubr.bf16.mxu0 %v377_v42  ;;  %1163 = vmatprep.mubr.bf16.mxu1 %v381_v43  ;;  %v1660_v42 = vld [vmem:[#allocation2 + $0x48] sm:$0xff] }
  0x5c   : > { %v1662_v43 = vld [vmem:[#allocation2 + $0x8] sm:$0xff] }
  0x62   : > { %1156 = vmatmul.mubr.bf16.gmra.mrb[4].mxu0 %v378_v48  ;;  %1164 = vmatmul.mubr.bf16.gmra.mrb[4].mxu1 %v382_v49 }
 0x12d   : > { %v1153_v51 = vpop.f32.mrb[0].mxu0  ;;  %v1161_v52 = vpop.f32.mrb[0].mxu1 }
 0x12e   : > { %v1563_v53 = vadd.f32 %v1153_v51, %v1105_v50  ;;  %v1565_v54 = vadd.f32 %v1161_v52, %v1105_v50  ;;  %v488_v55 = vpop.f32.mrb[1].mxu0  ;;  %v520_v56 = vpop.f32.mrb[1].mxu1  ;;  %v1682_v51 = vld [vmem:[#allocation2 + $0x30] sm:$0xff] }
 0x12f   : > { %v1154_v57 = vpop.f32.mrb[2].mxu0  ;;  %v1162_v58 = vpop.f32.mrb[2].mxu1  ;;  %v1569_v61 = vadd.f32 %v1105_v50, %v488_v55  ;;  %v1575_v1 = vadd.f32 %v1105_v50, %v520_v56 }
 0x130   : > { %587 = vmax.xlane.f32.xlu0 %v1565_v54  ;;  %v523_v59 = vpop.f32.mrb[3].mxu1  ;;  %571 = vmax.xlane.f32.xlu1 %v1563_v53  ;;  %v491_v60 = vpop.f32.mrb[3].mxu0  ;;  %v1571_v62 = vadd.f32 %v1154_v57, %v1105_v50  ;;  %v1577_v2 = vadd.f32 %v1162_v58, %v1105_v50 }
 0x131   : > { %v1581_v9 = vadd.f32 %v1105_v50, %v523_v59  ;;  %v1583_v10 = vadd.f32 %v1105_v50, %v491_v60  ;;  %v1700_v60 = vld [vmem:[#allocation2 + $0x78] sm:$0xff] }
 0x134   : > { %573 = vmax.xlane.f32.xlu1 %v1571_v62  ;;  %567 = vmax.xlane.f32.xlu0 %v1569_v61 }
 0x135   : > { %v1157_v63 = vpop.f32.mrb[4].mxu0  ;;  %v1165_v0 = vpop.f32.mrb[4].mxu1 }
 0x136   : > { %v504_v3 = vpop.f32.mrb[5].mxu0  ;;  %v536_v4 = vpop.f32.mrb[5].mxu1  ;;  %v1585_v11 = vadd.f32 %v1157_v63, %v1105_v50  ;;  %v1603_v18 = vadd.f32 %v1165_v0, %v1105_v50  ;;  %v1702_v63 = vld [vmem:[#allocation2 + $0x20] sm:$0xff] }
 0x137   : > { %v1158_v5 = vpop.f32.mrb[6].mxu0  ;;  %v1166_v6 = vpop.f32.mrb[6].mxu1  ;;  %v1591_v13 = vadd.f32 %v1105_v50, %v504_v3  ;;  %v1597_v16 = vadd.f32 %v1105_v50, %v536_v4 }
 0x138   : > { %589 = vmax.xlane.f32.xlu1 %v1577_v2  ;;  %583 = vmax.xlane.f32.xlu0 %v1575_v1  ;;  %v507_v7 = vpop.f32.mrb[7].mxu0  ;;  %v539_v8 = vpop.f32.mrb[7].mxu1  ;;  %v1589_v12 = vadd.f32 %v1158_v5, %v1105_v50  ;;  %v1595_v14 = vadd.f32 %v1166_v6, %v1105_v50 }
 0x139   : > { %v1601_v17 = vadd.f32 %v1105_v50, %v507_v7  ;;  %v1605_v19 = vadd.f32 %v1105_v50, %v539_v8  ;;  %v1680_v50 = vld [vmem:[#allocation2 + $0x38] sm:$0xff]  ;;  %v1719_v8 = vld [vmem:[#allocation2 + $0x28] sm:$0xff] }
 0x13c   : > { %585 = vmax.xlane.f32.xlu1 %v1581_v9  ;;  %569 = vmax.xlane.f32.xlu0 %v1583_v10 }
 0x140   : > { %581 = vmax.xlane.f32.xlu1 %v1589_v12  ;;  %579 = vmax.xlane.f32.xlu0 %v1585_v11 }
 0x144   : > { %597 = vmax.xlane.f32.xlu1 %v1595_v14  ;;  %575 = vmax.xlane.f32.xlu0 %v1591_v13 }
 0x148   : > { %577 = vmax.xlane.f32.xlu1 %v1601_v17  ;;  %591 = vmax.xlane.f32.xlu0 %v1597_v16 }
 0x14c   : > { %593 = vmax.xlane.f32.xlu1 %v1605_v19  ;;  %595 = vmax.xlane.f32.xlu0 %v1603_v18 }
 0x1bd   : > { %v588_v22 = vpop.xlane.xlu0 %587  ;;  %v572_v23 = vpop.xlane.xlu1 %571 }
 0x1be   : > { %v1616_v24 = vmax.f32 %v1611_v20, %v588_v22  ;;  %v1619_v25 = vmax.f32 %v1613_v21, %v572_v23 }
 0x1c0   : > { %v625_v28 = vsub.f32 %v1611_v20, %v1616_v24  ;;  %898 = vst.msk [vmem:[#allocation2 + $0x50] sm:$0xff] %vm871_vm1, %v1616_v24  ;;  %v617_v29 = vsub.f32 %v1613_v21, %v1619_v25  ;;  %890 = vst.msk [vmem:[#allocation2 + $0x10] sm:$0xff] %vm871_vm1, %v1619_v25  ;;  %707 = vperm.xlu1 %1226, %v1619_v25  }
 0x1c1   : > { %v574_v30 = vpop.xlane.xlu1 %573  ;;  %v568_v31 = vpop.xlane.xlu0 %567 }
 0x1c2   : > { %v1635_v32 = vmax.f32 %v1621_v26, %v574_v30  ;;  %v1638_v33 = vmax.f32 %v1623_v27, %v568_v31 }
 0x1c4   : > { %891 = vst.msk [vmem:[#allocation2 + $0x18] sm:$0xff] %vm871_vm1, %v1635_v32  ;;  %888 = vst.msk [vmem:[#allocation2] sm:$0xff] %vm871_vm1, %v1638_v33  ;;  %747 = vperm.xlu1 %1226, %v1616_v24   ;;  %697 = vperm.xlu0 %1227, %v1638_v33  }
 0x1c5   : > { %v590_v38 = vpop.xlane.xlu1 %589  ;;  %v584_v39 = vpop.xlane.xlu0 %583 }
 0x1c6   : > { %v1655_v40 = vmax.f32 %v1640_v34, %v590_v38  ;;  %v1658_v41 = vmax.f32 %v1642_v35, %v584_v39 }
 0x1c8   : > { %899 = vst.msk [vmem:[#allocation2 + $0x58] sm:$0xff] %vm871_vm1, %v1655_v40  ;;  %896 = vst.msk [vmem:[#allocation2 + $0x40] sm:$0xff] %vm871_vm1, %v1658_v41  ;;  %752 = vperm.xlu0 %1227, %v1655_v40   ;;  %737 = vperm.xlu1 %1226, %v1658_v41   ;;  %v1938_v20 = vsub.f32 %v1640_v34, %v1655_v40 }
 0x1c9   : > { %v586_v46 = vpop.xlane.xlu1 %585  ;;  %v570_v47 = vpop.xlane.xlu0 %569 }
 0x1ca   : > { %v1675_v48 = vmax.f32 %v1660_v42, %v586_v46  ;;  %v1678_v49 = vmax.f32 %v1662_v43, %v570_v47  ;;  %v1738_v46 = vld [vmem:[#allocation2 + $0x68] sm:$0xff]  ;;  %v1740_v47 = vld [vmem:[#allocation2 + $0x70] sm:$0xff]  ;;  %v653_v24 = vmul.f32 1.442695, %v1938_v20 }
 0x1cc   : > { %897 = vst.msk [vmem:[#allocation2 + $0x48] sm:$0xff] %vm871_vm1, %v1675_v48  ;;  %889 = vst.msk [vmem:[#allocation2 + $0x8] sm:$0xff] %vm871_vm1, %v1678_v49  ;;  %742 = vperm.xlu0 %1227, %v1675_v48   ;;  %712 = vperm.xlu1 %1226, %v1635_v32  }
 0x1cd   : > { %v582_v56 = vpop.xlane.xlu1 %581  ;;  %v580_v57 = vpop.xlane.xlu0 %579 }
 0x1ce   : > { %v1695_v58 = vmax.f32 %v1680_v50, %v582_v56  ;;  %v1698_v59 = vmax.f32 %v1682_v51, %v580_v57 }
 0x1d0   : > { %895 = vst.msk [vmem:[#allocation2 + $0x38] sm:$0xff] %vm871_vm1, %v1695_v58  ;;  %894 = vst.msk [vmem:[#allocation2 + $0x30] sm:$0xff] %vm871_vm1, %v1698_v59  ;;  %702 = vperm.xlu1 %1226, %v1678_v49   ;;  %v1941_v34 = vsub.f32 %v1682_v51, %v1698_v59 }
 0x1d1   : > { %v598_v4 = vpop.xlane.xlu1 %597  ;;  %v576_v5 = vpop.xlane.xlu0 %575 }
 0x1d2   : > { %v1714_v6 = vmax.f32 %v1700_v60, %v598_v4  ;;  %v1717_v7 = vmax.f32 %v1702_v63, %v576_v5  ;;  %v643_v40 = vmul.f32 1.442695, %v1941_v34  ;;  %v670_v34 = vld [vmem:[#allocation3 + $0x38] sm:$0xff] }
 0x1d4   : > { %903 = vst.msk [vmem:[#allocation2 + $0x78] sm:$0xff] %vm871_vm1, %v1714_v6  ;;  %892 = vst.msk [vmem:[#allocation2 + $0x20] sm:$0xff] %vm871_vm1, %v1717_v7  ;;  %727 = vperm.xlu1 %1226, %v1698_v59  }
 0x1d5   : > { %v578_v30 = vpop.xlane.xlu1 %577  ;;  %v592_v31 = vpop.xlane.xlu0 %591 }
 0x1d6   : > { %v1733_v38 = vmax.f32 %v1719_v8, %v578_v30  ;;  %v1736_v39 = vmax.f32 %v1721_v15, %v592_v31 }
 0x1d8   : > { %893 = vst.msk [vmem:[#allocation2 + $0x28] sm:$0xff] %vm871_vm1, %v1733_v38  ;;  %900 = vst.msk [vmem:[#allocation2 + $0x60] sm:$0xff] %vm871_vm1, %v1736_v39  ;;  %717 = vperm.xlu1 %1226, %v1717_v7  }
 0x1d9   : > { %v594_v4 = vpop.xlane.xlu1 %593  ;;  %v596_v5 = vpop.xlane.xlu0 %595 }
 0x1da   : > { %v1752_v30 = vmax.f32 %v1738_v46, %v594_v4  ;;  %v1755_v31 = vmax.f32 %v1740_v47, %v596_v5 }
 0x1dc   : > { %901 = vst.msk [vmem:[#allocation2 + $0x68] sm:$0xff] %vm871_vm1, %v1752_v30  ;;  %902 = vst.msk [vmem:[#allocation2 + $0x70] sm:$0xff] %vm871_vm1, %v1755_v31  ;;  %762 = vperm.xlu0 %1227, %v1752_v30   ;;  %757 = vperm.xlu1 %1226, %v1736_v39  }
 0x1e0   : > { %772 = vperm.xlu0 %1227, %v1714_v6   ;;  %732 = vperm.xlu1 %1226, %v1695_v58  }
 0x1e4   : > { %722 = vperm.xlu1 %1226, %v1733_v38  }
 0x1e8   : > { %767 = vperm.xlu1 %1226, %v1755_v31  }
 0x23f   : > { %v708_v4 = vpop.permute.xlu1 %707 }
 0x240   : > { %v777_v5 = vsub.f32 %v1563_v53, %v708_v4 }
 0x242   : > { %v795_v22 = vmul.f32 1.442695, %v777_v5 }
 0x243   : > { %v748_v56 = vpop.permute.xlu1 %747  ;;  %v698_v0 = vpop.permute.xlu0 %697 }
 0x244   : > { %1236 = vpow2.f32 %v795_v22  ;;  %v785_v57 = vsub.f32 %v1565_v54, %v748_v56  ;;  %v775_v23 = vsub.f32 %v1569_v61, %v698_v0 }
 0x246   : > { %v811_v3 = vmul.f32 1.442695, %v785_v57  ;;  %v791_v52 = vmul.f32 1.442695, %v775_v23 }
 0x247   : > { %v738_v55 = vpop.permute.xlu1 %737  ;;  %v753_v44 = vpop.permute.xlu0 %752 }
 0x248   : > { %1238 = vpow2.f32 %v811_v3  ;;  %v783_v36 = vsub.f32 %v1575_v1, %v738_v55  ;;  %v786_v37 = vsub.f32 %v1577_v2, %v753_v44 }
 0x249   : > { %1240 = vpow2.f32 %v791_v52 }
 0x24a   : > { %v807_v45 = vmul.f32 1.442695, %v783_v36  ;;  %v813_v56 = vmul.f32 1.442695, %v786_v37 }
 0x24b   : > { %v713_v53 = vpop.permute.xlu1 %712  ;;  %v743_v22 = vpop.permute.xlu0 %742 }
 0x24c   : > { %1242 = vpow2.f32 %v807_v45  ;;  %v778_v4 = vsub.f32 %v1571_v62, %v713_v53  ;;  %v784_v61 = vsub.f32 %v1581_v9, %v743_v22 }
 0x24e   : > { %v1237_v5 = vpop.eup %1236  ;;  %v797_v54 = vmul.f32 1.442695, %v778_v4  ;;  %v809_v2 = vmul.f32 1.442695, %v784_v61 }
 0x24f   : > { %827 = vadd.xlane.f32.xlu0 %v1237_v5  ;;  %v703_v0 = vpop.permute.xlu1 %702 }
 0x250   : > { %1244 = vpow2.f32 %v797_v54  ;;  %v776_v3 = vsub.f32 %v1583_v10, %v703_v0 }
 0x251   : > { %1246 = vpow2.f32 %v813_v56 }
 0x252   : > { %v1239_v1 = vpop.eup %1238  ;;  %v793_v52 = vmul.f32 1.442695, %v776_v3 }
 0x253   : > { %v1241_v36 = vpop.eup %1240  ;;  %843 = vadd.xlane.f32.xlu0 %v1239_v1  ;;  %v728_v44 = vpop.permute.xlu1 %727 }
 0x254   : > { %1248 = vpow2.f32 %v793_v52  ;;  %v781_v62 = vsub.f32 %v1585_v11, %v728_v44  ;;  %823 = vadd.xlane.f32.xlu1 %v1241_v36 }
 0x255   : > { %1250 = vpow2.f32 %v809_v2 }
 0x256   : > { %v1243_v45 = vpop.eup %1242  ;;  %v803_v37 = vmul.f32 1.442695, %v781_v62 }
 0x257   : > { %839 = vadd.xlane.f32.xlu0 %v1243_v45  ;;  %v718_v9 = vpop.permute.xlu1 %717 }
 0x258   : > { %1252 = vpow2.f32 %v803_v37  ;;  %v779_v55 = vsub.f32 %v1591_v13, %v718_v9 }
 0x25a   : > { %v1245_v10 = vpop.eup %1244  ;;  %v799_v23 = vmul.f32 1.442695, %v779_v55 }
 0x25b   : > { %v758_v57 = vpop.permute.xlu1 %757  ;;  %829 = vadd.xlane.f32.xlu1 %v1245_v10  ;;  %v1247_v4 = vpop.eup %1246 }
 0x25c   : > { %1254 = vpow2.f32 %v799_v23  ;;  %v787_v53 = vsub.f32 %v1597_v16, %v758_v57  ;;  %v763_v11 = vpop.permute.xlu0 %762 }
 0x25d   : > { %v788_v3 = vsub.f32 %v1605_v19, %v763_v11  ;;  %v1937_v11 = vsub.f32 %v1621_v26, %v1635_v32  ;;  %v1940_v26 = vsub.f32 %v1660_v42, %v1675_v48  ;;  %v1942_v42 = vsub.f32 %v1702_v63, %v1717_v7 }
 0x25e   : > { %v1249_v22 = vpop.eup %1248  ;;  %v815_v5 = vmul.f32 1.442695, %v787_v53  ;;  %v1935_v53 = vsub.f32 %v1623_v27, %v1638_v33  ;;  %v1939_v27 = vsub.f32 %v1662_v43, %v1678_v49 }
 0x25f   : > { %825 = vadd.xlane.f32.xlu0 %v1249_v22  ;;  %v733_v54 = vpop.permute.xlu1 %732  ;;  %845 = vadd.xlane.f32.xlu1 %v1247_v4  ;;  %v1251_v61 = vpop.eup %1250  ;;  %v817_v44 = vmul.f32 1.442695, %v788_v3  ;;  %v1936_v22 = vsub.f32 %v1642_v35, %v1658_v41  ;;  %v637_v21 = vmul.f32 1.442695, %v1937_v11  ;;  %v649_v32 = vmul.f32 1.442695, %v1940_v26 }
 0x260   : > { %1256 = vpow2.f32 %v815_v5  ;;  %v782_v56 = vsub.f32 %v1589_v12, %v733_v54  ;;  %v773_v52 = vpop.permute.xlu0 %772  ;;  %v631_v4 = vmul.f32 1.442695, %v1935_v53  ;;  %v673_v54 = vld [vmem:[#allocation3 + $0x50] sm:$0xff]  ;;  %v639_v48 = vmul.f32 1.442695, %v1942_v42  ;;  %v676_v42 = vld [vmem:[#allocation3 + $0x68] sm:$0xff] }
 0x261   : > { %v790_v45 = vsub.f32 %v1595_v14, %v773_v52  ;;  %v635_v14 = vmul.f32 1.442695, %v617_v29  ;;  %v647_v5 = vmul.f32 1.442695, %v1936_v22  ;;  %v665_v29 = vld [vmem:[#allocation3 + $0x10] sm:$0xff] }
 0x262   : > { %v1253_v0 = vpop.eup %1252  ;;  %v805_v13 = vmul.f32 1.442695, %v782_v56  ;;  %v669_v22 = vld [vmem:[#allocation3 + $0x30] sm:$0xff] }
 0x263   : > { %835 = vadd.xlane.f32.xlu0 %v1253_v0  ;;  %v723_v1 = vpop.permute.xlu1 %722  ;;  %841 = vadd.xlane.f32.xlu1 %v1251_v61  ;;  %v821_v19 = vmul.f32 1.442695, %v790_v45  ;;  %v663_v0 = vld [vmem:[#allocation3] sm:$0xff]  ;;  %v1943_v45 = vsub.f32 %v1721_v15, %v1736_v39 }
 0x264   : > { %1258 = vpow2.f32 %v805_v13  ;;  %v780_v16 = vsub.f32 %v1601_v17, %v723_v1  ;;  %v671_v1 = vld [vmem:[#allocation3 + $0x40] sm:$0xff] }
 0x266   : > { %v1255_v36 = vpop.eup %1254  ;;  %v801_v2 = vmul.f32 1.442695, %v780_v16 }
 0x267   : > { %831 = vadd.xlane.f32.xlu0 %v1255_v36  ;;  %v768_v62 = vpop.permute.xlu1 %767 }
 0x268   : > { %1260 = vpow2.f32 %v801_v2  ;;  %v789_v12 = vsub.f32 %v1603_v18, %v768_v62  ;;  %v651_v18 = vmul.f32 1.442695, %v625_v28  ;;  %v633_v28 = vmul.f32 1.442695, %v1939_v27  ;;  %v667_v27 = vld [vmem:[#allocation3 + $0x20] sm:$0xff] }
 0x269   : > { %1262 = vpow2.f32 %v817_v44  ;;  %v666_v44 = vld [vmem:[#allocation3 + $0x18] sm:$0xff] }
 0x26a   : > { %v1257_v37 = vpop.eup %1256  ;;  %v819_v9 = vmul.f32 1.442695, %v789_v12  ;;  %v655_v12 = vmul.f32 1.442695, %v1943_v45  ;;  %v678_v45 = vld [vmem:[#allocation3 + $0x78] sm:$0xff] }
 0x26b   : > { %847 = vadd.xlane.f32.xlu0 %v1257_v37 }
 0x26c   : > { %1264 = vpow2.f32 %v819_v9 }
 0x26d   : > { %1266 = vpow2.f32 %v821_v19  ;;  %v674_v19 = vld [vmem:[#allocation3 + $0x58] sm:$0xff] }
 0x26e   : > { %v1259_v55 = vpop.eup %1258  ;;  %1268 = vpow2.f32 %v635_v14 }
 0x26f   : > { %837 = vadd.xlane.f32.xlu1 %v1259_v55  ;;  %1270 = vpow2.f32 %v651_v18  ;;  %v664_v55 = vld [vmem:[#allocation3 + $0x8] sm:$0xff] }
 0x270   : > { %1272 = vpow2.f32 %v631_v4  ;;  %v672_v4 = vld [vmem:[#allocation3 + $0x48] sm:$0xff] }
 0x271   : > { %1274 = vpow2.f32 %v647_v5 }
 0x272   : > { %v1261_v17 = vpop.eup %1260  ;;  %1276 = vpow2.f32 %v637_v21  ;;  %v1945_v21 = vsub.f32 %v1719_v8, %v1733_v38  ;;  %v1947_v8 = vsub.f32 %v1740_v47, %v1755_v31 }
 0x273   : > { %833 = vadd.xlane.f32.xlu1 %v1261_v17  ;;  %v1263_v10 = vpop.eup %1262  ;;  %1278 = vpow2.f32 %v653_v24 }
 0x274   : > { %1280 = vpow2.f32 %v633_v28  ;;  %v1946_v28 = vsub.f32 %v1738_v46, %v1752_v30  ;;  %v659_v38 = vmul.f32 1.442695, %v1947_v8  ;;  %v1948_v46 = vsub.f32 %v1700_v60, %v1714_v6  ;;  %v911_v8 = vld [vmem:[#allocation2 + $0x18] sm:$0xff] (!%p1114_p11) }
 0x275   : > { %1282 = vpow2.f32 %v649_v32  ;;  %v675_v32 = vld [vmem:[#allocation3 + $0x60] sm:$0xff] }
 0x276   : > { %v1265_v23 = vpop.eup %1264  ;;  %1284 = vpow2.f32 %v643_v40  ;;  %v661_v30 = vmul.f32 1.442695, %v1948_v46 }
 0x277   : > { %851 = vadd.xlane.f32.xlu0 %v1265_v23  ;;  %849 = vadd.xlane.f32.xlu1 %v1263_v10  ;;  %v1267_v57 = vpop.eup %1266  ;;  %1286 = vpow2.f32 %v639_v48  ;;  %v1944_v10 = vsub.f32 %v1680_v50, %v1695_v58  ;;  %v677_v48 = vld [vmem:[#allocation3 + $0x70] sm:$0xff] }
 0x278   : > { %v1269_v25 = vpop.eup %1268  ;;  %1288 = vpow2.f32 %v655_v12 }
 0x279   : > { %v681_v33 = vmul.f32 %v1269_v25, %v665_v29  ;;  %v1271_v35 = vpop.eup %1270  ;;  %v645_v23 = vmul.f32 1.442695, %v1944_v10  ;;  %v641_v25 = vmul.f32 1.442695, %v1945_v21 }
 0x27a   : > { %v1273_v56 = vpop.eup %1272  ;;  %v689_v43 = vmul.f32 %v1271_v35, %v673_v54 }
 0x27b   : > { %853 = vadd.xlane.f32.xlu1 %v1267_v57  ;;  %v1275_v49 = vpop.eup %1274  ;;  %v679_v13 = vmul.f32 %v1273_v56, %v663_v0  ;;  %1290 = vpow2.f32 %v645_v23 }
 0x27c   : > { %v687_v51 = vmul.f32 %v1275_v49, %v671_v1  ;;  %v1277_v59 = vpop.eup %1276  ;;  %1292 = vpow2.f32 %v641_v25 }
 0x27d   : > { %v1279_v37 = vpop.eup %1278  ;;  %v682_v63 = vmul.f32 %v1277_v59, %v666_v44 }
 0x27e   : > { %v1281_v7 = vpop.eup %1280  ;;  %v690_v14 = vmul.f32 %v1279_v37, %v674_v19 }
 0x27f   : > { %v1283_v57 = vpop.eup %1282  ;;  %v680_v15 = vmul.f32 %v1281_v7, %v664_v55 }
 0x280   : > { %v1285_v39 = vpop.eup %1284  ;;  %v688_v50 = vmul.f32 %v1283_v57, %v672_v4 }
 0x281   : > { %v685_v58 = vmul.f32 %v1285_v39, %v669_v22  ;;  %v1287_v29 = vpop.eup %1286 }
 0x282   : > { %v683_v54 = vmul.f32 %v1287_v29, %v667_v27  ;;  %v1289_v56 = vpop.eup %1288  ;;  %v910_v27 = vld [vmem:[#allocation2 + $0x10] sm:$0xff] (!%p1114_p11) }
 0x283   : > { %v691_v0 = vmul.f32 %v1289_v56, %v675_v32 }
 0x285   : > { %v1291_v47 = vpop.eup %1290 }
 0x286   : > { %v1293_v49 = vpop.eup %1292 }
 0x2dc   : > { %v828_v41 = vpop.xlane.xlu0 %827 }
 0x2dd   : > { %v857_v61 = vadd.f32 %v828_v41, %v681_v33  ;;  %v657_v33 = vmul.f32 1.442695, %v1946_v28 }
 0x2df   : > { %874 = vst.msk [vmem:[#allocation3 + $0x10] sm:$0xff] %vm871_vm1, %v857_v61  ;;  %1294 = vpow2.f32 %v657_v33 }
 0x2e0   : > { %v844_v3 = vpop.xlane.xlu0 %843  ;;  %1296 = vpow2.f32 %v659_v38 }
 0x2e1   : > { %v824_v16 = vpop.xlane.xlu1 %823  ;;  %v865_v52 = vadd.f32 %v844_v3, %v689_v43  ;;  %1298 = vpow2.f32 %v661_v30  ;;  %v686_v43 = vmul.f32 %v1291_v47, %v670_v34  ;;  %v668_v3 = vld [vmem:[#allocation3 + $0x28] sm:$0xff]  ;;  %v914_v34 = vld [vmem:[#allocation2 + $0x30] sm:$0xff] (!%p1114_p11) }
 0x2e2   : > { %v855_v36 = vadd.f32 %v824_v16, %v679_v13  ;;  %v684_v60 = vmul.f32 %v1293_v49, %v668_v3  ;;  %v913_v30 = vld [vmem:[#allocation2 + $0x28] sm:$0xff] (!%p1114_p11) }
 0x2e3   : > { %882 = vst.msk [vmem:[#allocation3 + $0x50] sm:$0xff] %vm871_vm1, %v865_v52 }
 0x2e4   : > { %872 = vst.msk [vmem:[#allocation3] sm:$0xff] %vm871_vm1, %v855_v36  ;;  %v840_v2 = vpop.xlane.xlu0 %839 }
 0x2e5   : > { %v863_v62 = vadd.f32 %v840_v2, %v687_v51 }
 0x2e7   : > { %880 = vst.msk [vmem:[#allocation3 + $0x40] sm:$0xff] %vm871_vm1, %v863_v62 }
 0x2e8   : > { %v830_v9 = vpop.xlane.xlu1 %829 }
 0x2e9   : > { %v858_v17 = vadd.f32 %v830_v9, %v682_v63  ;;  %v1295_v16 = vpop.eup %1294 }
 0x2ea   : > { %v1297_v6 = vpop.eup %1296  ;;  %v692_v51 = vmul.f32 %v1295_v16, %v676_v42 }
 0x2eb   : > { %875 = vst.msk [vmem:[#allocation3 + $0x18] sm:$0xff] %vm871_vm1, %v858_v17  ;;  %v693_v59 = vmul.f32 %v1297_v6, %v677_v48  ;;  %v1299_v2 = vpop.eup %1298  ;;  %v924_v19 = vld [vmem:[#allocation3] sm:$0xff] (!%p1114_p11)  ;;  %v926_v17 = vld [vmem:[#allocation3 + $0x10] sm:$0xff] (!%p1114_p11)  ;;  %v917_v48 = vld [vmem:[#allocation2 + $0x48] sm:$0xff] (!%p1114_p11) }
 0x2ec   : > { %v846_v18 = vpop.xlane.xlu1 %845  ;;  %v826_v53 = vpop.xlane.xlu0 %825  ;;  %v694_v63 = vmul.f32 %v1299_v2, %v678_v45  ;;  %1300 = vlog2.f32 (!%p1114_p11), %v924_v19  ;;  %v918_v2 = vld [vmem:[#allocation2 + $0x50] sm:$0xff] (!%p1114_p11) }
 0x2ed   : > { %v866_v5 = vadd.f32 %v846_v18, %v690_v14  ;;  %v856_v11 = vadd.f32 %v826_v53, %v680_v15  ;;  %v934_v53 = vld [vmem:[#allocation3 + $0x50] sm:$0xff] (!%p1114_p11) }
 0x2ee   : > { %v932_v39 = vld [vmem:[#allocation3 + $0x40] sm:$0xff] (!%p1114_p11) }
 0x2ef   : > { %883 = vst.msk [vmem:[#allocation3 + $0x58] sm:$0xff] %vm871_vm1, %v866_v5  ;;  %873 = vst.msk [vmem:[#allocation3 + $0x8] sm:$0xff] %vm871_vm1, %v856_v11  ;;  %v908_v11 = vld [vmem:[#allocation2] sm:$0xff] (!%p1114_p11) }
 0x2f0   : > { %v842_v20 = vpop.xlane.xlu1 %841  ;;  %v836_v24 = vpop.xlane.xlu0 %835 }
 0x2f1   : > { %v864_v35 = vadd.f32 %v842_v20, %v688_v50  ;;  %v861_v41 = vadd.f32 %v836_v24, %v685_v58  ;;  %v909_v58 = vld [vmem:[#allocation2 + $0x8] sm:$0xff] (!%p1114_p11) }
 0x2f2   : > { %v927_v10 = vld [vmem:[#allocation3 + $0x18] sm:$0xff] (!%p1114_p11) }
 0x2f3   : > { %881 = vst.msk [vmem:[#allocation3 + $0x48] sm:$0xff] %vm871_vm1, %v864_v35  ;;  %878 = vst.msk [vmem:[#allocation3 + $0x30] sm:$0xff] %vm871_vm1, %v861_v41 }
 0x2f4   : > { %v832_v26 = vpop.xlane.xlu0 %831 }
 0x2f5   : > { %v859_v61 = vadd.f32 %v832_v26, %v683_v54  ;;  %v912_v26 = vld [vmem:[#allocation2 + $0x20] sm:$0xff] (!%p1114_p11) }
 0x2f6   : > { %v925_v55 = vld [vmem:[#allocation3 + $0x8] sm:$0xff] (!%p1114_p11)  ;;  %v935_v4 = vld [vmem:[#allocation3 + $0x58] sm:$0xff] (!%p1114_p11)  ;;  %v1301_v5 = vpop.eup (!%p1114_p11), %1300 }
 0x2f7   : > { %876 = vst.msk [vmem:[#allocation3 + $0x20] sm:$0xff] %vm871_vm1, %v859_v61  ;;  %1302 = vlog2.f32 (!%p1114_p11), %v925_v55  ;;  %v941_v50 = vmul.f32 (!%p1114_p11), 0.6931472, %v1301_v5 }
 0x2f8   : > { %v848_v31 = vpop.xlane.xlu0 %847  ;;  %1304 = vlog2.f32 (!%p1114_p11), %v926_v17 }
 0x2f9   : > { %v867_v40 = vadd.f32 %v848_v31, %v691_v0  ;;  %1306 = vlog2.f32 (!%p1114_p11), %v927_v10  ;;  %v972_v35 = vadd.f32 (!%p1114_p11), %v941_v50, %v908_v11  ;;  %v921_v10 = vld [vmem:[#allocation2 + $0x68] sm:$0xff] (!%p1114_p11) }
 0x2fa   : > { %v930_v14 = vld [vmem:[#allocation3 + $0x30] sm:$0xff] (!%p1114_p11)  ;;  %v933_v18 = vld [vmem:[#allocation3 + $0x48] sm:$0xff] (!%p1114_p11) }
 0x2fb   : > { %884 = vst.msk [vmem:[#allocation3 + $0x60] sm:$0xff] %vm871_vm1, %v867_v40  ;;  %988 = vst.msk [vmem:[%s1934_s3] sm:$0xff] (!%p1114_p11), %vm871_vm1, %v972_v35 }
 0x2fc   : > { %v838_v13 = vpop.xlane.xlu1 %837 }
 0x2fd   : > { %v862_v1 = vadd.f32 %v838_v13, %v686_v43  ;;  %v915_v13 = vld [vmem:[#allocation2 + $0x38] sm:$0xff] (!%p1114_p11) }
 0x2fe   : > { %v928_v23 = vld [vmem:[#allocation3 + $0x20] sm:$0xff] (!%p1114_p11) }
 0x2ff   : > { %879 = vst.msk [vmem:[#allocation3 + $0x38] sm:$0xff] %vm871_vm1, %v862_v1  ;;  %1308 = vlog2.f32 (!%p1114_p11), %v928_v23 }
 0x300   : > { %v834_v52 = vpop.xlane.xlu1 %833 }
 0x301   : > { %v860_v36 = vadd.f32 %v834_v52, %v684_v60  ;;  %v1303_v25 = vpop.eup (!%p1114_p11), %1302  ;;  %v916_v60 = vld [vmem:[#allocation2 + $0x40] sm:$0xff] (!%p1114_p11) }
 0x302   : > { %v936_v22 = vld [vmem:[#allocation3 + $0x60] sm:$0xff] (!%p1114_p11)  ;;  %v1305_v20 = vpop.eup (!%p1114_p11), %1304  ;;  %v943_v24 = vmul.f32 (!%p1114_p11), 0.6931472, %v1303_v25 }
 0x303   : > { %877 = vst.msk [vmem:[#allocation3 + $0x28] sm:$0xff] %vm871_vm1, %v860_v36  ;;  %v1307_v33 = vpop.eup (!%p1114_p11), %1306  ;;  %v945_v41 = vmul.f32 (!%p1114_p11), 0.6931472, %v1305_v20 }
 0x304   : > { %v850_v44 = vpop.xlane.xlu1 %849  ;;  %v852_v62 = vpop.xlane.xlu0 %851  ;;  %v973_v54 = vadd.f32 (!%p1114_p11), %v943_v24, %v909_v58  ;;  %v947_v56 = vmul.f32 (!%p1114_p11), 0.6931472, %v1307_v33 }
 0x305   : > { %v868_v12 = vadd.f32 %v850_v44, %v692_v51  ;;  %v869_v37 = vadd.f32 %v852_v62, %v693_v59  ;;  %907 = sbr.rel (%p1114_p11) target bundleno = 805 (0x325), region = 81  ;;  %v974_v61 = vadd.f32 (!%p1114_p11), %v945_v41, %v910_v27 }
 0x306   : > { %v931_v15 = vld [vmem:[#allocation3 + $0x38] sm:$0xff] (!%p1114_p11)  ;;  %989 = vst.msk [vmem:[%s1934_s3 + $0x8] sm:$0xff] (!%p1114_p11), %vm871_vm1, %v973_v54  ;;  %v975_v47 = vadd.f32 (!%p1114_p11), %v947_v56, %v911_v8 }
 0x307   : > { %885 = vst.msk [vmem:[#allocation3 + $0x68] sm:$0xff] %vm871_vm1, %v868_v12  ;;  %886 = vst.msk [vmem:[#allocation3 + $0x70] sm:$0xff] %vm871_vm1, %v869_v37  ;;  %v919_v12 = vld [vmem:[#allocation2 + $0x58] sm:$0xff] (!%p1114_p11) }
 0x308   : > { %v854_v7 = vpop.xlane.xlu1 %853  ;;  %990 = vst.msk [vmem:[%s1934_s3 + $0x10] sm:$0xff] (!%p1114_p11), %vm871_vm1, %v974_v61  ;;  %991 = vst.msk [vmem:[%s1934_s3 + $0x18] sm:$0xff] (!%p1114_p11), %vm871_vm1, %v975_v47 }
 0x309   : > { %v870_v9 = vadd.f32 %v854_v7, %v694_v63  ;;  %v1309_v38 = vpop.eup (!%p1114_p11), %1308 }
 0x30a   : > { %v929_v57 = vld [vmem:[#allocation3 + $0x28] sm:$0xff] (!%p1114_p11)  ;;  %v949_v46 = vmul.f32 (!%p1114_p11), 0.6931472, %v1309_v38 }
 0x30b   : > { %887 = vst.msk [vmem:[#allocation3 + $0x78] sm:$0xff] %vm871_vm1, %v870_v9  ;;  %1310 = vlog2.f32 (!%p1114_p11), %v929_v57  ;;  %v920_v9 = vld [vmem:[#allocation2 + $0x60] sm:$0xff] (!%p1114_p11) }
 0x30c   : > { %1312 = vlog2.f32 %v930_v14  ;;  %v976_v43 = vadd.f32 %v949_v46, %v912_v26 }
 0x30d   : > { %1314 = vlog2.f32 %v931_v15  ;;  %v922_v15 = vld [vmem:[#allocation2 + $0x70] sm:$0xff] }
 0x30e   : > { %1316 = vlog2.f32 %v932_v39  ;;  %v937_v21 = vld [vmem:[#allocation3 + $0x68] sm:$0xff]  ;;  %v938_v29 = vld [vmem:[#allocation3 + $0x70] sm:$0xff]  ;;  %992 = vst.msk [vmem:[%s1934_s3 + $0x20] sm:$0xff] %vm871_vm1, %v976_v43 }
 0x30f   : > { %1318 = vlog2.f32 %v933_v18 }
 0x310   : > { %1320 = vlog2.f32 %v934_v53 }
 0x311   : > { %1322 = vlog2.f32 %v935_v4  ;;  %v923_v4 = vld [vmem:[#allocation2 + $0x78] sm:$0xff] }
 0x312   : > { %1324 = vlog2.f32 %v936_v22  ;;  %v939_v28 = vld [vmem:[#allocation3 + $0x78] sm:$0xff] }
 0x313   : > { %1326 = vlog2.f32 %v937_v21 }
 0x314   : > { %1328 = vlog2.f32 %v938_v29 }
 0x315   : > { %v1311_v32 = vpop.eup %1310  ;;  %1330 = vlog2.f32 %v939_v28 }
 0x316   : > { %v1313_v0 = vpop.eup %1312  ;;  %v951_v31 = vmul.f32 0.6931472, %v1311_v32 }
 0x317   : > { %v1315_v40 = vpop.eup %1314  ;;  %v953_v49 = vmul.f32 0.6931472, %v1313_v0 }
 0x318   : > { %v1317_v3 = vpop.eup %1316  ;;  %v977_v1 = vadd.f32 %v951_v31, %v913_v30  ;;  %v955_v16 = vmul.f32 0.6931472, %v1315_v40 }
 0x319   : > { %v1319_v6 = vpop.eup %1318  ;;  %v978_v52 = vadd.f32 %v953_v49, %v914_v34  ;;  %v957_v42 = vmul.f32 0.6931472, %v1317_v3 }
 0x31a   : > { %v1321_v36 = vpop.eup %1320  ;;  %993 = vst.msk [vmem:[%s1934_s3 + $0x28] sm:$0xff] %vm871_vm1, %v977_v1  ;;  %v979_v51 = vadd.f32 %v955_v16, %v915_v13  ;;  %v959_v59 = vmul.f32 0.6931472, %v1319_v6 }
 0x31b   : > { %v1323_v44 = vpop.eup %1322  ;;  %994 = vst.msk [vmem:[%s1934_s3 + $0x30] sm:$0xff] %vm871_vm1, %v978_v52  ;;  %v980_v62 = vadd.f32 %v957_v42, %v916_v60  ;;  %v961_v45 = vmul.f32 0.6931472, %v1321_v36 }
 0x31c   : > { %v1325_v37 = vpop.eup %1324  ;;  %995 = vst.msk [vmem:[%s1934_s3 + $0x38] sm:$0xff] %vm871_vm1, %v979_v51  ;;  %v981_v63 = vadd.f32 %v959_v59, %v917_v48  ;;  %v963_v7 = vmul.f32 0.6931472, %v1323_v44 }
 0x31d   : > { %v1327_v19 = vpop.eup %1326  ;;  %996 = vst.msk [vmem:[%s1934_s3 + $0x40] sm:$0xff] %vm871_vm1, %v980_v62  ;;  %v982_v55 = vadd.f32 %v961_v45, %v918_v2  ;;  %v965_v17 = vmul.f32 0.6931472, %v1325_v37 }
 0x31e   : > { %v1329_v23 = vpop.eup %1328  ;;  %997 = vst.msk [vmem:[%s1934_s3 + $0x48] sm:$0xff] %vm871_vm1, %v981_v63  ;;  %v983_v57 = vadd.f32 %v963_v7, %v919_v12  ;;  %v967_v14 = vmul.f32 0.6931472, %v1327_v19 }
 0x31f   : > { %v1331_v39 = vpop.eup %1330  ;;  %998 = vst.msk [vmem:[%s1934_s3 + $0x50] sm:$0xff] %vm871_vm1, %v982_v55  ;;  %v984_v18 = vadd.f32 %v965_v17, %v920_v9  ;;  %v969_v53 = vmul.f32 0.6931472, %v1329_v23 }
 0x320   : > { %999 = vst.msk [vmem:[%s1934_s3 + $0x58] sm:$0xff] %vm871_vm1, %v983_v57  ;;  %v985_v22 = vadd.f32 %v967_v14, %v921_v10  ;;  %v971_v5 = vmul.f32 0.6931472, %v1331_v39 }
 0x321   : > { %1000 = vst.msk [vmem:[%s1934_s3 + $0x60] sm:$0xff] %vm871_vm1, %v984_v18  ;;  %v986_v11 = vadd.f32 %v969_v53, %v922_v15 }
 0x322   : > { %1001 = vst.msk [vmem:[%s1934_s3 + $0x68] sm:$0xff] %vm871_vm1, %v985_v22  ;;  %v987_v21 = vadd.f32 %v971_v5, %v923_v4 }
 0x323   : > { %1002 = vst.msk [vmem:[%s1934_s3 + $0x70] sm:$0xff] %vm871_vm1, %v986_v11 }
 0x324   : > { %1003 = vst.msk [vmem:[%s1934_s3 + $0x78] sm:$0xff] %vm871_vm1, %v987_v21 }
 0x325 PF: > { %s13_s16 = sadd.s32 1, %s1370_s16   ;;  %s1949_s12 = smov %s1358_s13 }
 0x326   : > { %p10_p12 = scmp.ge.s32.totalorder %s13_s16, 5   ;;  %s1950_s13 = smov %s1430_s20 }
 0x327   : > { %s1951_s14 = smov %s1366_s15  ;;  %s1952_s15 = smov %s1954_s17 }
 0x328   :  { %12 = sbr.rel (!%p10_p12) target bundleno = 3 (0x3), region = 122 }

// kernel: encoder_decoder_forward.4
= control target key start
LH: loop header
LB: loop body
LE: loop exit
PB: predicated region body
PF: predicated region fallthrough
CT: control target
= control target key end

     0   :  { %s2170_s24 = smov 0   ;;  %s3535_s0 = inlined_call_operand.vmem [shape: bf16[16,8,128], index: 0, kind: input, shape index: {}]   ;;  %s3536_s1 = inlined_call_operand.vmem [shape: bf16[256,512], index: 1, kind: input, shape index: {}]   ;;  %s3537_s2 = inlined_call_operand.vmem [shape: f32[1,512], index: 2, kind: input, shape index: {}]   ;;  %s3538_s3 = inlined_call_operand.vmem [shape: s32[8,1], index: 3, kind: input, shape index: {}]   ;;  %s3539_s4 = inlined_call_operand.vmem [shape: f32[8,128], index: 4, kind: input, shape index: {}]   ;;  %s3540_s5 = inlined_call_operand.vmem [shape: f32[8,128], index: 5, kind: input, shape index: {}]   ;;  %s3541_s6 = inlined_call_operand.vmem [shape: f32[8,128], index: 6, kind: output, shape index: {0}]   ;;  %s3542_s7 = inlined_call_operand.vmem [shape: f32[8,128], index: 7, kind: output, shape index: {1}]  }
   0x1 LB: > { %s2176_s25 = sadd.s32 4294967295, %s2127_s24   ;;  %p1702_p0 = scmp.ge.s32.totalorder %s2127_s24, 1  ;;  %s2127_s24 = sphi %s2170_s24, %s18_s24  }
   0x2   : > { %p231_p1 = scmp.lt.s32.totalorder %s2127_s24, 3 }
   0x4   : > { %p232_p2 = pnand %p1702_p0, %p231_p1 }
   0x6   : > { %235 = sbr.rel (%p232_p2) target bundleno = 2175 (0x87f), region = 44 }
   0xd   : > { %s2181_s26 = sshll.u32 %s2176_s25, 3  ;;  %p1705_p4 = scmp.ne.s32.totalorder %s2176_s25, 0 }
   0xe   : > { %p259_p3 = scmp.lt.s32.totalorder %s2181_s26, 15  ;;  %v268_v0 = vld [vmem:[%s3539_s4] sm:$0xff] (!%p1705_p4) }
   0xf   : > { %267 = sbr.rel (%p1705_p4) target bundleno = 22 (0x16), region = 48  ;;  %v270_v1 = vld [vmem:[%s3540_s5] sm:$0xff] (!%p1705_p4)  ;;  %269 = vst [vmem:[#allocation2] sm:$0xff] (!%p1705_p4), %v268_v0  ;;  %273 = vst [vmem:[#allocation4] sm:$0xff] (!%p1705_p4), %v268_v0 }
  0x10   : > { %s260_s27 = scalar_select %p259_p3, %s2181_s26, 15 }
  0x11   : > { %271 = vst [vmem:[#allocation3] sm:$0xff] (!%p1705_p4), %v270_v1  ;;  %275 = vst [vmem:[#allocation5] sm:$0xff] (!%p1705_p4), %v270_v1 }
  0x12   : > { %s1704_s28 = sshll.u32 %s260_s27, 2 }
  0x13   : > { %s2188_s8 = scalar_lea.vmem %s3535_s0, %s1704_s28 }
  0x16 PF: > { %v2200_v2 = vld [vmem:[%s3536_s1 + $0x4] ss:$16 sps:$4 sm:$0xff]   ;;  %v2205_v3 = vld [vmem:[%s3536_s1] ss:$16 sps:$4 sm:$0xff]   ;;  %v3543_v4 = vmov 0   ;;  %v799_v53 = vstv %s2181_s26  ;;  %s919_s10 = sadd.s32 1, %s2181_s26 }
  0x17   : > { %3660 = vst [vmem:[#allocation6_spill] sm:$0xff] %v2200_v2  ;;  %1823 = vset.pattern.permute.xlu0 %v3543_v4  ;;  %1824 = vset.pattern.permute.xlu1 %v3543_v4  ;;  %v2213_v5 = vld [vmem:[%s3536_s1 + $0x24] ss:$16 sps:$4 sm:$0xff]   ;;  %v2219_v6 = vld [vmem:[%s3536_s1 + $0x20] ss:$16 sps:$4 sm:$0xff]   ;;  %s1040_s13 = sadd.s32 2, %s2181_s26 }
  0x18   : > { %693 = vmatprep.subr.bf16.mxu0 %v2200_v2  ;;  %v2225_v7 = vld [vmem:[%s3536_s1 + $0x44] ss:$16 sps:$4 sm:$0xff]   ;;  %v2230_v8 = vld [vmem:[%s3536_s1 + $0xc] ss:$16 sps:$4 sm:$0xff]   ;;  %v2235_v9 = vld [vmem:[%s3536_s1 + $0x8] ss:$16 sps:$4 sm:$0xff]  }
  0x19   : > { %694 = vmatpush1.bf16.msra.mxu0 %v2205_v3  ;;  %3661 = vst [vmem:[#allocation7_spill] sm:$0xff] %v2230_v8  ;;  %v2241_v10 = vld [vmem:[%s3536_s1 + $0x40] ss:$16 sps:$4 sm:$0xff]   ;;  %734 = vmatprep.subr.bf16.mxu1 %v2230_v8  ;;  %v2248_v11 = vld [vmem:[%s3536_s1 + $0x64] ss:$16 sps:$4 sm:$0xff]   ;;  %s1161_s16 = sadd.s32 3, %s2181_s26 }
  0x1a   : > { %695 = vmatprep.subr.bf16.mxu0 %v2213_v5  ;;  %735 = vmatpush1.bf16.msra.mxu1 %v2235_v9  ;;  %v2254_v12 = vld [vmem:[%s3536_s1 + $0x2c] ss:$16 sps:$4 sm:$0xff]   ;;  %v2259_v13 = vld [vmem:[%s3536_s1 + $0x28] ss:$16 sps:$4 sm:$0xff]   ;;  %v2266_v14 = vld [vmem:[%s3536_s1 + $0x60] ss:$16 sps:$4 sm:$0xff]  }
  0x1b   : > { %736 = vmatprep.subr.bf16.mxu1 %v2254_v12  ;;  %v2271_v15 = vld [vmem:[%s3536_s1 + $0x84] ss:$16 sps:$4 sm:$0xff]   ;;  %v2276_v16 = vld [vmem:[%s3536_s1 + $0x4c] ss:$16 sps:$4 sm:$0xff]   ;;  %v2283_v17 = vld [vmem:[%s3536_s1 + $0x48] ss:$16 sps:$4 sm:$0xff]  }
  0x1c   : > { %v2289_v18 = vld [vmem:[%s3536_s1 + $0x6c] ss:$16 sps:$4 sm:$0xff]   ;;  %v2295_v19 = vld [vmem:[%s3536_s1 + $0x80] ss:$16 sps:$4 sm:$0xff]   ;;  %v2301_v20 = vld [vmem:[%s3536_s1 + $0xa4] ss:$16 sps:$4 sm:$0xff]  }
  0x1d   : > { %696 = vmatpush1.bf16.msra.mxu0 %v2219_v6  ;;  %v2307_v21 = vld [vmem:[%s3536_s1 + $0x68] ss:$16 sps:$4 sm:$0xff]   ;;  %v2313_v22 = vld [vmem:[%s3536_s1 + $0x8c] ss:$16 sps:$4 sm:$0xff]   ;;  %v2319_v23 = vld [vmem:[%s3536_s1 + $0xa0] ss:$16 sps:$4 sm:$0xff]  }
  0x1e   : > { %697 = vmatprep.subr.bf16.mxu0 %v2225_v7  ;;  %737 = vmatpush1.bf16.msra.mxu1 %v2259_v13  ;;  %v2324_v24 = vld [vmem:[%s3536_s1 + $0xc4] ss:$16 sps:$4 sm:$0xff]   ;;  %v2331_v25 = vld [vmem:[%s3536_s1 + $0x88] ss:$16 sps:$4 sm:$0xff]   ;;  %v2337_v26 = vld [vmem:[%s3536_s1 + $0xac] ss:$16 sps:$4 sm:$0xff]  }
  0x1f   : > { %738 = vmatprep.subr.bf16.mxu1 %v2276_v16  ;;  %v2343_v27 = vld [vmem:[%s3536_s1 + $0xc0] ss:$16 sps:$4 sm:$0xff]   ;;  %v2349_v28 = vld [vmem:[%s3536_s1 + $0xe4] ss:$16 sps:$4 sm:$0xff]   ;;  %v2355_v29 = vld [vmem:[%s3536_s1 + $0xa8] ss:$16 sps:$4 sm:$0xff]  }
  0x20   : > { %v2361_v30 = vld [vmem:[%s3536_s1 + $0xcc] ss:$16 sps:$4 sm:$0xff]   ;;  %v2367_v31 = vld [vmem:[%s3536_s1 + $0xe0] ss:$16 sps:$4 sm:$0xff]   ;;  %v2372_v32 = vld [vmem:[%s3536_s1 + $0x104] ss:$16 sps:$4 sm:$0xff]  }
  0x21   : > { %698 = vmatpush1.bf16.msra.mxu0 %v2241_v10  ;;  %v2379_v33 = vld [vmem:[%s3536_s1 + $0xc8] ss:$16 sps:$4 sm:$0xff]   ;;  %v2385_v34 = vld [vmem:[%s3536_s1 + $0xec] ss:$16 sps:$4 sm:$0xff]   ;;  %v2391_v35 = vld [vmem:[%s3536_s1 + $0x100] ss:$16 sps:$4 sm:$0xff]  }
  0x22   : > { %699 = vmatprep.subr.bf16.mxu0 %v2248_v11  ;;  %739 = vmatpush1.bf16.msra.mxu1 %v2283_v17  ;;  %v2397_v36 = vld [vmem:[%s3536_s1 + $0x124] ss:$16 sps:$4 sm:$0xff]   ;;  %v2403_v37 = vld [vmem:[%s3536_s1 + $0xe8] ss:$16 sps:$4 sm:$0xff]   ;;  %v2409_v38 = vld [vmem:[%s3536_s1 + $0x10c] ss:$16 sps:$4 sm:$0xff]  }
  0x23   : > { %740 = vmatprep.subr.bf16.mxu1 %v2289_v18  ;;  %v2415_v39 = vld [vmem:[%s3536_s1 + $0x120] ss:$16 sps:$4 sm:$0xff]   ;;  %v2420_v40 = vld [vmem:[%s3536_s1 + $0x144] ss:$16 sps:$4 sm:$0xff]   ;;  %v2427_v41 = vld [vmem:[%s3536_s1 + $0x108] ss:$16 sps:$4 sm:$0xff]  }
  0x24   : > { %v2433_v42 = vld [vmem:[%s3536_s1 + $0x12c] ss:$16 sps:$4 sm:$0xff]   ;;  %v343_v43 = vld [vmem:[#allocation2] sm:$0xff]  ;;  %v2451_v47 = vld [vmem:[%s3536_s1 + $0x128] ss:$16 sps:$4 sm:$0xff]   ;;  %s1403_s11 = sadd.s32 5, %s2181_s26 }
  0x25   : > { %700 = vmatpush1.bf16.msra.mxu0 %v2266_v14  ;;  %v2439_v44 = vld [vmem:[%s3536_s1 + $0x140] ss:$16 sps:$4 sm:$0xff]   ;;  %v351_v45 = vpack.c.bf16 %v343_v43, %v343_v43  ;;  %v2445_v46 = vld [vmem:[%s3536_s1 + $0x164] ss:$16 sps:$4 sm:$0xff]   ;;  %v2457_v48 = vld [vmem:[%s3536_s1 + $0x14c] ss:$16 sps:$4 sm:$0xff]  }
  0x26   : > { %701 = vmatprep.subr.bf16.mxu0 %v2271_v15  ;;  %741 = vmatpush1.bf16.msra.mxu1 %v2307_v21  ;;  %3662 = vst [vmem:[#allocation8_spill] sm:$0xff] %v2445_v46  ;;  %v2462_v49 = vld [vmem:[%s3536_s1 + $0x160] ss:$16 sps:$4 sm:$0xff]   ;;  %v2468_v50 = vld [vmem:[%s3536_s1 + $0x184] ss:$16 sps:$4 sm:$0xff]   ;;  %s1524_s12 = sadd.s32 6, %s2181_s26 }
  0x27   : > { %742 = vmatprep.subr.bf16.mxu1 %v2313_v22  ;;  %725 = vmatprep.mubr.bf16.mxu0 %v351_v45  ;;  %3663 = vst [vmem:[#allocation9_spill] sm:$0xff] %v2462_v49  ;;  %3664 = vst [vmem:[#allocation10_spill] sm:$0xff] %v2468_v50  ;;  %v2473_v51 = vld [vmem:[%s3536_s1 + $0x148] ss:$16 sps:$4 sm:$0xff]   ;;  %v341_v52 = vld [vmem:[%s3538_s3] sm:$0xff]  ;;  %p1811_p5 = scmp.ne.s32.totalorder %s2176_s25, 1 }
  0x28   : > { %766 = vmatprep.mubr.bf16.mxu1 %v351_v45  ;;  %3665 = vst [vmem:[#allocation11_spill] sm:$0xff] %v2473_v51  ;;  %v2484_v54 = vld [vmem:[%s3536_s1 + $0x16c] ss:$16 sps:$4 sm:$0xff]   ;;  %v2486_v55 = vadd.s32 4294967295, %v341_v52  ;;  %v2494_v56 = vld [vmem:[%s3536_s1 + $0x180] ss:$16 sps:$4 sm:$0xff]  }
  0x29   : > { %702 = vmatpush1.bf16.msra.mxu0 %v2295_v19  ;;  %3666 = vst [vmem:[#allocation12_spill] sm:$0xff] %v2484_v54  ;;  %3668 = vst [vmem:[#allocation14_spill] sm:$0xff] %v2494_v56  ;;  %v2501_v58 = vld [vmem:[%s3536_s1 + $0x1a4] ss:$16 sps:$4 sm:$0xff]   ;;  %v2507_v59 = vld [vmem:[%s3536_s1 + $0x168] ss:$16 sps:$4 sm:$0xff]  }
  0x2a   : > { %703 = vmatprep.subr.bf16.mxu0 %v2301_v20  ;;  %743 = vmatpush1.bf16.msra.mxu1 %v2331_v25  ;;  %3667 = vst [vmem:[#allocation13_spill] sm:$0xff] %v2486_v55  ;;  %vm800_vm0 = vcmp.eq.s32.totalorder %v2486_v55, %v799_v53  ;;  %3669 = vst [vmem:[#allocation15_spill] sm:$0xff] %v2501_v58  ;;  %v2513_v60 = vld [vmem:[%s3536_s1 + $0x18c] ss:$16 sps:$4 sm:$0xff]   ;;  %v2519_v61 = vld [vmem:[%s3536_s1 + $0x1a0] ss:$16 sps:$4 sm:$0xff]  }
  0x2b   : > { %744 = vmatprep.subr.bf16.mxu1 %v2337_v26  ;;  %v801_v57 = vsel %vm800_vm0, 1, %v3543_v4  ;;  %3670 = vst [vmem:[#allocation16_spill] sm:$0xff] %v2507_v59  ;;  %3671 = vst [vmem:[#allocation17_spill] sm:$0xff] %v2513_v60  ;;  %v2525_v62 = vld [vmem:[%s3536_s1 + $0x1c4] ss:$16 sps:$4 sm:$0xff]  }
  0x2c   : > { %803 = vperm.xlu0 %1823, %v801_v57   ;;  %3672 = vst [vmem:[#allocation18_spill] sm:$0xff] %v2519_v61  ;;  %3673 = vst [vmem:[#allocation19_spill] sm:$0xff] %v2525_v62  ;;  %v2531_v63 = vld [vmem:[%s3536_s1 + $0x188] ss:$16 sps:$4 sm:$0xff]   ;;  %v2537_v0 = vld [vmem:[%s3536_s1 + $0x1ac] ss:$16 sps:$4 sm:$0xff]  }
  0x2d   : > { %704 = vmatpush1.bf16.msra.mxu0 %v2319_v23  ;;  %3674 = vst [vmem:[#allocation20_spill] sm:$0xff] %v2531_v63  ;;  %3675 = vst [vmem:[#allocation21_spill] sm:$0xff] %v2537_v0  ;;  %v2543_v1 = vld [vmem:[%s3536_s1 + $0x1c0] ss:$16 sps:$4 sm:$0xff]   ;;  %v2549_v43 = vld [vmem:[%s3536_s1 + $0x1e4] ss:$16 sps:$4 sm:$0xff]  }
  0x2e   : > { %705 = vmatprep.subr.bf16.mxu0 %v2324_v24  ;;  %745 = vmatpush1.bf16.msra.mxu1 %v2355_v29  ;;  %3676 = vst [vmem:[#allocation22_spill] sm:$0xff] %v2543_v1  ;;  %3677 = vst [vmem:[#allocation23_spill] sm:$0xff] %v2549_v43  ;;  %v2555_v45 = vld [vmem:[%s3536_s1 + $0x1a8] ss:$16 sps:$4 sm:$0xff]   ;;  %v2561_v52 = vld [vmem:[%s3536_s1 + $0x1cc] ss:$16 sps:$4 sm:$0xff]  }
  0x2f   : > { %746 = vmatprep.subr.bf16.mxu1 %v2361_v30  ;;  %3678 = vst [vmem:[#allocation24_spill] sm:$0xff] %v2555_v45  ;;  %3679 = vst [vmem:[#allocation25_spill] sm:$0xff] %v2561_v52  ;;  %v2567_v53 = vld [vmem:[%s3536_s1 + $0x1e0] ss:$16 sps:$4 sm:$0xff]   ;;  %v2574_v57 = vld [vmem:[%s3536_s1 + $0x1c8] ss:$16 sps:$4 sm:$0xff]  }
  0x30   : > { %3680 = vst [vmem:[#allocation26_spill] sm:$0xff] %v2567_v53  ;;  %3681 = vst [vmem:[#allocation27_spill] sm:$0xff] %v2574_v57  ;;  %v2580_v4 = vld [vmem:[%s3536_s1 + $0x1ec] ss:$16 sps:$4 sm:$0xff]   ;;  %v1912_v55 = vld [vmem:[%s2188_s8] ss:$0 sps:$4 sm:$0xff]  }
  0x31   : > { %706 = vmatpush1.bf16.msra.mxu0 %v2343_v27  ;;  %3682 = vst [vmem:[#allocation28_spill] sm:$0xff] %v2580_v4 }
  0x32   : > { %707 = vmatprep.subr.bf16.mxu0 %v2349_v28  ;;  %747 = vmatpush1.bf16.msra.mxu1 %v2379_v33 }
  0x33   : > { %748 = vmatprep.subr.bf16.mxu1 %v2385_v34 }
  0x35   : > { %708 = vmatpush1.bf16.msra.mxu0 %v2367_v31 }
  0x36   : > { %709 = vmatprep.subr.bf16.mxu0 %v2372_v32  ;;  %749 = vmatpush1.bf16.msra.mxu1 %v2403_v37 }
  0x37   : > { %750 = vmatprep.subr.bf16.mxu1 %v2409_v38 }
  0x39   : > { %710 = vmatpush1.bf16.msra.mxu0 %v2391_v35 }
  0x3a   : > { %711 = vmatprep.subr.bf16.mxu0 %v2397_v36  ;;  %751 = vmatpush1.bf16.msra.mxu1 %v2427_v41 }
  0x3b   : > { %752 = vmatprep.subr.bf16.mxu1 %v2433_v42 }
  0x3d   : > { %712 = vmatpush1.bf16.msra.mxu0 %v2415_v39 }
  0x3e   : > { %713 = vmatprep.subr.bf16.mxu0 %v2420_v40  ;;  %753 = vmatpush1.bf16.msra.mxu1 %v2451_v47 }
  0x3f   : > { %754 = vmatprep.subr.bf16.mxu1 %v2457_v48 }
  0x41   : > { %714 = vmatpush1.bf16.msra.mxu0 %v2439_v44 }
  0x42   : > { %715 = vmatprep.subr.bf16.mxu0 %v2445_v46  ;;  %755 = vmatpush1.bf16.msra.mxu1 %v2473_v51 }
  0x43   : > { %756 = vmatprep.subr.bf16.mxu1 %v2484_v54 }
  0x45   : > { %716 = vmatpush1.bf16.msra.mxu0 %v2462_v49 }
  0x46   : > { %717 = vmatprep.subr.bf16.mxu0 %v2468_v50  ;;  %757 = vmatpush1.bf16.msra.mxu1 %v2507_v59 }
  0x47   : > { %758 = vmatprep.subr.bf16.mxu1 %v2513_v60 }
  0x49   : > { %718 = vmatpush1.bf16.msra.mxu0 %v2494_v56 }
  0x4a   : > { %719 = vmatprep.subr.bf16.mxu0 %v2501_v58  ;;  %759 = vmatpush1.bf16.msra.mxu1 %v2531_v63 }
  0x4b   : > { %760 = vmatprep.subr.bf16.mxu1 %v2537_v0 }
  0x4d   : > { %720 = vmatpush1.bf16.msra.mxu0 %v2519_v61 }
  0x4e   : > { %721 = vmatprep.subr.bf16.mxu0 %v2525_v62  ;;  %761 = vmatpush1.bf16.msra.mxu1 %v2555_v45  ;;  %v2588_v45 = vld [vmem:[%s3536_s1 + $0x1e8] ss:$16 sps:$4 sm:$0xff]  }
  0x4f   : > { %762 = vmatprep.subr.bf16.mxu1 %v2561_v52  ;;  %3683 = vst [vmem:[#allocation29_spill] sm:$0xff] %v2588_v45 }
  0x51   : > { %722 = vmatpush1.bf16.msra.mxu0 %v2543_v1 }
  0x52   : > { %723 = vmatprep.subr.bf16.mxu0 %v2549_v43  ;;  %763 = vmatpush1.bf16.msra.mxu1 %v2574_v57 }
  0x53   : > { %764 = vmatprep.subr.bf16.mxu1 %v2580_v4 }
  0x55   : > { %724 = vmatpush1.bf16.msra.mxu0 %v2567_v53 }
  0x56   : > { %813 = vmatprep.subr.bf16.mxu0 %v2200_v2  ;;  %765 = vmatpush1.bf16.msra.mxu1 %v2588_v45 }
  0x57   : > { %854 = vmatprep.subr.bf16.mxu1 %v2230_v8 }
  0x58   : > { %726 = vmatmul.mubr.bf16.vlgmr.msra.gmra.mrb[0].mxu0 %v1912_v55 }
  0x59   : > { %814 = vmatpush1.bf16.msra.mxu0 %v2205_v3  ;;  %767 = vmatmul.mubr.bf16.vlgmr.msra.gmra.mrb[0].mxu1 %v1912_v55  ;;  %v3684_v55 = vld [vmem:[#allocation24_spill] sm:$0xff] }
  0x5a   : > { %815 = vmatprep.subr.bf16.mxu0 %v2213_v5  ;;  %855 = vmatpush1.bf16.msra.mxu1 %v2235_v9 }
  0x5b   : > { %856 = vmatprep.subr.bf16.mxu1 %v2254_v12 }
  0x5d   : > { %816 = vmatpush1.bf16.msra.mxu0 %v2219_v6 }
  0x5e   : > { %817 = vmatprep.subr.bf16.mxu0 %v2225_v7  ;;  %857 = vmatpush1.bf16.msra.mxu1 %v2259_v13 }
  0x5f   : > { %858 = vmatprep.subr.bf16.mxu1 %v2276_v16 }
  0x61   : > { %818 = vmatpush1.bf16.msra.mxu0 %v2241_v10 }
  0x62   : > { %819 = vmatprep.subr.bf16.mxu0 %v2248_v11  ;;  %859 = vmatpush1.bf16.msra.mxu1 %v2283_v17 }
  0x63   : > { %860 = vmatprep.subr.bf16.mxu1 %v2289_v18 }
  0x65   : > { %820 = vmatpush1.bf16.msra.mxu0 %v2266_v14 }
  0x66   : > { %821 = vmatprep.subr.bf16.mxu0 %v2271_v15  ;;  %861 = vmatpush1.bf16.msra.mxu1 %v2307_v21 }
  0x67   : > { %862 = vmatprep.subr.bf16.mxu1 %v2313_v22 }
  0x69   : > { %822 = vmatpush1.bf16.msra.mxu0 %v2295_v19 }
  0x6a   : > { %823 = vmatprep.subr.bf16.mxu0 %v2301_v20  ;;  %863 = vmatpush1.bf16.msra.mxu1 %v2331_v25 }
  0x6b   : > { %864 = vmatprep.subr.bf16.mxu1 %v2337_v26 }
  0x6d   : > { %824 = vmatpush1.bf16.msra.mxu0 %v2319_v23 }
  0x6e   : > { %825 = vmatprep.subr.bf16.mxu0 %v2324_v24  ;;  %865 = vmatpush1.bf16.msra.mxu1 %v2355_v29 }
  0x6f   : > { %866 = vmatprep.subr.bf16.mxu1 %v2361_v30 }
  0x71   : > { %826 = vmatpush1.bf16.msra.mxu0 %v2343_v27 }
  0x72   : > { %827 = vmatprep.subr.bf16.mxu0 %v2349_v28  ;;  %867 = vmatpush1.bf16.msra.mxu1 %v2379_v33 }
  0x73   : > { %868 = vmatprep.subr.bf16.mxu1 %v2385_v34 }
  0x75   : > { %828 = vmatpush1.bf16.msra.mxu0 %v2367_v31 }
  0x76   : > { %829 = vmatprep.subr.bf16.mxu0 %v2372_v32  ;;  %869 = vmatpush1.bf16.msra.mxu1 %v2403_v37 }
  0x77   : > { %870 = vmatprep.subr.bf16.mxu1 %v2409_v38 }
  0x79   : > { %830 = vmatpush1.bf16.msra.mxu0 %v2391_v35 }
  0x7a   : > { %831 = vmatprep.subr.bf16.mxu0 %v2397_v36  ;;  %871 = vmatpush1.bf16.msra.mxu1 %v2427_v41 }
  0x7b   : > { %872 = vmatprep.subr.bf16.mxu1 %v2433_v42 }
  0x7d   : > { %832 = vmatpush1.bf16.msra.mxu0 %v2415_v39 }
  0x7e   : > { %833 = vmatprep.subr.bf16.mxu0 %v2420_v40  ;;  %873 = vmatpush1.bf16.msra.mxu1 %v2451_v47 }
  0x7f   : > { %874 = vmatprep.subr.bf16.mxu1 %v2457_v48 }
  0x81   : > { %834 = vmatpush1.bf16.msra.mxu0 %v2439_v44 }
  0x82   : > { %835 = vmatprep.subr.bf16.mxu0 %v2445_v46  ;;  %875 = vmatpush1.bf16.msra.mxu1 %v2473_v51 }
  0x83   : > { %876 = vmatprep.subr.bf16.mxu1 %v2484_v54 }
  0x85   : > { %836 = vmatpush1.bf16.msra.mxu0 %v2462_v49 }
  0x86   : > { %837 = vmatprep.subr.bf16.mxu0 %v2468_v50  ;;  %877 = vmatpush1.bf16.msra.mxu1 %v2507_v59 }
  0x87   : > { %878 = vmatprep.subr.bf16.mxu1 %v2513_v60 }
  0x89   : > { %838 = vmatpush1.bf16.msra.mxu0 %v2494_v56 }
  0x8a   : > { %839 = vmatprep.subr.bf16.mxu0 %v2501_v58  ;;  %879 = vmatpush1.bf16.msra.mxu1 %v2531_v63 }
  0x8b   : > { %880 = vmatprep.subr.bf16.mxu1 %v2537_v0 }
  0x8d   : > { %840 = vmatpush1.bf16.msra.mxu0 %v2519_v61 }
  0x8e   : > { %841 = vmatprep.subr.bf16.mxu0 %v2525_v62  ;;  %881 = vmatpush1.bf16.msra.mxu1 %v3684_v55  ;;  %v3685_v62 = vld [vmem:[#allocation13_spill] sm:$0xff] }
  0x8f   : > { %882 = vmatprep.subr.bf16.mxu1 %v2561_v52  ;;  %v353_v52 = vlaneseq }
  0x91   : > { %842 = vmatpush1.bf16.msra.mxu0 %v2543_v1  ;;  %v920_v1 = vstv %s919_s10  ;;  %v354_v61 = vshrl.u32 %v353_v52, 7  ;;  %s1282_s10 = sadd.s32 4, %s2181_s26 }
  0x92   : > { %843 = vmatprep.subr.bf16.mxu0 %v2549_v43  ;;  %883 = vmatpush1.bf16.msra.mxu1 %v2574_v57  ;;  %vm921_vm1 = vcmp.eq.s32.totalorder %v3685_v62, %v920_v1  ;;  %v3686_v43 = vmov 0  }
  0x93   : > { %884 = vmatprep.subr.bf16.mxu1 %v2580_v4  ;;  %v922_v55 = vsel %vm921_vm1, 1, %v3686_v43  ;;  %v359_v57 = vsub.s32 1, %v354_v61  ;;  %v363_v60 = vsub.s32 2, %v354_v61 }
  0x94   : > { %924 = vperm.xlu0 %1823, %v922_v55  }
  0x95   : > { %844 = vmatpush1.bf16.msra.mxu0 %v2567_v53  ;;  %v355_v53 = vsub.s32 0, %v354_v61 }
  0x96   : > { %934 = vmatprep.subr.bf16.mxu0 %v2200_v2  ;;  %885 = vmatpush1.bf16.msra.mxu1 %v2588_v45  ;;  %v340_v2 = vld [vmem:[%s3537_s2] sm:$0xf] }
  0x97   : > { %975 = vmatprep.subr.bf16.mxu1 %v2230_v8  ;;  %v2664_v4 = vrot.slane %v340_v2, %v355_v53  ;;  %v2666_v45 = vrot.slane %v340_v2, %v359_v57  ;;  %v367_v8 = vsub.s32 3, %v354_v61  ;;  %v2673_v49 = vrot.slane %v340_v2, %v363_v60 }
  0x99   : > { %3687 = vst [vmem:[#allocation30_spill] sm:$0xff] %v2664_v4  ;;  %v2670_v63 = vrot.slane %v340_v2, %v367_v8 }
 0x12b   : > { %v727_v0 = vpop.f32.mrb[0].mxu0 }
 0x12c   : > { %v728_v58 = vadd.f32 %v727_v0, %v2664_v4  ;;  %v729_v1 = vpop.f32.mrb[1].mxu0  ;;  %v768_v50 = vpop.f32.mrb[0].mxu1 }
 0x12d   : > { %v730_v43 = vadd.f32 %v729_v1, %v2666_v45  ;;  %v731_v55 = vpop.f32.mrb[2].mxu0  ;;  %v770_v53 = vpop.f32.mrb[1].mxu1  ;;  %v769_v1 = vadd.f32 %v768_v50, %v2673_v49 }
 0x12e   : > { %v1773_v62 = vmul.f32 -1.442695, %v728_v58  ;;  %v732_v52 = vpop.f32.mrb[3].mxu0  ;;  %v771_v57 = vadd.f32 %v770_v53, %v2670_v63  ;;  %v772_v59 = vpop.f32.mrb[2].mxu1 }
 0x12f   : > { %v1774_v56 = vmul.f32 -1.442695, %v730_v43  ;;  %v773_v0 = vpop.f32.mrb[3].mxu1 }
 0x130   : > { %1929 = vpow2.f32 %v1773_v62  ;;  %v1775_v4 = vmul.f32 -1.442695, %v771_v57  ;;  %v344_v62 = vld [vmem:[#allocation3] sm:$0xff] }
 0x131   : > { %1931 = vpow2.f32 %v1774_v56 }
 0x132   : > { %1933 = vpow2.f32 %v1775_v4 }
 0x133   : > { %1935 = vtanh.f32 %v769_v1  ;;  %v1922_v1 = vld [vmem:[%s2188_s8 + $0x4] ss:$0 sps:$4 sm:$0xff]  }
 0x13a   : > { %v1930_v55 = vpop.eup %1929 }
 0x13b   : > { %v1932_v58 = vpop.eup %1931  ;;  %v778_v8 = vadd.f32 1.0, %v1930_v55 }
 0x13c   : > { %v784_v43 = vadd.f32 1.0, %v1932_v58  ;;  %v1934_v56 = vpop.eup %1933  ;;  %v3689_v58 = vld [vmem:[#allocation9_spill] sm:$0xff] }
 0x13d   : > { %1937 = vrcp.f32 %v778_v8  ;;  %v1936_v61 = vpop.eup %1935  ;;  %v791_v59 = vadd.f32 1.0, %v1934_v56  ;;  %v3690_v8 = vld [vmem:[#allocation16_spill] sm:$0xff]  ;;  %v3692_v56 = vld [vmem:[#allocation17_spill] sm:$0xff] }
 0x13e   : > { %1939 = vrcp.f32 %v784_v43  ;;  %v3691_v43 = vld [vmem:[#allocation10_spill] sm:$0xff] }
 0x13f   : > { %1941 = vrcp.f32 %v791_v59  ;;  %v3696_v59 = vld [vmem:[#allocation21_spill] sm:$0xff] }
 0x147   : > { %v1938_v52 = vpop.eup %1937 }
 0x148   : > { %v1940_v2 = vpop.eup %1939  ;;  %v795_v60 = vmul.f32 %v1938_v52, %v1936_v61  ;;  %v3693_v61 = vld [vmem:[#allocation14_spill] sm:$0xff]  ;;  %v3695_v52 = vld [vmem:[#allocation15_spill] sm:$0xff] }
 0x149   : > { %v794_v53 = vmul.f32 %v1940_v2, %v344_v62  ;;  %v1942_v4 = vpop.eup %1941  ;;  %v3694_v62 = vld [vmem:[#allocation20_spill] sm:$0xff]  ;;  %v3697_v2 = vld [vmem:[#allocation18_spill] sm:$0xff] }
 0x14b   : > { %v2676_v57 = vadd.f32 %v795_v60, %v794_v53  ;;  %v3698_v60 = vld [vmem:[#allocation24_spill] sm:$0xff]  ;;  %v3699_v53 = vld [vmem:[#allocation19_spill] sm:$0xff] }
 0x14d   : > { %3688 = vst [vmem:[#allocation31_spill] sm:$0xff] %v2676_v57  ;;  %1943 = vtanh.f32 %v2676_v57 }
 0x157   : > { %v1944_v50 = vpop.eup %1943 }
 0x158   : > { %v2679_v0 = vmul.f32 %v1944_v50, %v1942_v4  ;;  %v3700_v4 = vld [vmem:[#allocation25_spill] sm:$0xff]  ;;  %v3701_v50 = vld [vmem:[#allocation22_spill] sm:$0xff] }
 0x15a   : > { %v812_v55 = vpack.c.bf16 %v2679_v0, %v2679_v0 }
 0x15c   : > { %845 = vmatprep.mubr.bf16.mxu0 %v812_v55  ;;  %886 = vmatprep.mubr.bf16.mxu1 %v812_v55  ;;  %v3703_v55 = vld [vmem:[#allocation23_spill] sm:$0xff] }
 0x15d   : > { %846 = vmatmul.mubr.bf16.vlgmr.msra.gmra.mrb[4].mxu0 %v1922_v1  ;;  %887 = vmatmul.mubr.bf16.vlgmr.msra.gmra.mrb[4].mxu1 %v1922_v1  ;;  %v3702_v1 = vld [vmem:[#allocation27_spill] sm:$0xff] }
 0x15e   : > { %935 = vmatpush1.bf16.msra.mxu0 %v2205_v3  ;;  %976 = vmatpush1.bf16.msra.mxu1 %v2235_v9 }
 0x15f   : > { %936 = vmatprep.subr.bf16.mxu0 %v2213_v5  ;;  %977 = vmatprep.subr.bf16.mxu1 %v2254_v12 }
 0x162   : > { %937 = vmatpush1.bf16.msra.mxu0 %v2219_v6  ;;  %978 = vmatpush1.bf16.msra.mxu1 %v2259_v13 }
 0x163   : > { %938 = vmatprep.subr.bf16.mxu0 %v2225_v7  ;;  %979 = vmatprep.subr.bf16.mxu1 %v2276_v16 }
 0x166   : > { %939 = vmatpush1.bf16.msra.mxu0 %v2241_v10  ;;  %980 = vmatpush1.bf16.msra.mxu1 %v2283_v17 }
 0x167   : > { %940 = vmatprep.subr.bf16.mxu0 %v2248_v11  ;;  %981 = vmatprep.subr.bf16.mxu1 %v2289_v18 }
 0x16a   : > { %941 = vmatpush1.bf16.msra.mxu0 %v2266_v14  ;;  %982 = vmatpush1.bf16.msra.mxu1 %v2307_v21 }
 0x16b   : > { %942 = vmatprep.subr.bf16.mxu0 %v2271_v15  ;;  %983 = vmatprep.subr.bf16.mxu1 %v2313_v22 }
 0x16e   : > { %943 = vmatpush1.bf16.msra.mxu0 %v2295_v19  ;;  %984 = vmatpush1.bf16.msra.mxu1 %v2331_v25 }
 0x16f   : > { %944 = vmatprep.subr.bf16.mxu0 %v2301_v20  ;;  %985 = vmatprep.subr.bf16.mxu1 %v2337_v26 }
 0x172   : > { %945 = vmatpush1.bf16.msra.mxu0 %v2319_v23  ;;  %986 = vmatpush1.bf16.msra.mxu1 %v2355_v29 }
 0x173   : > { %946 = vmatprep.subr.bf16.mxu0 %v2324_v24  ;;  %987 = vmatprep.subr.bf16.mxu1 %v2361_v30 }
 0x176   : > { %947 = vmatpush1.bf16.msra.mxu0 %v2343_v27  ;;  %988 = vmatpush1.bf16.msra.mxu1 %v2379_v33 }
 0x177   : > { %948 = vmatprep.subr.bf16.mxu0 %v2349_v28  ;;  %989 = vmatprep.subr.bf16.mxu1 %v2385_v34 }
 0x17a   : > { %949 = vmatpush1.bf16.msra.mxu0 %v2367_v31  ;;  %990 = vmatpush1.bf16.msra.mxu1 %v2403_v37 }
 0x17b   : > { %950 = vmatprep.subr.bf16.mxu0 %v2372_v32  ;;  %991 = vmatprep.subr.bf16.mxu1 %v2409_v38 }
 0x17e   : > { %951 = vmatpush1.bf16.msra.mxu0 %v2391_v35  ;;  %992 = vmatpush1.bf16.msra.mxu1 %v2427_v41 }
 0x17f   : > { %952 = vmatprep.subr.bf16.mxu0 %v2397_v36  ;;  %993 = vmatprep.subr.bf16.mxu1 %v2433_v42 }
 0x182   : > { %953 = vmatpush1.bf16.msra.mxu0 %v2415_v39  ;;  %994 = vmatpush1.bf16.msra.mxu1 %v2451_v47 }
 0x183   : > { %954 = vmatprep.subr.bf16.mxu0 %v2420_v40  ;;  %995 = vmatprep.subr.bf16.mxu1 %v2457_v48 }
 0x186   : > { %955 = vmatpush1.bf16.msra.mxu0 %v2439_v44  ;;  %996 = vmatpush1.bf16.msra.mxu1 %v2473_v51 }
 0x187   : > { %956 = vmatprep.subr.bf16.mxu0 %v2445_v46  ;;  %997 = vmatprep.subr.bf16.mxu1 %v2484_v54 }
 0x18a   : > { %957 = vmatpush1.bf16.msra.mxu0 %v3689_v58  ;;  %998 = vmatpush1.bf16.msra.mxu1 %v3690_v8 }
 0x18b   : > { %958 = vmatprep.subr.bf16.mxu0 %v3691_v43  ;;  %999 = vmatprep.subr.bf16.mxu1 %v3692_v56 }
 0x18e   : > { %959 = vmatpush1.bf16.msra.mxu0 %v3693_v61  ;;  %1000 = vmatpush1.bf16.msra.mxu1 %v3694_v62  ;;  %v3704_v61 = vld [vmem:[#allocation28_spill] sm:$0xff]  ;;  %v3705_v62 = vld [vmem:[#allocation26_spill] sm:$0xff] }
 0x18f   : > { %960 = vmatprep.subr.bf16.mxu0 %v3695_v52  ;;  %1001 = vmatprep.subr.bf16.mxu1 %v3696_v59  ;;  %v3706_v52 = vld [vmem:[#allocation29_spill] sm:$0xff]  ;;  %v3707_v59 = vld [vmem:[#allocation6_spill] sm:$0xff] }
 0x192   : > { %961 = vmatpush1.bf16.msra.mxu0 %v3697_v2  ;;  %1002 = vmatpush1.bf16.msra.mxu1 %v3698_v60  ;;  %v3708_v2 = vld [vmem:[#allocation7_spill] sm:$0xff]  ;;  %v3709_v60 = vld [vmem:[#allocation13_spill] sm:$0xff] }
 0x193   : > { %962 = vmatprep.subr.bf16.mxu0 %v3699_v53  ;;  %1003 = vmatprep.subr.bf16.mxu1 %v3700_v4  ;;  %v1041_v53 = vstv %s1040_s13  ;;  %v3710_v4 = vmov 0   ;;  %s1645_s13 = sadd.s32 7, %s2181_s26 }
 0x194   : > { %vm1042_vm2 = vcmp.eq.s32.totalorder %v3709_v60, %v1041_v53 }
 0x196   : > { %963 = vmatpush1.bf16.msra.mxu0 %v3701_v50  ;;  %1004 = vmatpush1.bf16.msra.mxu1 %v3702_v1  ;;  %v1043_v50 = vsel %vm1042_vm2, 1, %v3710_v4 }
 0x197   : > { %964 = vmatprep.subr.bf16.mxu0 %v3703_v55  ;;  %1005 = vmatprep.subr.bf16.mxu1 %v3704_v61  ;;  %v3711_v55 = vld [vmem:[#allocation30_spill] sm:$0xff] }
 0x198   : > { %1045 = vperm.xlu1 %1824, %v1043_v50  }
 0x19a   : > { %965 = vmatpush1.bf16.msra.mxu0 %v3705_v62  ;;  %1006 = vmatpush1.bf16.msra.mxu1 %v3706_v52 }
 0x19b   : > { %1055 = vmatprep.subr.bf16.mxu0 %v3707_v59  ;;  %1096 = vmatprep.subr.bf16.mxu1 %v3708_v2 }
 0x230   : > { %v847_v1 = vpop.f32.mrb[4].mxu0  ;;  %v888_v56 = vpop.f32.mrb[4].mxu1 }
 0x231   : > { %v848_v43 = vadd.f32 %v847_v1, %v3711_v55  ;;  %v849_v61 = vpop.f32.mrb[5].mxu0  ;;  %v890_v8 = vpop.f32.mrb[5].mxu1  ;;  %v889_v50 = vadd.f32 %v888_v56, %v2673_v49 }
 0x232   : > { %v850_v62 = vadd.f32 %v849_v61, %v2666_v45  ;;  %v851_v52 = vpop.f32.mrb[6].mxu0  ;;  %v892_v58 = vpop.f32.mrb[6].mxu1  ;;  %v891_v53 = vadd.f32 %v890_v8, %v2670_v63 }
 0x233   : > { %v1778_v59 = vmul.f32 -1.442695, %v848_v43  ;;  %v852_v54 = vpop.f32.mrb[7].mxu0  ;;  %v893_v2 = vpop.f32.mrb[7].mxu1 }
 0x234   : > { %v1779_v46 = vmul.f32 -1.442695, %v850_v62  ;;  %v1780_v4 = vmul.f32 -1.442695, %v891_v53  ;;  %v2759_v56 = vpop.permute.xlu0 %803  ;;  %v1923_v53 = vld [vmem:[%s2188_s8 + $0x8] ss:$0 sps:$4 sm:$0xff]  }
 0x235   : > { %1945 = vpow2.f32 %v1778_v59  ;;  %3713 = vst [vmem:[#allocation32_spill] sm:$0xff] %v2759_v56  ;;  %vm805_vm3 = vcmp.eq.s32.totalorder %v2759_v56, 1 }
 0x236   : > { %1947 = vpow2.f32 %v1779_v46 }
 0x237   : > { %1949 = vpow2.f32 %v1780_v4 }
 0x238   : > { %1951 = vtanh.f32 %v889_v50  ;;  %v2761_v4 = vpop.permute.xlu0 %924 }
 0x239   : > { %3714 = vst [vmem:[#allocation33_spill] sm:$0xff] %v2761_v4  ;;  %vm926_vm4 = vcmp.eq.s32.totalorder %v2761_v4, 1 }
 0x23f   : > { %v1946_v60 = vpop.eup %1945 }
 0x240   : > { %v1948_v1 = vpop.eup %1947  ;;  %v898_v55 = vadd.f32 1.0, %v1946_v60  ;;  %v345_v60 = vld [vmem:[#allocation4] sm:$0xff] }
 0x241   : > { %v904_v51 = vadd.f32 1.0, %v1948_v1  ;;  %v1950_v58 = vpop.eup %1949  ;;  %v806_v59 = vsel %vm805_vm3, %v2679_v0, %v345_v60  ;;  %v3738_v0 = vld [vmem:[#allocation13_spill] sm:$0xff] }
 0x242   : > { %1953 = vrcp.f32 %v898_v55  ;;  %v1952_v43 = vpop.eup %1951  ;;  %v911_v61 = vadd.f32 1.0, %v1950_v58  ;;  %v3739_v58 = vmov 0  }
 0x243   : > { %1955 = vrcp.f32 %v904_v51 }
 0x244   : > { %1957 = vrcp.f32 %v911_v61 }
 0x24c   : > { %v1954_v54 = vpop.eup %1953 }
 0x24d   : > { %v1956_v62 = vpop.eup %1955  ;;  %v915_v46 = vmul.f32 %v1954_v54, %v1952_v43 }
 0x24e   : > { %v914_v8 = vmul.f32 %v1956_v62, %v2676_v57  ;;  %v1958_v2 = vpop.eup %1957  ;;  %v3740_v62 = vld [vmem:[#allocation30_spill] sm:$0xff] }
 0x250   : > { %v2756_v52 = vadd.f32 %v915_v46, %v914_v8 }
 0x252   : > { %3712 = vst [vmem:[#allocation6_spill] sm:$0xff] %v2756_v52  ;;  %1959 = vtanh.f32 %v2756_v52 }
 0x25c   : > { %v1960_v51 = vpop.eup %1959 }
 0x25d   : > { %v918_v55 = vmul.f32 %v1960_v51, %v1958_v2 }
 0x25f   : > { %v2771_v50 = vsel %vm926_vm4, %v918_v55, %v806_v59  ;;  %v933_v1 = vpack.c.bf16 %v918_v55, %v918_v55 }
 0x261   : > { %966 = vmatprep.mubr.bf16.mxu0 %v933_v1  ;;  %1007 = vmatprep.mubr.bf16.mxu1 %v933_v1 }
 0x262   : > { %967 = vmatmul.mubr.bf16.vlgmr.msra.gmra.mrb[8].mxu0 %v1923_v53  ;;  %1008 = vmatmul.mubr.bf16.vlgmr.msra.gmra.mrb[8].mxu1 %v1923_v53 }
 0x263   : > { %1056 = vmatpush1.bf16.msra.mxu0 %v2205_v3  ;;  %1097 = vmatpush1.bf16.msra.mxu1 %v2235_v9  ;;  %v3715_v3 = vld [vmem:[#allocation11_spill] sm:$0xff]  ;;  %v3719_v9 = vld [vmem:[#allocation16_spill] sm:$0xff] }
 0x264   : > { %1057 = vmatprep.subr.bf16.mxu0 %v2213_v5  ;;  %1098 = vmatprep.subr.bf16.mxu1 %v2254_v12  ;;  %v3716_v5 = vld [vmem:[#allocation8_spill] sm:$0xff]  ;;  %v3722_v12 = vld [vmem:[#allocation14_spill] sm:$0xff] }
 0x267   : > { %1058 = vmatpush1.bf16.msra.mxu0 %v2219_v6  ;;  %1099 = vmatpush1.bf16.msra.mxu1 %v2259_v13  ;;  %v3717_v6 = vld [vmem:[#allocation12_spill] sm:$0xff] }
 0x268   : > { %1059 = vmatprep.subr.bf16.mxu0 %v2225_v7  ;;  %1100 = vmatprep.subr.bf16.mxu1 %v2276_v16  ;;  %v3718_v7 = vld [vmem:[#allocation9_spill] sm:$0xff]  ;;  %v3723_v13 = vld [vmem:[#allocation20_spill] sm:$0xff]  ;;  %v3726_v16 = vld [vmem:[#allocation18_spill] sm:$0xff] }
 0x26b   : > { %1060 = vmatpush1.bf16.msra.mxu0 %v2241_v10  ;;  %1101 = vmatpush1.bf16.msra.mxu1 %v2283_v17  ;;  %v3720_v10 = vld [vmem:[#allocation10_spill] sm:$0xff]  ;;  %v3727_v17 = vld [vmem:[#allocation24_spill] sm:$0xff] }
 0x26c   : > { %1061 = vmatprep.subr.bf16.mxu0 %v2248_v11  ;;  %1102 = vmatprep.subr.bf16.mxu1 %v2289_v18  ;;  %v3721_v11 = vld [vmem:[#allocation17_spill] sm:$0xff]  ;;  %v3728_v18 = vld [vmem:[#allocation19_spill] sm:$0xff] }
 0x26f   : > { %1062 = vmatpush1.bf16.msra.mxu0 %v2266_v14  ;;  %1103 = vmatpush1.bf16.msra.mxu1 %v2307_v21  ;;  %v3724_v14 = vld [vmem:[#allocation15_spill] sm:$0xff] }
 0x270   : > { %1063 = vmatprep.subr.bf16.mxu0 %v2271_v15  ;;  %1104 = vmatprep.subr.bf16.mxu1 %v2313_v22  ;;  %v3725_v15 = vld [vmem:[#allocation21_spill] sm:$0xff]  ;;  %v3731_v21 = vld [vmem:[#allocation27_spill] sm:$0xff] }
 0x271   : > { %v3732_v22 = vld [vmem:[#allocation23_spill] sm:$0xff] }
 0x273   : > { %1064 = vmatpush1.bf16.msra.mxu0 %v2295_v19  ;;  %1105 = vmatpush1.bf16.msra.mxu1 %v2331_v25  ;;  %v3729_v19 = vld [vmem:[#allocation25_spill] sm:$0xff] }
 0x274   : > { %1065 = vmatprep.subr.bf16.mxu0 %v2301_v20  ;;  %1106 = vmatprep.subr.bf16.mxu1 %v2337_v26  ;;  %v3730_v20 = vld [vmem:[#allocation22_spill] sm:$0xff]  ;;  %v3735_v25 = vld [vmem:[#allocation29_spill] sm:$0xff] }
 0x275   : > { %v2838_v26 = vld [vmem:[%s3536_s1 + $0x4] ss:$16 sps:$4 sm:$0xff]  }
 0x276   : > { %3736 = vst [vmem:[#allocation11_spill] sm:$0xff] %v2838_v26 }
 0x277   : > { %1066 = vmatpush1.bf16.msra.mxu0 %v2319_v23  ;;  %1107 = vmatpush1.bf16.msra.mxu1 %v2355_v29  ;;  %v3733_v23 = vld [vmem:[#allocation28_spill] sm:$0xff] }
 0x278   : > { %1067 = vmatprep.subr.bf16.mxu0 %v2324_v24  ;;  %1108 = vmatprep.subr.bf16.mxu1 %v2361_v30  ;;  %v3734_v24 = vld [vmem:[#allocation26_spill] sm:$0xff] }
 0x27b   : > { %1068 = vmatpush1.bf16.msra.mxu0 %v2343_v27  ;;  %1109 = vmatpush1.bf16.msra.mxu1 %v2379_v33  ;;  %v3737_v27 = vld [vmem:[#allocation7_spill] sm:$0xff] }
 0x27c   : > { %1069 = vmatprep.subr.bf16.mxu0 %v2349_v28  ;;  %1110 = vmatprep.subr.bf16.mxu1 %v2385_v34  ;;  %v1162_v28 = vstv %s1161_s16 }
 0x27d   : > { %vm1163_vm5 = vcmp.eq.s32.totalorder %v3738_v0, %v1162_v28 }
 0x27e   : > { %v1164_v43 = vsel %vm1163_vm5, 1, %v3739_v58 }
 0x27f   : > { %1070 = vmatpush1.bf16.msra.mxu0 %v2367_v31  ;;  %1111 = vmatpush1.bf16.msra.mxu1 %v2403_v37 }
 0x280   : > { %1071 = vmatprep.subr.bf16.mxu0 %v2372_v32  ;;  %1112 = vmatprep.subr.bf16.mxu1 %v2409_v38 }
 0x281   : > { %1166 = vperm.xlu1 %1824, %v1164_v43  }
 0x283   : > { %1072 = vmatpush1.bf16.msra.mxu0 %v2391_v35  ;;  %1113 = vmatpush1.bf16.msra.mxu1 %v2427_v41 }
 0x284   : > { %1073 = vmatprep.subr.bf16.mxu0 %v2397_v36  ;;  %1114 = vmatprep.subr.bf16.mxu1 %v2433_v42 }
 0x287   : > { %1074 = vmatpush1.bf16.msra.mxu0 %v2415_v39  ;;  %1115 = vmatpush1.bf16.msra.mxu1 %v2451_v47 }
 0x288   : > { %1075 = vmatprep.subr.bf16.mxu0 %v2420_v40  ;;  %1116 = vmatprep.subr.bf16.mxu1 %v2457_v48 }
 0x28b   : > { %1076 = vmatpush1.bf16.msra.mxu0 %v2439_v44  ;;  %1117 = vmatpush1.bf16.msra.mxu1 %v3715_v3 }
 0x28c   : > { %1077 = vmatprep.subr.bf16.mxu0 %v3716_v5  ;;  %1118 = vmatprep.subr.bf16.mxu1 %v3717_v6 }
 0x28f   : > { %1078 = vmatpush1.bf16.msra.mxu0 %v3718_v7  ;;  %1119 = vmatpush1.bf16.msra.mxu1 %v3719_v9 }
 0x290   : > { %1079 = vmatprep.subr.bf16.mxu0 %v3720_v10  ;;  %1120 = vmatprep.subr.bf16.mxu1 %v3721_v11 }
 0x293   : > { %1080 = vmatpush1.bf16.msra.mxu0 %v3722_v12  ;;  %1121 = vmatpush1.bf16.msra.mxu1 %v3723_v13 }
 0x294   : > { %1081 = vmatprep.subr.bf16.mxu0 %v3724_v14  ;;  %1122 = vmatprep.subr.bf16.mxu1 %v3725_v15 }
 0x297   : > { %1082 = vmatpush1.bf16.msra.mxu0 %v3726_v16  ;;  %1123 = vmatpush1.bf16.msra.mxu1 %v3727_v17 }
 0x298   : > { %1083 = vmatprep.subr.bf16.mxu0 %v3728_v18  ;;  %1124 = vmatprep.subr.bf16.mxu1 %v3729_v19 }
 0x29b   : > { %1084 = vmatpush1.bf16.msra.mxu0 %v3730_v20  ;;  %1125 = vmatpush1.bf16.msra.mxu1 %v3731_v21 }
 0x29c   : > { %1085 = vmatprep.subr.bf16.mxu0 %v3732_v22  ;;  %1126 = vmatprep.subr.bf16.mxu1 %v3733_v23 }
 0x29f   : > { %1086 = vmatpush1.bf16.msra.mxu0 %v3734_v24  ;;  %1127 = vmatpush1.bf16.msra.mxu1 %v3735_v25 }
 0x2a0   : > { %1176 = vmatprep.subr.bf16.mxu0 %v2838_v26  ;;  %1217 = vmatprep.subr.bf16.mxu1 %v3737_v27 }
 0x335   : > { %v968_v54 = vpop.f32.mrb[8].mxu0  ;;  %v1009_v61 = vpop.f32.mrb[8].mxu1 }
 0x336   : > { %v969_v46 = vadd.f32 %v968_v54, %v3740_v62  ;;  %v970_v8 = vpop.f32.mrb[9].mxu0  ;;  %v1011_v2 = vpop.f32.mrb[9].mxu1  ;;  %v1010_v43 = vadd.f32 %v1009_v61, %v2673_v49 }
 0x337   : > { %v971_v60 = vadd.f32 %v970_v8, %v2666_v45  ;;  %v972_v51 = vpop.f32.mrb[10].mxu0  ;;  %v1013_v55 = vpop.f32.mrb[10].mxu1  ;;  %v1012_v28 = vadd.f32 %v1011_v2, %v2670_v63 }
 0x338   : > { %v1783_v59 = vmul.f32 -1.442695, %v969_v46  ;;  %v973_v53 = vpop.f32.mrb[11].mxu0  ;;  %v1014_v1 = vpop.f32.mrb[11].mxu1 }
 0x339   : > { %v1784_v27 = vmul.f32 -1.442695, %v971_v60  ;;  %v1785_v4 = vmul.f32 -1.442695, %v1012_v28  ;;  %v2865_v28 = vld [vmem:[%s3536_s1] ss:$16 sps:$4 sm:$0xff]  }
 0x33a   : > { %1961 = vpow2.f32 %v1783_v59 }
 0x33b   : > { %1963 = vpow2.f32 %v1784_v27 }
 0x33c   : > { %1965 = vpow2.f32 %v1785_v4 }
 0x33d   : > { %1967 = vtanh.f32 %v1010_v43  ;;  %v2871_v43 = vld [vmem:[%s3536_s1 + $0x8] ss:$16 sps:$4 sm:$0xff]  }
 0x344   : > { %v1962_v56 = vpop.eup %1961 }
 0x345   : > { %v1964_v54 = vpop.eup %1963  ;;  %v1019_v57 = vadd.f32 1.0, %v1962_v56  ;;  %v2853_v56 = vpop.permute.xlu1 %1045 }
 0x346   : > { %v1025_v62 = vadd.f32 1.0, %v1964_v54  ;;  %v1966_v46 = vpop.eup %1965  ;;  %3742 = vst [vmem:[#allocation12_spill] sm:$0xff] %v2853_v56  ;;  %vm1047_vm6 = vcmp.eq.s32.totalorder %v2853_v56, 1  ;;  %v2883_v54 = vld [vmem:[%s3536_s1 + $0x2c] ss:$16 sps:$4 sm:$0xff]  }
 0x347   : > { %1969 = vrcp.f32 %v1019_v57  ;;  %v1968_v8 = vpop.eup %1967  ;;  %v1032_v60 = vadd.f32 1.0, %v1966_v46  ;;  %v2889_v46 = vld [vmem:[%s3536_s1 + $0x20] ss:$16 sps:$4 sm:$0xff]  }
 0x348   : > { %1971 = vrcp.f32 %v1025_v62  ;;  %v1924_v62 = vld [vmem:[%s2188_s8 + $0xc] ss:$0 sps:$4 sm:$0xff]   ;;  %v2961_v56 = vld [vmem:[%s3536_s1 + $0x80] ss:$16 sps:$4 sm:$0xff]  }
 0x349   : > { %1973 = vrcp.f32 %v1032_v60  ;;  %v2907_v60 = vld [vmem:[%s3536_s1 + $0x4c] ss:$16 sps:$4 sm:$0xff]   ;;  %3745 = vst [vmem:[#allocation10_spill] sm:$0xff] %v2961_v56 }
 0x351   : > { %v1970_v51 = vpop.eup %1969 }
 0x352   : > { %v1972_v55 = vpop.eup %1971  ;;  %v1036_v59 = vmul.f32 %v1970_v51, %v1968_v8  ;;  %v2895_v8 = vld [vmem:[%s3536_s1 + $0x28] ss:$16 sps:$4 sm:$0xff]   ;;  %v2901_v51 = vld [vmem:[%s3536_s1 + $0x44] ss:$16 sps:$4 sm:$0xff]  }
 0x353   : > { %v1035_v2 = vmul.f32 %v1972_v55, %v2756_v52  ;;  %v1974_v4 = vpop.eup %1973  ;;  %v2913_v55 = vld [vmem:[%s3536_s1 + $0x40] ss:$16 sps:$4 sm:$0xff]   ;;  %v2967_v52 = vld [vmem:[%s3536_s1 + $0x88] ss:$16 sps:$4 sm:$0xff]  }
 0x355   : > { %v2850_v53 = vadd.f32 %v1036_v59, %v1035_v2  ;;  %v2919_v59 = vld [vmem:[%s3536_s1 + $0x48] ss:$16 sps:$4 sm:$0xff]   ;;  %v2925_v2 = vld [vmem:[%s3536_s1 + $0x64] ss:$16 sps:$4 sm:$0xff]  }
 0x357   : > { %3741 = vst [vmem:[#allocation8_spill] sm:$0xff] %v2850_v53  ;;  %1975 = vtanh.f32 %v2850_v53 }
 0x361   : > { %v1976_v61 = vpop.eup %1975 }
 0x362   : > { %v1039_v57 = vmul.f32 %v1976_v61, %v1974_v4  ;;  %v2931_v4 = vld [vmem:[%s3536_s1 + $0x6c] ss:$16 sps:$4 sm:$0xff]   ;;  %v2937_v61 = vld [vmem:[%s3536_s1 + $0x60] ss:$16 sps:$4 sm:$0xff]  }
 0x364   : > { %v2860_v1 = vsel %vm1047_vm6, %v1039_v57, %v2771_v50  ;;  %v1054_v27 = vpack.c.bf16 %v1039_v57, %v1039_v57  ;;  %v2877_v50 = vld [vmem:[%s3536_s1 + $0x24] ss:$16 sps:$4 sm:$0xff]   ;;  %v2943_v57 = vld [vmem:[%s3536_s1 + $0x68] ss:$16 sps:$4 sm:$0xff]  }
 0x366   : > { %1087 = vmatprep.mubr.bf16.mxu0 %v1054_v27  ;;  %1128 = vmatprep.mubr.bf16.mxu1 %v1054_v27  ;;  %v2955_v27 = vld [vmem:[%s3536_s1 + $0x8c] ss:$16 sps:$4 sm:$0xff]  }
 0x367   : > { %1088 = vmatmul.mubr.bf16.vlgmr.msra.gmra.mrb[12].mxu0 %v1924_v62  ;;  %1129 = vmatmul.mubr.bf16.vlgmr.msra.gmra.mrb[12].mxu1 %v1924_v62  ;;  %v2949_v62 = vld [vmem:[%s3536_s1 + $0x84] ss:$16 sps:$4 sm:$0xff]   ;;  %3744 = vst [vmem:[#allocation16_spill] sm:$0xff] %v2955_v27 }
 0x368   : > { %1177 = vmatpush1.bf16.msra.mxu0 %v2865_v28  ;;  %1218 = vmatpush1.bf16.msra.mxu1 %v2871_v43  ;;  %3743 = vst [vmem:[#allocation9_spill] sm:$0xff] %v2949_v62 }
 0x369   : > { %1178 = vmatprep.subr.bf16.mxu0 %v2877_v50  ;;  %1219 = vmatprep.subr.bf16.mxu1 %v2883_v54 }
 0x36c   : > { %1179 = vmatpush1.bf16.msra.mxu0 %v2889_v46  ;;  %1220 = vmatpush1.bf16.msra.mxu1 %v2895_v8 }
 0x36d   : > { %1180 = vmatprep.subr.bf16.mxu0 %v2901_v51  ;;  %1221 = vmatprep.subr.bf16.mxu1 %v2907_v60 }
 0x370   : > { %1181 = vmatpush1.bf16.msra.mxu0 %v2913_v55  ;;  %1222 = vmatpush1.bf16.msra.mxu1 %v2919_v59 }
 0x371   : > { %1182 = vmatprep.subr.bf16.mxu0 %v2925_v2  ;;  %1223 = vmatprep.subr.bf16.mxu1 %v2931_v4 }
 0x374   : > { %1183 = vmatpush1.bf16.msra.mxu0 %v2937_v61  ;;  %1224 = vmatpush1.bf16.msra.mxu1 %v2943_v57 }
 0x375   : > { %1184 = vmatprep.subr.bf16.mxu0 %v2949_v62  ;;  %1225 = vmatprep.subr.bf16.mxu1 %v2955_v27  ;;  %v2973_v62 = vld [vmem:[%s3536_s1 + $0xa4] ss:$16 sps:$4 sm:$0xff]   ;;  %v2979_v27 = vld [vmem:[%s3536_s1 + $0xac] ss:$16 sps:$4 sm:$0xff]  }
 0x376   : > { %3746 = vst [vmem:[#allocation17_spill] sm:$0xff] %v2973_v62  ;;  %3747 = vst [vmem:[#allocation14_spill] sm:$0xff] %v2979_v27 }
 0x378   : > { %1185 = vmatpush1.bf16.msra.mxu0 %v2961_v56  ;;  %1226 = vmatpush1.bf16.msra.mxu1 %v2967_v52  ;;  %v2985_v56 = vld [vmem:[%s3536_s1 + $0xa0] ss:$16 sps:$4 sm:$0xff]  }
 0x379   : > { %1186 = vmatprep.subr.bf16.mxu0 %v2973_v62  ;;  %1227 = vmatprep.subr.bf16.mxu1 %v2979_v27  ;;  %v2992_v62 = vld [vmem:[%s3536_s1 + $0xc4] ss:$16 sps:$4 sm:$0xff]   ;;  %v2999_v27 = vld [vmem:[%s3536_s1 + $0xc0] ss:$16 sps:$4 sm:$0xff]  }
 0x37c   : > { %1187 = vmatpush1.bf16.msra.mxu0 %v2985_v56  ;;  %1228 = vmatpush1.bf16.msra.mxu1 %v2355_v29  ;;  %v3006_v29 = vld [vmem:[%s3536_s1 + $0xe4] ss:$16 sps:$4 sm:$0xff]  }
 0x37d   : > { %1188 = vmatprep.subr.bf16.mxu0 %v2992_v62  ;;  %1229 = vmatprep.subr.bf16.mxu1 %v2361_v30  ;;  %v3048_v30 = vld [vmem:[%s3536_s1 + $0xc] ss:$16 sps:$4 sm:$0xff]  }
 0x37e   : > { %3748 = vst [vmem:[#allocation20_spill] sm:$0xff] %v3048_v30 }
 0x380   : > { %1189 = vmatpush1.bf16.msra.mxu0 %v2999_v27  ;;  %1230 = vmatpush1.bf16.msra.mxu1 %v2379_v33 }
 0x381   : > { %1190 = vmatprep.subr.bf16.mxu0 %v3006_v29  ;;  %1231 = vmatprep.subr.bf16.mxu1 %v2385_v34 }
 0x384   : > { %1191 = vmatpush1.bf16.msra.mxu0 %v2367_v31  ;;  %1232 = vmatpush1.bf16.msra.mxu1 %v2403_v37  ;;  %v1283_v31 = vstv %s1282_s10 }
 0x385   : > { %1192 = vmatprep.subr.bf16.mxu0 %v2372_v32  ;;  %1233 = vmatprep.subr.bf16.mxu1 %v2409_v38  ;;  %vm1284_vm7 = vcmp.eq.s32.totalorder %v3738_v0, %v1283_v31 }
 0x386   : > { %v1285_v32 = vsel %vm1284_vm7, 1, %v3739_v58 }
 0x387   : > { %1287 = vperm.xlu0 %1823, %v1285_v32   ;;  %v3753_v32 = vld [vmem:[#allocation16_spill] sm:$0xff] }
 0x388   : > { %1193 = vmatpush1.bf16.msra.mxu0 %v2391_v35  ;;  %1234 = vmatpush1.bf16.msra.mxu1 %v2427_v41  ;;  %v3749_v35 = vld [vmem:[#allocation30_spill] sm:$0xff] }
 0x389   : > { %1194 = vmatprep.subr.bf16.mxu0 %v2397_v36  ;;  %1235 = vmatprep.subr.bf16.mxu1 %v2433_v42 }
 0x38c   : > { %1195 = vmatpush1.bf16.msra.mxu0 %v2415_v39  ;;  %1236 = vmatpush1.bf16.msra.mxu1 %v2451_v47 }
 0x38d   : > { %1196 = vmatprep.subr.bf16.mxu0 %v2420_v40  ;;  %1237 = vmatprep.subr.bf16.mxu1 %v2457_v48 }
 0x390   : > { %1197 = vmatpush1.bf16.msra.mxu0 %v2439_v44  ;;  %1238 = vmatpush1.bf16.msra.mxu1 %v3715_v3 }
 0x391   : > { %1198 = vmatprep.subr.bf16.mxu0 %v3716_v5  ;;  %1239 = vmatprep.subr.bf16.mxu1 %v3717_v6 }
 0x394   : > { %1199 = vmatpush1.bf16.msra.mxu0 %v3718_v7  ;;  %1240 = vmatpush1.bf16.msra.mxu1 %v3719_v9 }
 0x395   : > { %1200 = vmatprep.subr.bf16.mxu0 %v3720_v10  ;;  %1241 = vmatprep.subr.bf16.mxu1 %v3721_v11 }
 0x398   : > { %1201 = vmatpush1.bf16.msra.mxu0 %v3722_v12  ;;  %1242 = vmatpush1.bf16.msra.mxu1 %v3723_v13 }
 0x399   : > { %1202 = vmatprep.subr.bf16.mxu0 %v3724_v14  ;;  %1243 = vmatprep.subr.bf16.mxu1 %v3725_v15 }
 0x39c   : > { %1203 = vmatpush1.bf16.msra.mxu0 %v3726_v16  ;;  %1244 = vmatpush1.bf16.msra.mxu1 %v3727_v17 }
 0x39d   : > { %1204 = vmatprep.subr.bf16.mxu0 %v3728_v18  ;;  %1245 = vmatprep.subr.bf16.mxu1 %v3729_v19 }
 0x3a0   : > { %1205 = vmatpush1.bf16.msra.mxu0 %v3730_v20  ;;  %1246 = vmatpush1.bf16.msra.mxu1 %v3731_v21  ;;  %v3062_v21 = vpop.permute.xlu1 %1166 }
 0x3a1   : > { %1206 = vmatprep.subr.bf16.mxu0 %v3732_v22  ;;  %1247 = vmatprep.subr.bf16.mxu1 %v3733_v23  ;;  %3751 = vst [vmem:[#allocation21_spill] sm:$0xff] %v3062_v21  ;;  %vm1168_vm8 = vcmp.eq.s32.totalorder %v3062_v21, 1  ;;  %v3266_v21 = vld [vmem:[%s3536_s1 + $0x1a0] ss:$16 sps:$4 sm:$0xff]  }
 0x3a4   : > { %1207 = vmatpush1.bf16.msra.mxu0 %v3734_v24  ;;  %1248 = vmatpush1.bf16.msra.mxu1 %v3735_v25  ;;  %v1925_v24 = vld [vmem:[%s2188_s8 + $0x10] ss:$0 sps:$4 sm:$0xff]  }
 0x3a5   : > { %1297 = vmatprep.subr.bf16.mxu0 %v2838_v26  ;;  %1338 = vmatprep.subr.bf16.mxu1 %v3048_v30 }
 0x43a   : > { %v1089_v33 = vpop.f32.mrb[12].mxu0  ;;  %v1130_v34 = vpop.f32.mrb[12].mxu1 }
 0x43b   : > { %v1090_v36 = vadd.f32 %v1089_v33, %v3749_v35  ;;  %v1091_v37 = vpop.f32.mrb[13].mxu0  ;;  %v1132_v38 = vpop.f32.mrb[13].mxu1  ;;  %v1131_v6 = vadd.f32 %v1130_v34, %v2673_v49  ;;  %v3754_v33 = vld [vmem:[#allocation10_spill] sm:$0xff]  ;;  %v3755_v34 = vld [vmem:[#allocation17_spill] sm:$0xff] }
 0x43c   : > { %v1092_v39 = vadd.f32 %v1091_v37, %v2666_v45  ;;  %v1093_v40 = vpop.f32.mrb[14].mxu0  ;;  %v1134_v41 = vpop.f32.mrb[14].mxu1  ;;  %v1133_v3 = vadd.f32 %v1132_v38, %v2670_v63  ;;  %v3095_v37 = vld [vmem:[%s3536_s1 + $0xa8] ss:$16 sps:$4 sm:$0xff]   ;;  %v3102_v38 = vld [vmem:[%s3536_s1 + $0xcc] ss:$16 sps:$4 sm:$0xff]  }
 0x43d   : > { %v1788_v42 = vmul.f32 -1.442695, %v1090_v36  ;;  %v1094_v44 = vpop.f32.mrb[15].mxu0  ;;  %v1135_v47 = vpop.f32.mrb[15].mxu1  ;;  %v3756_v36 = vld [vmem:[#allocation14_spill] sm:$0xff] }
 0x43e   : > { %v1789_v48 = vmul.f32 -1.442695, %v1092_v39  ;;  %v1790_v5 = vmul.f32 -1.442695, %v1133_v3  ;;  %v3109_v39 = vld [vmem:[%s3536_s1 + $0xc8] ss:$16 sps:$4 sm:$0xff]  }
 0x43f   : > { %1977 = vpow2.f32 %v1788_v42  ;;  %v3116_v40 = vld [vmem:[%s3536_s1 + $0xec] ss:$16 sps:$4 sm:$0xff]   ;;  %v3122_v41 = vld [vmem:[%s3536_s1 + $0xe0] ss:$16 sps:$4 sm:$0xff]   ;;  %v3128_v42 = vld [vmem:[%s3536_s1 + $0xe8] ss:$16 sps:$4 sm:$0xff]  }
 0x440   : > { %1979 = vpow2.f32 %v1789_v48  ;;  %v3134_v44 = vld [vmem:[%s3536_s1 + $0x104] ss:$16 sps:$4 sm:$0xff]   ;;  %v3140_v47 = vld [vmem:[%s3536_s1 + $0x10c] ss:$16 sps:$4 sm:$0xff]   ;;  %v3146_v48 = vld [vmem:[%s3536_s1 + $0x100] ss:$16 sps:$4 sm:$0xff]  }
 0x441   : > { %1981 = vpow2.f32 %v1790_v5  ;;  %v3152_v3 = vld [vmem:[%s3536_s1 + $0x108] ss:$16 sps:$4 sm:$0xff]   ;;  %v3158_v5 = vld [vmem:[%s3536_s1 + $0x124] ss:$16 sps:$4 sm:$0xff]  }
 0x442   : > { %1983 = vtanh.f32 %v1131_v6  ;;  %v3164_v6 = vld [vmem:[%s3536_s1 + $0x12c] ss:$16 sps:$4 sm:$0xff]  }
 0x449   : > { %v1978_v7 = vpop.eup %1977 }
 0x44a   : > { %v1980_v9 = vpop.eup %1979  ;;  %v1140_v10 = vadd.f32 1.0, %v1978_v7  ;;  %v3170_v7 = vld [vmem:[%s3536_s1 + $0x120] ss:$16 sps:$4 sm:$0xff]  }
 0x44b   : > { %v1146_v11 = vadd.f32 1.0, %v1980_v9  ;;  %v1982_v12 = vpop.eup %1981  ;;  %v3176_v9 = vld [vmem:[%s3536_s1 + $0x128] ss:$16 sps:$4 sm:$0xff]  }
 0x44c   : > { %1985 = vrcp.f32 %v1140_v10  ;;  %v1984_v13 = vpop.eup %1983  ;;  %v1153_v15 = vadd.f32 1.0, %v1982_v12  ;;  %v3182_v10 = vld [vmem:[%s3536_s1 + $0x144] ss:$16 sps:$4 sm:$0xff]   ;;  %v3194_v12 = vld [vmem:[%s3536_s1 + $0x140] ss:$16 sps:$4 sm:$0xff]  }
 0x44d   : > { %1987 = vrcp.f32 %v1146_v11  ;;  %v3188_v11 = vld [vmem:[%s3536_s1 + $0x14c] ss:$16 sps:$4 sm:$0xff]  }
 0x44e   : > { %1989 = vrcp.f32 %v1153_v15  ;;  %v3212_v15 = vld [vmem:[%s3536_s1 + $0x16c] ss:$16 sps:$4 sm:$0xff]  }
 0x44f   : > { %3759 = vst [vmem:[#allocation19_spill] sm:$0xff] %v3212_v15 }
 0x456   : > { %v1986_v14 = vpop.eup %1985 }
 0x457   : > { %v1988_v16 = vpop.eup %1987  ;;  %v1157_v17 = vmul.f32 %v1986_v14, %v1984_v13  ;;  %v3200_v13 = vld [vmem:[%s3536_s1 + $0x148] ss:$16 sps:$4 sm:$0xff]   ;;  %v3206_v14 = vld [vmem:[%s3536_s1 + $0x164] ss:$16 sps:$4 sm:$0xff]  }
 0x458   : > { %v1156_v18 = vmul.f32 %v1988_v16, %v2850_v53  ;;  %v1990_v20 = vpop.eup %1989  ;;  %3757 = vst [vmem:[#allocation18_spill] sm:$0xff] %v3200_v13  ;;  %3758 = vst [vmem:[#allocation24_spill] sm:$0xff] %v3206_v14  ;;  %v3218_v16 = vld [vmem:[%s3536_s1 + $0x160] ss:$16 sps:$4 sm:$0xff]   ;;  %v3272_v53 = vld [vmem:[%s3536_s1 + $0x1a8] ss:$16 sps:$4 sm:$0xff]  }
 0x459   : > { %3760 = vst [vmem:[#allocation25_spill] sm:$0xff] %v3218_v16  ;;  %3769 = vst [vmem:[#allocation16_spill] sm:$0xff] %v3272_v53 }
 0x45a   : > { %v3059_v19 = vadd.f32 %v1157_v17, %v1156_v18  ;;  %v3224_v17 = vld [vmem:[%s3536_s1 + $0x168] ss:$16 sps:$4 sm:$0xff]   ;;  %v3230_v18 = vld [vmem:[%s3536_s1 + $0x184] ss:$16 sps:$4 sm:$0xff]  }
 0x45b   : > { %3761 = vst [vmem:[#allocation22_spill] sm:$0xff] %v3224_v17  ;;  %3762 = vst [vmem:[#allocation27_spill] sm:$0xff] %v3230_v18 }
 0x45c   : > { %3750 = vst [vmem:[#allocation15_spill] sm:$0xff] %v3059_v19  ;;  %1991 = vtanh.f32 %v3059_v19 }
 0x466   : > { %v1992_v22 = vpop.eup %1991 }
 0x467   : > { %v1160_v23 = vmul.f32 %v1992_v22, %v1990_v20  ;;  %v3236_v20 = vld [vmem:[%s3536_s1 + $0x18c] ss:$16 sps:$4 sm:$0xff]   ;;  %v3242_v22 = vld [vmem:[%s3536_s1 + $0x180] ss:$16 sps:$4 sm:$0xff]  }
 0x468   : > { %3763 = vst [vmem:[#allocation23_spill] sm:$0xff] %v3236_v20  ;;  %3764 = vst [vmem:[#allocation28_spill] sm:$0xff] %v3242_v22 }
 0x469   : > { %v3069_v25 = vsel %vm1168_vm8, %v1160_v23, %v2860_v1  ;;  %v1175_v31 = vpack.c.bf16 %v1160_v23, %v1160_v23  ;;  %v3752_v1 = vld [vmem:[#allocation9_spill] sm:$0xff] }
 0x46a   : > { %v3248_v23 = vld [vmem:[%s3536_s1 + $0x188] ss:$16 sps:$4 sm:$0xff]   ;;  %3768 = vst [vmem:[#allocation9_spill] sm:$0xff] %v3266_v21 }
 0x46b   : > { %1208 = vmatprep.mubr.bf16.mxu0 %v1175_v31  ;;  %1249 = vmatprep.mubr.bf16.mxu1 %v1175_v31  ;;  %3765 = vst [vmem:[#allocation26_spill] sm:$0xff] %v3248_v23  ;;  %v3260_v31 = vld [vmem:[%s3536_s1 + $0x1ac] ss:$16 sps:$4 sm:$0xff]  }
 0x46c   : > { %1209 = vmatmul.mubr.bf16.vlgmr.msra.gmra.mrb[16].mxu0 %v1925_v24  ;;  %1250 = vmatmul.mubr.bf16.vlgmr.msra.gmra.mrb[16].mxu1 %v1925_v24  ;;  %v3254_v24 = vld [vmem:[%s3536_s1 + $0x1a4] ss:$16 sps:$4 sm:$0xff]   ;;  %3767 = vst [vmem:[#allocation7_spill] sm:$0xff] %v3260_v31 }
 0x46d   : > { %1298 = vmatpush1.bf16.msra.mxu0 %v2865_v28  ;;  %1339 = vmatpush1.bf16.msra.mxu1 %v2871_v43  ;;  %3766 = vst [vmem:[#allocation29_spill] sm:$0xff] %v3254_v24 }
 0x46e   : > { %1299 = vmatprep.subr.bf16.mxu0 %v2877_v50  ;;  %1340 = vmatprep.subr.bf16.mxu1 %v2883_v54 }
 0x471   : > { %1300 = vmatpush1.bf16.msra.mxu0 %v2889_v46  ;;  %1341 = vmatpush1.bf16.msra.mxu1 %v2895_v8 }
 0x472   : > { %1301 = vmatprep.subr.bf16.mxu0 %v2901_v51  ;;  %1342 = vmatprep.subr.bf16.mxu1 %v2907_v60 }
 0x475   : > { %1302 = vmatpush1.bf16.msra.mxu0 %v2913_v55  ;;  %1343 = vmatpush1.bf16.msra.mxu1 %v2919_v59 }
 0x476   : > { %1303 = vmatprep.subr.bf16.mxu0 %v2925_v2  ;;  %1344 = vmatprep.subr.bf16.mxu1 %v2931_v4 }
 0x479   : > { %1304 = vmatpush1.bf16.msra.mxu0 %v2937_v61  ;;  %1345 = vmatpush1.bf16.msra.mxu1 %v2943_v57 }
 0x47a   : > { %1305 = vmatprep.subr.bf16.mxu0 %v3752_v1  ;;  %1346 = vmatprep.subr.bf16.mxu1 %v3753_v32 }
 0x47d   : > { %1306 = vmatpush1.bf16.msra.mxu0 %v3754_v33  ;;  %1347 = vmatpush1.bf16.msra.mxu1 %v2967_v52 }
 0x47e   : > { %1307 = vmatprep.subr.bf16.mxu0 %v3755_v34  ;;  %1348 = vmatprep.subr.bf16.mxu1 %v3756_v36 }
 0x481   : > { %1308 = vmatpush1.bf16.msra.mxu0 %v2985_v56  ;;  %1349 = vmatpush1.bf16.msra.mxu1 %v3095_v37 }
 0x482   : > { %1309 = vmatprep.subr.bf16.mxu0 %v2992_v62  ;;  %1350 = vmatprep.subr.bf16.mxu1 %v3102_v38 }
 0x485   : > { %1310 = vmatpush1.bf16.msra.mxu0 %v2999_v27  ;;  %1351 = vmatpush1.bf16.msra.mxu1 %v3109_v39 }
 0x486   : > { %1311 = vmatprep.subr.bf16.mxu0 %v3006_v29  ;;  %1352 = vmatprep.subr.bf16.mxu1 %v3116_v40 }
 0x489   : > { %1312 = vmatpush1.bf16.msra.mxu0 %v3122_v41  ;;  %1353 = vmatpush1.bf16.msra.mxu1 %v3128_v42 }
 0x48a   : > { %1313 = vmatprep.subr.bf16.mxu0 %v3134_v44  ;;  %1354 = vmatprep.subr.bf16.mxu1 %v3140_v47 }
 0x48d   : > { %1314 = vmatpush1.bf16.msra.mxu0 %v3146_v48  ;;  %1355 = vmatpush1.bf16.msra.mxu1 %v3152_v3 }
 0x48e   : > { %1315 = vmatprep.subr.bf16.mxu0 %v3158_v5  ;;  %1356 = vmatprep.subr.bf16.mxu1 %v3164_v6 }
 0x491   : > { %1316 = vmatpush1.bf16.msra.mxu0 %v3170_v7  ;;  %1357 = vmatpush1.bf16.msra.mxu1 %v3176_v9 }
 0x492   : > { %1317 = vmatprep.subr.bf16.mxu0 %v3182_v10  ;;  %1358 = vmatprep.subr.bf16.mxu1 %v3188_v11 }
 0x495   : > { %1318 = vmatpush1.bf16.msra.mxu0 %v3194_v12  ;;  %1359 = vmatpush1.bf16.msra.mxu1 %v3200_v13 }
 0x496   : > { %1319 = vmatprep.subr.bf16.mxu0 %v3206_v14  ;;  %1360 = vmatprep.subr.bf16.mxu1 %v3212_v15 }
 0x499   : > { %1320 = vmatpush1.bf16.msra.mxu0 %v3218_v16  ;;  %1361 = vmatpush1.bf16.msra.mxu1 %v3224_v17 }
 0x49a   : > { %1321 = vmatprep.subr.bf16.mxu0 %v3230_v18  ;;  %1362 = vmatprep.subr.bf16.mxu1 %v3236_v20 }
 0x49d   : > { %1322 = vmatpush1.bf16.msra.mxu0 %v3242_v22  ;;  %1363 = vmatpush1.bf16.msra.mxu1 %v3248_v23 }
 0x49e   : > { %1323 = vmatprep.subr.bf16.mxu0 %v3254_v24  ;;  %1364 = vmatprep.subr.bf16.mxu1 %v3260_v31  ;;  %v3278_v24 = vld [vmem:[%s3536_s1 + $0x1c4] ss:$16 sps:$4 sm:$0xff]   ;;  %v3284_v31 = vld [vmem:[%s3536_s1 + $0x1cc] ss:$16 sps:$4 sm:$0xff]  }
 0x49f   : > { %3770 = vst [vmem:[#allocation10_spill] sm:$0xff] %v3278_v24  ;;  %3771 = vst [vmem:[#allocation17_spill] sm:$0xff] %v3284_v31 }
 0x4a1   : > { %1324 = vmatpush1.bf16.msra.mxu0 %v3266_v21  ;;  %1365 = vmatpush1.bf16.msra.mxu1 %v3272_v53  ;;  %v3290_v21 = vld [vmem:[%s3536_s1 + $0x1c0] ss:$16 sps:$4 sm:$0xff]   ;;  %v3296_v53 = vld [vmem:[%s3536_s1 + $0x1c8] ss:$16 sps:$4 sm:$0xff]  }
 0x4a2   : > { %1325 = vmatprep.subr.bf16.mxu0 %v3278_v24  ;;  %1366 = vmatprep.subr.bf16.mxu1 %v3284_v31  ;;  %3772 = vst [vmem:[#allocation14_spill] sm:$0xff] %v3290_v21  ;;  %3773 = vst [vmem:[#allocation34_spill] sm:$0xff] %v3296_v53  ;;  %v3302_v24 = vld [vmem:[%s3536_s1 + $0x1e4] ss:$16 sps:$4 sm:$0xff]   ;;  %v3308_v31 = vld [vmem:[%s3536_s1 + $0x1ec] ss:$16 sps:$4 sm:$0xff]  }
 0x4a3   : > { %3774 = vst [vmem:[#allocation35_spill] sm:$0xff] %v3302_v24  ;;  %3775 = vst [vmem:[#allocation36_spill] sm:$0xff] %v3308_v31 }
 0x4a5   : > { %1326 = vmatpush1.bf16.msra.mxu0 %v3290_v21  ;;  %1367 = vmatpush1.bf16.msra.mxu1 %v3296_v53  ;;  %v3314_v21 = vld [vmem:[%s3536_s1 + $0x1e0] ss:$16 sps:$4 sm:$0xff]   ;;  %v3320_v53 = vld [vmem:[%s3536_s1 + $0x1e8] ss:$16 sps:$4 sm:$0xff]  }
 0x4a6   : > { %1327 = vmatprep.subr.bf16.mxu0 %v3302_v24  ;;  %1368 = vmatprep.subr.bf16.mxu1 %v3308_v31  ;;  %3776 = vst [vmem:[#allocation37_spill] sm:$0xff] %v3314_v21  ;;  %3777 = vst [vmem:[#allocation38_spill] sm:$0xff] %v3320_v53  ;;  %v1404_v31 = vstv %s1403_s11 }
 0x4a7   : > { %vm1405_vm9 = vcmp.eq.s32.totalorder %v3738_v0, %v1404_v31 }
 0x4a8   : > { %v1406_v24 = vsel %vm1405_vm9, 1, %v3739_v58 }
 0x4a9   : > { %1328 = vmatpush1.bf16.msra.mxu0 %v3314_v21  ;;  %1369 = vmatpush1.bf16.msra.mxu1 %v3320_v53 }
 0x4aa   : > { %1418 = vmatprep.subr.bf16.mxu0 %v2838_v26  ;;  %1459 = vmatprep.subr.bf16.mxu1 %v3048_v30 }
 0x4ab   : > { %1408 = vperm.xlu1 %1824, %v1406_v24  }
 0x53f   : > { %v1210_v23 = vpop.f32.mrb[16].mxu0  ;;  %v1251_v21 = vpop.f32.mrb[16].mxu1 }
 0x540   : > { %v1211_v22 = vadd.f32 %v1210_v23, %v3749_v35  ;;  %v1212_v20 = vpop.f32.mrb[17].mxu0  ;;  %v1253_v18 = vpop.f32.mrb[17].mxu1  ;;  %v1252_v24 = vadd.f32 %v1251_v21, %v2673_v49 }
 0x541   : > { %v1213_v17 = vadd.f32 %v1212_v20, %v2666_v45  ;;  %v1214_v53 = vpop.f32.mrb[18].mxu0  ;;  %v1255_v16 = vpop.f32.mrb[18].mxu1  ;;  %v1254_v31 = vadd.f32 %v1253_v18, %v2670_v63 }
 0x542   : > { %v1793_v26 = vmul.f32 -1.442695, %v1211_v22  ;;  %v1215_v15 = vpop.f32.mrb[19].mxu0  ;;  %v1256_v30 = vpop.f32.mrb[19].mxu1 }
 0x543   : > { %v1794_v14 = vmul.f32 -1.442695, %v1213_v17  ;;  %v1795_v58 = vmul.f32 -1.442695, %v1254_v31  ;;  %v3780_v31 = vld [vmem:[#allocation24_spill] sm:$0xff] }
 0x544   : > { %1993 = vpow2.f32 %v1793_v26 }
 0x545   : > { %1995 = vpow2.f32 %v1794_v14 }
 0x546   : > { %1997 = vpow2.f32 %v1795_v58 }
 0x547   : > { %1999 = vtanh.f32 %v1252_v24  ;;  %v3781_v24 = vld [vmem:[#allocation19_spill] sm:$0xff] }
 0x54e   : > { %v1994_v0 = vpop.eup %1993 }
 0x54f   : > { %v1996_v23 = vpop.eup %1995  ;;  %v1261_v35 = vadd.f32 1.0, %v1994_v0  ;;  %v3336_v0 = vpop.permute.xlu0 %1287 }
 0x550   : > { %v1267_v13 = vadd.f32 1.0, %v1996_v23  ;;  %v1998_v53 = vpop.eup %1997  ;;  %3778 = vst [vmem:[#allocation39_spill] sm:$0xff] %v3336_v0  ;;  %vm1289_vm10 = vcmp.eq.s32.totalorder %v3336_v0, 1  ;;  %v3782_v23 = vld [vmem:[#allocation25_spill] sm:$0xff]  ;;  %v3795_v0 = vld [vmem:[#allocation34_spill] sm:$0xff] }
 0x551   : > { %2001 = vrcp.f32 %v1261_v35  ;;  %v2000_v15 = vpop.eup %1999  ;;  %v1274_v16 = vadd.f32 1.0, %v1998_v53  ;;  %v3783_v53 = vld [vmem:[#allocation22_spill] sm:$0xff] }
 0x552   : > { %2003 = vrcp.f32 %v1267_v13  ;;  %v1926_v13 = vld [vmem:[%s2188_s8 + $0x14] ss:$0 sps:$4 sm:$0xff]  }
 0x553   : > { %2005 = vrcp.f32 %v1274_v16  ;;  %v3786_v16 = vld [vmem:[#allocation28_spill] sm:$0xff] }
 0x55b   : > { %v2002_v30 = vpop.eup %2001 }
 0x55c   : > { %v2004_v26 = vpop.eup %2003  ;;  %v1278_v14 = vmul.f32 %v2002_v30, %v2000_v15  ;;  %v3784_v15 = vld [vmem:[#allocation27_spill] sm:$0xff] }
 0x55d   : > { %v1277_v17 = vmul.f32 %v2004_v26, %v3059_v19  ;;  %v2006_v58 = vpop.eup %2005  ;;  %v3785_v30 = vld [vmem:[#allocation23_spill] sm:$0xff]  ;;  %v3787_v26 = vld [vmem:[#allocation26_spill] sm:$0xff] }
 0x55e   : > { %v3796_v19 = vld [vmem:[#allocation35_spill] sm:$0xff] }
 0x55f   : > { %v3333_v18 = vadd.f32 %v1278_v14, %v1277_v17  ;;  %v3788_v14 = vld [vmem:[#allocation29_spill] sm:$0xff]  ;;  %v3789_v17 = vld [vmem:[#allocation7_spill] sm:$0xff] }
 0x561   : > { %2007 = vtanh.f32 %v3333_v18 }
 0x56b   : > { %v2008_v21 = vpop.eup %2007 }
 0x56c   : > { %v1281_v35 = vmul.f32 %v2008_v21, %v2006_v58  ;;  %v3790_v58 = vld [vmem:[#allocation9_spill] sm:$0xff]  ;;  %v3791_v21 = vld [vmem:[#allocation16_spill] sm:$0xff] }
 0x56e   : > { %v3343_v20 = vsel %vm1289_vm10, %v1281_v35, %v3069_v25  ;;  %v1296_v22 = vpack.c.bf16 %v1281_v35, %v1281_v35  ;;  %v3779_v25 = vld [vmem:[#allocation18_spill] sm:$0xff] }
 0x56f   : > { %v3792_v35 = vld [vmem:[#allocation10_spill] sm:$0xff] }
 0x570   : > { %1329 = vmatprep.mubr.bf16.mxu0 %v1296_v22  ;;  %1370 = vmatprep.mubr.bf16.mxu1 %v1296_v22  ;;  %v3794_v22 = vld [vmem:[#allocation14_spill] sm:$0xff] }
 0x571   : > { %1330 = vmatmul.mubr.bf16.vlgmr.msra.gmra.mrb[20].mxu0 %v1926_v13  ;;  %1371 = vmatmul.mubr.bf16.vlgmr.msra.gmra.mrb[20].mxu1 %v1926_v13  ;;  %v3793_v13 = vld [vmem:[#allocation17_spill] sm:$0xff] }
 0x572   : > { %1419 = vmatpush1.bf16.msra.mxu0 %v2865_v28  ;;  %1460 = vmatpush1.bf16.msra.mxu1 %v2871_v43 }
 0x573   : > { %1420 = vmatprep.subr.bf16.mxu0 %v2877_v50  ;;  %1461 = vmatprep.subr.bf16.mxu1 %v2883_v54 }
 0x576   : > { %1421 = vmatpush1.bf16.msra.mxu0 %v2889_v46  ;;  %1462 = vmatpush1.bf16.msra.mxu1 %v2895_v8 }
 0x577   : > { %1422 = vmatprep.subr.bf16.mxu0 %v2901_v51  ;;  %1463 = vmatprep.subr.bf16.mxu1 %v2907_v60 }
 0x57a   : > { %1423 = vmatpush1.bf16.msra.mxu0 %v2913_v55  ;;  %1464 = vmatpush1.bf16.msra.mxu1 %v2919_v59 }
 0x57b   : > { %1424 = vmatprep.subr.bf16.mxu0 %v2925_v2  ;;  %1465 = vmatprep.subr.bf16.mxu1 %v2931_v4 }
 0x57e   : > { %1425 = vmatpush1.bf16.msra.mxu0 %v2937_v61  ;;  %1466 = vmatpush1.bf16.msra.mxu1 %v2943_v57 }
 0x57f   : > { %1426 = vmatprep.subr.bf16.mxu0 %v3752_v1  ;;  %1467 = vmatprep.subr.bf16.mxu1 %v3753_v32 }
 0x582   : > { %1427 = vmatpush1.bf16.msra.mxu0 %v3754_v33  ;;  %1468 = vmatpush1.bf16.msra.mxu1 %v2967_v52 }
 0x583   : > { %1428 = vmatprep.subr.bf16.mxu0 %v3755_v34  ;;  %1469 = vmatprep.subr.bf16.mxu1 %v3756_v36 }
 0x586   : > { %1429 = vmatpush1.bf16.msra.mxu0 %v2985_v56  ;;  %1470 = vmatpush1.bf16.msra.mxu1 %v3095_v37 }
 0x587   : > { %1430 = vmatprep.subr.bf16.mxu0 %v2992_v62  ;;  %1471 = vmatprep.subr.bf16.mxu1 %v3102_v38 }
 0x58a   : > { %1431 = vmatpush1.bf16.msra.mxu0 %v2999_v27  ;;  %1472 = vmatpush1.bf16.msra.mxu1 %v3109_v39 }
 0x58b   : > { %1432 = vmatprep.subr.bf16.mxu0 %v3006_v29  ;;  %1473 = vmatprep.subr.bf16.mxu1 %v3116_v40 }
 0x58e   : > { %1433 = vmatpush1.bf16.msra.mxu0 %v3122_v41  ;;  %1474 = vmatpush1.bf16.msra.mxu1 %v3128_v42 }
 0x58f   : > { %1434 = vmatprep.subr.bf16.mxu0 %v3134_v44  ;;  %1475 = vmatprep.subr.bf16.mxu1 %v3140_v47 }
 0x592   : > { %1435 = vmatpush1.bf16.msra.mxu0 %v3146_v48  ;;  %1476 = vmatpush1.bf16.msra.mxu1 %v3152_v3 }
 0x593   : > { %1436 = vmatprep.subr.bf16.mxu0 %v3158_v5  ;;  %1477 = vmatprep.subr.bf16.mxu1 %v3164_v6 }
 0x596   : > { %1437 = vmatpush1.bf16.msra.mxu0 %v3170_v7  ;;  %1478 = vmatpush1.bf16.msra.mxu1 %v3176_v9 }
 0x597   : > { %1438 = vmatprep.subr.bf16.mxu0 %v3182_v10  ;;  %1479 = vmatprep.subr.bf16.mxu1 %v3188_v11 }
 0x59a   : > { %1439 = vmatpush1.bf16.msra.mxu0 %v3194_v12  ;;  %1480 = vmatpush1.bf16.msra.mxu1 %v3779_v25 }
 0x59b   : > { %1440 = vmatprep.subr.bf16.mxu0 %v3780_v31  ;;  %1481 = vmatprep.subr.bf16.mxu1 %v3781_v24 }
 0x59e   : > { %1441 = vmatpush1.bf16.msra.mxu0 %v3782_v23  ;;  %1482 = vmatpush1.bf16.msra.mxu1 %v3783_v53 }
 0x59f   : > { %1442 = vmatprep.subr.bf16.mxu0 %v3784_v15  ;;  %1483 = vmatprep.subr.bf16.mxu1 %v3785_v30 }
 0x5a2   : > { %1443 = vmatpush1.bf16.msra.mxu0 %v3786_v16  ;;  %1484 = vmatpush1.bf16.msra.mxu1 %v3787_v26  ;;  %v3797_v16 = vld [vmem:[#allocation36_spill] sm:$0xff]  ;;  %v3798_v26 = vld [vmem:[#allocation37_spill] sm:$0xff] }
 0x5a3   : > { %1444 = vmatprep.subr.bf16.mxu0 %v3788_v14  ;;  %1485 = vmatprep.subr.bf16.mxu1 %v3789_v17  ;;  %v3799_v14 = vld [vmem:[#allocation38_spill] sm:$0xff]  ;;  %v3800_v17 = vld [vmem:[#allocation11_spill] sm:$0xff] }
 0x5a6   : > { %1445 = vmatpush1.bf16.msra.mxu0 %v3790_v58  ;;  %1486 = vmatpush1.bf16.msra.mxu1 %v3791_v21  ;;  %v3801_v58 = vld [vmem:[#allocation20_spill] sm:$0xff]  ;;  %v3802_v21 = vld [vmem:[#allocation13_spill] sm:$0xff] }
 0x5a7   : > { %1446 = vmatprep.subr.bf16.mxu0 %v3792_v35  ;;  %1487 = vmatprep.subr.bf16.mxu1 %v3793_v13  ;;  %v1525_v35 = vstv %s1524_s12  ;;  %v3803_v13 = vmov 0  }
 0x5a8   : > { %vm1526_vm11 = vcmp.eq.s32.totalorder %v3802_v21, %v1525_v35 }
 0x5aa   : > { %1447 = vmatpush1.bf16.msra.mxu0 %v3794_v22  ;;  %1488 = vmatpush1.bf16.msra.mxu1 %v3795_v0  ;;  %v1527_v22 = vsel %vm1526_vm11, 1, %v3803_v13 }
 0x5ab   : > { %1448 = vmatprep.subr.bf16.mxu0 %v3796_v19  ;;  %1489 = vmatprep.subr.bf16.mxu1 %v3797_v16  ;;  %v3804_v19 = vld [vmem:[#allocation30_spill] sm:$0xff] }
 0x5ac   : > { %1529 = vperm.xlu0 %1823, %v1527_v22  }
 0x5ae   : > { %1449 = vmatpush1.bf16.msra.mxu0 %v3798_v26  ;;  %1490 = vmatpush1.bf16.msra.mxu1 %v3799_v14 }
 0x5af   : > { %1539 = vmatprep.subr.bf16.mxu0 %v3800_v17  ;;  %1580 = vmatprep.subr.bf16.mxu1 %v3801_v58 }
 0x644   : > { %v1331_v0 = vpop.f32.mrb[20].mxu0  ;;  %v1372_v30 = vpop.f32.mrb[20].mxu1 }
 0x645   : > { %v1332_v15 = vadd.f32 %v1331_v0, %v3804_v19  ;;  %v1333_v16 = vpop.f32.mrb[21].mxu0  ;;  %v1374_v53 = vpop.f32.mrb[21].mxu1  ;;  %v1373_v22 = vadd.f32 %v1372_v30, %v2673_v49 }
 0x646   : > { %v1334_v26 = vadd.f32 %v1333_v16, %v2666_v45  ;;  %v1335_v14 = vpop.f32.mrb[22].mxu0  ;;  %v1376_v23 = vpop.f32.mrb[22].mxu1  ;;  %v1375_v35 = vadd.f32 %v1374_v53, %v2670_v63 }
 0x647   : > { %v1798_v17 = vmul.f32 -1.442695, %v1332_v15  ;;  %v1336_v24 = vpop.f32.mrb[23].mxu0  ;;  %v1377_v58 = vpop.f32.mrb[23].mxu1 }
 0x648   : > { %v1799_v31 = vmul.f32 -1.442695, %v1334_v26  ;;  %v1800_v13 = vmul.f32 -1.442695, %v1375_v35 }
 0x649   : > { %2009 = vpow2.f32 %v1798_v17 }
 0x64a   : > { %2011 = vpow2.f32 %v1799_v31 }
 0x64b   : > { %2013 = vpow2.f32 %v1800_v13 }
 0x64c   : > { %2015 = vtanh.f32 %v1373_v22 }
 0x653   : > { %v2010_v21 = vpop.eup %2009 }
 0x654   : > { %v2012_v0 = vpop.eup %2011  ;;  %v1382_v19 = vadd.f32 1.0, %v2010_v21  ;;  %v3420_v21 = vpop.permute.xlu1 %1408 }
 0x655   : > { %v1388_v25 = vadd.f32 1.0, %v2012_v0  ;;  %v2014_v23 = vpop.eup %2013  ;;  %vm1410_vm12 = vcmp.eq.s32.totalorder %v3420_v21, 1 }
 0x656   : > { %2017 = vrcp.f32 %v1382_v19  ;;  %v2016_v24 = vpop.eup %2015  ;;  %v1395_v16 = vadd.f32 1.0, %v2014_v23 }
 0x657   : > { %2019 = vrcp.f32 %v1388_v25  ;;  %v1927_v25 = vld [vmem:[%s2188_s8 + $0x18] ss:$0 sps:$4 sm:$0xff]  }
 0x658   : > { %2021 = vrcp.f32 %v1395_v16 }
 0x660   : > { %v2018_v15 = vpop.eup %2017 }
 0x661   : > { %v2020_v26 = vpop.eup %2019  ;;  %v1399_v31 = vmul.f32 %v2018_v15, %v2016_v24 }
 0x662   : > { %v1398_v53 = vmul.f32 %v2020_v26, %v3333_v18  ;;  %v2022_v30 = vpop.eup %2021 }
 0x664   : > { %v3417_v14 = vadd.f32 %v1399_v31, %v1398_v53 }
 0x666   : > { %2023 = vtanh.f32 %v3417_v14 }
 0x670   : > { %v2024_v13 = vpop.eup %2023 }
 0x671   : > { %v1402_v19 = vmul.f32 %v2024_v13, %v2022_v30 }
 0x673   : > { %v3427_v17 = vsel %vm1410_vm12, %v1402_v19, %v3343_v20  ;;  %v1417_v58 = vpack.c.bf16 %v1402_v19, %v1402_v19  ;;  %v1530_v19 = vpop.permute.xlu0 %1529 }
 0x674   : > { %vm1531_vm14 = vcmp.eq.s32.totalorder %v1530_v19, 1 }
 0x675   : > { %1450 = vmatprep.mubr.bf16.mxu0 %v1417_v58  ;;  %1491 = vmatprep.mubr.bf16.mxu1 %v1417_v58 }
 0x676   : > { %1451 = vmatmul.mubr.bf16.vlgmr.msra.gmra.mrb[24].mxu0 %v1927_v25  ;;  %1492 = vmatmul.mubr.bf16.vlgmr.msra.gmra.mrb[24].mxu1 %v1927_v25 }
 0x677   : > { %1540 = vmatpush1.bf16.msra.mxu0 %v2865_v28  ;;  %1581 = vmatpush1.bf16.msra.mxu1 %v2871_v43  ;;  %v3807_v28 = vld [vmem:[#allocation19_spill] sm:$0xff]  ;;  %v3808_v43 = vld [vmem:[#allocation25_spill] sm:$0xff] }
 0x678   : > { %1541 = vmatprep.subr.bf16.mxu0 %v2877_v50  ;;  %1582 = vmatprep.subr.bf16.mxu1 %v2883_v54  ;;  %v3809_v50 = vld [vmem:[#allocation22_spill] sm:$0xff]  ;;  %v3810_v54 = vld [vmem:[#allocation27_spill] sm:$0xff] }
 0x67b   : > { %1542 = vmatpush1.bf16.msra.mxu0 %v2889_v46  ;;  %1583 = vmatpush1.bf16.msra.mxu1 %v2895_v8  ;;  %v3811_v46 = vld [vmem:[#allocation23_spill] sm:$0xff]  ;;  %v3812_v8 = vld [vmem:[#allocation28_spill] sm:$0xff] }
 0x67c   : > { %1543 = vmatprep.subr.bf16.mxu0 %v2901_v51  ;;  %1584 = vmatprep.subr.bf16.mxu1 %v2907_v60  ;;  %v3813_v51 = vld [vmem:[#allocation26_spill] sm:$0xff]  ;;  %v3814_v60 = vld [vmem:[#allocation29_spill] sm:$0xff] }
 0x67f   : > { %1544 = vmatpush1.bf16.msra.mxu0 %v2913_v55  ;;  %1585 = vmatpush1.bf16.msra.mxu1 %v2919_v59  ;;  %v3815_v55 = vld [vmem:[#allocation7_spill] sm:$0xff]  ;;  %v3816_v59 = vld [vmem:[#allocation9_spill] sm:$0xff] }
 0x680   : > { %1545 = vmatprep.subr.bf16.mxu0 %v2925_v2  ;;  %1586 = vmatprep.subr.bf16.mxu1 %v2931_v4  ;;  %v3817_v2 = vld [vmem:[#allocation16_spill] sm:$0xff]  ;;  %v3818_v4 = vld [vmem:[#allocation10_spill] sm:$0xff] }
 0x683   : > { %1546 = vmatpush1.bf16.msra.mxu0 %v2937_v61  ;;  %1587 = vmatpush1.bf16.msra.mxu1 %v2943_v57  ;;  %v3819_v61 = vld [vmem:[#allocation17_spill] sm:$0xff]  ;;  %v3820_v57 = vld [vmem:[#allocation14_spill] sm:$0xff] }
 0x684   : > { %1547 = vmatprep.subr.bf16.mxu0 %v3752_v1  ;;  %1588 = vmatprep.subr.bf16.mxu1 %v3753_v32  ;;  %v3824_v1 = vld [vmem:[#allocation37_spill] sm:$0xff]  ;;  %v3825_v32 = vld [vmem:[#allocation38_spill] sm:$0xff] }
 0x687   : > { %1548 = vmatpush1.bf16.msra.mxu0 %v3754_v33  ;;  %1589 = vmatpush1.bf16.msra.mxu1 %v2967_v52  ;;  %v3805_v52 = vld [vmem:[#allocation18_spill] sm:$0xff]  ;;  %v1646_v33 = vstv %s1645_s13 }
 0x688   : > { %1549 = vmatprep.subr.bf16.mxu0 %v3755_v34  ;;  %1590 = vmatprep.subr.bf16.mxu1 %v3756_v36  ;;  %v3826_v34 = vld [vmem:[#allocation13_spill] sm:$0xff]  ;;  %v3827_v36 = vmov 0  }
 0x689   : > { %vm1647_vm13 = vcmp.eq.s32.totalorder %v3826_v34, %v1646_v33 }
 0x68b   : > { %1550 = vmatpush1.bf16.msra.mxu0 %v2985_v56  ;;  %1591 = vmatpush1.bf16.msra.mxu1 %v3095_v37  ;;  %v3806_v56 = vld [vmem:[#allocation24_spill] sm:$0xff]  ;;  %v1648_v37 = vsel %vm1647_vm13, 1, %v3827_v36  ;;  %v3829_v36 = vld [vmem:[#allocation31_spill] sm:$0xff] }
 0x68c   : > { %1551 = vmatprep.subr.bf16.mxu0 %v2992_v62  ;;  %1592 = vmatprep.subr.bf16.mxu1 %v3102_v38  ;;  %v3821_v62 = vld [vmem:[#allocation34_spill] sm:$0xff] }
 0x68d   : > { %1650 = vperm.xlu1 %1824, %v1648_v37  }
 0x68f   : > { %1552 = vmatpush1.bf16.msra.mxu0 %v2999_v27  ;;  %1593 = vmatpush1.bf16.msra.mxu1 %v3109_v39  ;;  %v3822_v27 = vld [vmem:[#allocation35_spill] sm:$0xff] }
 0x690   : > { %1553 = vmatprep.subr.bf16.mxu0 %v3006_v29  ;;  %1594 = vmatprep.subr.bf16.mxu1 %v3116_v40  ;;  %v3823_v29 = vld [vmem:[#allocation36_spill] sm:$0xff]  ;;  %v3828_v40 = vld [vmem:[#allocation30_spill] sm:$0xff] }
 0x693   : > { %1554 = vmatpush1.bf16.msra.mxu0 %v3122_v41  ;;  %1595 = vmatpush1.bf16.msra.mxu1 %v3128_v42 }
 0x694   : > { %1555 = vmatprep.subr.bf16.mxu0 %v3134_v44  ;;  %1596 = vmatprep.subr.bf16.mxu1 %v3140_v47 }
 0x697   : > { %1556 = vmatpush1.bf16.msra.mxu0 %v3146_v48  ;;  %1597 = vmatpush1.bf16.msra.mxu1 %v3152_v3 }
 0x698   : > { %1557 = vmatprep.subr.bf16.mxu0 %v3158_v5  ;;  %1598 = vmatprep.subr.bf16.mxu1 %v3164_v6 }
 0x69b   : > { %1558 = vmatpush1.bf16.msra.mxu0 %v3170_v7  ;;  %1599 = vmatpush1.bf16.msra.mxu1 %v3176_v9 }
 0x69c   : > { %1559 = vmatprep.subr.bf16.mxu0 %v3182_v10  ;;  %1600 = vmatprep.subr.bf16.mxu1 %v3188_v11 }
 0x69f   : > { %1560 = vmatpush1.bf16.msra.mxu0 %v3194_v12  ;;  %1601 = vmatpush1.bf16.msra.mxu1 %v3805_v52  ;;  %v1928_v52 = vld [vmem:[%s2188_s8 + $0x1c] ss:$0 sps:$4 sm:$0xff]  }
 0x6a0   : > { %1561 = vmatprep.subr.bf16.mxu0 %v3806_v56  ;;  %1602 = vmatprep.subr.bf16.mxu1 %v3807_v28 }
 0x6a3   : > { %1562 = vmatpush1.bf16.msra.mxu0 %v3808_v43  ;;  %1603 = vmatpush1.bf16.msra.mxu1 %v3809_v50 }
 0x6a4   : > { %1563 = vmatprep.subr.bf16.mxu0 %v3810_v54  ;;  %1604 = vmatprep.subr.bf16.mxu1 %v3811_v46 }
 0x6a7   : > { %1564 = vmatpush1.bf16.msra.mxu0 %v3812_v8  ;;  %1605 = vmatpush1.bf16.msra.mxu1 %v3813_v51 }
 0x6a8   : > { %1565 = vmatprep.subr.bf16.mxu0 %v3814_v60  ;;  %1606 = vmatprep.subr.bf16.mxu1 %v3815_v55 }
 0x6ab   : > { %1566 = vmatpush1.bf16.msra.mxu0 %v3816_v59  ;;  %1607 = vmatpush1.bf16.msra.mxu1 %v3817_v2 }
 0x6ac   : > { %1567 = vmatprep.subr.bf16.mxu0 %v3818_v4  ;;  %1608 = vmatprep.subr.bf16.mxu1 %v3819_v61 }
 0x6af   : > { %1568 = vmatpush1.bf16.msra.mxu0 %v3820_v57  ;;  %1609 = vmatpush1.bf16.msra.mxu1 %v3821_v62 }
 0x6b0   : > { %1569 = vmatprep.subr.bf16.mxu0 %v3822_v27  ;;  %1610 = vmatprep.subr.bf16.mxu1 %v3823_v29 }
 0x6b3   : > { %1570 = vmatpush1.bf16.msra.mxu0 %v3824_v1  ;;  %1611 = vmatpush1.bf16.msra.mxu1 %v3825_v32 }
 0x749   : > { %v1452_v38 = vpop.f32.mrb[24].mxu0  ;;  %v1493_v39 = vpop.f32.mrb[24].mxu1 }
 0x74a   : > { %v1453_v41 = vadd.f32 %v1452_v38, %v3828_v40  ;;  %v1454_v42 = vpop.f32.mrb[25].mxu0  ;;  %v1495_v44 = vpop.f32.mrb[25].mxu1  ;;  %v1494_v12 = vadd.f32 %v1493_v39, %v2673_v49 }
 0x74b   : > { %v1455_v47 = vadd.f32 %v1454_v42, %v2666_v45  ;;  %v1456_v48 = vpop.f32.mrb[26].mxu0  ;;  %v1497_v3 = vpop.f32.mrb[26].mxu1  ;;  %v1496_v10 = vadd.f32 %v1495_v44, %v2670_v63 }
 0x74c   : > { %v1803_v5 = vmul.f32 -1.442695, %v1453_v41  ;;  %v1457_v6 = vpop.f32.mrb[27].mxu0  ;;  %v1498_v7 = vpop.f32.mrb[27].mxu1 }
 0x74d   : > { %v1804_v9 = vmul.f32 -1.442695, %v1455_v47  ;;  %v1805_v11 = vmul.f32 -1.442695, %v1496_v10  ;;  %v1651_v42 = vpop.permute.xlu1 %1650  ;;  %v3833_v47 = vld [vmem:[#allocation8_spill] sm:$0xff]  ;;  %v3835_v6 = vld [vmem:[#allocation15_spill] sm:$0xff] }
 0x74e   : > { %2025 = vpow2.f32 %v1803_v5  ;;  %vm1652_vm15 = vcmp.eq.s32.totalorder %v1651_v42, 1 }
 0x74f   : > { %2027 = vpow2.f32 %v1804_v9 }
 0x750   : > { %2029 = vpow2.f32 %v1805_v11 }
 0x751   : > { %2031 = vtanh.f32 %v1494_v12 }
 0x758   : > { %v2026_v20 = vpop.eup %2025 }
 0x759   : > { %v2028_v35 = vpop.eup %2027  ;;  %v1503_v22 = vadd.f32 1.0, %v2026_v20 }
 0x75a   : > { %v1509_v0 = vadd.f32 1.0, %v2028_v35  ;;  %v2030_v23 = vpop.eup %2029 }
 0x75b   : > { %2033 = vrcp.f32 %v1503_v22  ;;  %v2032_v24 = vpop.eup %2031  ;;  %v1516_v16 = vadd.f32 1.0, %v2030_v23 }
 0x75c   : > { %2035 = vrcp.f32 %v1509_v0 }
 0x75d   : > { %2037 = vrcp.f32 %v1516_v16 }
 0x765   : > { %v2034_v15 = vpop.eup %2033 }
 0x766   : > { %v2036_v26 = vpop.eup %2035  ;;  %v1520_v31 = vmul.f32 %v2034_v15, %v2032_v24 }
 0x767   : > { %v1519_v53 = vmul.f32 %v2036_v26, %v3417_v14  ;;  %v2038_v13 = vpop.eup %2037 }
 0x769   : > { %v1521_v30 = vadd.f32 %v1520_v31, %v1519_v53 }
 0x76b   : > { %2039 = vtanh.f32 %v1521_v30 }
 0x775   : > { %v2040_v25 = vpop.eup %2039 }
 0x776   : > { %v1523_v58 = vmul.f32 %v2040_v25, %v2038_v13 }
 0x778   : > { %v1532_v56 = vsel %vm1531_vm14, %v1523_v58, %v3427_v17  ;;  %v1538_v28 = vpack.c.bf16 %v1523_v58, %v1523_v58 }
 0x77a   : > { %1571 = vmatprep.mubr.bf16.mxu0 %v1538_v28  ;;  %1612 = vmatprep.mubr.bf16.mxu1 %v1538_v28 }
 0x77b   : > { %1572 = vmatmul.mubr.bf16.vlgmr.msra.gmra.mrb[28].mxu0 %v1928_v52  ;;  %1613 = vmatmul.mubr.bf16.vlgmr.msra.gmra.mrb[28].mxu1 %v1928_v52 }
 0x84e   : > { %v1573_v43 = vpop.f32.mrb[28].mxu0  ;;  %v1614_v50 = vpop.f32.mrb[28].mxu1 }
 0x84f   : > { %v1574_v54 = vadd.f32 %v1573_v43, %v3828_v40  ;;  %v1575_v46 = vpop.f32.mrb[29].mxu0  ;;  %v1616_v8 = vpop.f32.mrb[29].mxu1  ;;  %v1615_v62 = vadd.f32 %v1614_v50, %v2673_v49 }
 0x850   : > { %v1576_v51 = vadd.f32 %v1575_v46, %v2666_v45  ;;  %v1577_v60 = vpop.f32.mrb[30].mxu0  ;;  %v1618_v55 = vpop.f32.mrb[30].mxu1  ;;  %v1617_v17 = vadd.f32 %v1616_v8, %v2670_v63  ;;  %v346_v45 = vld [vmem:[#allocation5] sm:$0xff]  ;;  %v3831_v63 = vld [vmem:[#allocation6_spill] sm:$0xff] }
 0x851   : > { %v1808_v59 = vmul.f32 -1.442695, %v1574_v54  ;;  %v1578_v2 = vpop.f32.mrb[31].mxu0  ;;  %v1619_v4 = vpop.f32.mrb[31].mxu1  ;;  %v807_v38 = vsel %vm805_vm3, %v3829_v36, %v346_v45 }
 0x852   : > { %v1809_v61 = vmul.f32 -1.442695, %v1576_v51  ;;  %v1810_v57 = vmul.f32 -1.442695, %v1617_v17  ;;  %v928_v49 = vsel %vm926_vm4, %v3831_v63, %v807_v38 }
 0x853   : > { %2041 = vpow2.f32 %v1808_v59  ;;  %v1049_v3 = vsel %vm1047_vm6, %v3833_v47, %v928_v49 }
 0x854   : > { %2043 = vpow2.f32 %v1809_v61  ;;  %v1170_v9 = vsel %vm1168_vm8, %v3835_v6, %v1049_v3 }
 0x855   : > { %2045 = vpow2.f32 %v1810_v57  ;;  %v1291_v12 = vsel %vm1289_vm10, %v3333_v18, %v1170_v9 }
 0x856   : > { %2047 = vtanh.f32 %v1615_v62  ;;  %v1412_v20 = vsel %vm1410_vm12, %v3417_v14, %v1291_v12 }
 0x857   : > { %v1533_v22 = vsel %vm1531_vm14, %v1521_v30, %v1412_v20 }
 0x85d   : > { %v2042_v27 = vpop.eup %2041 }
 0x85e   : > { %v2044_v29 = vpop.eup %2043  ;;  %v1624_v1 = vadd.f32 1.0, %v2042_v27 }
 0x85f   : > { %v1630_v32 = vadd.f32 1.0, %v2044_v29  ;;  %v2046_v33 = vpop.eup %2045 }
 0x860   : > { %2049 = vrcp.f32 %v1624_v1  ;;  %v2048_v34 = vpop.eup %2047  ;;  %v1637_v41 = vadd.f32 1.0, %v2046_v33 }
 0x861   : > { %2051 = vrcp.f32 %v1630_v32 }
 0x862   : > { %2053 = vrcp.f32 %v1637_v41 }
 0x86a   : > { %v2050_v39 = vpop.eup %2049 }
 0x86b   : > { %v2052_v44 = vpop.eup %2051  ;;  %v1641_v5 = vmul.f32 %v2050_v39, %v2048_v34 }
 0x86c   : > { %v1640_v10 = vmul.f32 %v2052_v44, %v1521_v30  ;;  %v2054_v23 = vpop.eup %2053 }
 0x86e   : > { %v1642_v35 = vadd.f32 %v1641_v5, %v1640_v10 }
 0x870   : > { %2055 = vtanh.f32 %v1642_v35  ;;  %v1654_v0 = vsel %vm1652_vm15, %v1642_v35, %v1533_v22  ;;  %1656 = vst [vmem:[#allocation3] sm:$0xff] %v1642_v35 }
 0x871   : > { %1658 = vst [vmem:[#allocation5] sm:$0xff] %v1654_v0  ;;  %1664 = vst [vmem:[%s3542_s7] sm:$0xff] (!%p1811_p5), %v1654_v0 }
 0x878   : > { %1662 = sbr.rel (%p1811_p5) target bundleno = 2175 (0x87f), region = 52 }
 0x87a   : > { %v2056_v24 = vpop.eup %2055 }
 0x87b   : > { %v1644_v15 = vmul.f32 %v2056_v24, %v2054_v23 }
 0x87d   : > { %v1653_v16 = vsel %vm1652_vm15, %v1644_v15, %v1532_v56  ;;  %1655 = vst [vmem:[#allocation2] sm:$0xff] %v1644_v15 }
 0x87e   : > { %1657 = vst [vmem:[#allocation4] sm:$0xff] %v1653_v16  ;;  %1663 = vst [vmem:[%s3541_s6] sm:$0xff] (!%p1811_p5), %v1653_v16 }
 0x87f PF: > { %s18_s24 = sadd.s32 1, %s2127_s24  }
 0x880   : > { %p15_p6 = scmp.ge.s32.totalorder %s18_s24, 4  }
 0x882   :  { %17 = sbr.rel (!%p15_p6) target bundleno = 1 (0x1), region = 93 }

// kernel: encoder_decoder_forward.5
= control target key start
LH: loop header
LB: loop body
LE: loop exit
PB: predicated region body
PF: predicated region fallthrough
CT: control target
= control target key end

     0   :  { %s2068_s18 = smov 0   ;;  %s3330_s0 = inlined_call_operand.vmem [shape: bf16[16,8,128], index: 0, kind: input, shape index: {}]   ;;  %s3331_s1 = inlined_call_operand.vmem [shape: bf16[256,512], index: 1, kind: input, shape index: {}]   ;;  %s3332_s2 = inlined_call_operand.vmem [shape: f32[1,512], index: 2, kind: input, shape index: {}]   ;;  %s3333_s3 = inlined_call_operand.vmem [shape: f32[8,128], index: 3, kind: input, shape index: {}]   ;;  %s3334_s4 = inlined_call_operand.vmem [shape: f32[8,128], index: 4, kind: input, shape index: {}]   ;;  %s3335_s5 = inlined_call_operand.vmem [shape: f32[16,8,128], index: 5, kind: output, shape index: {}]  }
   0x1 LB: > { %s1604_s19 = sadd.s32 4294967295, %s2036_s18   ;;  %p1608_p0 = scmp.ge.s32.totalorder %s2036_s18, 1  ;;  %s2036_s18 = sphi %s2068_s18, %s15_s18  }
   0x2   : > { %p188_p1 = scmp.lt.s32.totalorder %s2036_s18, 3 }
   0x4   : > { %p189_p2 = pnand %p1608_p0, %p188_p1 }
   0x6   : > { %192 = sbr.rel (%p189_p2) target bundleno = 2173 (0x87d), region = 40 }
   0xd   : > { %s1609_s20 = sshll.u32 %s1604_s19, 3  ;;  %p1613_p4 = scmp.ne.s32.totalorder %s1604_s19, 0 }
   0xe   : > { %p217_p3 = scmp.lt.s32.totalorder %s1609_s20, 15  ;;  %v232_v0 = vld [vmem:[%s3333_s3] sm:$0xff] (!%p1613_p4) }
   0xf   : > { %231 = sbr.rel (%p1613_p4) target bundleno = 22 (0x16), region = 44  ;;  %v234_v1 = vld [vmem:[%s3334_s4] sm:$0xff] (!%p1613_p4)  ;;  %233 = vst [vmem:[#allocation2] sm:$0xff] (!%p1613_p4), %v232_v0 }
  0x10   : > { %s3567_s20 = smov (!%p217_p3, %s1609_s20), 15  ;;  %235 = vst [vmem:[#allocation3] sm:$0xff] (!%p1613_p4), %v234_v1 }
  0x11   : > { %s1610_s21 = sshll.u32 %s3567_s20, 2  ;;  %s1612_s22 = sshll.u32 %s3567_s20, 3 }
  0x12   : > { %s2079_s25 = scalar_lea.vmem %s3330_s0, %s1610_s21  ;;  %s2084_s28 = scalar_lea.vmem %s3335_s5, %s1612_s22 }
  0x16 PF: > { %v2095_v2 = vld [vmem:[%s3331_s1 + $0x4] ss:$16 sps:$4 sm:$0xff]   ;;  %v2100_v3 = vld [vmem:[%s3331_s1] ss:$16 sps:$4 sm:$0xff]   ;;  %v2123_v7 = vld [vmem:[%s3331_s1 + $0xc] ss:$16 sps:$4 sm:$0xff]  }
  0x17   : > { %3425 = vst [vmem:[#allocation4_spill] sm:$0xff] %v2095_v2  ;;  %648 = vmatprep.subr.bf16.mxu0 %v2095_v2  ;;  %v2106_v4 = vld [vmem:[%s3331_s1 + $0x24] ss:$16 sps:$4 sm:$0xff]   ;;  %v2112_v5 = vld [vmem:[%s3331_s1 + $0x20] ss:$16 sps:$4 sm:$0xff]   ;;  %3426 = vst [vmem:[#allocation5_spill] sm:$0xff] %v2123_v7  ;;  %689 = vmatprep.subr.bf16.mxu1 %v2123_v7 }
  0x18   : > { %649 = vmatpush1.bf16.msra.mxu0 %v2100_v3  ;;  %v2118_v6 = vld [vmem:[%s3331_s1 + $0x44] ss:$16 sps:$4 sm:$0xff]   ;;  %v2128_v8 = vld [vmem:[%s3331_s1 + $0x8] ss:$16 sps:$4 sm:$0xff]   ;;  %v2134_v9 = vld [vmem:[%s3331_s1 + $0x40] ss:$16 sps:$4 sm:$0xff]  }
  0x19   : > { %650 = vmatprep.subr.bf16.mxu0 %v2106_v4  ;;  %v2141_v10 = vld [vmem:[%s3331_s1 + $0x64] ss:$16 sps:$4 sm:$0xff]   ;;  %690 = vmatpush1.bf16.msra.mxu1 %v2128_v8  ;;  %v2147_v11 = vld [vmem:[%s3331_s1 + $0x2c] ss:$16 sps:$4 sm:$0xff]   ;;  %v2152_v12 = vld [vmem:[%s3331_s1 + $0x28] ss:$16 sps:$4 sm:$0xff]  }
  0x1a   : > { %691 = vmatprep.subr.bf16.mxu1 %v2147_v11  ;;  %v2159_v13 = vld [vmem:[%s3331_s1 + $0x60] ss:$16 sps:$4 sm:$0xff]   ;;  %v2164_v14 = vld [vmem:[%s3331_s1 + $0x84] ss:$16 sps:$4 sm:$0xff]   ;;  %v2169_v15 = vld [vmem:[%s3331_s1 + $0x4c] ss:$16 sps:$4 sm:$0xff]  }
  0x1b   : > { %v2176_v16 = vld [vmem:[%s3331_s1 + $0x48] ss:$16 sps:$4 sm:$0xff]   ;;  %v2182_v17 = vld [vmem:[%s3331_s1 + $0x6c] ss:$16 sps:$4 sm:$0xff]   ;;  %v2188_v18 = vld [vmem:[%s3331_s1 + $0x80] ss:$16 sps:$4 sm:$0xff]  }
  0x1c   : > { %651 = vmatpush1.bf16.msra.mxu0 %v2112_v5  ;;  %v2194_v19 = vld [vmem:[%s3331_s1 + $0xa4] ss:$16 sps:$4 sm:$0xff]   ;;  %v2200_v20 = vld [vmem:[%s3331_s1 + $0x68] ss:$16 sps:$4 sm:$0xff]   ;;  %v2206_v21 = vld [vmem:[%s3331_s1 + $0x8c] ss:$16 sps:$4 sm:$0xff]  }
  0x1d   : > { %652 = vmatprep.subr.bf16.mxu0 %v2118_v6  ;;  %692 = vmatpush1.bf16.msra.mxu1 %v2152_v12  ;;  %v2212_v22 = vld [vmem:[%s3331_s1 + $0xa0] ss:$16 sps:$4 sm:$0xff]   ;;  %v2217_v23 = vld [vmem:[%s3331_s1 + $0xc4] ss:$16 sps:$4 sm:$0xff]   ;;  %v2224_v24 = vld [vmem:[%s3331_s1 + $0x88] ss:$16 sps:$4 sm:$0xff]  }
  0x1e   : > { %693 = vmatprep.subr.bf16.mxu1 %v2169_v15  ;;  %v2230_v25 = vld [vmem:[%s3331_s1 + $0xac] ss:$16 sps:$4 sm:$0xff]   ;;  %v2236_v26 = vld [vmem:[%s3331_s1 + $0xc0] ss:$16 sps:$4 sm:$0xff]   ;;  %v2242_v27 = vld [vmem:[%s3331_s1 + $0xe4] ss:$16 sps:$4 sm:$0xff]  }
  0x1f   : > { %v2248_v28 = vld [vmem:[%s3331_s1 + $0xa8] ss:$16 sps:$4 sm:$0xff]   ;;  %v2254_v29 = vld [vmem:[%s3331_s1 + $0xcc] ss:$16 sps:$4 sm:$0xff]   ;;  %v2260_v30 = vld [vmem:[%s3331_s1 + $0xe0] ss:$16 sps:$4 sm:$0xff]  }
  0x20   : > { %653 = vmatpush1.bf16.msra.mxu0 %v2134_v9  ;;  %v2265_v31 = vld [vmem:[%s3331_s1 + $0x104] ss:$16 sps:$4 sm:$0xff]   ;;  %v2272_v32 = vld [vmem:[%s3331_s1 + $0xc8] ss:$16 sps:$4 sm:$0xff]   ;;  %v2278_v33 = vld [vmem:[%s3331_s1 + $0xec] ss:$16 sps:$4 sm:$0xff]  }
  0x21   : > { %654 = vmatprep.subr.bf16.mxu0 %v2141_v10  ;;  %694 = vmatpush1.bf16.msra.mxu1 %v2176_v16  ;;  %v2284_v34 = vld [vmem:[%s3331_s1 + $0x100] ss:$16 sps:$4 sm:$0xff]   ;;  %v2290_v35 = vld [vmem:[%s3331_s1 + $0x124] ss:$16 sps:$4 sm:$0xff]   ;;  %v2296_v36 = vld [vmem:[%s3331_s1 + $0xe8] ss:$16 sps:$4 sm:$0xff]  }
  0x22   : > { %695 = vmatprep.subr.bf16.mxu1 %v2182_v17  ;;  %v2302_v37 = vld [vmem:[%s3331_s1 + $0x10c] ss:$16 sps:$4 sm:$0xff]   ;;  %v2308_v38 = vld [vmem:[%s3331_s1 + $0x120] ss:$16 sps:$4 sm:$0xff]   ;;  %v2313_v39 = vld [vmem:[%s3331_s1 + $0x144] ss:$16 sps:$4 sm:$0xff]  }
  0x23   : > { %v2320_v40 = vld [vmem:[%s3331_s1 + $0x108] ss:$16 sps:$4 sm:$0xff]   ;;  %v2326_v41 = vld [vmem:[%s3331_s1 + $0x12c] ss:$16 sps:$4 sm:$0xff]   ;;  %v301_v42 = vld [vmem:[#allocation2] sm:$0xff] }
  0x24   : > { %655 = vmatpush1.bf16.msra.mxu0 %v2159_v13  ;;  %v2332_v43 = vld [vmem:[%s3331_s1 + $0x140] ss:$16 sps:$4 sm:$0xff]   ;;  %v306_v44 = vpack.c.bf16 %v301_v42, %v301_v42  ;;  %v2338_v45 = vld [vmem:[%s3331_s1 + $0x164] ss:$16 sps:$4 sm:$0xff]   ;;  %v2344_v46 = vld [vmem:[%s3331_s1 + $0x128] ss:$16 sps:$4 sm:$0xff]  }
  0x25   : > { %656 = vmatprep.subr.bf16.mxu0 %v2164_v14  ;;  %696 = vmatpush1.bf16.msra.mxu1 %v2200_v20  ;;  %3427 = vst [vmem:[#allocation6_spill] sm:$0xff] %v2338_v45  ;;  %v2350_v47 = vld [vmem:[%s3331_s1 + $0x14c] ss:$16 sps:$4 sm:$0xff]   ;;  %v2355_v48 = vld [vmem:[%s3331_s1 + $0x160] ss:$16 sps:$4 sm:$0xff]  }
  0x26   : > { %697 = vmatprep.subr.bf16.mxu1 %v2206_v21  ;;  %680 = vmatprep.mubr.bf16.mxu0 %v306_v44  ;;  %3428 = vst [vmem:[#allocation7_spill] sm:$0xff] %v2355_v48  ;;  %v2361_v49 = vld [vmem:[%s3331_s1 + $0x184] ss:$16 sps:$4 sm:$0xff]   ;;  %v2366_v50 = vld [vmem:[%s3331_s1 + $0x148] ss:$16 sps:$4 sm:$0xff]  }
  0x27   : > { %721 = vmatprep.mubr.bf16.mxu1 %v306_v44  ;;  %3429 = vst [vmem:[#allocation8_spill] sm:$0xff] %v2361_v49  ;;  %v2371_v51 = vld [vmem:[%s3331_s1 + $0x16c] ss:$16 sps:$4 sm:$0xff]   ;;  %v2380_v52 = vld [vmem:[%s3331_s1 + $0x180] ss:$16 sps:$4 sm:$0xff]  }
  0x28   : > { %657 = vmatpush1.bf16.msra.mxu0 %v2188_v18  ;;  %3430 = vst [vmem:[#allocation9_spill] sm:$0xff] %v2371_v51  ;;  %3431 = vst [vmem:[#allocation10_spill] sm:$0xff] %v2380_v52  ;;  %v2386_v53 = vld [vmem:[%s3331_s1 + $0x1a4] ss:$16 sps:$4 sm:$0xff]   ;;  %v2392_v54 = vld [vmem:[%s3331_s1 + $0x168] ss:$16 sps:$4 sm:$0xff]  }
  0x29   : > { %658 = vmatprep.subr.bf16.mxu0 %v2194_v19  ;;  %698 = vmatpush1.bf16.msra.mxu1 %v2224_v24  ;;  %3432 = vst [vmem:[#allocation11_spill] sm:$0xff] %v2386_v53  ;;  %3433 = vst [vmem:[#allocation12_spill] sm:$0xff] %v2392_v54  ;;  %v2398_v55 = vld [vmem:[%s3331_s1 + $0x18c] ss:$16 sps:$4 sm:$0xff]   ;;  %v2404_v56 = vld [vmem:[%s3331_s1 + $0x1a0] ss:$16 sps:$4 sm:$0xff]  }
  0x2a   : > { %699 = vmatprep.subr.bf16.mxu1 %v2230_v25  ;;  %3434 = vst [vmem:[#allocation13_spill] sm:$0xff] %v2398_v55  ;;  %3435 = vst [vmem:[#allocation14_spill] sm:$0xff] %v2404_v56  ;;  %v2410_v57 = vld [vmem:[%s3331_s1 + $0x1c4] ss:$16 sps:$4 sm:$0xff]   ;;  %v2416_v58 = vld [vmem:[%s3331_s1 + $0x188] ss:$16 sps:$4 sm:$0xff]  }
  0x2b   : > { %3436 = vst [vmem:[#allocation15_spill] sm:$0xff] %v2410_v57  ;;  %3437 = vst [vmem:[#allocation16_spill] sm:$0xff] %v2416_v58  ;;  %v2422_v59 = vld [vmem:[%s3331_s1 + $0x1ac] ss:$16 sps:$4 sm:$0xff]   ;;  %v2428_v60 = vld [vmem:[%s3331_s1 + $0x1c0] ss:$16 sps:$4 sm:$0xff]  }
  0x2c   : > { %659 = vmatpush1.bf16.msra.mxu0 %v2212_v22  ;;  %3438 = vst [vmem:[#allocation17_spill] sm:$0xff] %v2422_v59  ;;  %3439 = vst [vmem:[#allocation18_spill] sm:$0xff] %v2428_v60  ;;  %v2434_v61 = vld [vmem:[%s3331_s1 + $0x1e4] ss:$16 sps:$4 sm:$0xff]   ;;  %v2440_v62 = vld [vmem:[%s3331_s1 + $0x1a8] ss:$16 sps:$4 sm:$0xff]  }
  0x2d   : > { %660 = vmatprep.subr.bf16.mxu0 %v2217_v23  ;;  %700 = vmatpush1.bf16.msra.mxu1 %v2248_v28  ;;  %3440 = vst [vmem:[#allocation19_spill] sm:$0xff] %v2434_v61  ;;  %3441 = vst [vmem:[#allocation20_spill] sm:$0xff] %v2440_v62  ;;  %v2446_v63 = vld [vmem:[%s3331_s1 + $0x1cc] ss:$16 sps:$4 sm:$0xff]   ;;  %v2452_v0 = vld [vmem:[%s3331_s1 + $0x1e0] ss:$16 sps:$4 sm:$0xff]  }
  0x2e   : > { %701 = vmatprep.subr.bf16.mxu1 %v2254_v29  ;;  %3442 = vst [vmem:[#allocation21_spill] sm:$0xff] %v2446_v63  ;;  %3443 = vst [vmem:[#allocation22_spill] sm:$0xff] %v2452_v0  ;;  %v2459_v1 = vld [vmem:[%s3331_s1 + $0x1c8] ss:$16 sps:$4 sm:$0xff]   ;;  %v2465_v42 = vld [vmem:[%s3331_s1 + $0x1ec] ss:$16 sps:$4 sm:$0xff]  }
  0x2f   : > { %3444 = vst [vmem:[#allocation23_spill] sm:$0xff] %v2459_v1  ;;  %3445 = vst [vmem:[#allocation24_spill] sm:$0xff] %v2465_v42  ;;  %v1821_v44 = vld [vmem:[%s2079_s25] ss:$0 sps:$4 sm:$0xff]  }
  0x30   : > { %661 = vmatpush1.bf16.msra.mxu0 %v2236_v26 }
  0x31   : > { %662 = vmatprep.subr.bf16.mxu0 %v2242_v27  ;;  %702 = vmatpush1.bf16.msra.mxu1 %v2272_v32 }
  0x32   : > { %703 = vmatprep.subr.bf16.mxu1 %v2278_v33 }
  0x34   : > { %663 = vmatpush1.bf16.msra.mxu0 %v2260_v30 }
  0x35   : > { %664 = vmatprep.subr.bf16.mxu0 %v2265_v31  ;;  %704 = vmatpush1.bf16.msra.mxu1 %v2296_v36 }
  0x36   : > { %705 = vmatprep.subr.bf16.mxu1 %v2302_v37 }
  0x38   : > { %665 = vmatpush1.bf16.msra.mxu0 %v2284_v34 }
  0x39   : > { %666 = vmatprep.subr.bf16.mxu0 %v2290_v35  ;;  %706 = vmatpush1.bf16.msra.mxu1 %v2320_v40 }
  0x3a   : > { %707 = vmatprep.subr.bf16.mxu1 %v2326_v41 }
  0x3c   : > { %667 = vmatpush1.bf16.msra.mxu0 %v2308_v38 }
  0x3d   : > { %668 = vmatprep.subr.bf16.mxu0 %v2313_v39  ;;  %708 = vmatpush1.bf16.msra.mxu1 %v2344_v46 }
  0x3e   : > { %709 = vmatprep.subr.bf16.mxu1 %v2350_v47 }
  0x40   : > { %669 = vmatpush1.bf16.msra.mxu0 %v2332_v43 }
  0x41   : > { %670 = vmatprep.subr.bf16.mxu0 %v2338_v45  ;;  %710 = vmatpush1.bf16.msra.mxu1 %v2366_v50 }
  0x42   : > { %711 = vmatprep.subr.bf16.mxu1 %v2371_v51 }
  0x44   : > { %671 = vmatpush1.bf16.msra.mxu0 %v2355_v48 }
  0x45   : > { %672 = vmatprep.subr.bf16.mxu0 %v2361_v49  ;;  %712 = vmatpush1.bf16.msra.mxu1 %v2392_v54 }
  0x46   : > { %713 = vmatprep.subr.bf16.mxu1 %v2398_v55 }
  0x48   : > { %673 = vmatpush1.bf16.msra.mxu0 %v2380_v52 }
  0x49   : > { %674 = vmatprep.subr.bf16.mxu0 %v2386_v53  ;;  %714 = vmatpush1.bf16.msra.mxu1 %v2416_v58 }
  0x4a   : > { %715 = vmatprep.subr.bf16.mxu1 %v2422_v59 }
  0x4c   : > { %675 = vmatpush1.bf16.msra.mxu0 %v2404_v56 }
  0x4d   : > { %676 = vmatprep.subr.bf16.mxu0 %v2410_v57  ;;  %716 = vmatpush1.bf16.msra.mxu1 %v2440_v62  ;;  %v2473_v62 = vld [vmem:[%s3331_s1 + $0x1e8] ss:$16 sps:$4 sm:$0xff]  }
  0x4e   : > { %717 = vmatprep.subr.bf16.mxu1 %v2446_v63  ;;  %3446 = vst [vmem:[#allocation25_spill] sm:$0xff] %v2473_v62 }
  0x50   : > { %677 = vmatpush1.bf16.msra.mxu0 %v2428_v60 }
  0x51   : > { %678 = vmatprep.subr.bf16.mxu0 %v2434_v61  ;;  %718 = vmatpush1.bf16.msra.mxu1 %v2459_v1 }
  0x52   : > { %719 = vmatprep.subr.bf16.mxu1 %v2465_v42 }
  0x54   : > { %679 = vmatpush1.bf16.msra.mxu0 %v2452_v0 }
  0x55   : > { %760 = vmatprep.subr.bf16.mxu0 %v2095_v2  ;;  %720 = vmatpush1.bf16.msra.mxu1 %v2473_v62 }
  0x56   : > { %801 = vmatprep.subr.bf16.mxu1 %v2123_v7 }
  0x57   : > { %681 = vmatmul.mubr.bf16.vlgmr.msra.gmra.mrb[0].mxu0 %v1821_v44 }
  0x58   : > { %761 = vmatpush1.bf16.msra.mxu0 %v2100_v3  ;;  %722 = vmatmul.mubr.bf16.vlgmr.msra.gmra.mrb[0].mxu1 %v1821_v44  ;;  %v3447_v44 = vld [vmem:[#allocation20_spill] sm:$0xff] }
  0x59   : > { %762 = vmatprep.subr.bf16.mxu0 %v2106_v4  ;;  %802 = vmatpush1.bf16.msra.mxu1 %v2128_v8 }
  0x5a   : > { %803 = vmatprep.subr.bf16.mxu1 %v2147_v11 }
  0x5c   : > { %763 = vmatpush1.bf16.msra.mxu0 %v2112_v5 }
  0x5d   : > { %764 = vmatprep.subr.bf16.mxu0 %v2118_v6  ;;  %804 = vmatpush1.bf16.msra.mxu1 %v2152_v12 }
  0x5e   : > { %805 = vmatprep.subr.bf16.mxu1 %v2169_v15 }
  0x60   : > { %765 = vmatpush1.bf16.msra.mxu0 %v2134_v9 }
  0x61   : > { %766 = vmatprep.subr.bf16.mxu0 %v2141_v10  ;;  %806 = vmatpush1.bf16.msra.mxu1 %v2176_v16 }
  0x62   : > { %807 = vmatprep.subr.bf16.mxu1 %v2182_v17 }
  0x64   : > { %767 = vmatpush1.bf16.msra.mxu0 %v2159_v13 }
  0x65   : > { %768 = vmatprep.subr.bf16.mxu0 %v2164_v14  ;;  %808 = vmatpush1.bf16.msra.mxu1 %v2200_v20 }
  0x66   : > { %809 = vmatprep.subr.bf16.mxu1 %v2206_v21 }
  0x68   : > { %769 = vmatpush1.bf16.msra.mxu0 %v2188_v18 }
  0x69   : > { %770 = vmatprep.subr.bf16.mxu0 %v2194_v19  ;;  %810 = vmatpush1.bf16.msra.mxu1 %v2224_v24 }
  0x6a   : > { %811 = vmatprep.subr.bf16.mxu1 %v2230_v25 }
  0x6c   : > { %771 = vmatpush1.bf16.msra.mxu0 %v2212_v22 }
  0x6d   : > { %772 = vmatprep.subr.bf16.mxu0 %v2217_v23  ;;  %812 = vmatpush1.bf16.msra.mxu1 %v2248_v28 }
  0x6e   : > { %813 = vmatprep.subr.bf16.mxu1 %v2254_v29 }
  0x70   : > { %773 = vmatpush1.bf16.msra.mxu0 %v2236_v26 }
  0x71   : > { %774 = vmatprep.subr.bf16.mxu0 %v2242_v27  ;;  %814 = vmatpush1.bf16.msra.mxu1 %v2272_v32 }
  0x72   : > { %815 = vmatprep.subr.bf16.mxu1 %v2278_v33 }
  0x74   : > { %775 = vmatpush1.bf16.msra.mxu0 %v2260_v30 }
  0x75   : > { %776 = vmatprep.subr.bf16.mxu0 %v2265_v31  ;;  %816 = vmatpush1.bf16.msra.mxu1 %v2296_v36 }
  0x76   : > { %817 = vmatprep.subr.bf16.mxu1 %v2302_v37 }
  0x78   : > { %777 = vmatpush1.bf16.msra.mxu0 %v2284_v34 }
  0x79   : > { %778 = vmatprep.subr.bf16.mxu0 %v2290_v35  ;;  %818 = vmatpush1.bf16.msra.mxu1 %v2320_v40 }
  0x7a   : > { %819 = vmatprep.subr.bf16.mxu1 %v2326_v41 }
  0x7c   : > { %779 = vmatpush1.bf16.msra.mxu0 %v2308_v38 }
  0x7d   : > { %780 = vmatprep.subr.bf16.mxu0 %v2313_v39  ;;  %820 = vmatpush1.bf16.msra.mxu1 %v2344_v46 }
  0x7e   : > { %821 = vmatprep.subr.bf16.mxu1 %v2350_v47 }
  0x80   : > { %781 = vmatpush1.bf16.msra.mxu0 %v2332_v43 }
  0x81   : > { %782 = vmatprep.subr.bf16.mxu0 %v2338_v45  ;;  %822 = vmatpush1.bf16.msra.mxu1 %v2366_v50 }
  0x82   : > { %823 = vmatprep.subr.bf16.mxu1 %v2371_v51 }
  0x84   : > { %783 = vmatpush1.bf16.msra.mxu0 %v2355_v48 }
  0x85   : > { %784 = vmatprep.subr.bf16.mxu0 %v2361_v49  ;;  %824 = vmatpush1.bf16.msra.mxu1 %v2392_v54 }
  0x86   : > { %825 = vmatprep.subr.bf16.mxu1 %v2398_v55 }
  0x88   : > { %785 = vmatpush1.bf16.msra.mxu0 %v2380_v52 }
  0x89   : > { %786 = vmatprep.subr.bf16.mxu0 %v2386_v53  ;;  %826 = vmatpush1.bf16.msra.mxu1 %v2416_v58 }
  0x8a   : > { %827 = vmatprep.subr.bf16.mxu1 %v2422_v59 }
  0x8c   : > { %787 = vmatpush1.bf16.msra.mxu0 %v2404_v56 }
  0x8d   : > { %788 = vmatprep.subr.bf16.mxu0 %v2410_v57  ;;  %828 = vmatpush1.bf16.msra.mxu1 %v3447_v44  ;;  %v308_v57 = vlaneseq }
  0x8e   : > { %829 = vmatprep.subr.bf16.mxu1 %v2446_v63 }
  0x90   : > { %789 = vmatpush1.bf16.msra.mxu0 %v2428_v60  ;;  %v309_v60 = vshrl.u32 %v308_v57, 7 }
  0x91   : > { %790 = vmatprep.subr.bf16.mxu0 %v2434_v61  ;;  %830 = vmatpush1.bf16.msra.mxu1 %v2459_v1  ;;  %v300_v61 = vld [vmem:[%s3332_s2] sm:$0xf] }
  0x92   : > { %831 = vmatprep.subr.bf16.mxu1 %v2465_v42  ;;  %v310_v56 = vsub.s32 0, %v309_v60  ;;  %v314_v63 = vsub.s32 1, %v309_v60  ;;  %v322_v1 = vsub.s32 3, %v309_v60  ;;  %v318_v55 = vsub.s32 2, %v309_v60  ;;  %v302_v60 = vld [vmem:[#allocation3] sm:$0xff] }
  0x94   : > { %791 = vmatpush1.bf16.msra.mxu0 %v2452_v0  ;;  %v2546_v44 = vrot.slane %v300_v61, %v310_v56  ;;  %v2548_v0 = vrot.slane %v300_v61, %v314_v63  ;;  %v2552_v58 = vrot.slane %v300_v61, %v322_v1  ;;  %v2555_v48 = vrot.slane %v300_v61, %v318_v55 }
  0x95   : > { %873 = vmatprep.subr.bf16.mxu0 %v2095_v2  ;;  %832 = vmatpush1.bf16.msra.mxu1 %v2473_v62 }
  0x96   : > { %914 = vmatprep.subr.bf16.mxu1 %v2123_v7  ;;  %3448 = vst [vmem:[#allocation26_spill] sm:$0xff] %v2546_v44 }
 0x12a   : > { %v682_v2 = vpop.f32.mrb[0].mxu0 }
 0x12b   : > { %v683_v42 = vadd.f32 %v682_v2, %v2546_v44  ;;  %v684_v59 = vpop.f32.mrb[1].mxu0  ;;  %v723_v49 = vpop.f32.mrb[0].mxu1 }
 0x12c   : > { %v685_v62 = vadd.f32 %v684_v59, %v2548_v0  ;;  %v686_v7 = vpop.f32.mrb[2].mxu0  ;;  %v725_v56 = vpop.f32.mrb[1].mxu1  ;;  %v724_v59 = vadd.f32 %v723_v49, %v2555_v48 }
 0x12d   : > { %v1679_v53 = vmul.f32 -1.442695, %v683_v42  ;;  %v687_v57 = vpop.f32.mrb[3].mxu0  ;;  %v726_v63 = vadd.f32 %v725_v56, %v2552_v58  ;;  %v727_v54 = vpop.f32.mrb[2].mxu1 }
 0x12e   : > { %v1680_v52 = vmul.f32 -1.442695, %v685_v62  ;;  %v728_v2 = vpop.f32.mrb[3].mxu1 }
 0x12f   : > { %1838 = vpow2.f32 %v1679_v53  ;;  %v1681_v44 = vmul.f32 -1.442695, %v726_v63 }
 0x130   : > { %1840 = vpow2.f32 %v1680_v52 }
 0x131   : > { %1842 = vpow2.f32 %v1681_v44 }
 0x132   : > { %1844 = vtanh.f32 %v724_v59  ;;  %v1831_v59 = vld [vmem:[%s2079_s25 + $0x4] ss:$0 sps:$4 sm:$0xff]  }
 0x139   : > { %v1839_v7 = vpop.eup %1838 }
 0x13a   : > { %v1841_v42 = vpop.eup %1840  ;;  %v733_v1 = vadd.f32 1.0, %v1839_v7 }
 0x13b   : > { %v739_v62 = vadd.f32 1.0, %v1841_v42  ;;  %v1843_v52 = vpop.eup %1842  ;;  %v3449_v42 = vld [vmem:[#allocation7_spill] sm:$0xff] }
 0x13c   : > { %1846 = vrcp.f32 %v733_v1  ;;  %v1845_v53 = vpop.eup %1844  ;;  %v746_v55 = vadd.f32 1.0, %v1843_v52  ;;  %v3450_v1 = vld [vmem:[#allocation12_spill] sm:$0xff]  ;;  %v3452_v52 = vld [vmem:[#allocation13_spill] sm:$0xff] }
 0x13d   : > { %1848 = vrcp.f32 %v739_v62  ;;  %v3451_v62 = vld [vmem:[#allocation8_spill] sm:$0xff] }
 0x13e   : > { %1850 = vrcp.f32 %v746_v55  ;;  %v3456_v55 = vld [vmem:[#allocation17_spill] sm:$0xff] }
 0x146   : > { %v1847_v54 = vpop.eup %1846 }
 0x147   : > { %v1849_v61 = vpop.eup %1848  ;;  %v750_v57 = vmul.f32 %v1847_v54, %v1845_v53  ;;  %v3453_v53 = vld [vmem:[#allocation10_spill] sm:$0xff]  ;;  %v3455_v54 = vld [vmem:[#allocation11_spill] sm:$0xff] }
 0x148   : > { %v749_v56 = vmul.f32 %v1849_v61, %v302_v60  ;;  %v1851_v49 = vpop.eup %1850  ;;  %v3454_v60 = vld [vmem:[#allocation16_spill] sm:$0xff]  ;;  %v3457_v61 = vld [vmem:[#allocation14_spill] sm:$0xff] }
 0x14a   : > { %v2558_v63 = vadd.f32 %v750_v57, %v749_v56  ;;  %v3458_v57 = vld [vmem:[#allocation20_spill] sm:$0xff]  ;;  %v3459_v56 = vld [vmem:[#allocation15_spill] sm:$0xff] }
 0x14c   : > { %1852 = vtanh.f32 %v2558_v63 }
 0x156   : > { %v1853_v44 = vpop.eup %1852 }
 0x157   : > { %v753_v2 = vmul.f32 %v1853_v44, %v1851_v49  ;;  %v3460_v49 = vld [vmem:[#allocation21_spill] sm:$0xff]  ;;  %v3461_v44 = vld [vmem:[#allocation18_spill] sm:$0xff] }
 0x159   : > { %754 = vst [vmem:[%s2084_s28] sm:$0xff] %v753_v2  ;;  %v759_v7 = vpack.c.bf16 %v753_v2, %v753_v2  ;;  %v3462_v2 = vld [vmem:[#allocation23_spill] sm:$0xff] }
 0x15b   : > { %792 = vmatprep.mubr.bf16.mxu0 %v759_v7  ;;  %833 = vmatprep.mubr.bf16.mxu1 %v759_v7  ;;  %v3464_v7 = vld [vmem:[#allocation24_spill] sm:$0xff] }
 0x15c   : > { %793 = vmatmul.mubr.bf16.vlgmr.msra.gmra.mrb[4].mxu0 %v1831_v59  ;;  %834 = vmatmul.mubr.bf16.vlgmr.msra.gmra.mrb[4].mxu1 %v1831_v59  ;;  %v3463_v59 = vld [vmem:[#allocation19_spill] sm:$0xff] }
 0x15d   : > { %874 = vmatpush1.bf16.msra.mxu0 %v2100_v3  ;;  %915 = vmatpush1.bf16.msra.mxu1 %v2128_v8 }
 0x15e   : > { %875 = vmatprep.subr.bf16.mxu0 %v2106_v4  ;;  %916 = vmatprep.subr.bf16.mxu1 %v2147_v11 }
 0x161   : > { %876 = vmatpush1.bf16.msra.mxu0 %v2112_v5  ;;  %917 = vmatpush1.bf16.msra.mxu1 %v2152_v12 }
 0x162   : > { %877 = vmatprep.subr.bf16.mxu0 %v2118_v6  ;;  %918 = vmatprep.subr.bf16.mxu1 %v2169_v15 }
 0x165   : > { %878 = vmatpush1.bf16.msra.mxu0 %v2134_v9  ;;  %919 = vmatpush1.bf16.msra.mxu1 %v2176_v16 }
 0x166   : > { %879 = vmatprep.subr.bf16.mxu0 %v2141_v10  ;;  %920 = vmatprep.subr.bf16.mxu1 %v2182_v17 }
 0x169   : > { %880 = vmatpush1.bf16.msra.mxu0 %v2159_v13  ;;  %921 = vmatpush1.bf16.msra.mxu1 %v2200_v20 }
 0x16a   : > { %881 = vmatprep.subr.bf16.mxu0 %v2164_v14  ;;  %922 = vmatprep.subr.bf16.mxu1 %v2206_v21 }
 0x16d   : > { %882 = vmatpush1.bf16.msra.mxu0 %v2188_v18  ;;  %923 = vmatpush1.bf16.msra.mxu1 %v2224_v24 }
 0x16e   : > { %883 = vmatprep.subr.bf16.mxu0 %v2194_v19  ;;  %924 = vmatprep.subr.bf16.mxu1 %v2230_v25 }
 0x171   : > { %884 = vmatpush1.bf16.msra.mxu0 %v2212_v22  ;;  %925 = vmatpush1.bf16.msra.mxu1 %v2248_v28 }
 0x172   : > { %885 = vmatprep.subr.bf16.mxu0 %v2217_v23  ;;  %926 = vmatprep.subr.bf16.mxu1 %v2254_v29 }
 0x175   : > { %886 = vmatpush1.bf16.msra.mxu0 %v2236_v26  ;;  %927 = vmatpush1.bf16.msra.mxu1 %v2272_v32 }
 0x176   : > { %887 = vmatprep.subr.bf16.mxu0 %v2242_v27  ;;  %928 = vmatprep.subr.bf16.mxu1 %v2278_v33 }
 0x179   : > { %888 = vmatpush1.bf16.msra.mxu0 %v2260_v30  ;;  %929 = vmatpush1.bf16.msra.mxu1 %v2296_v36 }
 0x17a   : > { %889 = vmatprep.subr.bf16.mxu0 %v2265_v31  ;;  %930 = vmatprep.subr.bf16.mxu1 %v2302_v37 }
 0x17d   : > { %890 = vmatpush1.bf16.msra.mxu0 %v2284_v34  ;;  %931 = vmatpush1.bf16.msra.mxu1 %v2320_v40 }
 0x17e   : > { %891 = vmatprep.subr.bf16.mxu0 %v2290_v35  ;;  %932 = vmatprep.subr.bf16.mxu1 %v2326_v41 }
 0x181   : > { %892 = vmatpush1.bf16.msra.mxu0 %v2308_v38  ;;  %933 = vmatpush1.bf16.msra.mxu1 %v2344_v46 }
 0x182   : > { %893 = vmatprep.subr.bf16.mxu0 %v2313_v39  ;;  %934 = vmatprep.subr.bf16.mxu1 %v2350_v47 }
 0x185   : > { %894 = vmatpush1.bf16.msra.mxu0 %v2332_v43  ;;  %935 = vmatpush1.bf16.msra.mxu1 %v2366_v50 }
 0x186   : > { %895 = vmatprep.subr.bf16.mxu0 %v2338_v45  ;;  %936 = vmatprep.subr.bf16.mxu1 %v2371_v51 }
 0x189   : > { %896 = vmatpush1.bf16.msra.mxu0 %v3449_v42  ;;  %937 = vmatpush1.bf16.msra.mxu1 %v3450_v1 }
 0x18a   : > { %897 = vmatprep.subr.bf16.mxu0 %v3451_v62  ;;  %938 = vmatprep.subr.bf16.mxu1 %v3452_v52 }
 0x18d   : > { %898 = vmatpush1.bf16.msra.mxu0 %v3453_v53  ;;  %939 = vmatpush1.bf16.msra.mxu1 %v3454_v60  ;;  %v3465_v60 = vld [vmem:[#allocation22_spill] sm:$0xff] }
 0x18e   : > { %899 = vmatprep.subr.bf16.mxu0 %v3455_v54  ;;  %940 = vmatprep.subr.bf16.mxu1 %v3456_v55  ;;  %v3466_v54 = vld [vmem:[#allocation25_spill] sm:$0xff]  ;;  %v3467_v55 = vld [vmem:[#allocation4_spill] sm:$0xff]  ;;  %v3469_v53 = vld [vmem:[#allocation26_spill] sm:$0xff] }
 0x191   : > { %900 = vmatpush1.bf16.msra.mxu0 %v3457_v61  ;;  %941 = vmatpush1.bf16.msra.mxu1 %v3458_v57  ;;  %v3468_v61 = vld [vmem:[#allocation5_spill] sm:$0xff] }
 0x192   : > { %901 = vmatprep.subr.bf16.mxu0 %v3459_v56  ;;  %942 = vmatprep.subr.bf16.mxu1 %v3460_v49 }
 0x195   : > { %902 = vmatpush1.bf16.msra.mxu0 %v3461_v44  ;;  %943 = vmatpush1.bf16.msra.mxu1 %v3462_v2 }
 0x196   : > { %903 = vmatprep.subr.bf16.mxu0 %v3463_v59  ;;  %944 = vmatprep.subr.bf16.mxu1 %v3464_v7 }
 0x199   : > { %904 = vmatpush1.bf16.msra.mxu0 %v3465_v60  ;;  %945 = vmatpush1.bf16.msra.mxu1 %v3466_v54 }
 0x19a   : > { %986 = vmatprep.subr.bf16.mxu0 %v3467_v55  ;;  %1027 = vmatprep.subr.bf16.mxu1 %v3468_v61 }
 0x22f   : > { %v794_v57 = vpop.f32.mrb[4].mxu0  ;;  %v835_v56 = vpop.f32.mrb[4].mxu1 }
 0x230   : > { %v795_v49 = vadd.f32 %v794_v57, %v3469_v53  ;;  %v796_v52 = vpop.f32.mrb[5].mxu0  ;;  %v837_v44 = vpop.f32.mrb[5].mxu1  ;;  %v836_v61 = vadd.f32 %v835_v56, %v2555_v48  ;;  %v1832_v56 = vld [vmem:[%s2079_s25 + $0x8] ss:$0 sps:$4 sm:$0xff]  }
 0x231   : > { %v797_v2 = vadd.f32 %v796_v52, %v2548_v0  ;;  %v798_v62 = vpop.f32.mrb[6].mxu0  ;;  %v839_v59 = vpop.f32.mrb[6].mxu1  ;;  %v838_v55 = vadd.f32 %v837_v44, %v2552_v58 }
 0x232   : > { %v1684_v1 = vmul.f32 -1.442695, %v795_v49  ;;  %v799_v7 = vpop.f32.mrb[7].mxu0  ;;  %v840_v42 = vpop.f32.mrb[7].mxu1  ;;  %v3487_v59 = vld [vmem:[#allocation24_spill] sm:$0xff] }
 0x233   : > { %v1685_v60 = vmul.f32 -1.442695, %v797_v2  ;;  %v1686_v54 = vmul.f32 -1.442695, %v838_v55  ;;  %v3486_v2 = vld [vmem:[#allocation19_spill] sm:$0xff]  ;;  %v3488_v7 = vld [vmem:[#allocation22_spill] sm:$0xff] }
 0x234   : > { %1854 = vpow2.f32 %v1684_v1 }
 0x235   : > { %1856 = vpow2.f32 %v1685_v60 }
 0x236   : > { %1858 = vpow2.f32 %v1686_v54 }
 0x237   : > { %1860 = vtanh.f32 %v836_v61 }
 0x23e   : > { %v1855_v51 = vpop.eup %1854 }
 0x23f   : > { %v1857_v57 = vpop.eup %1856  ;;  %v845_v53 = vadd.f32 1.0, %v1855_v51 }
 0x240   : > { %v851_v45 = vadd.f32 1.0, %v1857_v57  ;;  %v1859_v62 = vpop.eup %1858  ;;  %v3489_v57 = vld [vmem:[#allocation25_spill] sm:$0xff] }
 0x241   : > { %1862 = vrcp.f32 %v845_v53  ;;  %v1861_v42 = vpop.eup %1860  ;;  %v858_v1 = vadd.f32 1.0, %v1859_v62  ;;  %v3490_v62 = vld [vmem:[#allocation4_spill] sm:$0xff] }
 0x242   : > { %1864 = vrcp.f32 %v851_v45  ;;  %v3484_v45 = vld [vmem:[#allocation18_spill] sm:$0xff] }
 0x243   : > { %1866 = vrcp.f32 %v858_v1 }
 0x24b   : > { %v1863_v52 = vpop.eup %1862 }
 0x24c   : > { %v1865_v60 = vpop.eup %1864  ;;  %v862_v49 = vmul.f32 %v1863_v52, %v1861_v42  ;;  %v3491_v42 = vld [vmem:[#allocation5_spill] sm:$0xff] }
 0x24d   : > { %v861_v55 = vmul.f32 %v1865_v60, %v2558_v63  ;;  %v1867_v51 = vpop.eup %1866  ;;  %v3485_v63 = vld [vmem:[#allocation23_spill] sm:$0xff]  ;;  %v3492_v60 = vld [vmem:[#allocation26_spill] sm:$0xff] }
 0x24f   : > { %v2632_v44 = vadd.f32 %v862_v49, %v861_v55 }
 0x251   : > { %1868 = vtanh.f32 %v2632_v44 }
 0x25b   : > { %v1869_v54 = vpop.eup %1868 }
 0x25c   : > { %v865_v61 = vmul.f32 %v1869_v54, %v1867_v51 }
 0x25e   : > { %1687 = vst [vmem:[%s2084_s28 + $0x8] sm:$0xff] %v865_v61  ;;  %v872_v53 = vpack.c.bf16 %v865_v61, %v865_v61 }
 0x260   : > { %905 = vmatprep.mubr.bf16.mxu0 %v872_v53  ;;  %946 = vmatprep.mubr.bf16.mxu1 %v872_v53 }
 0x261   : > { %906 = vmatmul.mubr.bf16.vlgmr.msra.gmra.mrb[8].mxu0 %v1832_v56  ;;  %947 = vmatmul.mubr.bf16.vlgmr.msra.gmra.mrb[8].mxu1 %v1832_v56 }
 0x262   : > { %987 = vmatpush1.bf16.msra.mxu0 %v2100_v3  ;;  %1028 = vmatpush1.bf16.msra.mxu1 %v2128_v8  ;;  %v3470_v3 = vld [vmem:[#allocation6_spill] sm:$0xff]  ;;  %v3474_v8 = vld [vmem:[#allocation8_spill] sm:$0xff] }
 0x263   : > { %988 = vmatprep.subr.bf16.mxu0 %v2106_v4  ;;  %1029 = vmatprep.subr.bf16.mxu1 %v2147_v11  ;;  %v3471_v4 = vld [vmem:[#allocation9_spill] sm:$0xff]  ;;  %v3477_v11 = vld [vmem:[#allocation16_spill] sm:$0xff] }
 0x266   : > { %989 = vmatpush1.bf16.msra.mxu0 %v2112_v5  ;;  %1030 = vmatpush1.bf16.msra.mxu1 %v2152_v12  ;;  %v3472_v5 = vld [vmem:[#allocation7_spill] sm:$0xff] }
 0x267   : > { %990 = vmatprep.subr.bf16.mxu0 %v2118_v6  ;;  %1031 = vmatprep.subr.bf16.mxu1 %v2169_v15  ;;  %v3473_v6 = vld [vmem:[#allocation12_spill] sm:$0xff]  ;;  %v3478_v12 = vld [vmem:[#allocation11_spill] sm:$0xff] }
 0x268   : > { %v3481_v15 = vld [vmem:[#allocation20_spill] sm:$0xff] }
 0x26a   : > { %991 = vmatpush1.bf16.msra.mxu0 %v2134_v9  ;;  %1032 = vmatpush1.bf16.msra.mxu1 %v2176_v16  ;;  %v3475_v9 = vld [vmem:[#allocation13_spill] sm:$0xff]  ;;  %v3482_v16 = vld [vmem:[#allocation15_spill] sm:$0xff] }
 0x26b   : > { %992 = vmatprep.subr.bf16.mxu0 %v2141_v10  ;;  %1033 = vmatprep.subr.bf16.mxu1 %v2182_v17  ;;  %v3476_v10 = vld [vmem:[#allocation10_spill] sm:$0xff] }
 0x26e   : > { %993 = vmatpush1.bf16.msra.mxu0 %v2159_v13  ;;  %1034 = vmatpush1.bf16.msra.mxu1 %v2200_v20  ;;  %v3479_v13 = vld [vmem:[#allocation17_spill] sm:$0xff] }
 0x26f   : > { %994 = vmatprep.subr.bf16.mxu0 %v2164_v14  ;;  %1035 = vmatprep.subr.bf16.mxu1 %v2206_v21  ;;  %v3480_v14 = vld [vmem:[#allocation14_spill] sm:$0xff] }
 0x272   : > { %995 = vmatpush1.bf16.msra.mxu0 %v2188_v18  ;;  %1036 = vmatpush1.bf16.msra.mxu1 %v2224_v24  ;;  %v3483_v18 = vld [vmem:[#allocation21_spill] sm:$0xff] }
 0x273   : > { %996 = vmatprep.subr.bf16.mxu0 %v2194_v19  ;;  %1037 = vmatprep.subr.bf16.mxu1 %v2230_v25 }
 0x276   : > { %997 = vmatpush1.bf16.msra.mxu0 %v2212_v22  ;;  %1038 = vmatpush1.bf16.msra.mxu1 %v2248_v28 }
 0x277   : > { %998 = vmatprep.subr.bf16.mxu0 %v2217_v23  ;;  %1039 = vmatprep.subr.bf16.mxu1 %v2254_v29 }
 0x27a   : > { %999 = vmatpush1.bf16.msra.mxu0 %v2236_v26  ;;  %1040 = vmatpush1.bf16.msra.mxu1 %v2272_v32 }
 0x27b   : > { %1000 = vmatprep.subr.bf16.mxu0 %v2242_v27  ;;  %1041 = vmatprep.subr.bf16.mxu1 %v2278_v33 }
 0x27e   : > { %1001 = vmatpush1.bf16.msra.mxu0 %v2260_v30  ;;  %1042 = vmatpush1.bf16.msra.mxu1 %v2296_v36 }
 0x27f   : > { %1002 = vmatprep.subr.bf16.mxu0 %v2265_v31  ;;  %1043 = vmatprep.subr.bf16.mxu1 %v2302_v37 }
 0x282   : > { %1003 = vmatpush1.bf16.msra.mxu0 %v2284_v34  ;;  %1044 = vmatpush1.bf16.msra.mxu1 %v2320_v40 }
 0x283   : > { %1004 = vmatprep.subr.bf16.mxu0 %v2290_v35  ;;  %1045 = vmatprep.subr.bf16.mxu1 %v2326_v41 }
 0x286   : > { %1005 = vmatpush1.bf16.msra.mxu0 %v2308_v38  ;;  %1046 = vmatpush1.bf16.msra.mxu1 %v2344_v46 }
 0x287   : > { %1006 = vmatprep.subr.bf16.mxu0 %v2313_v39  ;;  %1047 = vmatprep.subr.bf16.mxu1 %v2350_v47 }
 0x28a   : > { %1007 = vmatpush1.bf16.msra.mxu0 %v2332_v43  ;;  %1048 = vmatpush1.bf16.msra.mxu1 %v2366_v50 }
 0x28b   : > { %1008 = vmatprep.subr.bf16.mxu0 %v3470_v3  ;;  %1049 = vmatprep.subr.bf16.mxu1 %v3471_v4 }
 0x28e   : > { %1009 = vmatpush1.bf16.msra.mxu0 %v3472_v5  ;;  %1050 = vmatpush1.bf16.msra.mxu1 %v3473_v6 }
 0x28f   : > { %1010 = vmatprep.subr.bf16.mxu0 %v3474_v8  ;;  %1051 = vmatprep.subr.bf16.mxu1 %v3475_v9 }
 0x292   : > { %1011 = vmatpush1.bf16.msra.mxu0 %v3476_v10  ;;  %1052 = vmatpush1.bf16.msra.mxu1 %v3477_v11 }
 0x293   : > { %1012 = vmatprep.subr.bf16.mxu0 %v3478_v12  ;;  %1053 = vmatprep.subr.bf16.mxu1 %v3479_v13 }
 0x296   : > { %1013 = vmatpush1.bf16.msra.mxu0 %v3480_v14  ;;  %1054 = vmatpush1.bf16.msra.mxu1 %v3481_v15 }
 0x297   : > { %1014 = vmatprep.subr.bf16.mxu0 %v3482_v16  ;;  %1055 = vmatprep.subr.bf16.mxu1 %v3483_v18 }
 0x29a   : > { %1015 = vmatpush1.bf16.msra.mxu0 %v3484_v45  ;;  %1056 = vmatpush1.bf16.msra.mxu1 %v3485_v63 }
 0x29b   : > { %1016 = vmatprep.subr.bf16.mxu0 %v3486_v2  ;;  %1057 = vmatprep.subr.bf16.mxu1 %v3487_v59 }
 0x29e   : > { %1017 = vmatpush1.bf16.msra.mxu0 %v3488_v7  ;;  %1058 = vmatpush1.bf16.msra.mxu1 %v3489_v57 }
 0x29f   : > { %1099 = vmatprep.subr.bf16.mxu0 %v3490_v62  ;;  %1140 = vmatprep.subr.bf16.mxu1 %v3491_v42 }
 0x334   : > { %v907_v52 = vpop.f32.mrb[8].mxu0  ;;  %v948_v1 = vpop.f32.mrb[8].mxu1 }
 0x335   : > { %v908_v49 = vadd.f32 %v907_v52, %v3492_v60  ;;  %v909_v55 = vpop.f32.mrb[9].mxu0  ;;  %v950_v51 = vpop.f32.mrb[9].mxu1  ;;  %v949_v42 = vadd.f32 %v948_v1, %v2555_v48 }
 0x336   : > { %v910_v54 = vadd.f32 %v909_v55, %v2548_v0  ;;  %v911_v61 = vpop.f32.mrb[10].mxu0  ;;  %v952_v56 = vpop.f32.mrb[10].mxu1  ;;  %v951_v62 = vadd.f32 %v950_v51, %v2552_v58 }
 0x337   : > { %v1690_v53 = vmul.f32 -1.442695, %v908_v49  ;;  %v912_v59 = vpop.f32.mrb[11].mxu0  ;;  %v953_v2 = vpop.f32.mrb[11].mxu1  ;;  %v1833_v56 = vld [vmem:[%s2079_s25 + $0xc] ss:$0 sps:$4 sm:$0xff]  }
 0x338   : > { %v1691_v7 = vmul.f32 -1.442695, %v910_v54  ;;  %v1692_v57 = vmul.f32 -1.442695, %v951_v62  ;;  %v2732_v62 = vld [vmem:[%s3331_s1 + $0x2c] ss:$16 sps:$4 sm:$0xff]  }
 0x339   : > { %1870 = vpow2.f32 %v1690_v53  ;;  %v2726_v53 = vld [vmem:[%s3331_s1 + $0x24] ss:$16 sps:$4 sm:$0xff]  }
 0x33a   : > { %1872 = vpow2.f32 %v1691_v7 }
 0x33b   : > { %1874 = vpow2.f32 %v1692_v57 }
 0x33c   : > { %1876 = vtanh.f32 %v949_v42  ;;  %v2738_v42 = vld [vmem:[%s3331_s1 + $0x20] ss:$16 sps:$4 sm:$0xff]  }
 0x343   : > { %v1871_v63 = vpop.eup %1870 }
 0x344   : > { %v1873_v52 = vpop.eup %1872  ;;  %v958_v60 = vadd.f32 1.0, %v1871_v63 }
 0x345   : > { %v964_v45 = vadd.f32 1.0, %v1873_v52  ;;  %v1875_v59 = vpop.eup %1874  ;;  %v2744_v52 = vld [vmem:[%s3331_s1 + $0x28] ss:$16 sps:$4 sm:$0xff]  }
 0x346   : > { %1878 = vrcp.f32 %v958_v60  ;;  %v1877_v2 = vpop.eup %1876  ;;  %v971_v55 = vadd.f32 1.0, %v1875_v59  ;;  %v2750_v59 = vld [vmem:[%s3331_s1 + $0x44] ss:$16 sps:$4 sm:$0xff]  }
 0x347   : > { %1880 = vrcp.f32 %v964_v45  ;;  %v2714_v45 = vld [vmem:[%s3331_s1] ss:$16 sps:$4 sm:$0xff]  }
 0x348   : > { %1882 = vrcp.f32 %v971_v55  ;;  %v2768_v55 = vld [vmem:[%s3331_s1 + $0x48] ss:$16 sps:$4 sm:$0xff]  }
 0x350   : > { %v1879_v49 = vpop.eup %1878 }
 0x351   : > { %v1881_v7 = vpop.eup %1880  ;;  %v975_v54 = vmul.f32 %v1879_v49, %v1877_v2  ;;  %v2756_v2 = vld [vmem:[%s3331_s1 + $0x4c] ss:$16 sps:$4 sm:$0xff]   ;;  %v2762_v49 = vld [vmem:[%s3331_s1 + $0x40] ss:$16 sps:$4 sm:$0xff]  }
 0x352   : > { %v974_v51 = vmul.f32 %v1881_v7, %v2632_v44  ;;  %v1883_v63 = vpop.eup %1882  ;;  %v2720_v44 = vld [vmem:[%s3331_s1 + $0x8] ss:$16 sps:$4 sm:$0xff]   ;;  %v2774_v7 = vld [vmem:[%s3331_s1 + $0x64] ss:$16 sps:$4 sm:$0xff]  }
 0x354   : > { %v2706_v61 = vadd.f32 %v975_v54, %v974_v51  ;;  %v2781_v54 = vld [vmem:[%s3331_s1 + $0x60] ss:$16 sps:$4 sm:$0xff]   ;;  %v2788_v51 = vld [vmem:[%s3331_s1 + $0x84] ss:$16 sps:$4 sm:$0xff]  }
 0x356   : > { %1884 = vtanh.f32 %v2706_v61 }
 0x360   : > { %v1885_v57 = vpop.eup %1884 }
 0x361   : > { %v978_v1 = vmul.f32 %v1885_v57, %v1883_v63  ;;  %v2886_v63 = vld [vmem:[%s3331_s1 + $0x68] ss:$16 sps:$4 sm:$0xff]   ;;  %v2893_v57 = vld [vmem:[%s3331_s1 + $0x8c] ss:$16 sps:$4 sm:$0xff]  }
 0x363   : > { %1693 = vst [vmem:[%s2084_s28 + $0x10] sm:$0xff] %v978_v1  ;;  %v985_v60 = vpack.c.bf16 %v978_v1, %v978_v1  ;;  %v2900_v1 = vld [vmem:[%s3331_s1 + $0x88] ss:$16 sps:$4 sm:$0xff]  }
 0x365   : > { %1018 = vmatprep.mubr.bf16.mxu0 %v985_v60  ;;  %1059 = vmatprep.mubr.bf16.mxu1 %v985_v60  ;;  %v2912_v60 = vld [vmem:[%s3331_s1 + $0xac] ss:$16 sps:$4 sm:$0xff]  }
 0x366   : > { %1019 = vmatmul.mubr.bf16.vlgmr.msra.gmra.mrb[12].mxu0 %v1833_v56  ;;  %1060 = vmatmul.mubr.bf16.vlgmr.msra.gmra.mrb[12].mxu1 %v1833_v56  ;;  %v2906_v56 = vld [vmem:[%s3331_s1 + $0xa4] ss:$16 sps:$4 sm:$0xff]  }
 0x367   : > { %1100 = vmatpush1.bf16.msra.mxu0 %v2714_v45  ;;  %1141 = vmatpush1.bf16.msra.mxu1 %v2720_v44 }
 0x368   : > { %1101 = vmatprep.subr.bf16.mxu0 %v2726_v53  ;;  %1142 = vmatprep.subr.bf16.mxu1 %v2732_v62 }
 0x36b   : > { %1102 = vmatpush1.bf16.msra.mxu0 %v2738_v42  ;;  %1143 = vmatpush1.bf16.msra.mxu1 %v2744_v52 }
 0x36c   : > { %1103 = vmatprep.subr.bf16.mxu0 %v2750_v59  ;;  %1144 = vmatprep.subr.bf16.mxu1 %v2756_v2 }
 0x36f   : > { %1104 = vmatpush1.bf16.msra.mxu0 %v2762_v49  ;;  %1145 = vmatpush1.bf16.msra.mxu1 %v2768_v55 }
 0x370   : > { %1105 = vmatprep.subr.bf16.mxu0 %v2774_v7  ;;  %1146 = vmatprep.subr.bf16.mxu1 %v2182_v17  ;;  %v2795_v17 = vld [vmem:[%s3331_s1 + $0x80] ss:$16 sps:$4 sm:$0xff]  }
 0x373   : > { %1106 = vmatpush1.bf16.msra.mxu0 %v2781_v54  ;;  %1147 = vmatpush1.bf16.msra.mxu1 %v2200_v20  ;;  %v3494_v20 = vld [vmem:[#allocation23_spill] sm:$0xff] }
 0x374   : > { %1107 = vmatprep.subr.bf16.mxu0 %v2788_v51  ;;  %1148 = vmatprep.subr.bf16.mxu1 %v2206_v21  ;;  %v3495_v21 = vld [vmem:[#allocation19_spill] sm:$0xff] }
 0x377   : > { %1108 = vmatpush1.bf16.msra.mxu0 %v2795_v17  ;;  %1149 = vmatpush1.bf16.msra.mxu1 %v2224_v24  ;;  %v3498_v24 = vld [vmem:[#allocation25_spill] sm:$0xff] }
 0x378   : > { %1109 = vmatprep.subr.bf16.mxu0 %v2194_v19  ;;  %1150 = vmatprep.subr.bf16.mxu1 %v2230_v25  ;;  %v3493_v19 = vld [vmem:[#allocation18_spill] sm:$0xff] }
 0x379   : > { %v2846_v25 = vld [vmem:[%s3331_s1 + $0x4] ss:$16 sps:$4 sm:$0xff]  }
 0x37a   : > { %3499 = vst [vmem:[#allocation6_spill] sm:$0xff] %v2846_v25 }
 0x37b   : > { %1110 = vmatpush1.bf16.msra.mxu0 %v2212_v22  ;;  %1151 = vmatpush1.bf16.msra.mxu1 %v2248_v28  ;;  %v3496_v22 = vld [vmem:[#allocation24_spill] sm:$0xff] }
 0x37c   : > { %1111 = vmatprep.subr.bf16.mxu0 %v2217_v23  ;;  %1152 = vmatprep.subr.bf16.mxu1 %v2254_v29  ;;  %v3497_v23 = vld [vmem:[#allocation22_spill] sm:$0xff] }
 0x37d   : > { %v3501_v29 = vld [vmem:[#allocation26_spill] sm:$0xff] }
 0x37f   : > { %1112 = vmatpush1.bf16.msra.mxu0 %v2236_v26  ;;  %1153 = vmatpush1.bf16.msra.mxu1 %v2272_v32  ;;  %v2852_v26 = vld [vmem:[%s3331_s1 + $0xc] ss:$16 sps:$4 sm:$0xff]  }
 0x380   : > { %1113 = vmatprep.subr.bf16.mxu0 %v2242_v27  ;;  %1154 = vmatprep.subr.bf16.mxu1 %v2278_v33  ;;  %3500 = vst [vmem:[#allocation9_spill] sm:$0xff] %v2852_v26 }
 0x383   : > { %1114 = vmatpush1.bf16.msra.mxu0 %v2260_v30  ;;  %1155 = vmatpush1.bf16.msra.mxu1 %v2296_v36 }
 0x384   : > { %1115 = vmatprep.subr.bf16.mxu0 %v2265_v31  ;;  %1156 = vmatprep.subr.bf16.mxu1 %v2302_v37 }
 0x387   : > { %1116 = vmatpush1.bf16.msra.mxu0 %v2284_v34  ;;  %1157 = vmatpush1.bf16.msra.mxu1 %v2320_v40 }
 0x388   : > { %1117 = vmatprep.subr.bf16.mxu0 %v2290_v35  ;;  %1158 = vmatprep.subr.bf16.mxu1 %v2326_v41 }
 0x38b   : > { %1118 = vmatpush1.bf16.msra.mxu0 %v2308_v38  ;;  %1159 = vmatpush1.bf16.msra.mxu1 %v2344_v46 }
 0x38c   : > { %1119 = vmatprep.subr.bf16.mxu0 %v2313_v39  ;;  %1160 = vmatprep.subr.bf16.mxu1 %v2350_v47 }
 0x38f   : > { %1120 = vmatpush1.bf16.msra.mxu0 %v2332_v43  ;;  %1161 = vmatpush1.bf16.msra.mxu1 %v2366_v50 }
 0x390   : > { %1121 = vmatprep.subr.bf16.mxu0 %v3470_v3  ;;  %1162 = vmatprep.subr.bf16.mxu1 %v3471_v4 }
 0x393   : > { %1122 = vmatpush1.bf16.msra.mxu0 %v3472_v5  ;;  %1163 = vmatpush1.bf16.msra.mxu1 %v3473_v6 }
 0x394   : > { %1123 = vmatprep.subr.bf16.mxu0 %v3474_v8  ;;  %1164 = vmatprep.subr.bf16.mxu1 %v3475_v9 }
 0x397   : > { %1124 = vmatpush1.bf16.msra.mxu0 %v3476_v10  ;;  %1165 = vmatpush1.bf16.msra.mxu1 %v3477_v11 }
 0x398   : > { %1125 = vmatprep.subr.bf16.mxu0 %v3478_v12  ;;  %1166 = vmatprep.subr.bf16.mxu1 %v3479_v13 }
 0x39b   : > { %1126 = vmatpush1.bf16.msra.mxu0 %v3480_v14  ;;  %1167 = vmatpush1.bf16.msra.mxu1 %v3481_v15 }
 0x39c   : > { %1127 = vmatprep.subr.bf16.mxu0 %v3482_v16  ;;  %1168 = vmatprep.subr.bf16.mxu1 %v3483_v18  ;;  %v1834_v16 = vld [vmem:[%s2079_s25 + $0x10] ss:$0 sps:$4 sm:$0xff]  }
 0x39f   : > { %1128 = vmatpush1.bf16.msra.mxu0 %v3493_v19  ;;  %1169 = vmatpush1.bf16.msra.mxu1 %v3494_v20  ;;  %v2918_v19 = vld [vmem:[%s3331_s1 + $0xa0] ss:$16 sps:$4 sm:$0xff]   ;;  %v2924_v20 = vld [vmem:[%s3331_s1 + $0xa8] ss:$16 sps:$4 sm:$0xff]  }
 0x3a0   : > { %1129 = vmatprep.subr.bf16.mxu0 %v3495_v21  ;;  %1170 = vmatprep.subr.bf16.mxu1 %v3496_v22  ;;  %v2930_v21 = vld [vmem:[%s3331_s1 + $0xc4] ss:$16 sps:$4 sm:$0xff]   ;;  %v2936_v22 = vld [vmem:[%s3331_s1 + $0xcc] ss:$16 sps:$4 sm:$0xff]  }
 0x3a3   : > { %1130 = vmatpush1.bf16.msra.mxu0 %v3497_v23  ;;  %1171 = vmatpush1.bf16.msra.mxu1 %v3498_v24  ;;  %v2942_v23 = vld [vmem:[%s3331_s1 + $0xc0] ss:$16 sps:$4 sm:$0xff]   ;;  %v2948_v24 = vld [vmem:[%s3331_s1 + $0xc8] ss:$16 sps:$4 sm:$0xff]  }
 0x3a4   : > { %1212 = vmatprep.subr.bf16.mxu0 %v2846_v25  ;;  %1253 = vmatprep.subr.bf16.mxu1 %v2852_v26 }
 0x439   : > { %v1020_v27 = vpop.f32.mrb[12].mxu0  ;;  %v1061_v28 = vpop.f32.mrb[12].mxu1 }
 0x43a   : > { %v1021_v30 = vadd.f32 %v1020_v27, %v3501_v29  ;;  %v1022_v31 = vpop.f32.mrb[13].mxu0  ;;  %v1063_v32 = vpop.f32.mrb[13].mxu1  ;;  %v1062_v43 = vadd.f32 %v1061_v28, %v2555_v48  ;;  %v2954_v27 = vld [vmem:[%s3331_s1 + $0xe4] ss:$16 sps:$4 sm:$0xff]   ;;  %v2960_v28 = vld [vmem:[%s3331_s1 + $0xec] ss:$16 sps:$4 sm:$0xff]  }
 0x43b   : > { %v1023_v33 = vadd.f32 %v1022_v31, %v2548_v0  ;;  %v1024_v34 = vpop.f32.mrb[14].mxu0  ;;  %v1065_v35 = vpop.f32.mrb[14].mxu1  ;;  %v1064_v40 = vadd.f32 %v1063_v32, %v2552_v58  ;;  %v2972_v31 = vld [vmem:[%s3331_s1 + $0xe8] ss:$16 sps:$4 sm:$0xff]   ;;  %v2978_v32 = vld [vmem:[%s3331_s1 + $0x104] ss:$16 sps:$4 sm:$0xff]  }
 0x43c   : > { %v1696_v36 = vmul.f32 -1.442695, %v1021_v30  ;;  %v1025_v37 = vpop.f32.mrb[15].mxu0  ;;  %v1066_v38 = vpop.f32.mrb[15].mxu1  ;;  %v2966_v30 = vld [vmem:[%s3331_s1 + $0xe0] ss:$16 sps:$4 sm:$0xff]  }
 0x43d   : > { %v1697_v39 = vmul.f32 -1.442695, %v1023_v33  ;;  %v1698_v41 = vmul.f32 -1.442695, %v1064_v40  ;;  %v2984_v33 = vld [vmem:[%s3331_s1 + $0x10c] ss:$16 sps:$4 sm:$0xff]  }
 0x43e   : > { %1886 = vpow2.f32 %v1696_v36  ;;  %v2990_v34 = vld [vmem:[%s3331_s1 + $0x100] ss:$16 sps:$4 sm:$0xff]   ;;  %v2996_v35 = vld [vmem:[%s3331_s1 + $0x108] ss:$16 sps:$4 sm:$0xff]   ;;  %v3002_v36 = vld [vmem:[%s3331_s1 + $0x124] ss:$16 sps:$4 sm:$0xff]  }
 0x43f   : > { %1888 = vpow2.f32 %v1697_v39  ;;  %v3008_v37 = vld [vmem:[%s3331_s1 + $0x12c] ss:$16 sps:$4 sm:$0xff]   ;;  %v3014_v38 = vld [vmem:[%s3331_s1 + $0x120] ss:$16 sps:$4 sm:$0xff]   ;;  %v3020_v39 = vld [vmem:[%s3331_s1 + $0x128] ss:$16 sps:$4 sm:$0xff]  }
 0x440   : > { %1890 = vpow2.f32 %v1698_v41  ;;  %v3026_v40 = vld [vmem:[%s3331_s1 + $0x144] ss:$16 sps:$4 sm:$0xff]   ;;  %v3032_v41 = vld [vmem:[%s3331_s1 + $0x14c] ss:$16 sps:$4 sm:$0xff]  }
 0x441   : > { %1892 = vtanh.f32 %v1062_v43  ;;  %v3038_v43 = vld [vmem:[%s3331_s1 + $0x140] ss:$16 sps:$4 sm:$0xff]  }
 0x448   : > { %v1887_v46 = vpop.eup %1886 }
 0x449   : > { %v1889_v47 = vpop.eup %1888  ;;  %v1071_v50 = vadd.f32 1.0, %v1887_v46  ;;  %v3044_v46 = vld [vmem:[%s3331_s1 + $0x148] ss:$16 sps:$4 sm:$0xff]  }
 0x44a   : > { %v1077_v3 = vadd.f32 1.0, %v1889_v47  ;;  %v1891_v4 = vpop.eup %1890  ;;  %v3050_v47 = vld [vmem:[%s3331_s1 + $0x164] ss:$16 sps:$4 sm:$0xff]  }
 0x44b   : > { %1894 = vrcp.f32 %v1071_v50  ;;  %v1893_v5 = vpop.eup %1892  ;;  %v1084_v8 = vadd.f32 1.0, %v1891_v4  ;;  %3502 = vst [vmem:[#allocation7_spill] sm:$0xff] %v3050_v47  ;;  %v3056_v50 = vld [vmem:[%s3331_s1 + $0x16c] ss:$16 sps:$4 sm:$0xff]   ;;  %v3068_v4 = vld [vmem:[%s3331_s1 + $0x168] ss:$16 sps:$4 sm:$0xff]  }
 0x44c   : > { %1896 = vrcp.f32 %v1077_v3  ;;  %3503 = vst [vmem:[#allocation12_spill] sm:$0xff] %v3056_v50  ;;  %v3062_v3 = vld [vmem:[%s3331_s1 + $0x160] ss:$16 sps:$4 sm:$0xff]   ;;  %3505 = vst [vmem:[#allocation13_spill] sm:$0xff] %v3068_v4 }
 0x44d   : > { %1898 = vrcp.f32 %v1084_v8  ;;  %3504 = vst [vmem:[#allocation8_spill] sm:$0xff] %v3062_v3  ;;  %v3086_v8 = vld [vmem:[%s3331_s1 + $0x180] ss:$16 sps:$4 sm:$0xff]  }
 0x44e   : > { %3508 = vst [vmem:[#allocation11_spill] sm:$0xff] %v3086_v8 }
 0x455   : > { %v1895_v6 = vpop.eup %1894 }
 0x456   : > { %v1897_v9 = vpop.eup %1896  ;;  %v1088_v10 = vmul.f32 %v1895_v6, %v1893_v5  ;;  %v3074_v5 = vld [vmem:[%s3331_s1 + $0x184] ss:$16 sps:$4 sm:$0xff]   ;;  %v3080_v6 = vld [vmem:[%s3331_s1 + $0x18c] ss:$16 sps:$4 sm:$0xff]  }
 0x457   : > { %v1087_v11 = vmul.f32 %v1897_v9, %v2706_v61  ;;  %v1899_v13 = vpop.eup %1898  ;;  %v2879_v61 = vld [vmem:[%s3331_s1 + $0x6c] ss:$16 sps:$4 sm:$0xff]   ;;  %3506 = vst [vmem:[#allocation10_spill] sm:$0xff] %v3074_v5  ;;  %3507 = vst [vmem:[#allocation16_spill] sm:$0xff] %v3080_v6  ;;  %v3092_v9 = vld [vmem:[%s3331_s1 + $0x188] ss:$16 sps:$4 sm:$0xff]  }
 0x458   : > { %3509 = vst [vmem:[#allocation17_spill] sm:$0xff] %v3092_v9 }
 0x459   : > { %v2860_v12 = vadd.f32 %v1088_v10, %v1087_v11  ;;  %v3098_v10 = vld [vmem:[%s3331_s1 + $0x1a4] ss:$16 sps:$4 sm:$0xff]   ;;  %v3104_v11 = vld [vmem:[%s3331_s1 + $0x1ac] ss:$16 sps:$4 sm:$0xff]  }
 0x45a   : > { %3510 = vst [vmem:[#allocation14_spill] sm:$0xff] %v3098_v10  ;;  %3511 = vst [vmem:[#allocation20_spill] sm:$0xff] %v3104_v11 }
 0x45b   : > { %1900 = vtanh.f32 %v2860_v12 }
 0x465   : > { %v1901_v14 = vpop.eup %1900 }
 0x466   : > { %v1091_v15 = vmul.f32 %v1901_v14, %v1899_v13  ;;  %v3110_v13 = vld [vmem:[%s3331_s1 + $0x1a0] ss:$16 sps:$4 sm:$0xff]   ;;  %v3116_v14 = vld [vmem:[%s3331_s1 + $0x1a8] ss:$16 sps:$4 sm:$0xff]  }
 0x467   : > { %3512 = vst [vmem:[#allocation15_spill] sm:$0xff] %v3110_v13  ;;  %3513 = vst [vmem:[#allocation21_spill] sm:$0xff] %v3116_v14 }
 0x468   : > { %1699 = vst [vmem:[%s2084_s28 + $0x18] sm:$0xff] %v1091_v15  ;;  %v1098_v18 = vpack.c.bf16 %v1091_v15, %v1091_v15  ;;  %v3122_v15 = vld [vmem:[%s3331_s1 + $0x1c4] ss:$16 sps:$4 sm:$0xff]  }
 0x469   : > { %3514 = vst [vmem:[#allocation4_spill] sm:$0xff] %v3122_v15 }
 0x46a   : > { %1131 = vmatprep.mubr.bf16.mxu0 %v1098_v18  ;;  %1172 = vmatprep.mubr.bf16.mxu1 %v1098_v18  ;;  %v3134_v18 = vld [vmem:[%s3331_s1 + $0x1c0] ss:$16 sps:$4 sm:$0xff]  }
 0x46b   : > { %1132 = vmatmul.mubr.bf16.vlgmr.msra.gmra.mrb[16].mxu0 %v1834_v16  ;;  %1173 = vmatmul.mubr.bf16.vlgmr.msra.gmra.mrb[16].mxu1 %v1834_v16  ;;  %v3128_v16 = vld [vmem:[%s3331_s1 + $0x1cc] ss:$16 sps:$4 sm:$0xff]   ;;  %3516 = vst [vmem:[#allocation18_spill] sm:$0xff] %v3134_v18 }
 0x46c   : > { %1213 = vmatpush1.bf16.msra.mxu0 %v2714_v45  ;;  %1254 = vmatpush1.bf16.msra.mxu1 %v2720_v44  ;;  %3515 = vst [vmem:[#allocation5_spill] sm:$0xff] %v3128_v16 }
 0x46d   : > { %1214 = vmatprep.subr.bf16.mxu0 %v2726_v53  ;;  %1255 = vmatprep.subr.bf16.mxu1 %v2732_v62 }
 0x470   : > { %1215 = vmatpush1.bf16.msra.mxu0 %v2738_v42  ;;  %1256 = vmatpush1.bf16.msra.mxu1 %v2744_v52 }
 0x471   : > { %1216 = vmatprep.subr.bf16.mxu0 %v2750_v59  ;;  %1257 = vmatprep.subr.bf16.mxu1 %v2756_v2 }
 0x474   : > { %1217 = vmatpush1.bf16.msra.mxu0 %v2762_v49  ;;  %1258 = vmatpush1.bf16.msra.mxu1 %v2768_v55 }
 0x475   : > { %1218 = vmatprep.subr.bf16.mxu0 %v2774_v7  ;;  %1259 = vmatprep.subr.bf16.mxu1 %v2879_v61 }
 0x478   : > { %1219 = vmatpush1.bf16.msra.mxu0 %v2781_v54  ;;  %1260 = vmatpush1.bf16.msra.mxu1 %v2886_v63 }
 0x479   : > { %1220 = vmatprep.subr.bf16.mxu0 %v2788_v51  ;;  %1261 = vmatprep.subr.bf16.mxu1 %v2893_v57 }
 0x47c   : > { %1221 = vmatpush1.bf16.msra.mxu0 %v2795_v17  ;;  %1262 = vmatpush1.bf16.msra.mxu1 %v2900_v1 }
 0x47d   : > { %1222 = vmatprep.subr.bf16.mxu0 %v2906_v56  ;;  %1263 = vmatprep.subr.bf16.mxu1 %v2912_v60 }
 0x480   : > { %1223 = vmatpush1.bf16.msra.mxu0 %v2918_v19  ;;  %1264 = vmatpush1.bf16.msra.mxu1 %v2924_v20 }
 0x481   : > { %1224 = vmatprep.subr.bf16.mxu0 %v2930_v21  ;;  %1265 = vmatprep.subr.bf16.mxu1 %v2936_v22 }
 0x484   : > { %1225 = vmatpush1.bf16.msra.mxu0 %v2942_v23  ;;  %1266 = vmatpush1.bf16.msra.mxu1 %v2948_v24 }
 0x485   : > { %1226 = vmatprep.subr.bf16.mxu0 %v2954_v27  ;;  %1267 = vmatprep.subr.bf16.mxu1 %v2960_v28 }
 0x488   : > { %1227 = vmatpush1.bf16.msra.mxu0 %v2966_v30  ;;  %1268 = vmatpush1.bf16.msra.mxu1 %v2972_v31 }
 0x489   : > { %1228 = vmatprep.subr.bf16.mxu0 %v2978_v32  ;;  %1269 = vmatprep.subr.bf16.mxu1 %v2984_v33 }
 0x48c   : > { %1229 = vmatpush1.bf16.msra.mxu0 %v2990_v34  ;;  %1270 = vmatpush1.bf16.msra.mxu1 %v2996_v35 }
 0x48d   : > { %1230 = vmatprep.subr.bf16.mxu0 %v3002_v36  ;;  %1271 = vmatprep.subr.bf16.mxu1 %v3008_v37 }
 0x490   : > { %1231 = vmatpush1.bf16.msra.mxu0 %v3014_v38  ;;  %1272 = vmatpush1.bf16.msra.mxu1 %v3020_v39 }
 0x491   : > { %1232 = vmatprep.subr.bf16.mxu0 %v3026_v40  ;;  %1273 = vmatprep.subr.bf16.mxu1 %v3032_v41 }
 0x494   : > { %1233 = vmatpush1.bf16.msra.mxu0 %v3038_v43  ;;  %1274 = vmatpush1.bf16.msra.mxu1 %v3044_v46 }
 0x495   : > { %1234 = vmatprep.subr.bf16.mxu0 %v3050_v47  ;;  %1275 = vmatprep.subr.bf16.mxu1 %v3056_v50 }
 0x498   : > { %1235 = vmatpush1.bf16.msra.mxu0 %v3062_v3  ;;  %1276 = vmatpush1.bf16.msra.mxu1 %v3068_v4 }
 0x499   : > { %1236 = vmatprep.subr.bf16.mxu0 %v3074_v5  ;;  %1277 = vmatprep.subr.bf16.mxu1 %v3080_v6 }
 0x49c   : > { %1237 = vmatpush1.bf16.msra.mxu0 %v3086_v8  ;;  %1278 = vmatpush1.bf16.msra.mxu1 %v3092_v9 }
 0x49d   : > { %1238 = vmatprep.subr.bf16.mxu0 %v3098_v10  ;;  %1279 = vmatprep.subr.bf16.mxu1 %v3104_v11 }
 0x4a0   : > { %1239 = vmatpush1.bf16.msra.mxu0 %v3110_v13  ;;  %1280 = vmatpush1.bf16.msra.mxu1 %v3116_v14  ;;  %v3140_v14 = vld [vmem:[%s3331_s1 + $0x1c8] ss:$16 sps:$4 sm:$0xff]  }
 0x4a1   : > { %1240 = vmatprep.subr.bf16.mxu0 %v3122_v15  ;;  %1281 = vmatprep.subr.bf16.mxu1 %v3128_v16  ;;  %3517 = vst [vmem:[#allocation23_spill] sm:$0xff] %v3140_v14  ;;  %v3146_v15 = vld [vmem:[%s3331_s1 + $0x1e4] ss:$16 sps:$4 sm:$0xff]   ;;  %v3152_v16 = vld [vmem:[%s3331_s1 + $0x1ec] ss:$16 sps:$4 sm:$0xff]  }
 0x4a2   : > { %3518 = vst [vmem:[#allocation19_spill] sm:$0xff] %v3146_v15  ;;  %3519 = vst [vmem:[#allocation24_spill] sm:$0xff] %v3152_v16 }
 0x4a4   : > { %1241 = vmatpush1.bf16.msra.mxu0 %v3134_v18  ;;  %1282 = vmatpush1.bf16.msra.mxu1 %v3140_v14  ;;  %v3158_v18 = vld [vmem:[%s3331_s1 + $0x1e0] ss:$16 sps:$4 sm:$0xff]   ;;  %v3164_v14 = vld [vmem:[%s3331_s1 + $0x1e8] ss:$16 sps:$4 sm:$0xff]  }
 0x4a5   : > { %1242 = vmatprep.subr.bf16.mxu0 %v3146_v15  ;;  %1283 = vmatprep.subr.bf16.mxu1 %v3152_v16  ;;  %3520 = vst [vmem:[#allocation22_spill] sm:$0xff] %v3158_v18  ;;  %3521 = vst [vmem:[#allocation25_spill] sm:$0xff] %v3164_v14 }
 0x4a8   : > { %1243 = vmatpush1.bf16.msra.mxu0 %v3158_v18  ;;  %1284 = vmatpush1.bf16.msra.mxu1 %v3164_v14 }
 0x4a9   : > { %1325 = vmatprep.subr.bf16.mxu0 %v2846_v25  ;;  %1366 = vmatprep.subr.bf16.mxu1 %v2852_v26 }
 0x53e   : > { %v1133_v15 = vpop.f32.mrb[16].mxu0  ;;  %v1174_v16 = vpop.f32.mrb[16].mxu1 }
 0x53f   : > { %v1134_v13 = vadd.f32 %v1133_v15, %v3501_v29  ;;  %v1135_v11 = vpop.f32.mrb[17].mxu0  ;;  %v1176_v10 = vpop.f32.mrb[17].mxu1  ;;  %v1175_v26 = vadd.f32 %v1174_v16, %v2555_v48  ;;  %v3525_v16 = vld [vmem:[#allocation13_spill] sm:$0xff] }
 0x540   : > { %v1136_v9 = vadd.f32 %v1135_v11, %v2548_v0  ;;  %v1137_v18 = vpop.f32.mrb[18].mxu0  ;;  %v1178_v8 = vpop.f32.mrb[18].mxu1  ;;  %v1177_v25 = vadd.f32 %v1176_v10, %v2552_v58 }
 0x541   : > { %v1702_v6 = vmul.f32 -1.442695, %v1134_v13  ;;  %v1138_v5 = vpop.f32.mrb[19].mxu0  ;;  %v1179_v4 = vpop.f32.mrb[19].mxu1  ;;  %v1835_v13 = vld [vmem:[%s2079_s25 + $0x14] ss:$0 sps:$4 sm:$0xff]  }
 0x542   : > { %v1703_v3 = vmul.f32 -1.442695, %v1136_v9  ;;  %v1704_v14 = vmul.f32 -1.442695, %v1177_v25  ;;  %v3526_v18 = vld [vmem:[#allocation10_spill] sm:$0xff] }
 0x543   : > { %1902 = vpow2.f32 %v1702_v6 }
 0x544   : > { %1904 = vpow2.f32 %v1703_v3 }
 0x545   : > { %1906 = vpow2.f32 %v1704_v14  ;;  %v3524_v14 = vld [vmem:[#allocation8_spill] sm:$0xff] }
 0x546   : > { %1908 = vtanh.f32 %v1175_v26 }
 0x54d   : > { %v1903_v50 = vpop.eup %1902 }
 0x54e   : > { %v1905_v15 = vpop.eup %1904  ;;  %v1184_v29 = vadd.f32 1.0, %v1903_v50 }
 0x54f   : > { %v1190_v47 = vadd.f32 1.0, %v1905_v15  ;;  %v1907_v5 = vpop.eup %1906  ;;  %v3527_v15 = vld [vmem:[#allocation16_spill] sm:$0xff] }
 0x550   : > { %1910 = vrcp.f32 %v1184_v29  ;;  %v1909_v4 = vpop.eup %1908  ;;  %v1197_v6 = vadd.f32 1.0, %v1907_v5  ;;  %v3528_v5 = vld [vmem:[#allocation11_spill] sm:$0xff] }
 0x551   : > { %1912 = vrcp.f32 %v1190_v47  ;;  %v3523_v47 = vld [vmem:[#allocation12_spill] sm:$0xff] }
 0x552   : > { %1914 = vrcp.f32 %v1197_v6  ;;  %v3531_v6 = vld [vmem:[#allocation20_spill] sm:$0xff] }
 0x55a   : > { %v1911_v8 = vpop.eup %1910 }
 0x55b   : > { %v1913_v3 = vpop.eup %1912  ;;  %v1201_v9 = vmul.f32 %v1911_v8, %v1909_v4  ;;  %v3529_v4 = vld [vmem:[#allocation17_spill] sm:$0xff]  ;;  %v3530_v8 = vld [vmem:[#allocation14_spill] sm:$0xff] }
 0x55c   : > { %v1200_v25 = vmul.f32 %v1913_v3, %v2860_v12  ;;  %v1915_v50 = vpop.eup %1914  ;;  %v3522_v12 = vld [vmem:[#allocation7_spill] sm:$0xff] }
 0x55d   : > { %v3532_v3 = vld [vmem:[#allocation15_spill] sm:$0xff] }
 0x55e   : > { %v3174_v10 = vadd.f32 %v1201_v9, %v1200_v25  ;;  %v3533_v9 = vld [vmem:[#allocation21_spill] sm:$0xff]  ;;  %v3534_v25 = vld [vmem:[#allocation4_spill] sm:$0xff] }
 0x560   : > { %1916 = vtanh.f32 %v3174_v10 }
 0x56a   : > { %v1917_v26 = vpop.eup %1916 }
 0x56b   : > { %v1204_v11 = vmul.f32 %v1917_v26, %v1915_v50  ;;  %v3535_v50 = vld [vmem:[#allocation5_spill] sm:$0xff]  ;;  %v3536_v26 = vld [vmem:[#allocation18_spill] sm:$0xff] }
 0x56d   : > { %1705 = vst [vmem:[%s2084_s28 + $0x20] sm:$0xff] %v1204_v11  ;;  %v1211_v29 = vpack.c.bf16 %v1204_v11, %v1204_v11  ;;  %v3537_v11 = vld [vmem:[#allocation23_spill] sm:$0xff] }
 0x56f   : > { %1244 = vmatprep.mubr.bf16.mxu0 %v1211_v29  ;;  %1285 = vmatprep.mubr.bf16.mxu1 %v1211_v29  ;;  %v3539_v29 = vld [vmem:[#allocation24_spill] sm:$0xff] }
 0x570   : > { %1245 = vmatmul.mubr.bf16.vlgmr.msra.gmra.mrb[20].mxu0 %v1835_v13  ;;  %1286 = vmatmul.mubr.bf16.vlgmr.msra.gmra.mrb[20].mxu1 %v1835_v13  ;;  %v3538_v13 = vld [vmem:[#allocation19_spill] sm:$0xff] }
 0x571   : > { %1326 = vmatpush1.bf16.msra.mxu0 %v2714_v45  ;;  %1367 = vmatpush1.bf16.msra.mxu1 %v2720_v44 }
 0x572   : > { %1327 = vmatprep.subr.bf16.mxu0 %v2726_v53  ;;  %1368 = vmatprep.subr.bf16.mxu1 %v2732_v62 }
 0x575   : > { %1328 = vmatpush1.bf16.msra.mxu0 %v2738_v42  ;;  %1369 = vmatpush1.bf16.msra.mxu1 %v2744_v52 }
 0x576   : > { %1329 = vmatprep.subr.bf16.mxu0 %v2750_v59  ;;  %1370 = vmatprep.subr.bf16.mxu1 %v2756_v2 }
 0x579   : > { %1330 = vmatpush1.bf16.msra.mxu0 %v2762_v49  ;;  %1371 = vmatpush1.bf16.msra.mxu1 %v2768_v55 }
 0x57a   : > { %1331 = vmatprep.subr.bf16.mxu0 %v2774_v7  ;;  %1372 = vmatprep.subr.bf16.mxu1 %v2879_v61 }
 0x57d   : > { %1332 = vmatpush1.bf16.msra.mxu0 %v2781_v54  ;;  %1373 = vmatpush1.bf16.msra.mxu1 %v2886_v63 }
 0x57e   : > { %1333 = vmatprep.subr.bf16.mxu0 %v2788_v51  ;;  %1374 = vmatprep.subr.bf16.mxu1 %v2893_v57 }
 0x581   : > { %1334 = vmatpush1.bf16.msra.mxu0 %v2795_v17  ;;  %1375 = vmatpush1.bf16.msra.mxu1 %v2900_v1 }
 0x582   : > { %1335 = vmatprep.subr.bf16.mxu0 %v2906_v56  ;;  %1376 = vmatprep.subr.bf16.mxu1 %v2912_v60 }
 0x585   : > { %1336 = vmatpush1.bf16.msra.mxu0 %v2918_v19  ;;  %1377 = vmatpush1.bf16.msra.mxu1 %v2924_v20 }
 0x586   : > { %1337 = vmatprep.subr.bf16.mxu0 %v2930_v21  ;;  %1378 = vmatprep.subr.bf16.mxu1 %v2936_v22 }
 0x589   : > { %1338 = vmatpush1.bf16.msra.mxu0 %v2942_v23  ;;  %1379 = vmatpush1.bf16.msra.mxu1 %v2948_v24 }
 0x58a   : > { %1339 = vmatprep.subr.bf16.mxu0 %v2954_v27  ;;  %1380 = vmatprep.subr.bf16.mxu1 %v2960_v28 }
 0x58d   : > { %1340 = vmatpush1.bf16.msra.mxu0 %v2966_v30  ;;  %1381 = vmatpush1.bf16.msra.mxu1 %v2972_v31 }
 0x58e   : > { %1341 = vmatprep.subr.bf16.mxu0 %v2978_v32  ;;  %1382 = vmatprep.subr.bf16.mxu1 %v2984_v33 }
 0x591   : > { %1342 = vmatpush1.bf16.msra.mxu0 %v2990_v34  ;;  %1383 = vmatpush1.bf16.msra.mxu1 %v2996_v35 }
 0x592   : > { %1343 = vmatprep.subr.bf16.mxu0 %v3002_v36  ;;  %1384 = vmatprep.subr.bf16.mxu1 %v3008_v37 }
 0x595   : > { %1344 = vmatpush1.bf16.msra.mxu0 %v3014_v38  ;;  %1385 = vmatpush1.bf16.msra.mxu1 %v3020_v39 }
 0x596   : > { %1345 = vmatprep.subr.bf16.mxu0 %v3026_v40  ;;  %1386 = vmatprep.subr.bf16.mxu1 %v3032_v41 }
 0x599   : > { %1346 = vmatpush1.bf16.msra.mxu0 %v3038_v43  ;;  %1387 = vmatpush1.bf16.msra.mxu1 %v3044_v46 }
 0x59a   : > { %1347 = vmatprep.subr.bf16.mxu0 %v3522_v12  ;;  %1388 = vmatprep.subr.bf16.mxu1 %v3523_v47 }
 0x59d   : > { %1348 = vmatpush1.bf16.msra.mxu0 %v3524_v14  ;;  %1389 = vmatpush1.bf16.msra.mxu1 %v3525_v16 }
 0x59e   : > { %1349 = vmatprep.subr.bf16.mxu0 %v3526_v18  ;;  %1390 = vmatprep.subr.bf16.mxu1 %v3527_v15 }
 0x5a1   : > { %1350 = vmatpush1.bf16.msra.mxu0 %v3528_v5  ;;  %1391 = vmatpush1.bf16.msra.mxu1 %v3529_v4  ;;  %v3540_v4 = vld [vmem:[#allocation22_spill] sm:$0xff] }
 0x5a2   : > { %1351 = vmatprep.subr.bf16.mxu0 %v3530_v8  ;;  %1392 = vmatprep.subr.bf16.mxu1 %v3531_v6  ;;  %v3541_v8 = vld [vmem:[#allocation25_spill] sm:$0xff]  ;;  %v3542_v6 = vld [vmem:[#allocation6_spill] sm:$0xff] }
 0x5a3   : > { %v3544_v5 = vld [vmem:[#allocation26_spill] sm:$0xff] }
 0x5a5   : > { %1352 = vmatpush1.bf16.msra.mxu0 %v3532_v3  ;;  %1393 = vmatpush1.bf16.msra.mxu1 %v3533_v9  ;;  %v3543_v3 = vld [vmem:[#allocation9_spill] sm:$0xff] }
 0x5a6   : > { %1353 = vmatprep.subr.bf16.mxu0 %v3534_v25  ;;  %1394 = vmatprep.subr.bf16.mxu1 %v3535_v50 }
 0x5a9   : > { %1354 = vmatpush1.bf16.msra.mxu0 %v3536_v26  ;;  %1395 = vmatpush1.bf16.msra.mxu1 %v3537_v11 }
 0x5aa   : > { %1355 = vmatprep.subr.bf16.mxu0 %v3538_v13  ;;  %1396 = vmatprep.subr.bf16.mxu1 %v3539_v29 }
 0x5ad   : > { %1356 = vmatpush1.bf16.msra.mxu0 %v3540_v4  ;;  %1397 = vmatpush1.bf16.msra.mxu1 %v3541_v8 }
 0x5ae   : > { %1438 = vmatprep.subr.bf16.mxu0 %v3542_v6  ;;  %1479 = vmatprep.subr.bf16.mxu1 %v3543_v3 }
 0x643   : > { %v1246_v9 = vpop.f32.mrb[20].mxu0  ;;  %v1287_v25 = vpop.f32.mrb[20].mxu1 }
 0x644   : > { %v1247_v50 = vadd.f32 %v1246_v9, %v3544_v5  ;;  %v1248_v15 = vpop.f32.mrb[21].mxu0  ;;  %v1289_v26 = vpop.f32.mrb[21].mxu1  ;;  %v1288_v3 = vadd.f32 %v1287_v25, %v2555_v48 }
 0x645   : > { %v1249_v11 = vadd.f32 %v1248_v15, %v2548_v0  ;;  %v1250_v18 = vpop.f32.mrb[22].mxu0  ;;  %v1291_v13 = vpop.f32.mrb[22].mxu1  ;;  %v1290_v6 = vadd.f32 %v1289_v26, %v2552_v58 }
 0x646   : > { %v1708_v16 = vmul.f32 -1.442695, %v1247_v50  ;;  %v1251_v29 = vpop.f32.mrb[23].mxu0  ;;  %v1292_v14 = vpop.f32.mrb[23].mxu1  ;;  %v1836_v13 = vld [vmem:[%s2079_s25 + $0x18] ss:$0 sps:$4 sm:$0xff]  }
 0x647   : > { %v1709_v4 = vmul.f32 -1.442695, %v1249_v11  ;;  %v1710_v8 = vmul.f32 -1.442695, %v1290_v6 }
 0x648   : > { %1918 = vpow2.f32 %v1708_v16 }
 0x649   : > { %1920 = vpow2.f32 %v1709_v4 }
 0x64a   : > { %1922 = vpow2.f32 %v1710_v8 }
 0x64b   : > { %1924 = vtanh.f32 %v1288_v3 }
 0x652   : > { %v1919_v47 = vpop.eup %1918 }
 0x653   : > { %v1921_v9 = vpop.eup %1920  ;;  %v1297_v5 = vadd.f32 1.0, %v1919_v47 }
 0x654   : > { %v1303_v12 = vadd.f32 1.0, %v1921_v9  ;;  %v1923_v18 = vpop.eup %1922 }
 0x655   : > { %1926 = vrcp.f32 %v1297_v5  ;;  %v1925_v14 = vpop.eup %1924  ;;  %v1310_v16 = vadd.f32 1.0, %v1923_v18 }
 0x656   : > { %1928 = vrcp.f32 %v1303_v12 }
 0x657   : > { %1930 = vrcp.f32 %v1310_v16  ;;  %v1837_v16 = vld [vmem:[%s2079_s25 + $0x1c] ss:$0 sps:$4 sm:$0xff]  }
 0x65f   : > { %v1927_v15 = vpop.eup %1926 }
 0x660   : > { %v1929_v4 = vpop.eup %1928  ;;  %v1314_v50 = vmul.f32 %v1927_v15, %v1925_v14 }
 0x661   : > { %v1313_v26 = vmul.f32 %v1929_v4, %v3174_v10  ;;  %v1931_v47 = vpop.eup %1930 }
 0x663   : > { %v3248_v11 = vadd.f32 %v1314_v50, %v1313_v26 }
 0x665   : > { %1932 = vtanh.f32 %v3248_v11 }
 0x66f   : > { %v1933_v8 = vpop.eup %1932 }
 0x670   : > { %v1317_v25 = vmul.f32 %v1933_v8, %v1931_v47 }
 0x672   : > { %1711 = vst [vmem:[%s2084_s28 + $0x28] sm:$0xff] %v1317_v25  ;;  %v1324_v5 = vpack.c.bf16 %v1317_v25, %v1317_v25 }
 0x674   : > { %1357 = vmatprep.mubr.bf16.mxu0 %v1324_v5  ;;  %1398 = vmatprep.mubr.bf16.mxu1 %v1324_v5 }
 0x675   : > { %1358 = vmatmul.mubr.bf16.vlgmr.msra.gmra.mrb[24].mxu0 %v1836_v13  ;;  %1399 = vmatmul.mubr.bf16.vlgmr.msra.gmra.mrb[24].mxu1 %v1836_v13 }
 0x676   : > { %1439 = vmatpush1.bf16.msra.mxu0 %v2714_v45  ;;  %1480 = vmatpush1.bf16.msra.mxu1 %v2720_v44  ;;  %v3545_v45 = vld [vmem:[#allocation7_spill] sm:$0xff]  ;;  %v3546_v44 = vld [vmem:[#allocation12_spill] sm:$0xff] }
 0x677   : > { %1440 = vmatprep.subr.bf16.mxu0 %v2726_v53  ;;  %1481 = vmatprep.subr.bf16.mxu1 %v2732_v62  ;;  %v3547_v53 = vld [vmem:[#allocation8_spill] sm:$0xff]  ;;  %v3548_v62 = vld [vmem:[#allocation13_spill] sm:$0xff] }
 0x67a   : > { %1441 = vmatpush1.bf16.msra.mxu0 %v2738_v42  ;;  %1482 = vmatpush1.bf16.msra.mxu1 %v2744_v52  ;;  %v3549_v42 = vld [vmem:[#allocation10_spill] sm:$0xff]  ;;  %v3550_v52 = vld [vmem:[#allocation16_spill] sm:$0xff] }
 0x67b   : > { %1442 = vmatprep.subr.bf16.mxu0 %v2750_v59  ;;  %1483 = vmatprep.subr.bf16.mxu1 %v2756_v2  ;;  %v3551_v59 = vld [vmem:[#allocation11_spill] sm:$0xff]  ;;  %v3552_v2 = vld [vmem:[#allocation17_spill] sm:$0xff] }
 0x67e   : > { %1443 = vmatpush1.bf16.msra.mxu0 %v2762_v49  ;;  %1484 = vmatpush1.bf16.msra.mxu1 %v2768_v55  ;;  %v3553_v49 = vld [vmem:[#allocation14_spill] sm:$0xff]  ;;  %v3554_v55 = vld [vmem:[#allocation20_spill] sm:$0xff] }
 0x67f   : > { %1444 = vmatprep.subr.bf16.mxu0 %v2774_v7  ;;  %1485 = vmatprep.subr.bf16.mxu1 %v2879_v61  ;;  %v3555_v7 = vld [vmem:[#allocation15_spill] sm:$0xff]  ;;  %v3559_v61 = vld [vmem:[#allocation18_spill] sm:$0xff] }
 0x682   : > { %1445 = vmatpush1.bf16.msra.mxu0 %v2781_v54  ;;  %1486 = vmatpush1.bf16.msra.mxu1 %v2886_v63  ;;  %v3556_v54 = vld [vmem:[#allocation21_spill] sm:$0xff]  ;;  %v3560_v63 = vld [vmem:[#allocation23_spill] sm:$0xff] }
 0x683   : > { %1446 = vmatprep.subr.bf16.mxu0 %v2788_v51  ;;  %1487 = vmatprep.subr.bf16.mxu1 %v2893_v57  ;;  %v3557_v51 = vld [vmem:[#allocation4_spill] sm:$0xff]  ;;  %v3561_v57 = vld [vmem:[#allocation19_spill] sm:$0xff] }
 0x686   : > { %1447 = vmatpush1.bf16.msra.mxu0 %v2795_v17  ;;  %1488 = vmatpush1.bf16.msra.mxu1 %v2900_v1  ;;  %v3558_v17 = vld [vmem:[#allocation5_spill] sm:$0xff]  ;;  %v3562_v1 = vld [vmem:[#allocation24_spill] sm:$0xff] }
 0x687   : > { %1448 = vmatprep.subr.bf16.mxu0 %v2906_v56  ;;  %1489 = vmatprep.subr.bf16.mxu1 %v2912_v60  ;;  %v3563_v56 = vld [vmem:[#allocation22_spill] sm:$0xff]  ;;  %v3564_v60 = vld [vmem:[#allocation25_spill] sm:$0xff] }
 0x68a   : > { %1449 = vmatpush1.bf16.msra.mxu0 %v2918_v19  ;;  %1490 = vmatpush1.bf16.msra.mxu1 %v2924_v20 }
 0x68b   : > { %1450 = vmatprep.subr.bf16.mxu0 %v2930_v21  ;;  %1491 = vmatprep.subr.bf16.mxu1 %v2936_v22  ;;  %v3565_v21 = vld [vmem:[#allocation26_spill] sm:$0xff] }
 0x68e   : > { %1451 = vmatpush1.bf16.msra.mxu0 %v2942_v23  ;;  %1492 = vmatpush1.bf16.msra.mxu1 %v2948_v24 }
 0x68f   : > { %1452 = vmatprep.subr.bf16.mxu0 %v2954_v27  ;;  %1493 = vmatprep.subr.bf16.mxu1 %v2960_v28 }
 0x692   : > { %1453 = vmatpush1.bf16.msra.mxu0 %v2966_v30  ;;  %1494 = vmatpush1.bf16.msra.mxu1 %v2972_v31 }
 0x693   : > { %1454 = vmatprep.subr.bf16.mxu0 %v2978_v32  ;;  %1495 = vmatprep.subr.bf16.mxu1 %v2984_v33 }
 0x696   : > { %1455 = vmatpush1.bf16.msra.mxu0 %v2990_v34  ;;  %1496 = vmatpush1.bf16.msra.mxu1 %v2996_v35 }
 0x697   : > { %1456 = vmatprep.subr.bf16.mxu0 %v3002_v36  ;;  %1497 = vmatprep.subr.bf16.mxu1 %v3008_v37 }
 0x69a   : > { %1457 = vmatpush1.bf16.msra.mxu0 %v3014_v38  ;;  %1498 = vmatpush1.bf16.msra.mxu1 %v3020_v39 }
 0x69b   : > { %1458 = vmatprep.subr.bf16.mxu0 %v3026_v40  ;;  %1499 = vmatprep.subr.bf16.mxu1 %v3032_v41 }
 0x69e   : > { %1459 = vmatpush1.bf16.msra.mxu0 %v3038_v43  ;;  %1500 = vmatpush1.bf16.msra.mxu1 %v3044_v46 }
 0x69f   : > { %1460 = vmatprep.subr.bf16.mxu0 %v3545_v45  ;;  %1501 = vmatprep.subr.bf16.mxu1 %v3546_v44 }
 0x6a2   : > { %1461 = vmatpush1.bf16.msra.mxu0 %v3547_v53  ;;  %1502 = vmatpush1.bf16.msra.mxu1 %v3548_v62 }
 0x6a3   : > { %1462 = vmatprep.subr.bf16.mxu0 %v3549_v42  ;;  %1503 = vmatprep.subr.bf16.mxu1 %v3550_v52 }
 0x6a6   : > { %1463 = vmatpush1.bf16.msra.mxu0 %v3551_v59  ;;  %1504 = vmatpush1.bf16.msra.mxu1 %v3552_v2 }
 0x6a7   : > { %1464 = vmatprep.subr.bf16.mxu0 %v3553_v49  ;;  %1505 = vmatprep.subr.bf16.mxu1 %v3554_v55 }
 0x6aa   : > { %1465 = vmatpush1.bf16.msra.mxu0 %v3555_v7  ;;  %1506 = vmatpush1.bf16.msra.mxu1 %v3556_v54 }
 0x6ab   : > { %1466 = vmatprep.subr.bf16.mxu0 %v3557_v51  ;;  %1507 = vmatprep.subr.bf16.mxu1 %v3558_v17 }
 0x6ae   : > { %1467 = vmatpush1.bf16.msra.mxu0 %v3559_v61  ;;  %1508 = vmatpush1.bf16.msra.mxu1 %v3560_v63 }
 0x6af   : > { %1468 = vmatprep.subr.bf16.mxu0 %v3561_v57  ;;  %1509 = vmatprep.subr.bf16.mxu1 %v3562_v1 }
 0x6b2   : > { %1469 = vmatpush1.bf16.msra.mxu0 %v3563_v56  ;;  %1510 = vmatpush1.bf16.msra.mxu1 %v3564_v60 }
 0x748   : > { %v1359_v19 = vpop.f32.mrb[24].mxu0  ;;  %v1400_v20 = vpop.f32.mrb[24].mxu1 }
 0x749   : > { %v1360_v22 = vadd.f32 %v1359_v19, %v3565_v21  ;;  %v1361_v23 = vpop.f32.mrb[25].mxu0  ;;  %v1402_v24 = vpop.f32.mrb[25].mxu1  ;;  %v1401_v37 = vadd.f32 %v1400_v20, %v2555_v48 }
 0x74a   : > { %v1362_v27 = vadd.f32 %v1361_v23, %v2548_v0  ;;  %v1363_v28 = vpop.f32.mrb[26].mxu0  ;;  %v1404_v30 = vpop.f32.mrb[26].mxu1  ;;  %v1403_v35 = vadd.f32 %v1402_v24, %v2552_v58 }
 0x74b   : > { %v1714_v31 = vmul.f32 -1.442695, %v1360_v22  ;;  %v1364_v32 = vpop.f32.mrb[27].mxu0  ;;  %v1405_v33 = vpop.f32.mrb[27].mxu1 }
 0x74c   : > { %v1715_v34 = vmul.f32 -1.442695, %v1362_v27  ;;  %v1716_v36 = vmul.f32 -1.442695, %v1403_v35 }
 0x74d   : > { %1934 = vpow2.f32 %v1714_v31 }
 0x74e   : > { %1936 = vpow2.f32 %v1715_v34 }
 0x74f   : > { %1938 = vpow2.f32 %v1716_v36 }
 0x750   : > { %1940 = vtanh.f32 %v1401_v37 }
 0x757   : > { %v1935_v38 = vpop.eup %1934 }
 0x758   : > { %v1937_v39 = vpop.eup %1936  ;;  %v1410_v40 = vadd.f32 1.0, %v1935_v38 }
 0x759   : > { %v1416_v41 = vadd.f32 1.0, %v1937_v39  ;;  %v1939_v43 = vpop.eup %1938 }
 0x75a   : > { %1942 = vrcp.f32 %v1410_v40  ;;  %v1941_v46 = vpop.eup %1940  ;;  %v1423_v12 = vadd.f32 1.0, %v1939_v43 }
 0x75b   : > { %1944 = vrcp.f32 %v1416_v41 }
 0x75c   : > { %1946 = vrcp.f32 %v1423_v12 }
 0x764   : > { %v1943_v10 = vpop.eup %1942 }
 0x765   : > { %v1945_v29 = vpop.eup %1944  ;;  %v1427_v6 = vmul.f32 %v1943_v10, %v1941_v46 }
 0x766   : > { %v1426_v3 = vmul.f32 %v1945_v29, %v3248_v11  ;;  %v1947_v18 = vpop.eup %1946 }
 0x768   : > { %v1428_v9 = vadd.f32 %v1427_v6, %v1426_v3 }
 0x76a   : > { %1948 = vtanh.f32 %v1428_v9 }
 0x774   : > { %v1949_v14 = vpop.eup %1948 }
 0x775   : > { %v1430_v15 = vmul.f32 %v1949_v14, %v1947_v18 }
 0x777   : > { %1717 = vst [vmem:[%s2084_s28 + $0x30] sm:$0xff] %v1430_v15  ;;  %v1437_v4 = vpack.c.bf16 %v1430_v15, %v1430_v15 }
 0x779   : > { %1470 = vmatprep.mubr.bf16.mxu0 %v1437_v4  ;;  %1511 = vmatprep.mubr.bf16.mxu1 %v1437_v4 }
 0x77a   : > { %1471 = vmatmul.mubr.bf16.vlgmr.msra.gmra.mrb[28].mxu0 %v1837_v16  ;;  %1512 = vmatmul.mubr.bf16.vlgmr.msra.gmra.mrb[28].mxu1 %v1837_v16 }
 0x84d   : > { %v1472_v50 = vpop.f32.mrb[28].mxu0  ;;  %v1513_v26 = vpop.f32.mrb[28].mxu1 }
 0x84e   : > { %v1473_v47 = vadd.f32 %v1472_v50, %v3565_v21  ;;  %v1474_v8 = vpop.f32.mrb[29].mxu0  ;;  %v1515_v25 = vpop.f32.mrb[29].mxu1  ;;  %v1514_v59 = vadd.f32 %v1513_v26, %v2555_v48 }
 0x84f   : > { %v1475_v11 = vadd.f32 %v1474_v8, %v2548_v0  ;;  %v1476_v13 = vpop.f32.mrb[30].mxu0  ;;  %v1517_v5 = vpop.f32.mrb[30].mxu1  ;;  %v1516_v42 = vadd.f32 %v1515_v25, %v2552_v58 }
 0x850   : > { %v1720_v45 = vmul.f32 -1.442695, %v1473_v47  ;;  %v1477_v44 = vpop.f32.mrb[31].mxu0  ;;  %v1518_v53 = vpop.f32.mrb[31].mxu1 }
 0x851   : > { %v1721_v62 = vmul.f32 -1.442695, %v1475_v11  ;;  %v1722_v52 = vmul.f32 -1.442695, %v1516_v42 }
 0x852   : > { %1950 = vpow2.f32 %v1720_v45 }
 0x853   : > { %1952 = vpow2.f32 %v1721_v62 }
 0x854   : > { %1954 = vpow2.f32 %v1722_v52 }
 0x855   : > { %1956 = vtanh.f32 %v1514_v59 }
 0x85c   : > { %v1951_v2 = vpop.eup %1950 }
 0x85d   : > { %v1953_v49 = vpop.eup %1952  ;;  %v1523_v55 = vadd.f32 1.0, %v1951_v2 }
 0x85e   : > { %v1529_v7 = vadd.f32 1.0, %v1953_v49  ;;  %v1955_v0 = vpop.eup %1954 }
 0x85f   : > { %1958 = vrcp.f32 %v1523_v55  ;;  %v1957_v54 = vpop.eup %1956  ;;  %v1536_v17 = vadd.f32 1.0, %v1955_v0 }
 0x860   : > { %1960 = vrcp.f32 %v1529_v7 }
 0x861   : > { %1962 = vrcp.f32 %v1536_v17 }
 0x869   : > { %v1959_v51 = vpop.eup %1958 }
 0x86a   : > { %v1961_v61 = vpop.eup %1960  ;;  %v1540_v63 = vmul.f32 %v1959_v51, %v1957_v54 }
 0x86b   : > { %v1539_v57 = vmul.f32 %v1961_v61, %v1428_v9  ;;  %v1963_v48 = vpop.eup %1962 }
 0x86d   : > { %v1541_v58 = vadd.f32 %v1540_v63, %v1539_v57 }
 0x86f   : > { %1964 = vtanh.f32 %v1541_v58  ;;  %1547 = vst [vmem:[#allocation3] sm:$0xff] %v1541_v58 }
 0x879   : > { %v1965_v1 = vpop.eup %1964 }
 0x87a   : > { %v1543_v56 = vmul.f32 %v1965_v1, %v1963_v48 }
 0x87c   : > { %1723 = vst [vmem:[%s2084_s28 + $0x38] sm:$0xff] %v1543_v56  ;;  %1546 = vst [vmem:[#allocation2] sm:$0xff] %v1543_v56 }
 0x87d PF: > { %s15_s18 = sadd.s32 1, %s2036_s18  }
 0x87e   : > { %p12_p5 = scmp.ge.s32.totalorder %s15_s18, 4  }
 0x880   :  { %14 = sbr.rel (!%p12_p5) target bundleno = 1 (0x1), region = 88 }

</bundles_post_ra>
